<compile_context>
chip_gen: v7x
topology: tpu7x:2x2x1
jax: 0.10.0
libtpu: 0.0.40
codegen_flags: <defaults>
</compile_context>

<pallas_src>
import functools

import jax
import jax.numpy as jnp
from jax.experimental import pallas as pl
from jax.experimental.pallas import tpu as pltpu


# ----------------------------- Pallas kernels ------------------------------


def _matmul_bias_act_kernel(x_ref, w_ref, b_ref, o_ref, *, apply_leaky):
    """o = leaky_relu(x @ w + b) (or no activation). bf16 in, f32 accumulate, bf16 out."""
    acc = jnp.dot(x_ref[...], w_ref[...], preferred_element_type=jnp.float32)
    acc = acc + b_ref[...]                      # b is (1, N) f32, broadcasts over rows
    if apply_leaky:
        acc = jnp.where(acc > 0, acc, 0.2 * acc)
    o_ref[...] = acc.astype(o_ref.dtype)


def _instnorm_leaky_kernel(x_ref, o_ref):
    """Per-(batch, 128-channel) InstanceNorm (biased var, eps=1e-5) + LeakyReLU(0.2).

    Block is (1, H*W, 128); stats reduced over axis=1 (spatial) in a single pass:
    sum / sum-of-squares, var = E[x^2] - mean^2 clamped at 0. Stats in f32.
    """
    x = x_ref[...].astype(jnp.float32)          # (1, HW, 128)
    hw = x.shape[1]
    inv_hw = 1.0 / hw
    s = jnp.sum(x, axis=1, keepdims=True)
    ss = jnp.sum(x * x, axis=1, keepdims=True)
    mean = s * inv_hw
    var = jnp.maximum(ss * inv_hw - mean * mean, 0.0)
    y = (x - mean) * jax.lax.rsqrt(var + 1e-5)
    o_ref[...] = jnp.where(y > 0, y, 0.2 * y).astype(o_ref.dtype)


def _conv_avgpool_kernel(x_ref, w_ref, b_ref, o_ref):
    """Fused final Conv(512->1) + global average pool for one batch element.

    x: (1, Ho*Wo, Kp) bf16 patches, w: (Kp, 128) bf16 (only column 0 is the real
    weight, rest zero-padded for lane density), b: (1, 128) f32, o: (1, 1, 128) f32.
    """
    x = x_ref[0]                                               # (HW, Kp)
    acc = jnp.dot(x, w_ref[...], preferred_element_type=jnp.float32)   # (HW, 128)
    inv_hw = 1.0 / acc.shape[0]
    mean = jnp.sum(acc, axis=0, keepdims=True) * inv_hw + b_ref[...]    # (1, 128)
    o_ref[0] = mean


# ------------------------------ JAX glue / wrapper --------------------------


def _round_up(x, m):
    return (x + m - 1) // m * m


def _im2col(x, k, stride, pad):
    """x: (B, H, W, C) NHWC -> patches (B*Ho*Wo, k*k*C), column order (kh, kw, c)."""
    x = jnp.pad(x, ((0, 0), (pad, pad), (pad, pad), (0, 0)))
    B, H, W, C = x.shape
    Ho = (H - k) // stride + 1
    Wo = (W - k) // stride + 1
    slices = []
    for i in range(k):
        for j in range(k):
            slices.append(x[:, i:i + Ho * stride:stride, j:j + Wo * stride:stride, :])
    p = jnp.stack(slices, axis=3)               # (B, Ho, Wo, k*k, C)
    return p.reshape(B * Ho * Wo, k * k * C), Ho, Wo


def _weight_matrix(w_oihw, k, c_in, c_out):
    """(Cout, Cin, kH, kW) -> (kH*kW*Cin, Cout) bf16, matching im2col column order."""
    return jnp.transpose(w_oihw, (2, 3, 1, 0)).reshape(k * k * c_in, c_out).astype(jnp.bfloat16)


def _conv2d_pallas(x_nhwc, w_oihw, b, *, stride, pad, apply_leaky):
    """4x4 conv via im2col + tiled Pallas matmul (bias + optional LeakyReLU fused)."""
    c_out, c_in, k, _ = w_oihw.shape
    patches, ho, wo = _im2col(x_nhwc, k, stride, pad)           # bf16 (M, K)
    M, K = patches.shape
    Kp = _round_up(K, 128)
    # Row tile: big enough to amortize per-step overhead, small enough for v7x VMEM.
    TM = 256 if M >= 256 else _round_up(M, 16)
    Mp = _round_up(M, TM)
    patches = jnp.pad(patches, ((0, Mp - M), (0, Kp - K)))
    w_mat = jnp.pad(_weight_matrix(w_oihw, k, c_in, c_out), ((0, Kp - K), (0, 0)))
    bias = b.reshape(1, c_out).astype(jnp.float32)

    grid = (Mp // TM,)
    flops = 2 * Mp * Kp * c_out
    bytes_acc = Mp * Kp * 2 + Kp * c_out * 2 + Mp * c_out * 2 + c_out * 4

    out = pl.pallas_call(
        functools.partial(_matmul_bias_act_kernel, apply_leaky=apply_leaky),
        out_shape=jax.ShapeDtypeStruct((Mp, c_out), jnp.bfloat16),
        grid=grid,
        in_specs=[
            pl.BlockSpec((TM, Kp), lambda i: (i, 0)),       # patches row tile
            pl.BlockSpec((Kp, c_out), lambda i: (0, 0)),    # weight resident
            pl.BlockSpec((1, c_out), lambda i: (0, 0)),     # bias resident
        ],
        out_specs=pl.BlockSpec((TM, c_out), lambda i: (i, 0)),
        compiler_params=pltpu.CompilerParams(dimension_semantics=("parallel",)),
        cost_estimate=pl.CostEstimate(flops=flops, transcendentals=0,
                                      bytes_accessed=bytes_acc),
    )(patches, w_mat, bias)

    out = out[:M]
    return out.reshape(x_nhwc.shape[0], ho, wo, c_out)


def _instance_norm_leaky(x_nhwc):
    B, H, W, C = x_nhwc.shape
    assert C % 128 == 0, C
    x2 = x_nhwc.reshape(B, H * W, C)
    out = pl.pallas_call(
        _instnorm_leaky_kernel,
        out_shape=jax.ShapeDtypeStruct((B, H * W, C), jnp.bfloat16),
        grid=(B, C // 128),
        in_specs=[pl.BlockSpec((1, H * W, 128), lambda b, c: (b, 0, c))],
        out_specs=pl.BlockSpec((1, H * W, 128), lambda b, c: (b, 0, c)),
        compiler_params=pltpu.CompilerParams(
            dimension_semantics=("parallel", "parallel")),
    )(x2)
    return out.reshape(B, H, W, C)


def _conv_avgpool_pallas(x_nhwc, w_oihw, b, *, pad):
    """Fused final Conv(Cin->1, k4 s1 p1) + global average pool -> (B, 1) f32."""
    c_out, c_in, k, _ = w_oihw.shape            # c_out == 1
    patches, ho, wo = _im2col(x_nhwc, k, 1, pad)
    B = x_nhwc.shape[0]
    hw = ho * wo
    K = k * k * c_in
    Kp = _round_up(K, 128)
    patches = jnp.pad(patches, ((0, 0), (0, Kp - K))).reshape(B, hw, Kp)
    w_mat = jnp.pad(_weight_matrix(w_oihw, k, c_in, c_out),
                    ((0, Kp - K), (0, 128 - c_out)))            # (Kp, 128), col 0 real
    bias = jnp.broadcast_to(b.reshape(1, c_out).astype(jnp.float32), (1, 128))

    out = pl.pallas_call(
        _conv_avgpool_kernel,
        out_shape=jax.ShapeDtypeStruct((B, 1, 128), jnp.float32),
        grid=(B,),
        in_specs=[
            pl.BlockSpec((1, hw, Kp), lambda bi: (bi, 0, 0)),
            pl.BlockSpec((Kp, 128), lambda bi: (0, 0)),
            pl.BlockSpec((1, 128), lambda bi: (0, 0)),
        ],
        out_specs=pl.BlockSpec((1, 1, 128), lambda bi: (bi, 0, 0)),
        compiler_params=pltpu.CompilerParams(dimension_semantics=("parallel",)),
        cost_estimate=pl.CostEstimate(
            flops=2 * B * hw * Kp * 128, transcendentals=0,
            bytes_accessed=B * hw * Kp * 2 + Kp * 128 * 2 + B * 128 * 4),
    )(patches, w_mat, bias)
    return out[:, 0, 0:1]                       # (B, 1)


def init_discriminator_params(key, input_nc):
    """Deterministic params matching init_weights(net, 'normal', 0.02)."""
    specs = [(64, input_nc), (128, 64), (256, 128), (512, 256), (1, 512)]
    params = []
    keys = jax.random.split(key, len(specs))
    for k_, (c_out, c_in) in zip(keys, specs):
        w = 0.02 * jax.random.normal(k_, (c_out, c_in, 4, 4), dtype=jnp.float32)
        b = jnp.zeros((c_out,), dtype=jnp.float32)
        params.append((w, b))
    return params


@jax.jit
def discriminator_forward(x_nchw, params):
    """Forward pass. Input x: (B, C, H, W) float32 (PyTorch NCHW). Output: (B, 1) f32."""
    x = jnp.transpose(x_nchw, (0, 2, 3, 1)).astype(jnp.bfloat16)    # -> NHWC bf16

    (w1, b1), (w2, b2), (w3, b3), (w4, b4), (w5, b5) = params

    # Conv(input_nc->64, k4 s2 p1) + LeakyReLU (fused)
    x = _conv2d_pallas(x, w1, b1, stride=2, pad=1, apply_leaky=True)
    # Conv(64->128, k4 s2 p1) + InstanceNorm + LeakyReLU
    x = _conv2d_pallas(x, w2, b2, stride=2, pad=1, apply_leaky=False)
    x = _instance_norm_leaky(x)
    # Conv(128->256, k4 s2 p1) + InstanceNorm + LeakyReLU
    x = _conv2d_pallas(x, w3, b3, stride=2, pad=1, apply_leaky=False)
    x = _instance_norm_leaky(x)
    # Conv(256->512, k4 s1 p1) + InstanceNorm + LeakyReLU
    x = _conv2d_pallas(x, w4, b4, stride=1, pad=1, apply_leaky=False)
    x = _instance_norm_leaky(x)
    # Conv(512->1, k4 s1 p1) fused with global average pool -> (B, 1)
    return _conv_avgpool_pallas(x, w5, b5, pad=1)


if __name__ == "__main__":
    key = jax.random.PRNGKey(0)
    k_params, k_input = jax.random.split(key)

    input_nc = 3
    batch, H, W = 2, 32, 32   # 32 -> 16 -> 8 -> 4 -> 3 -> 2 -> global pool

    params = init_discriminator_params(k_params, input_nc)
    x = jax.random.normal(k_input, (batch, input_nc, H, W), dtype=jnp.float32)

    out = discriminator_forward(x, params)
    out = jax.block_until_ready(out)

    assert out.shape == (batch, 1), out.shape
    assert jnp.all(jnp.isfinite(out))
    print("KERNEL_OK")
</pallas_src>

<mosaic_0001>
module attributes {stable_mosaic.version = 11 : i64} {
  func.func @_matmul_bias_act_kernel(%arg0: i32, %arg1: memref<256x128xbf16, #tpu.memory_space<vmem>>, %arg2: memref<128x64xbf16, #tpu.memory_space<vmem>>, %arg3: memref<1x64xf32, #tpu.memory_space<vmem>>, %arg4: memref<256x64xbf16, #tpu.memory_space<vmem>>) attributes {dimension_semantics = [#tpu.dimension_semantics<parallel>], iteration_bounds = array<i64: 2>, scalar_prefetch = 0 : i64, scratch_operands = 0 : i64, tpu.core_type = #tpu.core_type<tc>, window_params = [{transform_indices = @transform_0, window_bounds = array<i64: 256, 128>}, {pipeline_mode = #tpu.pipeline_mode<synchronous>, transform_indices = @transform_1, window_bounds = array<i64: 128, 64>}, {pipeline_mode = #tpu.pipeline_mode<synchronous>, transform_indices = @transform_2, window_bounds = array<i64: 1, 64>}, {transform_indices = @transform_3, window_bounds = array<i64: 256, 64>}]} {
    %c0 = arith.constant 0 : index
    %c0_0 = arith.constant 0 : index
    %0 = vector.load %arg1[%c0, %c0_0] : memref<256x128xbf16, #tpu.memory_space<vmem>>, vector<256x128xbf16>
    %c0_1 = arith.constant 0 : index
    %c0_2 = arith.constant 0 : index
    %1 = vector.load %arg2[%c0_1, %c0_2] : memref<128x64xbf16, #tpu.memory_space<vmem>>, vector<128x64xbf16>
    %cst = arith.constant dense<0.000000e+00> : vector<256x64xf32>
    %2 = tpu.matmul %0, %1, %cst {dimension_numbers = #tpu.dot_dimension_numbers<[1], [0], [0], [1], [0, 0, 1, 1], [], []>} : vector<256x128xbf16>, vector<128x64xbf16>, vector<256x64xf32> -> vector<256x64xf32>
    %c0_3 = arith.constant 0 : index
    %c0_4 = arith.constant 0 : index
    %3 = vector.load %arg3[%c0_3, %c0_4] : memref<1x64xf32, #tpu.memory_space<vmem>>, vector<1x64xf32>
    %4 = vector.broadcast %3 : vector<1x64xf32> to vector<256x64xf32>
    %5 = arith.addf %2, %4 : vector<256x64xf32>
    %cst_5 = arith.constant 0.000000e+00 : f32
    %6 = vector.broadcast %cst_5 : f32 to vector<256x64xf32>
    %7 = arith.cmpf ogt, %5, %6 : vector<256x64xf32>
    %cst_6 = arith.constant 2.000000e-01 : f32
    %8 = vector.broadcast %cst_6 : f32 to vector<256x64xf32>
    %9 = arith.mulf %8, %5 : vector<256x64xf32>
    %10 = arith.select %7, %5, %9 : vector<256x64xi1>, vector<256x64xf32>
    %11 = arith.truncf %10 : vector<256x64xf32> to vector<256x64xbf16>
    %c0_7 = arith.constant 0 : index
    %c0_8 = arith.constant 0 : index
    %12 = vector.load %arg4[%c0_7, %c0_8] : memref<256x64xbf16, #tpu.memory_space<vmem>>, vector<256x64xbf16>
    tpu.vector_store %arg4[%c0_7, %c0_8], %11 {strides = array<i32>} : memref<256x64xbf16, #tpu.memory_space<vmem>>, vector<256x64xbf16>,
    return
  }
  func.func @transform_0(%arg0: i32) -> (i32, i32) {
    %c0_i32 = arith.constant 0 : i32
    %c0_i32_0 = arith.constant 0 : i32
    return %arg0, %c0_i32 : i32, i32
  }
  func.func @transform_1(%arg0: i32) -> (i32, i32) {
    %c0_i32 = arith.constant 0 : i32
    %c0_i32_0 = arith.constant 0 : i32
    %c0_i32_1 = arith.constant 0 : i32
    return %c0_i32, %c0_i32_0 : i32, i32
  }
  func.func @transform_2(%arg0: i32) -> (i32, i32) {
    %c0_i32 = arith.constant 0 : i32
    %c0_i32_0 = arith.constant 0 : i32
    %c0_i32_1 = arith.constant 0 : i32
    return %c0_i32, %c0_i32_0 : i32, i32
  }
  func.func @transform_3(%arg0: i32) -> (i32, i32) {
    %c0_i32 = arith.constant 0 : i32
    %c0_i32_0 = arith.constant 0 : i32
    return %arg0, %c0_i32 : i32, i32
  }
}

module attributes {stable_mosaic.version = 11 : i64} {
  func.func @_matmul_bias_act_kernel(%arg0: i32, %arg1: memref<128x1024xbf16, #tpu.memory_space<vmem>>, %arg2: memref<1024x128xbf16, #tpu.memory_space<vmem>>, %arg3: memref<1x128xf32, #tpu.memory_space<vmem>>, %arg4: memref<128x128xbf16, #tpu.memory_space<vmem>>) attributes {dimension_semantics = [#tpu.dimension_semantics<parallel>], iteration_bounds = array<i64: 1>, scalar_prefetch = 0 : i64, scratch_operands = 0 : i64, tpu.core_type = #tpu.core_type<tc>, window_params = [{transform_indices = @transform_0, window_bounds = array<i64: 128, 1024>}, {pipeline_mode = #tpu.pipeline_mode<synchronous>, transform_indices = @transform_1, window_bounds = array<i64: 1024, 128>}, {pipeline_mode = #tpu.pipeline_mode<synchronous>, transform_indices = @transform_2, window_bounds = array<i64: 1, 128>}, {transform_indices = @transform_3, window_bounds = array<i64: 128, 128>}]} {
    %c0 = arith.constant 0 : index
    %c0_0 = arith.constant 0 : index
    %0 = vector.load %arg1[%c0, %c0_0] : memref<128x1024xbf16, #tpu.memory_space<vmem>>, vector<128x1024xbf16>
    %c0_1 = arith.constant 0 : index
    %c0_2 = arith.constant 0 : index
    %1 = vector.load %arg2[%c0_1, %c0_2] : memref<1024x128xbf16, #tpu.memory_space<vmem>>, vector<1024x128xbf16>
    %cst = arith.constant dense<0.000000e+00> : vector<128x128xf32>
    %2 = tpu.matmul %0, %1, %cst {dimension_numbers = #tpu.dot_dimension_numbers<[1], [0], [0], [1], [0, 0, 1, 1], [], []>} : vector<128x1024xbf16>, vector<1024x128xbf16>, vector<128x128xf32> -> vector<128x128xf32>
    %c0_3 = arith.constant 0 : index
    %c0_4 = arith.constant 0 : index
    %3 = vector.load %arg3[%c0_3, %c0_4] : memref<1x128xf32, #tpu.memory_space<vmem>>, vector<1x128xf32>
    %4 = vector.broadcast %3 : vector<1x128xf32> to vector<128x128xf32>
    %5 = arith.addf %2, %4 : vector<128x128xf32>
    %6 = arith.truncf %5 : vector<128x128xf32> to vector<128x128xbf16>
    %c0_5 = arith.constant 0 : index
    %c0_6 = arith.constant 0 : index
    %7 = vector.load %arg4[%c0_5, %c0_6] : memref<128x128xbf16, #tpu.memory_space<vmem>>, vector<128x128xbf16>
    tpu.vector_store %arg4[%c0_5, %c0_6], %6 {strides = array<i32>} : memref<128x128xbf16, #tpu.memory_space<vmem>>, vector<128x128xbf16>,
    return
  }
  func.func @transform_0(%arg0: i32) -> (i32, i32) {
    %c0_i32 = arith.constant 0 : i32
    %c0_i32_0 = arith.constant 0 : i32
    return %arg0, %c0_i32 : i32, i32
  }
  func.func @transform_1(%arg0: i32) -> (i32, i32) {
    %c0_i32 = arith.constant 0 : i32
    %c0_i32_0 = arith.constant 0 : i32
    %c0_i32_1 = arith.constant 0 : i32
    return %c0_i32, %c0_i32_0 : i32, i32
  }
  func.func @transform_2(%arg0: i32) -> (i32, i32) {
    %c0_i32 = arith.constant 0 : i32
    %c0_i32_0 = arith.constant 0 : i32
    %c0_i32_1 = arith.constant 0 : i32
    return %c0_i32, %c0_i32_0 : i32, i32
  }
  func.func @transform_3(%arg0: i32) -> (i32, i32) {
    %c0_i32 = arith.constant 0 : i32
    %c0_i32_0 = arith.constant 0 : i32
    return %arg0, %c0_i32 : i32, i32
  }
}

module attributes {stable_mosaic.version = 11 : i64} {
  func.func @_instnorm_leaky_kernel(%arg0: i32, %arg1: i32, %arg2: memref<1x64x128xbf16, #tpu.memory_space<vmem>>, %arg3: memref<1x64x128xbf16, #tpu.memory_space<vmem>>) attributes {dimension_semantics = [#tpu.dimension_semantics<parallel>, #tpu.dimension_semantics<parallel>], iteration_bounds = array<i64: 2, 1>, scalar_prefetch = 0 : i64, scratch_operands = 0 : i64, tpu.core_type = #tpu.core_type<tc>, window_params = [{transform_indices = @transform_0, window_bounds = array<i64: 1, 64, 128>}, {transform_indices = @transform_1, window_bounds = array<i64: 1, 64, 128>}]} {
    %c0 = arith.constant 0 : index
    %c0_0 = arith.constant 0 : index
    %c0_1 = arith.constant 0 : index
    %0 = vector.load %arg2[%c0, %c0_0, %c0_1] : memref<1x64x128xbf16, #tpu.memory_space<vmem>>, vector<1x64x128xbf16>
    %1 = arith.extf %0 : vector<1x64x128xbf16> to vector<1x64x128xf32>
    %cst = arith.constant dense<0.000000e+00> : vector<1x128xf32>
    %2 = vector.multi_reduction <add>, %1, %cst [1] : vector<1x64x128xf32> to vector<1x128xf32>
    %3 = vector.shape_cast %2 : vector<1x128xf32> to vector<1x1x128xf32>
    %4 = arith.mulf %1, %1 : vector<1x64x128xf32>
    %cst_2 = arith.constant dense<0.000000e+00> : vector<1x128xf32>
    %5 = vector.multi_reduction <add>, %4, %cst_2 [1] : vector<1x64x128xf32> to vector<1x128xf32>
    %6 = vector.shape_cast %5 : vector<1x128xf32> to vector<1x1x128xf32>
    %cst_3 = arith.constant 1.562500e-02 : f32
    %7 = vector.broadcast %cst_3 : f32 to vector<1x1x128xf32>
    %8 = arith.mulf %3, %7 : vector<1x1x128xf32>
    %cst_4 = arith.constant 1.562500e-02 : f32
    %9 = vector.broadcast %cst_4 : f32 to vector<1x1x128xf32>
    %10 = arith.mulf %6, %9 : vector<1x1x128xf32>
    %11 = arith.mulf %8, %8 : vector<1x1x128xf32>
    %12 = arith.subf %10, %11 : vector<1x1x128xf32>
    %cst_5 = arith.constant 0.000000e+00 : f32
    %13 = vector.broadcast %cst_5 : f32 to vector<1x1x128xf32>
    %14 = arith.maximumf %12, %13 : vector<1x1x128xf32>
    %15 = vector.broadcast %8 : vector<1x1x128xf32> to vector<1x64x128xf32>
    %16 = arith.subf %1, %15 : vector<1x64x128xf32>
    %cst_6 = arith.constant 9.99999974E-6 : f32
    %17 = vector.broadcast %cst_6 : f32 to vector<1x1x128xf32>
    %18 = arith.addf %14, %17 : vector<1x1x128xf32>
    %19 = math.rsqrt %18 : vector<1x1x128xf32>
    %20 = vector.broadcast %19 : vector<1x1x128xf32> to vector<1x64x128xf32>
    %21 = arith.mulf %16, %20 : vector<1x64x128xf32>
    %cst_7 = arith.constant 0.000000e+00 : f32
    %22 = vector.broadcast %cst_7 : f32 to vector<1x64x128xf32>
    %23 = arith.cmpf ogt, %21, %22 : vector<1x64x128xf32>
    %cst_8 = arith.constant 2.000000e-01 : f32
    %24 = vector.broadcast %cst_8 : f32 to vector<1x64x128xf32>
    %25 = arith.mulf %24, %21 : vector<1x64x128xf32>
    %26 = arith.select %23, %21, %25 : vector<1x64x128xi1>, vector<1x64x128xf32>
    %27 = arith.truncf %26 : vector<1x64x128xf32> to vector<1x64x128xbf16>
    %c0_9 = arith.constant 0 : index
    %c0_10 = arith.constant 0 : index
    %c0_11 = arith.constant 0 : index
    %28 = vector.load %arg3[%c0_9, %c0_10, %c0_11] : memref<1x64x128xbf16, #tpu.memory_space<vmem>>, vector<1x64x128xbf16>
    tpu.vector_store %arg3[%c0_9, %c0_10, %c0_11], %27 {strides = array<i32>} : memref<1x64x128xbf16, #tpu.memory_space<vmem>>, vector<1x64x128xbf16>,
    return
  }
  func.func @transform_0(%arg0: i32, %arg1: i32) -> (i32, i32, i32) {
    %c0_i32 = arith.constant 0 : i32
    %c0_i32_0 = arith.constant 0 : i32
    return %arg0, %c0_i32, %arg1 : i32, i32, i32
  }
  func.func @transform_1(%arg0: i32, %arg1: i32) -> (i32, i32, i32) {
    %c0_i32 = arith.constant 0 : i32
    %c0_i32_0 = arith.constant 0 : i32
    return %arg0, %c0_i32, %arg1 : i32, i32, i32
  }
}

module attributes {stable_mosaic.version = 11 : i64} {
  func.func @_matmul_bias_act_kernel(%arg0: i32, %arg1: memref<32x2048xbf16, #tpu.memory_space<vmem>>, %arg2: memref<2048x256xbf16, #tpu.memory_space<vmem>>, %arg3: memref<1x256xf32, #tpu.memory_space<vmem>>, %arg4: memref<32x256xbf16, #tpu.memory_space<vmem>>) attributes {dimension_semantics = [#tpu.dimension_semantics<parallel>], iteration_bounds = array<i64: 1>, scalar_prefetch = 0 : i64, scratch_operands = 0 : i64, tpu.core_type = #tpu.core_type<tc>, window_params = [{transform_indices = @transform_0, window_bounds = array<i64: 32, 2048>}, {pipeline_mode = #tpu.pipeline_mode<synchronous>, transform_indices = @transform_1, window_bounds = array<i64: 2048, 256>}, {pipeline_mode = #tpu.pipeline_mode<synchronous>, transform_indices = @transform_2, window_bounds = array<i64: 1, 256>}, {transform_indices = @transform_3, window_bounds = array<i64: 32, 256>}]} {
    %c0 = arith.constant 0 : index
    %c0_0 = arith.constant 0 : index
    %0 = vector.load %arg1[%c0, %c0_0] : memref<32x2048xbf16, #tpu.memory_space<vmem>>, vector<32x2048xbf16>
    %c0_1 = arith.constant 0 : index
    %c0_2 = arith.constant 0 : index
    %1 = vector.load %arg2[%c0_1, %c0_2] : memref<2048x256xbf16, #tpu.memory_space<vmem>>, vector<2048x256xbf16>
    %cst = arith.constant dense<0.000000e+00> : vector<32x256xf32>
    %2 = tpu.matmul %0, %1, %cst {dimension_numbers = #tpu.dot_dimension_numbers<[1], [0], [0], [1], [0, 0, 1, 1], [], []>} : vector<32x2048xbf16>, vector<2048x256xbf16>, vector<32x256xf32> -> vector<32x256xf32>
    %c0_3 = arith.constant 0 : index
    %c0_4 = arith.constant 0 : index
    %3 = vector.load %arg3[%c0_3, %c0_4] : memref<1x256xf32, #tpu.memory_space<vmem>>, vector<1x256xf32>
    %4 = vector.broadcast %3 : vector<1x256xf32> to vector<32x256xf32>
    %5 = arith.addf %2, %4 : vector<32x256xf32>
    %6 = arith.truncf %5 : vector<32x256xf32> to vector<32x256xbf16>
    %c0_5 = arith.constant 0 : index
    %c0_6 = arith.constant 0 : index
    %7 = vector.load %arg4[%c0_5, %c0_6] : memref<32x256xbf16, #tpu.memory_space<vmem>>, vector<32x256xbf16>
    tpu.vector_store %arg4[%c0_5, %c0_6], %6 {strides = array<i32>} : memref<32x256xbf16, #tpu.memory_space<vmem>>, vector<32x256xbf16>,
    return
  }
  func.func @transform_0(%arg0: i32) -> (i32, i32) {
    %c0_i32 = arith.constant 0 : i32
    %c0_i32_0 = arith.constant 0 : i32
    return %arg0, %c0_i32 : i32, i32
  }
  func.func @transform_1(%arg0: i32) -> (i32, i32) {
    %c0_i32 = arith.constant 0 : i32
    %c0_i32_0 = arith.constant 0 : i32
    %c0_i32_1 = arith.constant 0 : i32
    return %c0_i32, %c0_i32_0 : i32, i32
  }
  func.func @transform_2(%arg0: i32) -> (i32, i32) {
    %c0_i32 = arith.constant 0 : i32
    %c0_i32_0 = arith.constant 0 : i32
    %c0_i32_1 = arith.constant 0 : i32
    return %c0_i32, %c0_i32_0 : i32, i32
  }
  func.func @transform_3(%arg0: i32) -> (i32, i32) {
    %c0_i32 = arith.constant 0 : i32
    %c0_i32_0 = arith.constant 0 : i32
    return %arg0, %c0_i32 : i32, i32
  }
}

module attributes {stable_mosaic.version = 11 : i64} {
  func.func @_instnorm_leaky_kernel(%arg0: i32, %arg1: i32, %arg2: memref<1x16x128xbf16, #tpu.memory_space<vmem>>, %arg3: memref<1x16x128xbf16, #tpu.memory_space<vmem>>) attributes {dimension_semantics = [#tpu.dimension_semantics<parallel>, #tpu.dimension_semantics<parallel>], iteration_bounds = array<i64: 2, 2>, scalar_prefetch = 0 : i64, scratch_operands = 0 : i64, tpu.core_type = #tpu.core_type<tc>, window_params = [{transform_indices = @transform_0, window_bounds = array<i64: 1, 16, 128>}, {transform_indices = @transform_1, window_bounds = array<i64: 1, 16, 128>}]} {
    %c0 = arith.constant 0 : index
    %c0_0 = arith.constant 0 : index
    %c0_1 = arith.constant 0 : index
    %0 = vector.load %arg2[%c0, %c0_0, %c0_1] : memref<1x16x128xbf16, #tpu.memory_space<vmem>>, vector<1x16x128xbf16>
    %1 = arith.extf %0 : vector<1x16x128xbf16> to vector<1x16x128xf32>
    %cst = arith.constant dense<0.000000e+00> : vector<1x128xf32>
    %2 = vector.multi_reduction <add>, %1, %cst [1] : vector<1x16x128xf32> to vector<1x128xf32>
    %3 = vector.shape_cast %2 : vector<1x128xf32> to vector<1x1x128xf32>
    %4 = arith.mulf %1, %1 : vector<1x16x128xf32>
    %cst_2 = arith.constant dense<0.000000e+00> : vector<1x128xf32>
    %5 = vector.multi_reduction <add>, %4, %cst_2 [1] : vector<1x16x128xf32> to vector<1x128xf32>
    %6 = vector.shape_cast %5 : vector<1x128xf32> to vector<1x1x128xf32>
    %cst_3 = arith.constant 6.250000e-02 : f32
    %7 = vector.broadcast %cst_3 : f32 to vector<1x1x128xf32>
    %8 = arith.mulf %3, %7 : vector<1x1x128xf32>
    %cst_4 = arith.constant 6.250000e-02 : f32
    %9 = vector.broadcast %cst_4 : f32 to vector<1x1x128xf32>
    %10 = arith.mulf %6, %9 : vector<1x1x128xf32>
    %11 = arith.mulf %8, %8 : vector<1x1x128xf32>
    %12 = arith.subf %10, %11 : vector<1x1x128xf32>
    %cst_5 = arith.constant 0.000000e+00 : f32
    %13 = vector.broadcast %cst_5 : f32 to vector<1x1x128xf32>
    %14 = arith.maximumf %12, %13 : vector<1x1x128xf32>
    %15 = vector.broadcast %8 : vector<1x1x128xf32> to vector<1x16x128xf32>
    %16 = arith.subf %1, %15 : vector<1x16x128xf32>
    %cst_6 = arith.constant 9.99999974E-6 : f32
    %17 = vector.broadcast %cst_6 : f32 to vector<1x1x128xf32>
    %18 = arith.addf %14, %17 : vector<1x1x128xf32>
    %19 = math.rsqrt %18 : vector<1x1x128xf32>
    %20 = vector.broadcast %19 : vector<1x1x128xf32> to vector<1x16x128xf32>
    %21 = arith.mulf %16, %20 : vector<1x16x128xf32>
    %cst_7 = arith.constant 0.000000e+00 : f32
    %22 = vector.broadcast %cst_7 : f32 to vector<1x16x128xf32>
    %23 = arith.cmpf ogt, %21, %22 : vector<1x16x128xf32>
    %cst_8 = arith.constant 2.000000e-01 : f32
    %24 = vector.broadcast %cst_8 : f32 to vector<1x16x128xf32>
    %25 = arith.mulf %24, %21 : vector<1x16x128xf32>
    %26 = arith.select %23, %21, %25 : vector<1x16x128xi1>, vector<1x16x128xf32>
    %27 = arith.truncf %26 : vector<1x16x128xf32> to vector<1x16x128xbf16>
    %c0_9 = arith.constant 0 : index
    %c0_10 = arith.constant 0 : index
    %c0_11 = arith.constant 0 : index
    %28 = vector.load %arg3[%c0_9, %c0_10, %c0_11] : memref<1x16x128xbf16, #tpu.memory_space<vmem>>, vector<1x16x128xbf16>
    tpu.vector_store %arg3[%c0_9, %c0_10, %c0_11], %27 {strides = array<i32>} : memref<1x16x128xbf16, #tpu.memory_space<vmem>>, vector<1x16x128xbf16>,
    return
  }
  func.func @transform_0(%arg0: i32, %arg1: i32) -> (i32, i32, i32) {
    %c0_i32 = arith.constant 0 : i32
    %c0_i32_0 = arith.constant 0 : i32
    return %arg0, %c0_i32, %arg1 : i32, i32, i32
  }
  func.func @transform_1(%arg0: i32, %arg1: i32) -> (i32, i32, i32) {
    %c0_i32 = arith.constant 0 : i32
    %c0_i32_0 = arith.constant 0 : i32
    return %arg0, %c0_i32, %arg1 : i32, i32, i32
  }
}

module attributes {stable_mosaic.version = 11 : i64} {
  func.func @_matmul_bias_act_kernel(%arg0: i32, %arg1: memref<32x4096xbf16, #tpu.memory_space<vmem>>, %arg2: memref<4096x512xbf16, #tpu.memory_space<vmem>>, %arg3: memref<1x512xf32, #tpu.memory_space<vmem>>, %arg4: memref<32x512xbf16, #tpu.memory_space<vmem>>) attributes {dimension_semantics = [#tpu.dimension_semantics<parallel>], iteration_bounds = array<i64: 1>, scalar_prefetch = 0 : i64, scratch_operands = 0 : i64, tpu.core_type = #tpu.core_type<tc>, window_params = [{transform_indices = @transform_0, window_bounds = array<i64: 32, 4096>}, {pipeline_mode = #tpu.pipeline_mode<synchronous>, transform_indices = @transform_1, window_bounds = array<i64: 4096, 512>}, {pipeline_mode = #tpu.pipeline_mode<synchronous>, transform_indices = @transform_2, window_bounds = array<i64: 1, 512>}, {transform_indices = @transform_3, window_bounds = array<i64: 32, 512>}]} {
    %c0 = arith.constant 0 : index
    %c0_0 = arith.constant 0 : index
    %0 = vector.load %arg1[%c0, %c0_0] : memref<32x4096xbf16, #tpu.memory_space<vmem>>, vector<32x4096xbf16>
    %c0_1 = arith.constant 0 : index
    %c0_2 = arith.constant 0 : index
    %1 = vector.load %arg2[%c0_1, %c0_2] : memref<4096x512xbf16, #tpu.memory_space<vmem>>, vector<4096x512xbf16>
    %cst = arith.constant dense<0.000000e+00> : vector<32x512xf32>
    %2 = tpu.matmul %0, %1, %cst {dimension_numbers = #tpu.dot_dimension_numbers<[1], [0], [0], [1], [0, 0, 1, 1], [], []>} : vector<32x4096xbf16>, vector<4096x512xbf16>, vector<32x512xf32> -> vector<32x512xf32>
    %c0_3 = arith.constant 0 : index
    %c0_4 = arith.constant 0 : index
    %3 = vector.load %arg3[%c0_3, %c0_4] : memref<1x512xf32, #tpu.memory_space<vmem>>, vector<1x512xf32>
    %4 = vector.broadcast %3 : vector<1x512xf32> to vector<32x512xf32>
    %5 = arith.addf %2, %4 : vector<32x512xf32>
    %6 = arith.truncf %5 : vector<32x512xf32> to vector<32x512xbf16>
    %c0_5 = arith.constant 0 : index
    %c0_6 = arith.constant 0 : index
    %7 = vector.load %arg4[%c0_5, %c0_6] : memref<32x512xbf16, #tpu.memory_space<vmem>>, vector<32x512xbf16>
    tpu.vector_store %arg4[%c0_5, %c0_6], %6 {strides = array<i32>} : memref<32x512xbf16, #tpu.memory_space<vmem>>, vector<32x512xbf16>,
    return
  }
  func.func @transform_0(%arg0: i32) -> (i32, i32) {
    %c0_i32 = arith.constant 0 : i32
    %c0_i32_0 = arith.constant 0 : i32
    return %arg0, %c0_i32 : i32, i32
  }
  func.func @transform_1(%arg0: i32) -> (i32, i32) {
    %c0_i32 = arith.constant 0 : i32
    %c0_i32_0 = arith.constant 0 : i32
    %c0_i32_1 = arith.constant 0 : i32
    return %c0_i32, %c0_i32_0 : i32, i32
  }
  func.func @transform_2(%arg0: i32) -> (i32, i32) {
    %c0_i32 = arith.constant 0 : i32
    %c0_i32_0 = arith.constant 0 : i32
    %c0_i32_1 = arith.constant 0 : i32
    return %c0_i32, %c0_i32_0 : i32, i32
  }
  func.func @transform_3(%arg0: i32) -> (i32, i32) {
    %c0_i32 = arith.constant 0 : i32
    %c0_i32_0 = arith.constant 0 : i32
    return %arg0, %c0_i32 : i32, i32
  }
}

module attributes {stable_mosaic.version = 11 : i64} {
  func.func @_instnorm_leaky_kernel(%arg0: i32, %arg1: i32, %arg2: memref<1x9x128xbf16, #tpu.memory_space<vmem>>, %arg3: memref<1x9x128xbf16, #tpu.memory_space<vmem>>) attributes {dimension_semantics = [#tpu.dimension_semantics<parallel>, #tpu.dimension_semantics<parallel>], iteration_bounds = array<i64: 2, 4>, scalar_prefetch = 0 : i64, scratch_operands = 0 : i64, tpu.core_type = #tpu.core_type<tc>, window_params = [{transform_indices = @transform_0, window_bounds = array<i64: 1, 9, 128>}, {transform_indices = @transform_1, window_bounds = array<i64: 1, 9, 128>}]} {
    %c0 = arith.constant 0 : index
    %c0_0 = arith.constant 0 : index
    %c0_1 = arith.constant 0 : index
    %0 = vector.load %arg2[%c0, %c0_0, %c0_1] : memref<1x9x128xbf16, #tpu.memory_space<vmem>>, vector<1x9x128xbf16>
    %1 = arith.extf %0 : vector<1x9x128xbf16> to vector<1x9x128xf32>
    %cst = arith.constant dense<0.000000e+00> : vector<1x128xf32>
    %2 = vector.multi_reduction <add>, %1, %cst [1] : vector<1x9x128xf32> to vector<1x128xf32>
    %3 = vector.shape_cast %2 : vector<1x128xf32> to vector<1x1x128xf32>
    %4 = arith.mulf %1, %1 : vector<1x9x128xf32>
    %cst_2 = arith.constant dense<0.000000e+00> : vector<1x128xf32>
    %5 = vector.multi_reduction <add>, %4, %cst_2 [1] : vector<1x9x128xf32> to vector<1x128xf32>
    %6 = vector.shape_cast %5 : vector<1x128xf32> to vector<1x1x128xf32>
    %cst_3 = arith.constant 0.111111112 : f32
    %7 = vector.broadcast %cst_3 : f32 to vector<1x1x128xf32>
    %8 = arith.mulf %3, %7 : vector<1x1x128xf32>
    %cst_4 = arith.constant 0.111111112 : f32
    %9 = vector.broadcast %cst_4 : f32 to vector<1x1x128xf32>
    %10 = arith.mulf %6, %9 : vector<1x1x128xf32>
    %11 = arith.mulf %8, %8 : vector<1x1x128xf32>
    %12 = arith.subf %10, %11 : vector<1x1x128xf32>
    %cst_5 = arith.constant 0.000000e+00 : f32
    %13 = vector.broadcast %cst_5 : f32 to vector<1x1x128xf32>
    %14 = arith.maximumf %12, %13 : vector<1x1x128xf32>
    %15 = vector.broadcast %8 : vector<1x1x128xf32> to vector<1x9x128xf32>
    %16 = arith.subf %1, %15 : vector<1x9x128xf32>
    %cst_6 = arith.constant 9.99999974E-6 : f32
    %17 = vector.broadcast %cst_6 : f32 to vector<1x1x128xf32>
    %18 = arith.addf %14, %17 : vector<1x1x128xf32>
    %19 = math.rsqrt %18 : vector<1x1x128xf32>
    %20 = vector.broadcast %19 : vector<1x1x128xf32> to vector<1x9x128xf32>
    %21 = arith.mulf %16, %20 : vector<1x9x128xf32>
    %cst_7 = arith.constant 0.000000e+00 : f32
    %22 = vector.broadcast %cst_7 : f32 to vector<1x9x128xf32>
    %23 = arith.cmpf ogt, %21, %22 : vector<1x9x128xf32>
    %cst_8 = arith.constant 2.000000e-01 : f32
    %24 = vector.broadcast %cst_8 : f32 to vector<1x9x128xf32>
    %25 = arith.mulf %24, %21 : vector<1x9x128xf32>
    %26 = arith.select %23, %21, %25 : vector<1x9x128xi1>, vector<1x9x128xf32>
    %27 = arith.truncf %26 : vector<1x9x128xf32> to vector<1x9x128xbf16>
    %c0_9 = arith.constant 0 : index
    %c0_10 = arith.constant 0 : index
    %c0_11 = arith.constant 0 : index
    %28 = vector.load %arg3[%c0_9, %c0_10, %c0_11] : memref<1x9x128xbf16, #tpu.memory_space<vmem>>, vector<1x9x128xbf16>
    tpu.vector_store %arg3[%c0_9, %c0_10, %c0_11], %27 {strides = array<i32>} : memref<1x9x128xbf16, #tpu.memory_space<vmem>>, vector<1x9x128xbf16>,
    return
  }
  func.func @transform_0(%arg0: i32, %arg1: i32) -> (i32, i32, i32) {
    %c0_i32 = arith.constant 0 : i32
    %c0_i32_0 = arith.constant 0 : i32
    return %arg0, %c0_i32, %arg1 : i32, i32, i32
  }
  func.func @transform_1(%arg0: i32, %arg1: i32) -> (i32, i32, i32) {
    %c0_i32 = arith.constant 0 : i32
    %c0_i32_0 = arith.constant 0 : i32
    return %arg0, %c0_i32, %arg1 : i32, i32, i32
  }
}

module attributes {stable_mosaic.version = 11 : i64} {
  func.func @_conv_avgpool_kernel(%arg0: i32, %arg1: memref<1x4x8192xbf16, #tpu.memory_space<vmem>>, %arg2: memref<8192x128xbf16, #tpu.memory_space<vmem>>, %arg3: memref<1x128xf32, #tpu.memory_space<vmem>>, %arg4: memref<1x1x128xf32, #tpu.memory_space<vmem>>) attributes {dimension_semantics = [#tpu.dimension_semantics<parallel>], iteration_bounds = array<i64: 2>, scalar_prefetch = 0 : i64, scratch_operands = 0 : i64, tpu.core_type = #tpu.core_type<tc>, window_params = [{transform_indices = @transform_0, window_bounds = array<i64: 1, 4, 8192>}, {pipeline_mode = #tpu.pipeline_mode<synchronous>, transform_indices = @transform_1, window_bounds = array<i64: 8192, 128>}, {pipeline_mode = #tpu.pipeline_mode<synchronous>, transform_indices = @transform_2, window_bounds = array<i64: 1, 128>}, {transform_indices = @transform_3, window_bounds = array<i64: 1, 1, 128>}]} {
    %c0 = arith.constant 0 : index
    %c0_0 = arith.constant 0 : index
    %c0_1 = arith.constant 0 : index
    %0 = vector.load %arg1[%c0, %c0_0, %c0_1] : memref<1x4x8192xbf16, #tpu.memory_space<vmem>>, vector<1x4x8192xbf16>
    %1 = vector.shape_cast %0 : vector<1x4x8192xbf16> to vector<4x8192xbf16>
    %c0_2 = arith.constant 0 : index
    %c0_3 = arith.constant 0 : index
    %2 = vector.load %arg2[%c0_2, %c0_3] : memref<8192x128xbf16, #tpu.memory_space<vmem>>, vector<8192x128xbf16>
    %cst = arith.constant dense<0.000000e+00> : vector<4x128xf32>
    %3 = tpu.matmul %1, %2, %cst {dimension_numbers = #tpu.dot_dimension_numbers<[1], [0], [0], [1], [0, 0, 1, 1], [], []>} : vector<4x8192xbf16>, vector<8192x128xbf16>, vector<4x128xf32> -> vector<4x128xf32>
    %cst_4 = arith.constant dense<0.000000e+00> : vector<128xf32>
    %4 = vector.multi_reduction <add>, %3, %cst_4 [0] : vector<4x128xf32> to vector<128xf32>
    %5 = vector.shape_cast %4 : vector<128xf32> to vector<1x128xf32>
    %cst_5 = arith.constant 2.500000e-01 : f32
    %6 = vector.broadcast %cst_5 : f32 to vector<1x128xf32>
    %7 = arith.mulf %5, %6 : vector<1x128xf32>
    %c0_6 = arith.constant 0 : index
    %c0_7 = arith.constant 0 : index
    %8 = vector.load %arg3[%c0_6, %c0_7] : memref<1x128xf32, #tpu.memory_space<vmem>>, vector<1x128xf32>
    %9 = arith.addf %7, %8 : vector<1x128xf32>
    %c0_8 = arith.constant 0 : index
    %c0_9 = arith.constant 0 : index
    %c0_10 = arith.constant 0 : index
    %10 = vector.load %arg4[%c0_8, %c0_9, %c0_10] : memref<1x1x128xf32, #tpu.memory_space<vmem>>, vector<1x1x128xf32>
    %11 = vector.shape_cast %10 : vector<1x1x128xf32> to vector<1x128xf32>
    %12 = vector.shape_cast %9 : vector<1x128xf32> to vector<1x1x128xf32>
    tpu.vector_store %arg4[%c0_8, %c0_9, %c0_10], %12 {strides = array<i32>} : memref<1x1x128xf32, #tpu.memory_space<vmem>>, vector<1x1x128xf32>,
    return
  }
  func.func @transform_0(%arg0: i32) -> (i32, i32, i32) {
    %c0_i32 = arith.constant 0 : i32
    %c0_i32_0 = arith.constant 0 : i32
    %c0_i32_1 = arith.constant 0 : i32
    return %arg0, %c0_i32, %c0_i32_0 : i32, i32, i32
  }
  func.func @transform_1(%arg0: i32) -> (i32, i32) {
    %c0_i32 = arith.constant 0 : i32
    %c0_i32_0 = arith.constant 0 : i32
    %c0_i32_1 = arith.constant 0 : i32
    return %c0_i32, %c0_i32_0 : i32, i32
  }
  func.func @transform_2(%arg0: i32) -> (i32, i32) {
    %c0_i32 = arith.constant 0 : i32
    %c0_i32_0 = arith.constant 0 : i32
    %c0_i32_1 = arith.constant 0 : i32
    return %c0_i32, %c0_i32_0 : i32, i32
  }
  func.func @transform_3(%arg0: i32) -> (i32, i32, i32) {
    %c0_i32 = arith.constant 0 : i32
    %c0_i32_0 = arith.constant 0 : i32
    %c0_i32_1 = arith.constant 0 : i32
    return %arg0, %c0_i32, %c0_i32_0 : i32, i32, i32
  }
}

</mosaic_0001>

<bundles_post_ra>
// kernel: discriminator_forward.8
= control target key start
LH: loop header
LB: loop body
LE: loop exit
PB: predicated region body
PF: predicated region fallthrough
CT: control target
= control target key end

     0   :  { %8 = vsyncpa [#allocation3], 0  ;;  %s1167_s12 = smov 0   ;;  %s1376_s0 = inlined_call_operand.vmem [shape: bf16[512,128], index: 0, kind: input, shape index: {}]   ;;  %s1377_s1 = inlined_call_operand.vmem [shape: bf16[128,64], index: 1, kind: input, shape index: {}]   ;;  %s1378_s2 = inlined_call_operand.hbm [shape: f32[1,64], index: 2, kind: input, shape index: {}]   ;;  %s1379_s3 = inlined_call_operand.vmem [shape: bf16[512,64], index: 3, kind: output, shape index: {}]  }
   0x1 LB: > { %s873_s13 = sadd.s32 4294967295, %s1144_s12   ;;  %p875_p0 = scmp.ge.s32.totalorder %s1144_s12, 1  ;;  %s1144_s12 = sphi %s1167_s12, %s14_s12  }
   0x2   : > { %p113_p1 = scmp.lt.s32.totalorder %s1144_s12, 3  ;;  %p1181_p3 = scmp.eq.s32.totalorder %s873_s13, 0 }
   0x3   : > { %s1146_s16 = smov [#allocation2]   ;;  %s1106_s21 = scalar_lea.hbm %s1378_s2, 16 }
   0x4   : > { %p1175_p2 = pnand %p875_p0, %p113_p1  ;;  %s129_s17 = sshll.u32 %s1146_s16, 4  ;;  %s130_s17 = int_to_ptr.vmem [resolvable:$true] %s129_s17 }
   0x5   : > { %s1384_s15 = scalar_select %p1181_p3, 1, 0 }
   0x6   : > { %s1383_s14 = scalar_select %p1175_p2, 1, 0 }
   0x7   : > { %p1067_p4 = pneg %p1175_p2  ;;  %p1107_p6 = scmp.ne.s32.totalorder %s1378_s2, %s1106_s21 }
   0x8   : > { %p1113_p10 = scmp.lt.u32.totalorder %s1106_s21, %s1378_s2 }
   0x9   : > { %p1189_p5 = pnand %p1181_p3, %p1067_p4 }
   0xb   : > { %p1108_p7 = pneg %p1189_p5 }
   0xd   : > { %p1109_p8 = pnand %p1108_p7, %p1107_p6 }
   0xf   : > { %p1110_p9 = pneg %p1109_p8 }
  0x11   : > { %p1115_p11 = pnand %p1113_p10, %p1110_p9 }
  0x13   : > { %1118 = shalt.err (!%p1115_p11)
}
  0x14   : > { %s1119_s26 = scalar_lea.vmem %s130_s17, 16  ;;  %s1126_s27 = scalar_lea.vmem %s130_s17, 32 }
  0x15   : > { %p1120_p12 = scmp.ne.s32.totalorder %s130_s17, %s1119_s26  ;;  %p1127_p1 = scmp.lt.s32.totalorder %s130_s17, %s130_s17 }
  0x16   : > { %p1128_p4 = scmp.lt.s32.totalorder %s1126_s27, %s1119_s26 }
  0x17   : > { %p1122_p13 = pnand %p1120_p12, %p1108_p7 }
  0x18   : > { %p1129_p3 = por %p1128_p4, %p1127_p1 }
  0x19   : > { %p1123_p0 = pneg %p1122_p13 }
  0x1b   : > { %p1130_p2 = pnand %p1129_p3, %p1123_p0 }
  0x1d   : > { %1133 = shalt.err (!%p1130_p2)
}
  0x1e   : > { %1070 = dma.hbm_to_vmem [thread:$0]  (!%p1189_p5), %s1378_s2, 16, %s130_s17, [#allocation3]  }
  0x1f   : > { %p1386_p6 = scmp.ne.s32.totalorder %s1383_s14, 0 }
  0x20   : > { %p1387_p8 = scmp.ne.s32.totalorder (!%p1386_p6), %s1384_s15, 0 }
  0x21   : > { %151 = sbr.rel (%p1386_p6) target bundleno = 332 (0x14c), region = 32 }
  0x28   : > { %1139 = dma.done.wait (%p1387_p8), [#allocation3], 16  }
  0x29   : > { %1141 = vsyncadd (%p1387_p8), [#allocation3], 4294967280  ;;  %s880_s30 = sshll.u32 %s873_s13, 5  ;;  %v1082_v0 = vld [vmem:[%s1377_s1] sm:$0xff]   ;;  %v1083_v1 = vld [vmem:[%s1377_s1 + $0x8] sm:$0xff]   ;;  %vm772_vm0 = vcmask 519168  }
  0x2a   : > { %p176_p3 = scmp.lt.s32.totalorder %s880_s30, 63  ;;  %999 = vmatprep.subr.bf16.mxu0 %v1082_v0  ;;  %1047 = vmatprep.subr.bf16.mxu1 %v1082_v0  ;;  %v1084_v2 = vld [vmem:[%s1377_s1 + $0x10] sm:$0xff]   ;;  %v1085_v3 = vld [vmem:[%s1377_s1 + $0x18] sm:$0xff]   ;;  %v1086_v6 = vld [vmem:[%s1377_s1 + $0x20] sm:$0xff]  }
  0x2b   : > { %1000 = vmatpush3.bf16.msra.mxu0 %v1082_v0  ;;  %1055 = vmatpush3.bf16.msra.mxu1 %v1082_v0  ;;  %v1087_v7 = vld [vmem:[%s1377_s1 + $0x28] sm:$0xff]   ;;  %v1088_v8 = vld [vmem:[%s1377_s1 + $0x30] sm:$0xff]   ;;  %v1089_v9 = vld [vmem:[%s1377_s1 + $0x38] sm:$0xff]  }
  0x2c   : > { %s1389_s30 = smov (!%p176_p3, %s880_s30), 63  ;;  %1001 = vmatprep.subr.bf16.mxu0 %v1083_v1  ;;  %1048 = vmatprep.subr.bf16.mxu1 %v1083_v1  ;;  %v1267_v24 = vld [vmem:[#allocation2] ss:$0 sm:$0xff] }
  0x2d   : > { %s881_s8 = sshll.u32 %s1389_s30, 2 }
  0x2e   : > { %s1234_s14 = scalar_lea.vmem %s1376_s0, %s881_s8  ;;  %s1278_s27 = scalar_lea.vmem %s1379_s3, %s881_s8 }
  0x2f   : > { %1002 = vmatpush3.bf16.msra.mxu0 %v1083_v1  ;;  %1056 = vmatpush3.bf16.msra.mxu1 %v1083_v1  ;;  %v1090_v4 = vld [vmem:[%s1234_s14] sm:$0xff]   ;;  %v1092_v10 = vld [vmem:[%s1234_s14 + $0x8] sm:$0xff]   ;;  %v1094_v12 = vld [vmem:[%s1234_s14 + $0x10] sm:$0xff]  }
  0x30   : > { %1003 = vmatprep.subr.bf16.mxu0 %v1084_v2  ;;  %1049 = vmatprep.subr.bf16.mxu1 %v1084_v2  ;;  %v1091_v5 = vld [vmem:[%s1234_s14 + $0x40] sm:$0xff]   ;;  %v1093_v11 = vld [vmem:[%s1234_s14 + $0x48] sm:$0xff]   ;;  %v1095_v13 = vld [vmem:[%s1234_s14 + $0x50] sm:$0xff]  }
  0x31   : > { %1015 = vmatprep.mubr.bf16.mxu0 %v1090_v4  ;;  %1031 = vmatprep.mubr.bf16.mxu1 %v1091_v5  ;;  %v1096_v14 = vld [vmem:[%s1234_s14 + $0x18] sm:$0xff]   ;;  %v1098_v16 = vld [vmem:[%s1234_s14 + $0x20] sm:$0xff]   ;;  %v1100_v18 = vld [vmem:[%s1234_s14 + $0x28] sm:$0xff]  }
  0x32   : > { %v1097_v15 = vld [vmem:[%s1234_s14 + $0x58] sm:$0xff]   ;;  %v1099_v17 = vld [vmem:[%s1234_s14 + $0x60] sm:$0xff]   ;;  %v1101_v19 = vld [vmem:[%s1234_s14 + $0x68] sm:$0xff]  }
  0x33   : > { %1004 = vmatpush3.bf16.msra.mxu0 %v1084_v2  ;;  %1057 = vmatpush3.bf16.msra.mxu1 %v1084_v2  ;;  %v1102_v20 = vld [vmem:[%s1234_s14 + $0x30] sm:$0xff]   ;;  %v1104_v22 = vld [vmem:[%s1234_s14 + $0x38] sm:$0xff]  }
  0x34   : > { %1005 = vmatprep.subr.bf16.mxu0 %v1085_v3  ;;  %1050 = vmatprep.subr.bf16.mxu1 %v1085_v3  ;;  %v1103_v21 = vld [vmem:[%s1234_s14 + $0x70] sm:$0xff]   ;;  %v1105_v23 = vld [vmem:[%s1234_s14 + $0x78] sm:$0xff]  }
  0x37   : > { %1006 = vmatpush3.bf16.msra.mxu0 %v1085_v3  ;;  %1058 = vmatpush3.bf16.msra.mxu1 %v1085_v3 }
  0x38   : > { %1007 = vmatprep.subr.bf16.mxu0 %v1086_v6  ;;  %1051 = vmatprep.subr.bf16.mxu1 %v1086_v6 }
  0x3b   : > { %1008 = vmatpush3.bf16.msra.mxu0 %v1086_v6  ;;  %1059 = vmatpush3.bf16.msra.mxu1 %v1086_v6 }
  0x3c   : > { %1009 = vmatprep.subr.bf16.mxu0 %v1087_v7  ;;  %1052 = vmatprep.subr.bf16.mxu1 %v1087_v7 }
  0x3f   : > { %1010 = vmatpush3.bf16.msra.mxu0 %v1087_v7  ;;  %1060 = vmatpush3.bf16.msra.mxu1 %v1087_v7 }
  0x40   : > { %1011 = vmatprep.subr.bf16.mxu0 %v1088_v8  ;;  %1053 = vmatprep.subr.bf16.mxu1 %v1088_v8 }
  0x43   : > { %1012 = vmatpush3.bf16.msra.mxu0 %v1088_v8  ;;  %1061 = vmatpush3.bf16.msra.mxu1 %v1088_v8 }
  0x44   : > { %1013 = vmatprep.subr.bf16.mxu0 %v1089_v9  ;;  %1054 = vmatprep.subr.bf16.mxu1 %v1089_v9 }
  0x47   : > { %1014 = vmatpush3.bf16.msra.mxu0 %v1089_v9  ;;  %1062 = vmatpush3.bf16.msra.mxu1 %v1089_v9 }
  0x4a   : > { %1016 = vmatmul.mubr.bf16.vlgmr.msra.gmra.mrb[0].mxu0 %v1092_v10  ;;  %1032 = vmatmul.mubr.bf16.vlgmr.msra.gmra.mrb[0].mxu1 %v1093_v11 }
  0x4b   : > { %1019 = vmatprep.mubr.bf16.mxu0 %v1094_v12  ;;  %1035 = vmatprep.mubr.bf16.mxu1 %v1095_v13 }
  0x52   : > { %1020 = vmatmul.mubr.bf16.gmra.mrb[4].mxu0 %v1096_v14  ;;  %1036 = vmatmul.mubr.bf16.gmra.mrb[4].mxu1 %v1097_v15 }
  0x53   : > { %1023 = vmatprep.mubr.bf16.mxu0 %v1098_v16  ;;  %1039 = vmatprep.mubr.bf16.mxu1 %v1099_v17 }
  0x5a   : > { %1024 = vmatmul.mubr.bf16.gmra.mrb[8].mxu0 %v1100_v18  ;;  %1040 = vmatmul.mubr.bf16.gmra.mrb[8].mxu1 %v1101_v19 }
  0x5b   : > { %1027 = vmatprep.mubr.bf16.mxu0 %v1102_v20  ;;  %1043 = vmatprep.mubr.bf16.mxu1 %v1103_v21 }
  0x62   : > { %1028 = vmatmul.mubr.bf16.gmra.mrb[12].mxu0 %v1104_v22  ;;  %1044 = vmatmul.mubr.bf16.gmra.mrb[12].mxu1 %v1105_v23 }
 0x11d   : > { %v1017_v25 = vpop.f32.mrb[0].mxu0  ;;  %v1033_v26 = vpop.f32.mrb[0].mxu1 }
 0x11e   : > { %v430_v27 = vadd.f32 %v1017_v25, %v1267_v24  ;;  %v494_v28 = vadd.f32 %v1033_v26, %v1267_v24  ;;  %v421_v29 = vpop.f32.mrb[1].mxu0  ;;  %v485_v30 = vpop.f32.mrb[1].mxu1 }
 0x11f   : > { %v422_v31 = vadd.f32 %v1267_v24, %v421_v29  ;;  %v486_v32 = vadd.f32 %v1267_v24, %v485_v30  ;;  %v1018_v33 = vpop.f32.mrb[2].mxu0  ;;  %v1034_v34 = vpop.f32.mrb[2].mxu1 }
 0x120   : > { %vm550_vm1 = vcmp.gt.f32.partialorder %v430_v27, 0.0  ;;  %v582_v35 = vmul.f32 0.2, %v430_v27  ;;  %vm566_vm2 = vcmp.gt.f32.partialorder %v494_v28, 0.0  ;;  %v598_v36 = vmul.f32 0.2, %v494_v28 }
 0x121   : > { %vm548_vm3 = vcmp.gt.f32.partialorder %v422_v31, 0.0  ;;  %v580_v37 = vmul.f32 0.2, %v422_v31  ;;  %vm564_vm4 = vcmp.gt.f32.partialorder %v486_v32, 0.0  ;;  %v596_v38 = vmul.f32 0.2, %v486_v32 }
 0x122   : > { %v614_v39 = vsel %vm550_vm1, %v430_v27, %v582_v35  ;;  %v630_v40 = vsel %vm566_vm2, %v494_v28, %v598_v36  ;;  %v433_v41 = vadd.f32 %v1018_v33, %v1267_v24  ;;  %v497_v42 = vadd.f32 %v1034_v34, %v1267_v24  ;;  %v424_v43 = vpop.f32.mrb[3].mxu0  ;;  %v488_v44 = vpop.f32.mrb[3].mxu1 }
 0x123   : > { %v945_v45 = vpack.c.bf16 %v614_v39, %v614_v39  ;;  %v961_v46 = vpack.c.bf16 %v630_v40, %v630_v40  ;;  %v612_v47 = vsel %vm548_vm3, %v422_v31, %v580_v37  ;;  %v628_v48 = vsel %vm564_vm4, %v486_v32, %v596_v38 }
 0x124   : > { %v943_v49 = vpack.c.bf16 %v612_v47, %v612_v47  ;;  %v959_v50 = vpack.c.bf16 %v628_v48, %v628_v48  ;;  %vm551_vm5 = vcmp.gt.f32.partialorder %v433_v41, 0.0  ;;  %v583_v51 = vmul.f32 0.2, %v433_v41 }
 0x125   : > { %775 = vst.msk [vmem:[%s1278_s27 + $0x8] sm:$0xf] %vm772_vm0, %v945_v45  ;;  %791 = vst.msk [vmem:[%s1278_s27 + $0x48] sm:$0xf] %vm772_vm0, %v961_v46  ;;  %vm567_vm6 = vcmp.gt.f32.partialorder %v497_v42, 0.0  ;;  %v425_v53 = vadd.f32 %v1267_v24, %v424_v43  ;;  %v489_v54 = vadd.f32 %v1267_v24, %v488_v44  ;;  %v1021_v55 = vpop.f32.mrb[4].mxu0 }
 0x126   : > { %v599_v52 = vmul.f32 0.2, %v497_v42  ;;  %v1037_v56 = vpop.f32.mrb[4].mxu1  ;;  %773 = vst.msk [vmem:[%s1278_s27] sm:$0xf] %vm772_vm0, %v943_v49  ;;  %v615_v57 = vsel %vm551_vm5, %v433_v41, %v583_v51  ;;  %v446_v58 = vadd.f32 %v1021_v55, %v1267_v24  ;;  %v437_v60 = vpop.f32.mrb[5].mxu0 }
 0x127   : > { %789 = vst.msk [vmem:[%s1278_s27 + $0x40] sm:$0xf] %vm772_vm0, %v959_v50  ;;  %v510_v59 = vadd.f32 %v1037_v56, %v1267_v24  ;;  %v501_v61 = vpop.f32.mrb[5].mxu1  ;;  %v946_v62 = vpack.c.bf16 %v615_v57, %v615_v57  ;;  %vm549_vm7 = vcmp.gt.f32.partialorder %v425_v53, 0.0  ;;  %v581_v0 = vmul.f32 0.2, %v425_v53 }
 0x128   : > { %v631_v63 = vsel %vm567_vm6, %v497_v42, %v599_v52  ;;  %v1022_v1 = vpop.f32.mrb[6].mxu0  ;;  %v1038_v2 = vpop.f32.mrb[6].mxu1  ;;  %vm565_vm8 = vcmp.gt.f32.partialorder %v489_v54, 0.0  ;;  %v597_v4 = vmul.f32 0.2, %v489_v54  ;;  %vm554_vm9 = vcmp.gt.f32.partialorder %v446_v58, 0.0 }
 0x129   : > { %v962_v3 = vpack.c.bf16 %v631_v63, %v631_v63  ;;  %v440_v5 = vpop.f32.mrb[7].mxu0  ;;  %v504_v6 = vpop.f32.mrb[7].mxu1  ;;  %776 = vst.msk [vmem:[%s1278_s27 + $0xc] sm:$0xf] %vm772_vm0, %v946_v62  ;;  %v613_v7 = vsel %vm549_vm7, %v425_v53, %v581_v0  ;;  %v586_v8 = vmul.f32 0.2, %v446_v58  ;;  %v438_v12 = vadd.f32 %v1267_v24, %v437_v60 }
 0x12a   : > { %vm570_vm10 = vcmp.gt.f32.partialorder %v510_v59, 0.0  ;;  %v602_v9 = vmul.f32 0.2, %v510_v59  ;;  %v944_v10 = vpack.c.bf16 %v613_v7, %v613_v7  ;;  %v629_v11 = vsel %vm565_vm8, %v489_v54, %v597_v4 }
 0x12b   : > { %792 = vst.msk [vmem:[%s1278_s27 + $0x4c] sm:$0xf] %vm772_vm0, %v962_v3  ;;  %v502_v13 = vadd.f32 %v1267_v24, %v501_v61  ;;  %v960_v14 = vpack.c.bf16 %v629_v11, %v629_v11  ;;  %v618_v15 = vsel %vm554_vm9, %v446_v58, %v586_v8  ;;  %v449_v17 = vadd.f32 %v1022_v1, %v1267_v24 }
 0x12c   : > { %v634_v16 = vsel %vm570_vm10, %v510_v59, %v602_v9  ;;  %774 = vst.msk [vmem:[%s1278_s27 + $0x4] sm:$0xf] %vm772_vm0, %v944_v10  ;;  %v949_v18 = vpack.c.bf16 %v618_v15, %v618_v15  ;;  %vm552_vm11 = vcmp.gt.f32.partialorder %v438_v12, 0.0  ;;  %v584_v20 = vmul.f32 0.2, %v438_v12 }
 0x12d   : > { %v965_v19 = vpack.c.bf16 %v634_v16, %v634_v16  ;;  %790 = vst.msk [vmem:[%s1278_s27 + $0x44] sm:$0xf] %vm772_vm0, %v960_v14  ;;  %vm568_vm12 = vcmp.gt.f32.partialorder %v502_v13, 0.0  ;;  %v600_v21 = vmul.f32 0.2, %v502_v13  ;;  %vm555_vm13 = vcmp.gt.f32.partialorder %v449_v17, 0.0 }
 0x12e   : > { %v587_v22 = vmul.f32 0.2, %v449_v17  ;;  %779 = vst.msk [vmem:[%s1278_s27 + $0x18] sm:$0xf] %vm772_vm0, %v949_v18  ;;  %v616_v23 = vsel %vm552_vm11, %v438_v12, %v584_v20  ;;  %v513_v25 = vadd.f32 %v1038_v2, %v1267_v24  ;;  %v441_v26 = vadd.f32 %v1267_v24, %v440_v5  ;;  %v1025_v28 = vpop.f32.mrb[8].mxu0  ;;  %v1041_v29 = vpop.f32.mrb[8].mxu1 }
 0x12f   : > { %795 = vst.msk [vmem:[%s1278_s27 + $0x58] sm:$0xf] %vm772_vm0, %v965_v19  ;;  %v505_v27 = vadd.f32 %v1267_v24, %v504_v6  ;;  %v947_v30 = vpack.c.bf16 %v616_v23, %v616_v23  ;;  %v632_v31 = vsel %vm568_vm12, %v502_v13, %v600_v21  ;;  %v462_v33 = vadd.f32 %v1025_v28, %v1267_v24  ;;  %v453_v34 = vpop.f32.mrb[9].mxu0  ;;  %v517_v35 = vpop.f32.mrb[9].mxu1 }
 0x130   : > { %v619_v32 = vsel %vm555_vm13, %v449_v17, %v587_v22  ;;  %v963_v36 = vpack.c.bf16 %v632_v31, %v632_v31  ;;  %vm571_vm14 = vcmp.gt.f32.partialorder %v513_v25, 0.0  ;;  %v603_v38 = vmul.f32 0.2, %v513_v25  ;;  %v1026_v39 = vpop.f32.mrb[10].mxu0  ;;  %v1042_v40 = vpop.f32.mrb[10].mxu1 }
 0x131   : > { %v950_v37 = vpack.c.bf16 %v619_v32, %v619_v32  ;;  %777 = vst.msk [vmem:[%s1278_s27 + $0x10] sm:$0xf] %vm772_vm0, %v947_v30  ;;  %vm553_vm15 = vcmp.gt.f32.partialorder %v441_v26, 0.0  ;;  %v585_v41 = vmul.f32 0.2, %v441_v26  ;;  %vm569_vm1 = vcmp.gt.f32.partialorder %v505_v27, 0.0 }
 0x132   : > { %v601_v42 = vmul.f32 0.2, %v505_v27  ;;  %793 = vst.msk [vmem:[%s1278_s27 + $0x50] sm:$0xf] %vm772_vm0, %v963_v36  ;;  %v635_v43 = vsel %vm571_vm14, %v513_v25, %v603_v38  ;;  %vm558_vm2 = vcmp.gt.f32.partialorder %v462_v33, 0.0  ;;  %v526_v45 = vadd.f32 %v1041_v29, %v1267_v24  ;;  %v456_v46 = vpop.f32.mrb[11].mxu0 }
 0x133   : > { %780 = vst.msk [vmem:[%s1278_s27 + $0x1c] sm:$0xf] %vm772_vm0, %v950_v37  ;;  %v590_v44 = vmul.f32 0.2, %v462_v33  ;;  %v520_v47 = vpop.f32.mrb[11].mxu1  ;;  %v966_v48 = vpack.c.bf16 %v635_v43, %v635_v43  ;;  %v617_v49 = vsel %vm553_vm15, %v441_v26, %v585_v41  ;;  %v454_v51 = vadd.f32 %v1267_v24, %v453_v34 }
 0x134   : > { %v633_v50 = vsel %vm569_vm1, %v505_v27, %v601_v42  ;;  %v948_v52 = vpack.c.bf16 %v617_v49, %v617_v49  ;;  %vm574_vm3 = vcmp.gt.f32.partialorder %v526_v45, 0.0  ;;  %v606_v56 = vmul.f32 0.2, %v526_v45 }
 0x135   : > { %v964_v53 = vpack.c.bf16 %v633_v50, %v633_v50  ;;  %v622_v54 = vsel %vm558_vm2, %v462_v33, %v590_v44  ;;  %796 = vst.msk [vmem:[%s1278_s27 + $0x5c] sm:$0xf] %vm772_vm0, %v966_v48  ;;  %vm556_vm4 = vcmp.gt.f32.partialorder %v454_v51, 0.0  ;;  %v588_v57 = vmul.f32 0.2, %v454_v51  ;;  %v1029_v58 = vpop.f32.mrb[12].mxu0 }
 0x136   : > { %v953_v55 = vpack.c.bf16 %v622_v54, %v622_v54  ;;  %778 = vst.msk [vmem:[%s1278_s27 + $0x14] sm:$0xf] %vm772_vm0, %v948_v52  ;;  %v518_v59 = vadd.f32 %v1267_v24, %v517_v35  ;;  %v465_v60 = vadd.f32 %v1026_v39, %v1267_v24  ;;  %v529_v61 = vadd.f32 %v1042_v40, %v1267_v24  ;;  %v1045_v63 = vpop.f32.mrb[12].mxu1  ;;  %v469_v0 = vpop.f32.mrb[13].mxu0 }
 0x137   : > { %794 = vst.msk [vmem:[%s1278_s27 + $0x54] sm:$0xf] %vm772_vm0, %v964_v53  ;;  %v457_v62 = vadd.f32 %v1267_v24, %v456_v46  ;;  %v638_v1 = vsel %vm574_vm3, %v526_v45, %v606_v56  ;;  %v620_v2 = vsel %vm556_vm4, %v454_v51, %v588_v57  ;;  %v521_v3 = vadd.f32 %v1267_v24, %v520_v47  ;;  %v533_v5 = vpop.f32.mrb[13].mxu1  ;;  %v1030_v6 = vpop.f32.mrb[14].mxu0 }
 0x138   : > { %783 = vst.msk [vmem:[%s1278_s27 + $0x28] sm:$0xf] %vm772_vm0, %v953_v55  ;;  %v478_v4 = vadd.f32 %v1029_v58, %v1267_v24  ;;  %v969_v7 = vpack.c.bf16 %v638_v1, %v638_v1  ;;  %v951_v8 = vpack.c.bf16 %v620_v2, %v620_v2  ;;  %vm572_vm5 = vcmp.gt.f32.partialorder %v518_v59, 0.0  ;;  %v1046_v10 = vpop.f32.mrb[14].mxu1  ;;  %v472_v11 = vpop.f32.mrb[15].mxu0 }
 0x139   : > { %v604_v9 = vmul.f32 0.2, %v518_v59  ;;  %vm559_vm6 = vcmp.gt.f32.partialorder %v465_v60, 0.0  ;;  %v591_v12 = vmul.f32 0.2, %v465_v60  ;;  %vm575_vm7 = vcmp.gt.f32.partialorder %v529_v61, 0.0 }
 0x13a   : > { %v607_v13 = vmul.f32 0.2, %v529_v61  ;;  %799 = vst.msk [vmem:[%s1278_s27 + $0x68] sm:$0xf] %vm772_vm0, %v969_v7  ;;  %781 = vst.msk [vmem:[%s1278_s27 + $0x20] sm:$0xf] %vm772_vm0, %v951_v8  ;;  %v542_v28 = vadd.f32 %v1045_v63, %v1267_v24  ;;  %v470_v30 = vadd.f32 %v1267_v24, %v469_v0  ;;  %v534_v31 = vadd.f32 %v1267_v24, %v533_v5 }
 0x13b   : > { %v636_v14 = vsel %vm572_vm5, %v518_v59, %v604_v9  ;;  %vm557_vm8 = vcmp.gt.f32.partialorder %v457_v62, 0.0  ;;  %v589_v15 = vmul.f32 0.2, %v457_v62  ;;  %vm573_vm9 = vcmp.gt.f32.partialorder %v521_v3, 0.0  ;;  %v536_v16 = vpop.f32.mrb[15].mxu1 }
 0x13c   : > { %v967_v17 = vpack.c.bf16 %v636_v14, %v636_v14  ;;  %v623_v18 = vsel %vm559_vm6, %v465_v60, %v591_v12  ;;  %v639_v19 = vsel %vm575_vm7, %v529_v61, %v607_v13  ;;  %v605_v20 = vmul.f32 0.2, %v521_v3 }
 0x13d   : > { %v954_v21 = vpack.c.bf16 %v623_v18, %v623_v18  ;;  %v970_v22 = vpack.c.bf16 %v639_v19, %v639_v19  ;;  %v621_v23 = vsel %vm557_vm8, %v457_v62, %v589_v15  ;;  %vm562_vm10 = vcmp.gt.f32.partialorder %v478_v4, 0.0 }
 0x13e   : > { %797 = vst.msk [vmem:[%s1278_s27 + $0x60] sm:$0xf] %vm772_vm0, %v967_v17  ;;  %v952_v25 = vpack.c.bf16 %v621_v23, %v621_v23  ;;  %v637_v26 = vsel %vm573_vm9, %v521_v3, %v605_v20  ;;  %v594_v27 = vmul.f32 0.2, %v478_v4  ;;  %v481_v32 = vadd.f32 %v1030_v6, %v1267_v24 }
 0x13f   : > { %784 = vst.msk [vmem:[%s1278_s27 + $0x2c] sm:$0xf] %vm772_vm0, %v954_v21  ;;  %800 = vst.msk [vmem:[%s1278_s27 + $0x6c] sm:$0xf] %vm772_vm0, %v970_v22  ;;  %v968_v29 = vpack.c.bf16 %v637_v26, %v637_v26  ;;  %vm578_vm11 = vcmp.gt.f32.partialorder %v542_v28, 0.0  ;;  %v545_v35 = vadd.f32 %v1046_v10, %v1267_v24  ;;  %vm560_vm12 = vcmp.gt.f32.partialorder %v470_v30, 0.0 }
 0x140   : > { %782 = vst.msk [vmem:[%s1278_s27 + $0x24] sm:$0xf] %vm772_vm0, %v952_v25  ;;  %v626_v33 = vsel %vm562_vm10, %v478_v4, %v594_v27  ;;  %v610_v34 = vmul.f32 0.2, %v542_v28  ;;  %v592_v37 = vmul.f32 0.2, %v470_v30  ;;  %v473_v47 = vadd.f32 %v1267_v24, %v472_v11 }
 0x141   : > { %798 = vst.msk [vmem:[%s1278_s27 + $0x64] sm:$0xf] %vm772_vm0, %v968_v29  ;;  %v957_v36 = vpack.c.bf16 %v626_v33, %v626_v33  ;;  %vm576_vm13 = vcmp.gt.f32.partialorder %v534_v31, 0.0  ;;  %v608_v39 = vmul.f32 0.2, %v534_v31  ;;  %vm563_vm14 = vcmp.gt.f32.partialorder %v481_v32, 0.0 }
 0x142   : > { %v642_v38 = vsel %vm578_vm11, %v542_v28, %v610_v34  ;;  %v595_v40 = vmul.f32 0.2, %v481_v32  ;;  %v624_v42 = vsel %vm560_vm12, %v470_v30, %v592_v37  ;;  %vm579_vm15 = vcmp.gt.f32.partialorder %v545_v35, 0.0 }
 0x143   : > { %787 = vst.msk [vmem:[%s1278_s27 + $0x38] sm:$0xf] %vm772_vm0, %v957_v36  ;;  %v973_v41 = vpack.c.bf16 %v642_v38, %v642_v38  ;;  %v611_v43 = vmul.f32 0.2, %v545_v35  ;;  %v955_v44 = vpack.c.bf16 %v624_v42, %v624_v42  ;;  %v640_v45 = vsel %vm576_vm13, %v534_v31, %v608_v39 }
 0x144   : > { %v627_v46 = vsel %vm563_vm14, %v481_v32, %v595_v40  ;;  %v971_v48 = vpack.c.bf16 %v640_v45, %v640_v45  ;;  %v537_v51 = vadd.f32 %v1267_v24, %v536_v16  ;;  %vm561_vm1 = vcmp.gt.f32.partialorder %v473_v47, 0.0 }
 0x145   : > { %803 = vst.msk [vmem:[%s1278_s27 + $0x78] sm:$0xf] %vm772_vm0, %v973_v41  ;;  %v958_v49 = vpack.c.bf16 %v627_v46, %v627_v46  ;;  %v643_v50 = vsel %vm579_vm15, %v545_v35, %v611_v43  ;;  %785 = vst.msk [vmem:[%s1278_s27 + $0x30] sm:$0xf] %vm772_vm0, %v955_v44  ;;  %v593_v53 = vmul.f32 0.2, %v473_v47 }
 0x146   : > { %v974_v52 = vpack.c.bf16 %v643_v50, %v643_v50  ;;  %801 = vst.msk [vmem:[%s1278_s27 + $0x70] sm:$0xf] %vm772_vm0, %v971_v48  ;;  %vm577_vm2 = vcmp.gt.f32.partialorder %v537_v51, 0.0  ;;  %v609_v54 = vmul.f32 0.2, %v537_v51 }
 0x147   : > { %788 = vst.msk [vmem:[%s1278_s27 + $0x3c] sm:$0xf] %vm772_vm0, %v958_v49  ;;  %v625_v55 = vsel %vm561_vm1, %v473_v47, %v593_v53 }
 0x148   : > { %804 = vst.msk [vmem:[%s1278_s27 + $0x7c] sm:$0xf] %vm772_vm0, %v974_v52  ;;  %v956_v56 = vpack.c.bf16 %v625_v55, %v625_v55  ;;  %v641_v57 = vsel %vm577_vm2, %v537_v51, %v609_v54 }
 0x149   : > { %v972_v58 = vpack.c.bf16 %v641_v57, %v641_v57 }
 0x14a   : > { %786 = vst.msk [vmem:[%s1278_s27 + $0x34] sm:$0xf] %vm772_vm0, %v956_v56 }
 0x14b   : > { %802 = vst.msk [vmem:[%s1278_s27 + $0x74] sm:$0xf] %vm772_vm0, %v972_v58 }
 0x14c PF: > { %s14_s12 = sadd.s32 1, %s1144_s12  }
 0x14d   : > { %p11_p2 = scmp.ge.s32.totalorder %s14_s12, 4  }
 0x14f   :  { %13 = sbr.rel (!%p11_p2) target bundleno = 1 (0x1), region = 67 }
 0x156   :  { %827 = vsyncpa [#allocation3], 1 }
 0x157   :  { %829 = vsyncpa [#allocation3 + $0x1], 1 }

// kernel: discriminator_forward.9
= control target key start
LH: loop header
LB: loop body
LE: loop exit
PB: predicated region body
PF: predicated region fallthrough
CT: control target
= control target key end

     0   :  { %s2415_s1 = inlined_call_operand.vmem [shape: bf16[1024,128], index: 1, kind: input, shape index: {}]   ;;  %s2416_s0 = inlined_call_operand.vmem [shape: bf16[128,1024], index: 0, kind: input, shape index: {}]   ;;  %s2417_s2 = inlined_call_operand.vmem [shape: f32[1,128], index: 2, kind: input, shape index: {}]   ;;  %s2418_s3 = inlined_call_operand.vmem [shape: bf16[128,128], index: 3, kind: output, shape index: {}]  }
   0x1   :  { %v1854_v0 = vld [vmem:[%s2415_s1 + $0x40] sm:$0xff]   ;;  %v1858_v4 = vld [vmem:[%s2415_s1 + $0x48] sm:$0xff]   ;;  %v1862_v8 = vld [vmem:[%s2415_s1 + $0x50] sm:$0xff]  }
   0x2   :  { %v1855_v1 = vld [vmem:[%s2415_s1 + $0xc0] sm:$0xff]   ;;  %1598 = vmatprep.subr.bf16.mxu0 %v1854_v0  ;;  %v1859_v5 = vld [vmem:[%s2415_s1 + $0xc8] sm:$0xff]   ;;  %v1863_v9 = vld [vmem:[%s2415_s1 + $0xd0] sm:$0xff]  }
   0x3   :  { %v1856_v2 = vld [vmem:[%s2415_s1] sm:$0xff]   ;;  %1662 = vmatprep.subr.bf16.mxu1 %v1855_v1  ;;  %v1860_v6 = vld [vmem:[%s2415_s1 + $0x8] sm:$0xff]   ;;  %v1864_v10 = vld [vmem:[%s2415_s1 + $0x10] sm:$0xff]  }
   0x4   :  { %v1857_v3 = vld [vmem:[%s2415_s1 + $0x80] sm:$0xff]   ;;  %1599 = vmatpush3.bf16.msra.mxu0 %v1856_v2  ;;  %v1861_v7 = vld [vmem:[%s2415_s1 + $0x88] sm:$0xff]   ;;  %v1865_v11 = vld [vmem:[%s2415_s1 + $0x90] sm:$0xff]  }
   0x5   :  { %1663 = vmatpush3.bf16.msra.mxu1 %v1857_v3  ;;  %1600 = vmatprep.subr.bf16.mxu0 %v1858_v4  ;;  %v1866_v12 = vld [vmem:[%s2415_s1 + $0x58] sm:$0xff]   ;;  %v1870_v16 = vld [vmem:[%s2415_s1 + $0x60] sm:$0xff]   ;;  %v1874_v20 = vld [vmem:[%s2415_s1 + $0x68] sm:$0xff]  }
   0x6   :  { %1664 = vmatprep.subr.bf16.mxu1 %v1859_v5  ;;  %v1867_v13 = vld [vmem:[%s2415_s1 + $0xd8] sm:$0xff]   ;;  %v1871_v17 = vld [vmem:[%s2415_s1 + $0xe0] sm:$0xff]   ;;  %v1875_v21 = vld [vmem:[%s2415_s1 + $0xe8] sm:$0xff]  }
   0x7   :  { %v1868_v14 = vld [vmem:[%s2415_s1 + $0x18] sm:$0xff]   ;;  %v1872_v18 = vld [vmem:[%s2415_s1 + $0x20] sm:$0xff]   ;;  %v1876_v22 = vld [vmem:[%s2415_s1 + $0x28] sm:$0xff]  }
   0x8   :  { %1601 = vmatpush3.bf16.msra.mxu0 %v1860_v6  ;;  %v1869_v15 = vld [vmem:[%s2415_s1 + $0x98] sm:$0xff]   ;;  %v1873_v19 = vld [vmem:[%s2415_s1 + $0xa0] sm:$0xff]   ;;  %v1877_v23 = vld [vmem:[%s2415_s1 + $0xa8] sm:$0xff]  }
   0x9   :  { %1665 = vmatpush3.bf16.msra.mxu1 %v1861_v7  ;;  %1602 = vmatprep.subr.bf16.mxu0 %v1862_v8  ;;  %v1878_v24 = vld [vmem:[%s2415_s1 + $0x70] sm:$0xff]   ;;  %v1882_v28 = vld [vmem:[%s2415_s1 + $0x78] sm:$0xff]   ;;  %v15_v32 = vld [vmem:[%s2416_s0] sm:$0xff] }
   0xa   :  { %1666 = vmatprep.subr.bf16.mxu1 %v1863_v9  ;;  %v1879_v25 = vld [vmem:[%s2415_s1 + $0xf0] sm:$0xff]   ;;  %v1883_v29 = vld [vmem:[%s2415_s1 + $0xf8] sm:$0xff]   ;;  %v19_v33 = vld [vmem:[%s2416_s0 + $0x20] sm:$0xff] }
   0xb   :  { %v1880_v26 = vld [vmem:[%s2415_s1 + $0x30] sm:$0xff]   ;;  %v1884_v30 = vld [vmem:[%s2415_s1 + $0x38] sm:$0xff]   ;;  %v16_v34 = vld [vmem:[%s2416_s0 + $0x8] sm:$0xff]  ;;  %v1391_v35 = vcombine.low %v15_v32, %v19_v33  ;;  %v1392_v36 = vcombine.high %v15_v32, %v19_v33 }
   0xc   :  { %1603 = vmatpush3.bf16.msra.mxu0 %v1864_v10  ;;  %v1881_v27 = vld [vmem:[%s2415_s1 + $0xb0] sm:$0xff]   ;;  %v1885_v31 = vld [vmem:[%s2415_s1 + $0xb8] sm:$0xff]   ;;  %v20_v37 = vld [vmem:[%s2416_s0 + $0x28] sm:$0xff] }
   0xd   :  { %1667 = vmatpush3.bf16.msra.mxu1 %v1865_v11  ;;  %1604 = vmatprep.subr.bf16.mxu0 %v1866_v12  ;;  %v1393_v38 = vcombine.low %v16_v34, %v20_v37  ;;  %v1394_v39 = vcombine.high %v16_v34, %v20_v37  ;;  %v1886_v40 = vld [vmem:[%s2415_s1 + $0x140] sm:$0xff]   ;;  %v24_v47 = vld [vmem:[%s2416_s0 + $0x48] sm:$0xff]  ;;  %v1894_v62 = vld [vmem:[%s2415_s1 + $0x150] sm:$0xff]  }
   0xe   :  { %1668 = vmatprep.subr.bf16.mxu1 %v1867_v13  ;;  %950 = vmatprep.mubr.bf16.mxu0 %v1392_v36  ;;  %v1887_v41 = vld [vmem:[%s2415_s1 + $0x100] sm:$0xff]   ;;  %v28_v48 = vld [vmem:[%s2416_s0 + $0x68] sm:$0xff]  ;;  %v1895_v63 = vld [vmem:[%s2415_s1 + $0x110] sm:$0xff]  }
   0xf   :  { %1047 = vmatprep.mubr.bf16.mxu1 %v1394_v39  ;;  %v1888_v42 = vld [vmem:[%s2415_s1 + $0x1c0] sm:$0xff]   ;;  %v1402_v49 = vcombine.high %v24_v47, %v28_v48  ;;  %v1890_v50 = vld [vmem:[%s2415_s1 + $0x148] sm:$0xff]   ;;  %v1401_v53 = vcombine.low %v24_v47, %v28_v48  ;;  %v1896_v0 = vld [vmem:[%s2415_s1 + $0x1d0] sm:$0xff]  }
  0x10   :  { %1605 = vmatpush3.bf16.msra.mxu0 %v1868_v14  ;;  %v1889_v43 = vld [vmem:[%s2415_s1 + $0x180] sm:$0xff]   ;;  %v1891_v52 = vld [vmem:[%s2415_s1 + $0x108] sm:$0xff]   ;;  %v1897_v1 = vld [vmem:[%s2415_s1 + $0x190] sm:$0xff]  }
  0x11   :  { %1669 = vmatpush3.bf16.msra.mxu1 %v1869_v15  ;;  %1606 = vmatprep.subr.bf16.mxu0 %v1870_v16  ;;  %v23_v44 = vld [vmem:[%s2416_s0 + $0x40] sm:$0xff]  ;;  %v1892_v54 = vld [vmem:[%s2415_s1 + $0x1c8] sm:$0xff]   ;;  %v1898_v10 = vld [vmem:[%s2415_s1 + $0x158] sm:$0xff]  }
  0x12   :  { %1670 = vmatprep.subr.bf16.mxu1 %v1871_v17  ;;  %v27_v45 = vld [vmem:[%s2416_s0 + $0x60] sm:$0xff]  ;;  %v1893_v55 = vld [vmem:[%s2415_s1 + $0x188] sm:$0xff]   ;;  %v1899_v11 = vld [vmem:[%s2415_s1 + $0x118] sm:$0xff]  }
  0x13   :  { %v1400_v46 = vcombine.high %v23_v44, %v27_v45  ;;  %v1399_v51 = vcombine.low %v23_v44, %v27_v45  ;;  %v31_v56 = vld [vmem:[%s2416_s0 + $0x80] sm:$0xff]  ;;  %v32_v58 = vld [vmem:[%s2416_s0 + $0x88] sm:$0xff]  ;;  %v1900_v12 = vld [vmem:[%s2415_s1 + $0x1d8] sm:$0xff]  }
  0x14   :  { %1607 = vmatpush3.bf16.msra.mxu0 %v1872_v18  ;;  %v35_v57 = vld [vmem:[%s2416_s0 + $0xa0] sm:$0xff]  ;;  %v36_v59 = vld [vmem:[%s2416_s0 + $0xa8] sm:$0xff]  ;;  %v1901_v13 = vld [vmem:[%s2415_s1 + $0x198] sm:$0xff]  }
  0x15   :  { %1671 = vmatpush3.bf16.msra.mxu1 %v1873_v19  ;;  %1608 = vmatprep.subr.bf16.mxu0 %v1874_v20  ;;  %v1408_v60 = vcombine.high %v31_v56, %v35_v57  ;;  %v1410_v61 = vcombine.high %v32_v58, %v36_v59  ;;  %v1407_v2 = vcombine.low %v31_v56, %v35_v57  ;;  %v39_v3 = vld [vmem:[%s2416_s0 + $0xc0] sm:$0xff]  ;;  %v40_v5 = vld [vmem:[%s2416_s0 + $0xc8] sm:$0xff]  ;;  %v1911_v39 = vld [vmem:[%s2415_s1 + $0x130] sm:$0xff]  }
  0x16   :  { %1672 = vmatprep.subr.bf16.mxu1 %v1875_v21  ;;  %v43_v4 = vld [vmem:[%s2416_s0 + $0xe0] sm:$0xff]  ;;  %v1409_v6 = vcombine.low %v32_v58, %v36_v59  ;;  %v44_v8 = vld [vmem:[%s2416_s0 + $0xe8] sm:$0xff]  ;;  %v1915_v48 = vld [vmem:[%s2415_s1 + $0x138] sm:$0xff]  }
  0x17   :  { %v1416_v7 = vcombine.high %v39_v3, %v43_v4  ;;  %v1418_v9 = vcombine.high %v40_v5, %v44_v8  ;;  %v47_v14 = vld [vmem:[%s2416_s0 + $0x100] sm:$0xff]  ;;  %v48_v16 = vld [vmem:[%s2416_s0 + $0x108] sm:$0xff]  ;;  %v1415_v19 = vcombine.low %v39_v3, %v43_v4  ;;  %v1417_v21 = vcombine.low %v40_v5, %v44_v8  ;;  %v26_v8 = vld [vmem:[%s2416_s0 + $0x58] sm:$0xff] }
  0x18   :  { %1609 = vmatpush3.bf16.msra.mxu0 %v1876_v22  ;;  %v51_v15 = vld [vmem:[%s2416_s0 + $0x120] sm:$0xff]  ;;  %v52_v17 = vld [vmem:[%s2416_s0 + $0x128] sm:$0xff] }
  0x19   :  { %1673 = vmatpush3.bf16.msra.mxu1 %v1877_v23  ;;  %1610 = vmatprep.subr.bf16.mxu0 %v1878_v24  ;;  %v1902_v18 = vld [vmem:[%s2415_s1 + $0x160] sm:$0xff]   ;;  %v1424_v22 = vcombine.high %v47_v14, %v51_v15  ;;  %v1426_v24 = vcombine.high %v48_v16, %v52_v17  ;;  %v1908_v32 = vld [vmem:[%s2415_s1 + $0x1e8] sm:$0xff]   ;;  %v1423_v34 = vcombine.low %v47_v14, %v51_v15  ;;  %v33_v14 = vld [vmem:[%s2416_s0 + $0x90] sm:$0xff] }
  0x1a   :  { %1674 = vmatprep.subr.bf16.mxu1 %v1879_v25  ;;  %v1903_v20 = vld [vmem:[%s2415_s1 + $0x120] sm:$0xff]   ;;  %v1909_v33 = vld [vmem:[%s2415_s1 + $0x1a8] sm:$0xff]   ;;  %v37_v15 = vld [vmem:[%s2416_s0 + $0xb0] sm:$0xff] }
  0x1b   :  { %v1904_v23 = vld [vmem:[%s2415_s1 + $0x1e0] sm:$0xff]   ;;  %v64_v44 = vld [vmem:[%s2416_s0 + $0x188] sm:$0xff] }
  0x1c   :  { %1611 = vmatpush3.bf16.msra.mxu0 %v1880_v26  ;;  %v1905_v25 = vld [vmem:[%s2415_s1 + $0x1a0] sm:$0xff]   ;;  %v68_v45 = vld [vmem:[%s2416_s0 + $0x1a8] sm:$0xff] }
  0x1d   :  { %1675 = vmatpush3.bf16.msra.mxu1 %v1881_v27  ;;  %1612 = vmatprep.subr.bf16.mxu0 %v1882_v28  ;;  %v55_v26 = vld [vmem:[%s2416_s0 + $0x140] sm:$0xff]  ;;  %v1906_v28 = vld [vmem:[%s2415_s1 + $0x168] sm:$0xff]   ;;  %v1441_v59 = vcombine.low %v64_v44, %v68_v45 }
  0x1e   :  { %1676 = vmatprep.subr.bf16.mxu1 %v1883_v29  ;;  %v59_v27 = vld [vmem:[%s2416_s0 + $0x160] sm:$0xff]  ;;  %v56_v29 = vld [vmem:[%s2416_s0 + $0x148] sm:$0xff] }
  0x1f   :  { %v1432_v36 = vcombine.high %v55_v26, %v59_v27  ;;  %v1431_v47 = vcombine.low %v55_v26, %v59_v27  ;;  %v72_v56 = vld [vmem:[%s2416_s0 + $0x1c8] sm:$0xff]  ;;  %v1411_v26 = vcombine.low %v33_v14, %v37_v15 }
  0x20   :  { %1613 = vmatpush3.bf16.msra.mxu0 %v1884_v30  ;;  %v60_v30 = vld [vmem:[%s2416_s0 + $0x168] sm:$0xff] }
  0x21   :  { %1677 = vmatpush3.bf16.msra.mxu1 %v1885_v31  ;;  %1726 = vmatprep.subr.bf16.mxu0 %v1886_v40  ;;  %v1907_v31 = vld [vmem:[%s2415_s1 + $0x128] sm:$0xff]   ;;  %v1434_v37 = vcombine.high %v56_v29, %v60_v30  ;;  %v1912_v40 = vld [vmem:[%s2415_s1 + $0x1f0] sm:$0xff]  }
  0x22   :  { %1790 = vmatprep.subr.bf16.mxu1 %v1888_v42  ;;  %v67_v42 = vld [vmem:[%s2416_s0 + $0x1a0] sm:$0xff]  ;;  %v76_v57 = vld [vmem:[%s2416_s0 + $0x1e8] sm:$0xff] }
  0x23   :  { %951 = vmatmul.mubr.bf16.vlgmr.msra.gmra.mrb[0].mxu0 %v1391_v35  ;;  %v1425_v35 = vcombine.low %v48_v16, %v52_v17  ;;  %v1449_v3 = vcombine.low %v72_v56, %v76_v57  ;;  %v34_v16 = vld [vmem:[%s2416_s0 + $0x98] sm:$0xff] }
  0x24   :  { %1048 = vmatmul.mubr.bf16.vlgmr.msra.gmra.mrb[0].mxu1 %v1393_v38  ;;  %1727 = vmatpush3.bf16.msra.mxu0 %v1887_v41  ;;  %v1910_v38 = vld [vmem:[%s2415_s1 + $0x170] sm:$0xff]   ;;  %v63_v41 = vld [vmem:[%s2416_s0 + $0x180] sm:$0xff]  ;;  %v38_v17 = vld [vmem:[%s2416_s0 + $0xb8] sm:$0xff] }
  0x25   :  { %1791 = vmatpush3.bf16.msra.mxu1 %v1889_v43  ;;  %958 = vmatprep.mubr.bf16.mxu0 %v1400_v46  ;;  %v1913_v43 = vld [vmem:[%s2415_s1 + $0x1b0] sm:$0xff]   ;;  %v1914_v46 = vld [vmem:[%s2415_s1 + $0x178] sm:$0xff]   ;;  %v1439_v58 = vcombine.low %v63_v41, %v67_v42  ;;  %v1413_v27 = vcombine.low %v34_v16, %v38_v17 }
  0x26   :  { %1055 = vmatprep.mubr.bf16.mxu1 %v1402_v49  ;;  %1728 = vmatprep.subr.bf16.mxu0 %v1890_v50  ;;  %v1433_v49 = vcombine.low %v56_v29, %v60_v30  ;;  %v1440_v50 = vcombine.high %v63_v41, %v67_v42  ;;  %v49_v30 = vld [vmem:[%s2416_s0 + $0x110] sm:$0xff]  ;;  %v62_v41 = vld [vmem:[%s2416_s0 + $0x178] sm:$0xff] }
  0x27   :  { %1792 = vmatprep.subr.bf16.mxu1 %v1892_v54  ;;  %v71_v54 = vld [vmem:[%s2416_s0 + $0x1c0] sm:$0xff] }
  0x28   :  { %1729 = vmatpush3.bf16.msra.mxu0 %v1891_v52  ;;  %v1442_v52 = vcombine.high %v64_v44, %v68_v45 }
  0x29   :  { %1793 = vmatpush3.bf16.msra.mxu1 %v1893_v55  ;;  %1730 = vmatprep.subr.bf16.mxu0 %v1894_v62  ;;  %v75_v55 = vld [vmem:[%s2416_s0 + $0x1e0] sm:$0xff]  ;;  %v17_v62 = vld [vmem:[%s2416_s0 + $0x10] sm:$0xff] }
  0x2a   :  { %1794 = vmatprep.subr.bf16.mxu1 %v1896_v0  ;;  %v18_v0 = vld [vmem:[%s2416_s0 + $0x18] sm:$0xff] }
  0x2b   :  { %959 = vmatmul.mubr.bf16.gmra.mrb[4].mxu0 %v1399_v51  ;;  %v1916_v51 = vld [vmem:[%s2415_s1 + $0x1f8] sm:$0xff]  }
  0x2c   :  { %1056 = vmatmul.mubr.bf16.gmra.mrb[4].mxu1 %v1401_v53  ;;  %966 = vmatprep.mubr.bf16.mxu0 %v1408_v60  ;;  %v1917_v53 = vld [vmem:[%s2415_s1 + $0x1b8] sm:$0xff]   ;;  %v1448_v60 = vcombine.high %v71_v54, %v75_v55 }
  0x2d   :  { %1063 = vmatprep.mubr.bf16.mxu1 %v1410_v61  ;;  %1731 = vmatpush3.bf16.msra.mxu0 %v1895_v63  ;;  %v1450_v61 = vcombine.high %v72_v56, %v76_v57  ;;  %v21_v63 = vld [vmem:[%s2416_s0 + $0x30] sm:$0xff]  ;;  %v74_v56 = vld [vmem:[%s2416_s0 + $0x1d8] sm:$0xff] }
  0x2e   :  { %1795 = vmatpush3.bf16.msra.mxu1 %v1897_v1  ;;  %1732 = vmatprep.subr.bf16.mxu0 %v1898_v10  ;;  %v22_v1 = vld [vmem:[%s2416_s0 + $0x38] sm:$0xff]  ;;  %v1396_v4 = vcombine.high %v17_v62, %v21_v63  ;;  %v1395_v10 = vcombine.low %v17_v62, %v21_v63 }
  0x2f   :  { %1796 = vmatprep.subr.bf16.mxu1 %v1900_v12  ;;  %v1398_v5 = vcombine.high %v18_v0, %v22_v1  ;;  %v78_v57 = vld [vmem:[%s2416_s0 + $0x1f8] sm:$0xff] }
  0x30   :  { %v1453_v63 = vcombine.low %v74_v56, %v78_v57 }
  0x31   :  { %1733 = vmatpush3.bf16.msra.mxu0 %v1899_v11  ;;  %v1397_v11 = vcombine.low %v18_v0, %v22_v1 }
  0x32   :  { %1797 = vmatpush3.bf16.msra.mxu1 %v1901_v13  ;;  %1734 = vmatprep.subr.bf16.mxu0 %v1902_v18 }
  0x33   :  { %967 = vmatmul.mubr.bf16.gmra.mrb[8].mxu0 %v1407_v2  ;;  %1798 = vmatprep.subr.bf16.mxu1 %v1904_v23  ;;  %v1447_v2 = vcombine.low %v71_v54, %v75_v55  ;;  %v45_v23 = vld [vmem:[%s2416_s0 + $0xf0] sm:$0xff] }
  0x34   :  { %1064 = vmatmul.mubr.bf16.gmra.mrb[8].mxu1 %v1409_v6  ;;  %974 = vmatprep.mubr.bf16.mxu0 %v1416_v7  ;;  %v25_v6 = vld [vmem:[%s2416_s0 + $0x50] sm:$0xff] }
  0x35   :  { %1071 = vmatprep.mubr.bf16.mxu1 %v1418_v9  ;;  %1735 = vmatpush3.bf16.msra.mxu0 %v1903_v20  ;;  %v29_v7 = vld [vmem:[%s2416_s0 + $0x70] sm:$0xff]  ;;  %v30_v9 = vld [vmem:[%s2416_s0 + $0x78] sm:$0xff]  ;;  %v1412_v20 = vcombine.high %v33_v14, %v37_v15 }
  0x36   :  { %1799 = vmatpush3.bf16.msra.mxu1 %v1905_v25  ;;  %1736 = vmatprep.subr.bf16.mxu0 %v1906_v28  ;;  %v1404_v12 = vcombine.high %v25_v6, %v29_v7  ;;  %v1406_v13 = vcombine.high %v26_v8, %v30_v9  ;;  %v1403_v18 = vcombine.low %v25_v6, %v29_v7  ;;  %v46_v25 = vld [vmem:[%s2416_s0 + $0xf8] sm:$0xff]  ;;  %v73_v54 = vld [vmem:[%s2416_s0 + $0x1d0] sm:$0xff] }
  0x37   :  { %1800 = vmatprep.subr.bf16.mxu1 %v1908_v32  ;;  %v50_v32 = vld [vmem:[%s2416_s0 + $0x118] sm:$0xff]  ;;  %v77_v55 = vld [vmem:[%s2416_s0 + $0x1f0] sm:$0xff] }
  0x38   :  { %v1451_v62 = vcombine.low %v73_v54, %v77_v55 }
  0x39   :  { %1737 = vmatpush3.bf16.msra.mxu0 %v1907_v31  ;;  %v53_v31 = vld [vmem:[%s2416_s0 + $0x130] sm:$0xff] }
  0x3a   :  { %1801 = vmatpush3.bf16.msra.mxu1 %v1909_v33  ;;  %1738 = vmatprep.subr.bf16.mxu0 %v1910_v38  ;;  %v54_v33 = vld [vmem:[%s2416_s0 + $0x138] sm:$0xff]  ;;  %v57_v38 = vld [vmem:[%s2416_s0 + $0x150] sm:$0xff]  ;;  %v1427_v42 = vcombine.low %v49_v30, %v53_v31 }
  0x3b   :  { %975 = vmatmul.mubr.bf16.gmra.mrb[12].mxu0 %v1415_v19  ;;  %1802 = vmatprep.subr.bf16.mxu1 %v1912_v40  ;;  %v1405_v19 = vcombine.low %v26_v8, %v30_v9  ;;  %v58_v40 = vld [vmem:[%s2416_s0 + $0x158] sm:$0xff] }
  0x3c   :  { %1072 = vmatmul.mubr.bf16.gmra.mrb[12].mxu1 %v1417_v21  ;;  %982 = vmatprep.mubr.bf16.mxu0 %v1424_v22  ;;  %v1414_v21 = vcombine.high %v34_v16, %v38_v17  ;;  %v41_v22 = vld [vmem:[%s2416_s0 + $0xd0] sm:$0xff]  ;;  %v1438_v45 = vcombine.high %v58_v40, %v62_v41 }
  0x3d   :  { %1079 = vmatprep.mubr.bf16.mxu1 %v1426_v24  ;;  %1739 = vmatpush3.bf16.msra.mxu0 %v1911_v39  ;;  %v42_v24 = vld [vmem:[%s2416_s0 + $0xd8] sm:$0xff]  ;;  %v1420_v28 = vcombine.high %v41_v22, %v45_v23  ;;  %v61_v39 = vld [vmem:[%s2416_s0 + $0x170] sm:$0xff] }
  0x3e   :  { %1803 = vmatpush3.bf16.msra.mxu1 %v1913_v43  ;;  %1740 = vmatprep.subr.bf16.mxu0 %v1914_v46  ;;  %v1422_v29 = vcombine.high %v42_v24, %v46_v25  ;;  %v1429_v43 = vcombine.low %v50_v32, %v54_v33  ;;  %v1436_v44 = vcombine.high %v57_v38, %v61_v39  ;;  %v65_v46 = vld [vmem:[%s2416_s0 + $0x190] sm:$0xff] }
  0x3f   :  { %1804 = vmatprep.subr.bf16.mxu1 %v1916_v51  ;;  %v1437_v51 = vcombine.low %v58_v40, %v62_v41 }
  0x41   :  { %1741 = vmatpush3.bf16.msra.mxu0 %v1915_v48  ;;  %v66_v48 = vld [vmem:[%s2416_s0 + $0x198] sm:$0xff] }
  0x42   :  { %1805 = vmatpush3.bf16.msra.mxu1 %v1917_v53 }
  0x43   :  { %983 = vmatmul.mubr.bf16.gmra.mrb[16].mxu0 %v1423_v34  ;;  %v1419_v34 = vcombine.low %v41_v22, %v45_v23 }
  0x44   :  { %1080 = vmatmul.mubr.bf16.gmra.mrb[16].mxu1 %v1425_v35  ;;  %990 = vmatprep.mubr.bf16.mxu0 %v1432_v36  ;;  %v1421_v35 = vcombine.low %v42_v24, %v46_v25  ;;  %v1428_v36 = vcombine.high %v49_v30, %v53_v31 }
  0x45   :  { %1087 = vmatprep.mubr.bf16.mxu1 %v1434_v37  ;;  %v1430_v37 = vcombine.high %v50_v32, %v54_v33 }
  0x4b   :  { %991 = vmatmul.mubr.bf16.gmra.mrb[20].mxu0 %v1431_v47  ;;  %v69_v47 = vld [vmem:[%s2416_s0 + $0x1b0] sm:$0xff] }
  0x4c   :  { %1088 = vmatmul.mubr.bf16.gmra.mrb[20].mxu1 %v1433_v49  ;;  %998 = vmatprep.mubr.bf16.mxu0 %v1440_v50  ;;  %v70_v49 = vld [vmem:[%s2416_s0 + $0x1b8] sm:$0xff]  ;;  %v1435_v50 = vcombine.low %v57_v38, %v61_v39 }
  0x4d   :  { %1095 = vmatprep.mubr.bf16.mxu1 %v1442_v52  ;;  %v1444_v52 = vcombine.high %v65_v46, %v69_v47  ;;  %v1446_v53 = vcombine.high %v66_v48, %v70_v49 }
  0x53   :  { %999 = vmatmul.mubr.bf16.gmra.mrb[24].mxu0 %v1439_v58  ;;  %v1443_v58 = vcombine.low %v65_v46, %v69_v47 }
  0x54   :  { %1096 = vmatmul.mubr.bf16.gmra.mrb[24].mxu1 %v1441_v59  ;;  %1006 = vmatprep.mubr.bf16.mxu0 %v1448_v60  ;;  %v1445_v59 = vcombine.low %v66_v48, %v70_v49  ;;  %v1452_v60 = vcombine.high %v73_v54, %v77_v55 }
  0x55   :  { %1103 = vmatprep.mubr.bf16.mxu1 %v1450_v61  ;;  %v1454_v61 = vcombine.high %v74_v56, %v78_v57 }
  0x5b   :  { %1007 = vmatmul.mubr.bf16.gmra.mrb[28].mxu0 %v1447_v2  ;;  %v2325_v2 = vld [vmem:[%s2417_s2] ss:$0 sm:$0xff] }
  0x5c   :  { %1104 = vmatmul.mubr.bf16.gmra.mrb[28].mxu1 %v1449_v3  ;;  %1144 = vmatprep.mubr.bf16.mxu0 %v1396_v4 }
  0x5d   :  { %1241 = vmatprep.mubr.bf16.mxu1 %v1398_v5 }
  0x63   :  { %1145 = vmatmul.mubr.bf16.vlgmr.msra.gmra.mrb[32].mxu0 %v1395_v10 }
  0x64   :  { %1242 = vmatmul.mubr.bf16.vlgmr.msra.gmra.mrb[32].mxu1 %v1397_v11  ;;  %1152 = vmatprep.mubr.bf16.mxu0 %v1404_v12 }
  0x65   :  { %1249 = vmatprep.mubr.bf16.mxu1 %v1406_v13 }
  0x6b   :  { %1153 = vmatmul.mubr.bf16.gmra.mrb[36].mxu0 %v1403_v18 }
  0x6c   :  { %1250 = vmatmul.mubr.bf16.gmra.mrb[36].mxu1 %v1405_v19  ;;  %1160 = vmatprep.mubr.bf16.mxu0 %v1412_v20 }
  0x6d   :  { %1257 = vmatprep.mubr.bf16.mxu1 %v1414_v21 }
  0x73   :  { %1161 = vmatmul.mubr.bf16.gmra.mrb[40].mxu0 %v1411_v26 }
  0x74   :  { %1258 = vmatmul.mubr.bf16.gmra.mrb[40].mxu1 %v1413_v27  ;;  %1168 = vmatprep.mubr.bf16.mxu0 %v1420_v28 }
  0x75   :  { %1265 = vmatprep.mubr.bf16.mxu1 %v1422_v29 }
  0x7b   :  { %1169 = vmatmul.mubr.bf16.gmra.mrb[44].mxu0 %v1419_v34 }
  0x7c   :  { %1266 = vmatmul.mubr.bf16.gmra.mrb[44].mxu1 %v1421_v35  ;;  %1176 = vmatprep.mubr.bf16.mxu0 %v1428_v36 }
  0x7d   :  { %1273 = vmatprep.mubr.bf16.mxu1 %v1430_v37 }
  0x83   :  { %1177 = vmatmul.mubr.bf16.gmra.mrb[48].mxu0 %v1427_v42 }
  0x84   :  { %1274 = vmatmul.mubr.bf16.gmra.mrb[48].mxu1 %v1429_v43  ;;  %1184 = vmatprep.mubr.bf16.mxu0 %v1436_v44 }
  0x85   :  { %1281 = vmatprep.mubr.bf16.mxu1 %v1438_v45 }
  0x8b   :  { %1185 = vmatmul.mubr.bf16.gmra.mrb[52].mxu0 %v1435_v50 }
  0x8c   :  { %1282 = vmatmul.mubr.bf16.gmra.mrb[52].mxu1 %v1437_v51  ;;  %1192 = vmatprep.mubr.bf16.mxu0 %v1444_v52 }
  0x8d   :  { %1289 = vmatprep.mubr.bf16.mxu1 %v1446_v53 }
  0x93   :  { %1193 = vmatmul.mubr.bf16.gmra.mrb[56].mxu0 %v1443_v58 }
  0x94   :  { %1290 = vmatmul.mubr.bf16.gmra.mrb[56].mxu1 %v1445_v59  ;;  %1200 = vmatprep.mubr.bf16.mxu0 %v1452_v60 }
  0x95   :  { %1297 = vmatprep.mubr.bf16.mxu1 %v1454_v61 }
  0x9b   :  { %1201 = vmatmul.mubr.bf16.gmra.mrb[60].mxu0 %v1451_v62 }
  0x9c   :  { %1298 = vmatmul.mubr.bf16.gmra.mrb[60].mxu1 %v1453_v63 }
  0xf6   :  { %v1614_v0 = vpop.f32.mrb[0].mxu0 }
  0xf7   :  { %v1678_v1 = vpop.f32.mrb[0].mxu1  ;;  %v1615_v3 = vpop.f32.mrb[1].mxu0 }
  0xf8   :  { %v1616_v4 = vadd.f32 %v1615_v3, %v1614_v0  ;;  %v1679_v5 = vpop.f32.mrb[1].mxu1  ;;  %v1617_v6 = vpop.f32.mrb[2].mxu0 }
  0xf9   :  { %v1680_v7 = vadd.f32 %v1679_v5, %v1678_v1  ;;  %v1681_v8 = vpop.f32.mrb[2].mxu1  ;;  %v1618_v9 = vpop.f32.mrb[3].mxu0 }
  0xfa   :  { %v953_v10 = vadd.f32 %v1616_v4, %v2325_v2  ;;  %v1619_v11 = vadd.f32 %v1618_v9, %v1617_v6  ;;  %v1682_v12 = vpop.f32.mrb[3].mxu1 }
  0xfb   :  { %v1683_v13 = vadd.f32 %v1682_v12, %v1681_v8 }
  0xfc   :  { %v2328_v14 = vadd.f32 %v1680_v7, %v953_v10  ;;  %v956_v15 = vadd.f32 %v1619_v11, %v2325_v2 }
  0xfe   :  { %v2331_v16 = vadd.f32 %v1683_v13, %v956_v15  ;;  %v1620_v17 = vpop.f32.mrb[4].mxu0 }
  0xff   :  { %v1684_v18 = vpop.f32.mrb[4].mxu1  ;;  %v1621_v19 = vpop.f32.mrb[5].mxu0 }
 0x100   :  { %v1622_v20 = vadd.f32 %v1621_v19, %v1620_v17  ;;  %v1685_v21 = vpop.f32.mrb[5].mxu1  ;;  %v1623_v22 = vpop.f32.mrb[6].mxu0 }
 0x101   :  { %v1686_v23 = vadd.f32 %v1685_v21, %v1684_v18  ;;  %v1687_v24 = vpop.f32.mrb[6].mxu1  ;;  %v1624_v25 = vpop.f32.mrb[7].mxu0 }
 0x102   :  { %v961_v26 = vadd.f32 %v1622_v20, %v2325_v2  ;;  %v1625_v27 = vadd.f32 %v1624_v25, %v1623_v22  ;;  %v1688_v28 = vpop.f32.mrb[7].mxu1 }
 0x103   :  { %v1689_v29 = vadd.f32 %v1688_v28, %v1687_v24 }
 0x104   :  { %v2334_v30 = vadd.f32 %v1686_v23, %v961_v26  ;;  %v964_v31 = vadd.f32 %v1625_v27, %v2325_v2 }
 0x106   :  { %v2337_v32 = vadd.f32 %v1689_v29, %v964_v31  ;;  %v1626_v33 = vpop.f32.mrb[8].mxu0 }
 0x107   :  { %v1690_v34 = vpop.f32.mrb[8].mxu1  ;;  %v1627_v35 = vpop.f32.mrb[9].mxu0 }
 0x108   :  { %v1628_v36 = vadd.f32 %v1627_v35, %v1626_v33  ;;  %v1691_v37 = vpop.f32.mrb[9].mxu1  ;;  %v1629_v38 = vpop.f32.mrb[10].mxu0 }
 0x109   :  { %v1692_v39 = vadd.f32 %v1691_v37, %v1690_v34  ;;  %v1693_v40 = vpop.f32.mrb[10].mxu1  ;;  %v1630_v41 = vpop.f32.mrb[11].mxu0 }
 0x10a   :  { %v969_v42 = vadd.f32 %v1628_v36, %v2325_v2  ;;  %v1631_v43 = vadd.f32 %v1630_v41, %v1629_v38  ;;  %v1694_v44 = vpop.f32.mrb[11].mxu1 }
 0x10b   :  { %v1695_v45 = vadd.f32 %v1694_v44, %v1693_v40 }
 0x10c   :  { %v2340_v46 = vadd.f32 %v1692_v39, %v969_v42  ;;  %v972_v47 = vadd.f32 %v1631_v43, %v2325_v2 }
 0x10e   :  { %v2343_v48 = vadd.f32 %v1695_v45, %v972_v47  ;;  %v1632_v49 = vpop.f32.mrb[12].mxu0 }
 0x10f   :  { %v1696_v50 = vpop.f32.mrb[12].mxu1  ;;  %v1633_v51 = vpop.f32.mrb[13].mxu0 }
 0x110   :  { %v1634_v52 = vadd.f32 %v1633_v51, %v1632_v49  ;;  %v1697_v53 = vpop.f32.mrb[13].mxu1  ;;  %v1635_v54 = vpop.f32.mrb[14].mxu0 }
 0x111   :  { %v1698_v55 = vadd.f32 %v1697_v53, %v1696_v50  ;;  %v1699_v56 = vpop.f32.mrb[14].mxu1  ;;  %v1636_v57 = vpop.f32.mrb[15].mxu0 }
 0x112   :  { %v977_v58 = vadd.f32 %v1634_v52, %v2325_v2  ;;  %v1637_v59 = vadd.f32 %v1636_v57, %v1635_v54  ;;  %v1700_v60 = vpop.f32.mrb[15].mxu1 }
 0x113   :  { %v1701_v61 = vadd.f32 %v1700_v60, %v1699_v56 }
 0x114   :  { %v2346_v62 = vadd.f32 %v1698_v55, %v977_v58  ;;  %v980_v63 = vadd.f32 %v1637_v59, %v2325_v2 }
 0x116   :  { %v2349_v0 = vadd.f32 %v1701_v61, %v980_v63  ;;  %v1638_v1 = vpop.f32.mrb[16].mxu0 }
 0x117   :  { %v1702_v3 = vpop.f32.mrb[16].mxu1  ;;  %v1639_v4 = vpop.f32.mrb[17].mxu0 }
 0x118   :  { %v1640_v5 = vadd.f32 %v1639_v4, %v1638_v1  ;;  %v1703_v6 = vpop.f32.mrb[17].mxu1  ;;  %v1641_v7 = vpop.f32.mrb[18].mxu0 }
 0x119   :  { %v1704_v8 = vadd.f32 %v1703_v6, %v1702_v3  ;;  %v1705_v9 = vpop.f32.mrb[18].mxu1  ;;  %v1642_v10 = vpop.f32.mrb[19].mxu0 }
 0x11a   :  { %v985_v11 = vadd.f32 %v1640_v5, %v2325_v2  ;;  %v1643_v12 = vadd.f32 %v1642_v10, %v1641_v7  ;;  %v1706_v13 = vpop.f32.mrb[19].mxu1 }
 0x11b   :  { %v1707_v15 = vadd.f32 %v1706_v13, %v1705_v9 }
 0x11c   :  { %v2352_v17 = vadd.f32 %v1704_v8, %v985_v11  ;;  %v988_v18 = vadd.f32 %v1643_v12, %v2325_v2 }
 0x11e   :  { %v2355_v19 = vadd.f32 %v1707_v15, %v988_v18  ;;  %v1644_v20 = vpop.f32.mrb[20].mxu0 }
 0x11f   :  { %v1708_v21 = vpop.f32.mrb[20].mxu1  ;;  %v1645_v22 = vpop.f32.mrb[21].mxu0 }
 0x120   :  { %v1646_v23 = vadd.f32 %v1645_v22, %v1644_v20  ;;  %v1709_v24 = vpop.f32.mrb[21].mxu1  ;;  %v1647_v25 = vpop.f32.mrb[22].mxu0 }
 0x121   :  { %v1710_v26 = vadd.f32 %v1709_v24, %v1708_v21  ;;  %v1711_v27 = vpop.f32.mrb[22].mxu1  ;;  %v1648_v28 = vpop.f32.mrb[23].mxu0 }
 0x122   :  { %v993_v29 = vadd.f32 %v1646_v23, %v2325_v2  ;;  %v1649_v31 = vadd.f32 %v1648_v28, %v1647_v25  ;;  %v1712_v33 = vpop.f32.mrb[23].mxu1 }
 0x123   :  { %v1713_v34 = vadd.f32 %v1712_v33, %v1711_v27 }
 0x124   :  { %v2358_v35 = vadd.f32 %v1710_v26, %v993_v29  ;;  %v996_v36 = vadd.f32 %v1649_v31, %v2325_v2 }
 0x126   :  { %v2361_v37 = vadd.f32 %v1713_v34, %v996_v36  ;;  %v1650_v38 = vpop.f32.mrb[24].mxu0 }
 0x127   :  { %v1714_v39 = vpop.f32.mrb[24].mxu1  ;;  %v1651_v40 = vpop.f32.mrb[25].mxu0 }
 0x128   :  { %v1652_v41 = vadd.f32 %v1651_v40, %v1650_v38  ;;  %v1715_v42 = vpop.f32.mrb[25].mxu1  ;;  %v1653_v43 = vpop.f32.mrb[26].mxu0 }
 0x129   :  { %v1716_v44 = vadd.f32 %v1715_v42, %v1714_v39  ;;  %v1717_v45 = vpop.f32.mrb[26].mxu1  ;;  %v1654_v47 = vpop.f32.mrb[27].mxu0 }
 0x12a   :  { %v1001_v49 = vadd.f32 %v1652_v41, %v2325_v2  ;;  %v1655_v50 = vadd.f32 %v1654_v47, %v1653_v43  ;;  %v1718_v51 = vpop.f32.mrb[27].mxu1 }
 0x12b   :  { %v1719_v52 = vadd.f32 %v1718_v51, %v1717_v45 }
 0x12c   :  { %v2364_v53 = vadd.f32 %v1716_v44, %v1001_v49  ;;  %v1004_v54 = vadd.f32 %v1655_v50, %v2325_v2 }
 0x12e   :  { %v2367_v55 = vadd.f32 %v1719_v52, %v1004_v54  ;;  %v1656_v56 = vpop.f32.mrb[28].mxu0 }
 0x12f   :  { %v1720_v57 = vpop.f32.mrb[28].mxu1  ;;  %v1657_v58 = vpop.f32.mrb[29].mxu0 }
 0x130   :  { %v1658_v59 = vadd.f32 %v1657_v58, %v1656_v56  ;;  %v1721_v60 = vpop.f32.mrb[29].mxu1  ;;  %v1659_v61 = vpop.f32.mrb[30].mxu0 }
 0x131   :  { %v1722_v63 = vadd.f32 %v1721_v60, %v1720_v57  ;;  %v1723_v1 = vpop.f32.mrb[30].mxu1  ;;  %v1660_v3 = vpop.f32.mrb[31].mxu0 }
 0x132   :  { %v1009_v4 = vadd.f32 %v1658_v59, %v2325_v2  ;;  %v1661_v5 = vadd.f32 %v1660_v3, %v1659_v61  ;;  %v1724_v6 = vpop.f32.mrb[31].mxu1 }
 0x133   :  { %v1725_v7 = vadd.f32 %v1724_v6, %v1723_v1 }
 0x134   :  { %v2370_v8 = vadd.f32 %v1722_v63, %v1009_v4  ;;  %v1012_v9 = vadd.f32 %v1661_v5, %v2325_v2 }
 0x136   :  { %v2373_v10 = vadd.f32 %v1725_v7, %v1012_v9  ;;  %v1742_v11 = vpop.f32.mrb[32].mxu0 }
 0x137   :  { %v1806_v12 = vpop.f32.mrb[32].mxu1  ;;  %v1743_v13 = vpop.f32.mrb[33].mxu0 }
 0x138   :  { %v1744_v15 = vadd.f32 %v1743_v13, %v1742_v11  ;;  %v1807_v18 = vpop.f32.mrb[33].mxu1  ;;  %v1745_v20 = vpop.f32.mrb[34].mxu0 }
 0x139   :  { %v1808_v21 = vadd.f32 %v1807_v18, %v1806_v12  ;;  %v1809_v22 = vpop.f32.mrb[34].mxu1  ;;  %v1746_v23 = vpop.f32.mrb[35].mxu0 }
 0x13a   :  { %v1147_v24 = vadd.f32 %v1744_v15, %v2328_v14  ;;  %v1747_v25 = vadd.f32 %v1746_v23, %v1745_v20  ;;  %v1810_v26 = vpop.f32.mrb[35].mxu1 }
 0x13b   :  { %v1811_v27 = vadd.f32 %v1810_v26, %v1809_v22 }
 0x13c   :  { %v1244_v28 = vadd.f32 %v1808_v21, %v1147_v24  ;;  %v1150_v29 = vadd.f32 %v1747_v25, %v2331_v16 }
 0x13e   :  { %v1247_v2 = vadd.f32 %v1811_v27, %v1150_v29  ;;  %v1748_v31 = vpop.f32.mrb[36].mxu0 }
 0x13f   :  { %v1812_v33 = vpop.f32.mrb[36].mxu1  ;;  %v1749_v34 = vpop.f32.mrb[37].mxu0 }
 0x140   :  { %v1554_v36 = vpack.c.bf16 %v1247_v2, %v1244_v28  ;;  %v1750_v38 = vadd.f32 %v1749_v34, %v1748_v31  ;;  %v1813_v39 = vpop.f32.mrb[37].mxu1  ;;  %v1751_v40 = vpop.f32.mrb[38].mxu0 }
 0x141   :  { %v1814_v41 = vadd.f32 %v1813_v39, %v1812_v33  ;;  %v1815_v42 = vpop.f32.mrb[38].mxu1  ;;  %v1752_v43 = vpop.f32.mrb[39].mxu0 }
 0x142   :  { %1555 = vst [vmem:[%s2418_s3] sm:$0xff] %v1554_v36   ;;  %v1155_v14 = vadd.f32 %v1750_v38, %v2334_v30  ;;  %v1753_v44 = vadd.f32 %v1752_v43, %v1751_v40  ;;  %v1816_v45 = vpop.f32.mrb[39].mxu1 }
 0x143   :  { %v1817_v16 = vadd.f32 %v1816_v45, %v1815_v42 }
 0x144   :  { %v1252_v47 = vadd.f32 %v1814_v41, %v1155_v14  ;;  %v1158_v49 = vadd.f32 %v1753_v44, %v2337_v32 }
 0x146   :  { %v1255_v50 = vadd.f32 %v1817_v16, %v1158_v49  ;;  %v1754_v51 = vpop.f32.mrb[40].mxu0 }
 0x147   :  { %v1818_v52 = vpop.f32.mrb[40].mxu1  ;;  %v1755_v54 = vpop.f32.mrb[41].mxu0 }
 0x148   :  { %v1559_v56 = vpack.c.bf16 %v1255_v50, %v1252_v47  ;;  %v1756_v57 = vadd.f32 %v1755_v54, %v1754_v51  ;;  %v1819_v58 = vpop.f32.mrb[41].mxu1  ;;  %v1757_v59 = vpop.f32.mrb[42].mxu0 }
 0x149   :  { %v1820_v60 = vadd.f32 %v1819_v58, %v1818_v52  ;;  %v1821_v61 = vpop.f32.mrb[42].mxu1  ;;  %v1758_v63 = vpop.f32.mrb[43].mxu0 }
 0x14a   :  { %1591 = vst [vmem:[%s2418_s3 + $0x8] sm:$0xff] %v1559_v56   ;;  %v1163_v30 = vadd.f32 %v1756_v57, %v2340_v46  ;;  %v1759_v1 = vadd.f32 %v1758_v63, %v1757_v59  ;;  %v1822_v3 = vpop.f32.mrb[43].mxu1 }
 0x14b   :  { %v1823_v32 = vadd.f32 %v1822_v3, %v1821_v61 }
 0x14c   :  { %v1260_v4 = vadd.f32 %v1820_v60, %v1163_v30  ;;  %v1166_v5 = vadd.f32 %v1759_v1, %v2343_v48 }
 0x14e   :  { %v1263_v6 = vadd.f32 %v1823_v32, %v1166_v5  ;;  %v1760_v7 = vpop.f32.mrb[44].mxu0 }
 0x14f   :  { %v1824_v9 = vpop.f32.mrb[44].mxu1  ;;  %v1761_v11 = vpop.f32.mrb[45].mxu0 }
 0x150   :  { %v1564_v12 = vpack.c.bf16 %v1263_v6, %v1260_v4  ;;  %v1762_v13 = vadd.f32 %v1761_v11, %v1760_v7  ;;  %v1825_v15 = vpop.f32.mrb[45].mxu1  ;;  %v1763_v18 = vpop.f32.mrb[46].mxu0 }
 0x151   :  { %v1826_v20 = vadd.f32 %v1825_v15, %v1824_v9  ;;  %v1827_v21 = vpop.f32.mrb[46].mxu1  ;;  %v1764_v22 = vpop.f32.mrb[47].mxu0 }
 0x152   :  { %1592 = vst [vmem:[%s2418_s3 + $0x10] sm:$0xff] %v1564_v12   ;;  %v1171_v46 = vadd.f32 %v1762_v13, %v2346_v62  ;;  %v1765_v23 = vadd.f32 %v1764_v22, %v1763_v18  ;;  %v1828_v24 = vpop.f32.mrb[47].mxu1 }
 0x153   :  { %v1829_v48 = vadd.f32 %v1828_v24, %v1827_v21 }
 0x154   :  { %v1268_v25 = vadd.f32 %v1826_v20, %v1171_v46  ;;  %v1174_v26 = vadd.f32 %v1765_v23, %v2349_v0 }
 0x156   :  { %v1271_v27 = vadd.f32 %v1829_v48, %v1174_v26  ;;  %v1766_v28 = vpop.f32.mrb[48].mxu0 }
 0x157   :  { %v1830_v29 = vpop.f32.mrb[48].mxu1  ;;  %v1767_v2 = vpop.f32.mrb[49].mxu0 }
 0x158   :  { %v1569_v31 = vpack.c.bf16 %v1271_v27, %v1268_v25  ;;  %v1768_v33 = vadd.f32 %v1767_v2, %v1766_v28  ;;  %v1831_v34 = vpop.f32.mrb[49].mxu1  ;;  %v1769_v36 = vpop.f32.mrb[50].mxu0 }
 0x159   :  { %v1832_v38 = vadd.f32 %v1831_v34, %v1830_v29  ;;  %v1833_v39 = vpop.f32.mrb[50].mxu1  ;;  %v1770_v40 = vpop.f32.mrb[51].mxu0 }
 0x15a   :  { %1593 = vst [vmem:[%s2418_s3 + $0x18] sm:$0xff] %v1569_v31   ;;  %v1179_v62 = vadd.f32 %v1768_v33, %v2352_v17  ;;  %v1771_v41 = vadd.f32 %v1770_v40, %v1769_v36  ;;  %v1834_v42 = vpop.f32.mrb[51].mxu1 }
 0x15b   :  { %v1835_v0 = vadd.f32 %v1834_v42, %v1833_v39 }
 0x15c   :  { %v1276_v43 = vadd.f32 %v1832_v38, %v1179_v62  ;;  %v1182_v14 = vadd.f32 %v1771_v41, %v2355_v19 }
 0x15e   :  { %v1279_v44 = vadd.f32 %v1835_v0, %v1182_v14  ;;  %v1772_v45 = vpop.f32.mrb[52].mxu0 }
 0x15f   :  { %v1836_v16 = vpop.f32.mrb[52].mxu1  ;;  %v1773_v47 = vpop.f32.mrb[53].mxu0 }
 0x160   :  { %v1574_v49 = vpack.c.bf16 %v1279_v44, %v1276_v43  ;;  %v1774_v50 = vadd.f32 %v1773_v47, %v1772_v45  ;;  %v1837_v51 = vpop.f32.mrb[53].mxu1  ;;  %v1775_v52 = vpop.f32.mrb[54].mxu0 }
 0x161   :  { %v1838_v54 = vadd.f32 %v1837_v51, %v1836_v16  ;;  %v1839_v56 = vpop.f32.mrb[54].mxu1  ;;  %v1776_v57 = vpop.f32.mrb[55].mxu0 }
 0x162   :  { %1594 = vst [vmem:[%s2418_s3 + $0x20] sm:$0xff] %v1574_v49   ;;  %v1187_v17 = vadd.f32 %v1774_v50, %v2358_v35  ;;  %v1777_v58 = vadd.f32 %v1776_v57, %v1775_v52  ;;  %v1840_v59 = vpop.f32.mrb[55].mxu1 }
 0x163   :  { %v1841_v19 = vadd.f32 %v1840_v59, %v1839_v56 }
 0x164   :  { %v1284_v60 = vadd.f32 %v1838_v54, %v1187_v17  ;;  %v1190_v61 = vadd.f32 %v1777_v58, %v2361_v37 }
 0x166   :  { %v1287_v63 = vadd.f32 %v1841_v19, %v1190_v61  ;;  %v1778_v30 = vpop.f32.mrb[56].mxu0 }
 0x167   :  { %v1842_v1 = vpop.f32.mrb[56].mxu1  ;;  %v1779_v3 = vpop.f32.mrb[57].mxu0 }
 0x168   :  { %v1579_v32 = vpack.c.bf16 %v1287_v63, %v1284_v60  ;;  %v1780_v4 = vadd.f32 %v1779_v3, %v1778_v30  ;;  %v1843_v5 = vpop.f32.mrb[57].mxu1  ;;  %v1781_v6 = vpop.f32.mrb[58].mxu0 }
 0x169   :  { %v1844_v7 = vadd.f32 %v1843_v5, %v1842_v1  ;;  %v1845_v9 = vpop.f32.mrb[58].mxu1  ;;  %v1782_v11 = vpop.f32.mrb[59].mxu0 }
 0x16a   :  { %1595 = vst [vmem:[%s2418_s3 + $0x28] sm:$0xff] %v1579_v32   ;;  %v1195_v35 = vadd.f32 %v1780_v4, %v2364_v53  ;;  %v1783_v12 = vadd.f32 %v1782_v11, %v1781_v6  ;;  %v1846_v13 = vpop.f32.mrb[59].mxu1 }
 0x16b   :  { %v1847_v37 = vadd.f32 %v1846_v13, %v1845_v9 }
 0x16c   :  { %v1292_v15 = vadd.f32 %v1844_v7, %v1195_v35  ;;  %v1198_v18 = vadd.f32 %v1783_v12, %v2367_v55 }
 0x16e   :  { %v1295_v20 = vadd.f32 %v1847_v37, %v1198_v18  ;;  %v1784_v21 = vpop.f32.mrb[60].mxu0 }
 0x16f   :  { %v1848_v22 = vpop.f32.mrb[60].mxu1  ;;  %v1785_v46 = vpop.f32.mrb[61].mxu0 }
 0x170   :  { %v1584_v23 = vpack.c.bf16 %v1295_v20, %v1292_v15  ;;  %v1786_v24 = vadd.f32 %v1785_v46, %v1784_v21  ;;  %v1849_v48 = vpop.f32.mrb[61].mxu1  ;;  %v1787_v25 = vpop.f32.mrb[62].mxu0 }
 0x171   :  { %v1850_v26 = vadd.f32 %v1849_v48, %v1848_v22  ;;  %v1851_v27 = vpop.f32.mrb[62].mxu1  ;;  %v1788_v28 = vpop.f32.mrb[63].mxu0 }
 0x172   :  { %1596 = vst [vmem:[%s2418_s3 + $0x30] sm:$0xff] %v1584_v23   ;;  %v1203_v53 = vadd.f32 %v1786_v24, %v2370_v8  ;;  %v1789_v29 = vadd.f32 %v1788_v28, %v1787_v25  ;;  %v1852_v2 = vpop.f32.mrb[63].mxu1 }
 0x173   :  { %v1853_v55 = vadd.f32 %v1852_v2, %v1851_v27 }
 0x174   :  { %v1300_v31 = vadd.f32 %v1850_v26, %v1203_v53  ;;  %v1206_v33 = vadd.f32 %v1789_v29, %v2373_v10 }
 0x176   :  { %v1303_v34 = vadd.f32 %v1853_v55, %v1206_v33 }
 0x178   :  { %v1589_v36 = vpack.c.bf16 %v1303_v34, %v1300_v31 }
 0x17a   :  { %1597 = vst [vmem:[%s2418_s3 + $0x38] sm:$0xff] %v1589_v36  }

// kernel: discriminator_forward.10
= control target key start
LH: loop header
LB: loop body
LE: loop exit
PB: predicated region body
PF: predicated region fallthrough
CT: control target
= control target key end

     0   :  { %s499_s6 = smov 0   ;;  %s501_s7 = smov 0   ;;  %s539_s0 = inlined_call_operand.vmem [shape: bf16[2,64,128], index: 0, kind: input, shape index: {}]   ;;  %s540_s1 = inlined_call_operand.vmem [shape: bf16[2,64,128], index: 1, kind: output, shape index: {}]  }
   0x1   :  { %s503_s8 = smov 0  }
   0x2 LB: > { %s23_s9 = sadd.s32 1, %s483_s7  ;;  %p372_p0 = scmp.ge.s32.totalorder %s487_s8, 1  ;;  %s487_s8 = sphi %s503_s8, %s11_s8   ;;  %s483_s7 = sphi %s501_s7, %s542_s7   ;;  %s479_s6 = sphi %s499_s6, %s541_s6  }
   0x3   : > { %p25_p1 = scmp.ge.s32.totalorder %s23_s9, 2  ;;  %p106_p2 = scmp.lt.s32.totalorder %s487_s8, 3 }
   0x5   : > { %s544_s9 = smov (%p25_p1, %s23_s9), 0  ;;  %p107_p3 = pnand %p372_p0, %p106_p2 }
   0x6   : > { %p132_p4 = scmp.lt.s32.totalorder (!%p107_p3), %s479_s6, 1 }
   0x7   : > { %110 = sbr.rel (%p107_p3) target bundleno = 80 (0x50), region = 24 }
   0xe   : > { %s546_s6 = smov (!%p132_p4, %s479_s6), 1 }
   0xf   : > { %s387_s10 = sshll.u32 %s546_s6, 5 }
  0x10   : > { %s139_s13 = scalar_lea.vmem %s539_s0, %s387_s10  ;;  %s147_s16 = scalar_lea.vmem %s540_s1, %s387_s10 }
  0x11   : > { %v398_v0 = vld [vmem:[%s139_s13] sm:$0xff]   ;;  %v433_v1 = vld [vmem:[%s139_s13 + $0x8] sm:$0xff]   ;;  %v434_v2 = vld [vmem:[%s139_s13 + $0x10] sm:$0xff]  }
  0x12   : > { %v399_v3 = vunpack.c.l.bf16 %v398_v0  ;;  %v400_v4 = vunpack.c.h.bf16 %v398_v0  ;;  %v403_v5 = vunpack.c.l.bf16 %v433_v1  ;;  %v404_v6 = vunpack.c.h.bf16 %v433_v1  ;;  %v435_v12 = vld [vmem:[%s139_s13 + $0x18] sm:$0xff]  }
  0x13   : > { %v407_v7 = vunpack.c.l.bf16 %v434_v2  ;;  %v408_v13 = vunpack.c.h.bf16 %v434_v2  ;;  %v411_v17 = vunpack.c.l.bf16 %v435_v12  ;;  %v412_v21 = vunpack.c.h.bf16 %v435_v12 }
  0x14   : > { %v164_v8 = vadd.f32 %v400_v4, %v399_v3  ;;  %v177_v9 = vmul.f32 %v399_v3, %v399_v3  ;;  %v178_v10 = vmul.f32 %v400_v4, %v400_v4  ;;  %v179_v11 = vmul.f32 %v403_v5, %v403_v5 }
  0x15   : > { %v180_v15 = vmul.f32 %v404_v6, %v404_v6  ;;  %v181_v19 = vmul.f32 %v407_v7, %v407_v7  ;;  %v182_v23 = vmul.f32 %v408_v13, %v408_v13  ;;  %v183_v26 = vmul.f32 %v411_v17, %v411_v17 }
  0x16   : > { %v165_v14 = vadd.f32 %v403_v5, %v164_v8  ;;  %v185_v16 = vadd.f32 %v178_v10, %v177_v9  ;;  %v184_v29 = vmul.f32 %v412_v21, %v412_v21 }
  0x18   : > { %v166_v18 = vadd.f32 %v404_v6, %v165_v14  ;;  %v186_v20 = vadd.f32 %v185_v16, %v179_v11 }
  0x1a   : > { %v167_v22 = vadd.f32 %v407_v7, %v166_v18  ;;  %v187_v24 = vadd.f32 %v186_v20, %v180_v15 }
  0x1c   : > { %v168_v25 = vadd.f32 %v408_v13, %v167_v22  ;;  %v188_v27 = vadd.f32 %v187_v24, %v181_v19 }
  0x1e   : > { %v169_v28 = vadd.f32 %v411_v17, %v168_v25  ;;  %v189_v30 = vadd.f32 %v188_v27, %v182_v23 }
  0x20   : > { %v170_v31 = vadd.f32 %v412_v21, %v169_v28  ;;  %v190_v32 = vadd.f32 %v189_v30, %v183_v26 }
  0x22   : > { %v171_v33 = vrot.slane %v170_v31, 4  ;;  %v191_v34 = vadd.f32 %v190_v32, %v184_v29 }
  0x24   : > { %v172_v35 = vadd.f32 %v171_v33, %v170_v31  ;;  %v192_v36 = vrot.slane %v191_v34, 4 }
  0x26   : > { %v173_v37 = vrot.slane %v172_v35, 2  ;;  %v193_v38 = vadd.f32 %v192_v36, %v191_v34 }
  0x28   : > { %v174_v39 = vadd.f32 %v173_v37, %v172_v35  ;;  %v194_v40 = vrot.slane %v193_v38, 2 }
  0x2a   : > { %v175_v41 = vrot.slane %v174_v39, 1  ;;  %v195_v42 = vadd.f32 %v194_v40, %v193_v38 }
  0x2c   : > { %v176_v43 = vadd.f32 %v175_v41, %v174_v39  ;;  %v196_v44 = vrot.slane %v195_v42, 1 }
  0x2e   : > { %v197_v45 = vadd.f32 %v196_v44, %v195_v42  ;;  %v198_v46 = vmul.f32 0.015625, %v176_v43 }
  0x30   : > { %v199_v47 = vmul.f32 0.015625, %v197_v45  ;;  %v200_v48 = vmul.f32 %v198_v46, %v198_v46  ;;  %v203_v52 = vsub.f32 %v399_v3, %v198_v46  ;;  %v204_v53 = vsub.f32 %v400_v4, %v198_v46 }
  0x31   : > { %v205_v54 = vsub.f32 %v403_v5, %v198_v46  ;;  %v206_v55 = vsub.f32 %v404_v6, %v198_v46  ;;  %v207_v56 = vsub.f32 %v407_v7, %v198_v46  ;;  %v208_v57 = vsub.f32 %v408_v13, %v198_v46 }
  0x32   : > { %v201_v49 = vsub.f32 %v199_v47, %v200_v48  ;;  %v209_v58 = vsub.f32 %v411_v17, %v198_v46  ;;  %v210_v59 = vsub.f32 %v412_v21, %v198_v46 }
  0x34   : > { %v202_v50 = vmax.f32 %v201_v49, 0.0 }
  0x36   : > { %v211_v51 = vadd.f32 1e-05, %v202_v50 }
  0x38   : > { %463 = vrsqrt.f32 %v211_v51 }
  0x42   : > { %v464_v60 = vpop.eup %463 }
  0x43   : > { %v213_v61 = vmul.f32 %v464_v60, %v203_v52  ;;  %v214_v62 = vmul.f32 %v464_v60, %v204_v53  ;;  %v215_v63 = vmul.f32 %v464_v60, %v205_v54  ;;  %v216_v0 = vmul.f32 %v464_v60, %v206_v55 }
  0x44   : > { %v217_v1 = vmul.f32 %v464_v60, %v207_v56  ;;  %v218_v2 = vmul.f32 %v464_v60, %v208_v57  ;;  %v219_v8 = vmul.f32 %v464_v60, %v209_v58  ;;  %v220_v9 = vmul.f32 %v464_v60, %v210_v59 }
  0x45   : > { %vm221_vm0 = vcmp.gt.f32.partialorder %v213_v61, 0.0  ;;  %vm222_vm1 = vcmp.gt.f32.partialorder %v214_v62, 0.0  ;;  %v229_v3 = vmul.f32 0.2, %v213_v61  ;;  %v230_v4 = vmul.f32 0.2, %v214_v62 }
  0x46   : > { %vm223_vm2 = vcmp.gt.f32.partialorder %v215_v63, 0.0  ;;  %vm224_vm3 = vcmp.gt.f32.partialorder %v216_v0, 0.0  ;;  %v231_v5 = vmul.f32 0.2, %v215_v63  ;;  %v232_v6 = vmul.f32 0.2, %v216_v0 }
  0x47   : > { %v237_v7 = vsel %vm221_vm0, %v213_v61, %v229_v3  ;;  %v238_v10 = vsel %vm222_vm1, %v214_v62, %v230_v4  ;;  %vm225_vm4 = vcmp.gt.f32.partialorder %v217_v1, 0.0  ;;  %vm226_vm5 = vcmp.gt.f32.partialorder %v218_v2, 0.0 }
  0x48   : > { %v416_v11 = vpack.c.bf16 %v238_v10, %v237_v7  ;;  %v239_v12 = vsel %vm223_vm2, %v215_v63, %v231_v5  ;;  %v240_v13 = vsel %vm224_vm3, %v216_v0, %v232_v6  ;;  %v233_v14 = vmul.f32 0.2, %v217_v1 }
  0x49   : > { %v421_v15 = vpack.c.bf16 %v240_v13, %v239_v12  ;;  %v234_v16 = vmul.f32 0.2, %v218_v2  ;;  %vm227_vm6 = vcmp.gt.f32.partialorder %v219_v8, 0.0  ;;  %vm228_vm7 = vcmp.gt.f32.partialorder %v220_v9, 0.0 }
  0x4a   : > { %417 = vst [vmem:[%s147_s16] sm:$0xff] %v416_v11   ;;  %v241_v17 = vsel %vm225_vm4, %v217_v1, %v233_v14  ;;  %v235_v18 = vmul.f32 0.2, %v219_v8  ;;  %v236_v19 = vmul.f32 0.2, %v220_v9 }
  0x4b   : > { %436 = vst [vmem:[%s147_s16 + $0x8] sm:$0xff] %v421_v15   ;;  %v242_v20 = vsel %vm226_vm5, %v218_v2, %v234_v16 }
  0x4c   : > { %v426_v21 = vpack.c.bf16 %v242_v20, %v241_v17  ;;  %v243_v22 = vsel %vm227_vm6, %v219_v8, %v235_v18  ;;  %v244_v23 = vsel %vm228_vm7, %v220_v9, %v236_v19 }
  0x4d   : > { %v431_v24 = vpack.c.bf16 %v244_v23, %v243_v22 }
  0x4e   : > { %437 = vst [vmem:[%s147_s16 + $0x10] sm:$0xff] %v426_v21  }
  0x4f   : > { %438 = vst [vmem:[%s147_s16 + $0x18] sm:$0xff] %v431_v24  }
  0x50 PF: > { %s11_s8 = sadd.s32 1, %s487_s8   ;;  %s541_s6 = smov %s483_s7 }
  0x51   : > { %p8_p5 = scmp.ge.s32.totalorder %s11_s8, 4   ;;  %s542_s7 = smov %s544_s9 }
  0x53   :  { %10 = sbr.rel (!%p8_p5) target bundleno = 2 (0x2), region = 54 }

// kernel: discriminator_forward.12
= control target key start
LH: loop header
LB: loop body
LE: loop exit
PB: predicated region body
PF: predicated region fallthrough
CT: control target
= control target key end

     0   :  { %s499_s6 = smov 0   ;;  %s501_s7 = smov 0   ;;  %s599_s0 = inlined_call_operand.vmem [shape: bf16[2,16,256], index: 0, kind: input, shape index: {}]   ;;  %s600_s1 = inlined_call_operand.vmem [shape: bf16[2,16,256], index: 1, kind: output, shape index: {}]  }
   0x1   :  { %s503_s8 = smov 0   ;;  %s505_s9 = smov 0  }
   0x2   :  { %s507_s10 = smov 0   ;;  %s509_s11 = smov 0  }
   0x3   :  { %s511_s12 = smov 0  }
   0x4 LB: > { %s20_s13 = sadd.s32 1, %s479_s10  ;;  %s23_s14 = sadd.s32 1, %s483_s11  ;;  %s487_s12 = sphi %s511_s12, %s11_s12   ;;  %s483_s11 = sphi %s509_s11, %s607_s11   ;;  %s479_s10 = sphi %s507_s10, %s606_s10   ;;  %s475_s9 = sphi %s505_s9, %s605_s9   ;;  %s471_s8 = sphi %s503_s8, %s604_s8   ;;  %s467_s7 = sphi %s501_s7, %s603_s7   ;;  %s463_s6 = sphi %s499_s6, %s602_s6  }
   0x5   : > { %p21_p0 = scmp.ge.s32.totalorder %s20_s13, 2  ;;  %s347_s15 = sadd.s32 4294967295, %s487_s12  }
   0x6   : > { %p39_p1 = scmp.ne.s32.totalorder %s467_s7, %s463_s6  ;;  %p40_p2 = scmp.eq.s32.totalorder %s487_s12, 0 }
   0x7   : > { %s609_s13 = smov (%p21_p0, %s20_s13), 0  ;;  %s611_s14 = smov (!%p21_p0, %s23_s14), %s483_s11 }
   0x8   : > { %p25_p3 = scmp.ge.s32.totalorder %s611_s14, 2  ;;  %p71_p4 = scmp.eq.s32.totalorder %s347_s15, 3 }
   0x9   : > { %s28_s16 = ssub.s32 %s479_s10, %s609_s13  ;;  %p41_p5 = por %p40_p2, %p39_p1 }
   0xa   : > { %s613_s14 = smov (%p25_p3, %s611_s14), 0  ;;  %p547_p6 = por %p71_p4, %p39_p1 }
   0xb   : > { %s27_s18 = ssub.s32 %s483_s11, %s613_s14  ;;  %s32_s20 = sadd.s32 1, %s467_s7 }
   0xc   : > { %s29_s19 = sor.u32 %s28_s16, %s27_s18  ;;  %p350_p8 = scmp.ge.s32.totalorder %s487_s12, 4 }
   0xd   : > { %p30_p7 = scmp.eq.s32.totalorder %s29_s19, 0 }
   0xe   : > { %93 = sbr.rel (%p350_p8) target bundleno = 28 (0x1c), region = 16 }
   0xf   : > { %s555_s21 = scalar_select %p30_p7, %s467_s7, %s32_s20  }
  0x15   : > { %96 = sbr.rel (!%p41_p5) target bundleno = 28 (0x1c), region = 20  ;;  %s98_s22 = sand.u32 (%p41_p5), 1, %s467_s7  }
  0x16   : > { %s352_s23 = sshll.u32 (%p41_p5), %s483_s11, 2  ;;  %s351_s24 = sshll.u32 (%p41_p5), %s98_s22, 3 }
  0x17   : > { %s102_s25 = sadd.s32 (%p41_p5), %s479_s10, %s352_s23  ;;  %s100_s30 = scalar_lea.vmem (%p41_p5), [#allocation2], %s351_s24 }
  0x18   : > { %s353_s26 = sshll.u32 (%p41_p5), %s102_s25, 2 }
  0x19   : > { %s104_s29 = scalar_lea.vmem (%p41_p5), %s599_s0, %s353_s26 }
  0x1a   : > { %v120_v0 = vld [vmem:[%s104_s29] sm:$0xf] (%p41_p5)  ;;  %v122_v1 = vld [vmem:[%s104_s29 + $0x8] sm:$0xf] (%p41_p5) }
  0x1b   : > { %121 = vst [vmem:[%s100_s30] sm:$0xf] (%p41_p5), %v120_v0  ;;  %123 = vst [vmem:[%s100_s30 + $0x4] sm:$0xf] (%p41_p5), %v122_v1 }
  0x1c PF: > { %p354_p9 = scmp.ge.s32.totalorder %s487_s12, 1  ;;  %p149_p10 = scmp.lt.s32.totalorder %s487_s12, 5 }
  0x1e   : > { %p150_p11 = pnand %p354_p9, %p149_p10 }
  0x1f   : > { %s156_s2 = sand.u32 (!%p150_p11), 1, %s463_s6  }
  0x20   : > { %153 = sbr.rel (%p150_p11) target bundleno = 88 (0x58), region = 61  ;;  %s567_s3 = sshll.u32 (!%p150_p11), %s156_s2, 3 }
  0x21   : > { %s158_s4 = scalar_lea.vmem (!%p150_p11), [#allocation2], %s567_s3  ;;  %s173_s5 = scalar_lea.vmem (!%p150_p11), [#allocation3], %s567_s3 }
  0x22   : > { %v367_v2 = vld [vmem:[%s158_s4] sm:$0xff] (!%p150_p11)  }
  0x23   : > { %v368_v3 = vunpack.c.l.bf16 (!%p150_p11), %v367_v2  ;;  %v369_v4 = vunpack.c.h.bf16 (!%p150_p11), %v367_v2 }
  0x25   : > { %v178_v5 = vadd.f32 (!%p150_p11), %v369_v4, %v368_v3  ;;  %v185_v6 = vmul.f32 (!%p150_p11), %v368_v3, %v368_v3  ;;  %v186_v7 = vmul.f32 (!%p150_p11), %v369_v4, %v369_v4 }
  0x27   : > { %v179_v8 = vrot.slane %v178_v5, 4  ;;  %v187_v9 = vadd.f32 %v186_v7, %v185_v6  ;;  %s360_s6 = sshll.u32 (%p547_p6), %s475_s9, 2 }
  0x28   : > { %s229_s15 = sadd.s32 (%p547_p6), %s471_s8, %s360_s6 }
  0x29   : > { %v180_v10 = vadd.f32 %v179_v8, %v178_v5  ;;  %v188_v11 = vrot.slane %v187_v9, 4  ;;  %s361_s16 = sshll.u32 (%p547_p6), %s229_s15, 2 }
  0x2a   : > { %s231_s20 = scalar_lea.vmem (%p547_p6), %s600_s1, %s361_s16 }
  0x2b   : > { %v181_v12 = vrot.slane %v180_v10, 2  ;;  %v189_v13 = vadd.f32 %v188_v11, %v187_v9 }
  0x2d   : > { %v182_v14 = vadd.f32 %v181_v12, %v180_v10  ;;  %v190_v15 = vrot.slane %v189_v13, 2 }
  0x2f   : > { %v183_v16 = vrot.slane %v182_v14, 1  ;;  %v191_v17 = vadd.f32 %v190_v15, %v189_v13 }
  0x31   : > { %v184_v18 = vadd.f32 %v183_v16, %v182_v14  ;;  %v192_v19 = vrot.slane %v191_v17, 1 }
  0x33   : > { %v193_v20 = vadd.f32 %v192_v19, %v191_v17  ;;  %v194_v21 = vmul.f32 0.0625, %v184_v18 }
  0x35   : > { %v195_v22 = vmul.f32 0.0625, %v193_v20  ;;  %v196_v23 = vmul.f32 %v194_v21, %v194_v21  ;;  %v199_v27 = vsub.f32 %v368_v3, %v194_v21  ;;  %v200_v28 = vsub.f32 %v369_v4, %v194_v21 }
  0x37   : > { %v197_v24 = vsub.f32 %v195_v22, %v196_v23 }
  0x39   : > { %v198_v25 = vmax.f32 %v197_v24, 0.0 }
  0x3b   : > { %v201_v26 = vadd.f32 1e-05, %v198_v25 }
  0x3d   : > { %431 = vrsqrt.f32 %v201_v26 }
  0x47   : > { %v432_v29 = vpop.eup %431 }
  0x48   : > { %v203_v30 = vmul.f32 %v432_v29, %v199_v27  ;;  %v204_v31 = vmul.f32 %v432_v29, %v200_v28 }
  0x49   : > { %227 = sbr.rel (!%p547_p6) target bundleno = 88 (0x58), region = 69 }
  0x4a   : > { %vm205_vm0 = vcmp.gt.f32.partialorder %v203_v30, 0.0  ;;  %vm206_vm1 = vcmp.gt.f32.partialorder %v204_v31, 0.0  ;;  %v207_v32 = vmul.f32 0.2, %v203_v30  ;;  %v208_v33 = vmul.f32 0.2, %v204_v31 }
  0x4c   : > { %v209_v34 = vsel %vm205_vm0, %v203_v30, %v207_v32  ;;  %v210_v35 = vsel %vm206_vm1, %v204_v31, %v208_v33 }
  0x4d   : > { %v373_v36 = vpack.c.bf16 %v210_v35, %v209_v34 }
  0x4f   : > { %374 = vst [vmem:[%s173_s5] sm:$0xff] %v373_v36  }
  0x56   : > { %v247_v37 = vld [vmem:[%s173_s5] sm:$0xf]  ;;  %v249_v38 = vld [vmem:[%s173_s5 + $0x4] sm:$0xf] }
  0x57   : > { %248 = vst [vmem:[%s231_s20] sm:$0xf] %v247_v37  ;;  %250 = vst [vmem:[%s231_s20 + $0x8] sm:$0xf] %v249_v38 }
  0x58 PF: > { %s11_s12 = sadd.s32 1, %s487_s12   ;;  %s602_s6 = smov %s467_s7 }
  0x59   : > { %p8_p12 = scmp.ge.s32.totalorder %s11_s12, 6   ;;  %s603_s7 = smov %s555_s21 }
  0x5a   : > { %s604_s8 = smov %s479_s10  ;;  %s605_s9 = smov %s483_s11 }
  0x5b   : > { %s606_s10 = smov %s609_s13  ;;  %s607_s11 = smov %s613_s14 }
  0x5c   :  { %10 = sbr.rel (!%p8_p12) target bundleno = 4 (0x4), region = 141 }

// kernel: discriminator_forward.11
= control target key start
LH: loop header
LB: loop body
LE: loop exit
PB: predicated region body
PF: predicated region fallthrough
CT: control target
= control target key end

     0   :  { %s3901_s1 = inlined_call_operand.vmem [shape: bf16[2048,256], index: 1, kind: input, shape index: {}]   ;;  %s3902_s0 = inlined_call_operand.vmem [shape: bf16[32,2048], index: 0, kind: input, shape index: {}]   ;;  %s3903_s2 = inlined_call_operand.vmem [shape: f32[1,256], index: 2, kind: input, shape index: {}]   ;;  %s3904_s3 = inlined_call_operand.vmem [shape: bf16[32,256], index: 3, kind: output, shape index: {}]  }
   0x1   :  { %v2570_v0 = vld [vmem:[%s3901_s1 + $0x4] ss:$8 sps:$4 sm:$0xff]   ;;  %v2574_v2 = vld [vmem:[%s3901_s1] ss:$8 sps:$4 sm:$0xff]   ;;  %v2576_v4 = vld [vmem:[%s3901_s1 + $0x14] ss:$8 sps:$4 sm:$0xff]  }
   0x2   :  { %v2572_v1 = vld [vmem:[%s3901_s1 + $0x404] ss:$8 sps:$4 sm:$0xff]   ;;  %1754 = vmatprep.subr.bf16.mxu1 %v2570_v0  ;;  %v2575_v3 = vld [vmem:[%s3901_s1 + $0x400] ss:$8 sps:$4 sm:$0xff]   ;;  %v2578_v5 = vld [vmem:[%s3901_s1 + $0x414] ss:$8 sps:$4 sm:$0xff]  }
   0x3   :  { %1966 = vmatprep.subr.bf16.mxu0 %v2572_v1  ;;  %1755 = vmatpush1.bf16.msra.mxu1 %v2574_v2  ;;  %v2580_v6 = vld [vmem:[%s3901_s1 + $0x10] ss:$8 sps:$4 sm:$0xff]   ;;  %v2582_v8 = vld [vmem:[%s3901_s1 + $0x24] ss:$8 sps:$4 sm:$0xff]   ;;  %v2586_v10 = vld [vmem:[%s3901_s1 + $0x20] ss:$8 sps:$4 sm:$0xff]  }
   0x4   :  { %1967 = vmatpush1.bf16.msra.mxu0 %v2575_v3  ;;  %1756 = vmatprep.subr.bf16.mxu1 %v2576_v4  ;;  %v2581_v7 = vld [vmem:[%s3901_s1 + $0x410] ss:$8 sps:$4 sm:$0xff]   ;;  %v2584_v9 = vld [vmem:[%s3901_s1 + $0x424] ss:$8 sps:$4 sm:$0xff]   ;;  %v2587_v11 = vld [vmem:[%s3901_s1 + $0x420] ss:$8 sps:$4 sm:$0xff]  }
   0x5   :  { %1968 = vmatprep.subr.bf16.mxu0 %v2578_v5  ;;  %v2588_v12 = vld [vmem:[%s3901_s1 + $0x34] ss:$8 sps:$4 sm:$0xff]   ;;  %v2592_v14 = vld [vmem:[%s3901_s1 + $0x30] ss:$8 sps:$4 sm:$0xff]   ;;  %v2594_v16 = vld [vmem:[%s3901_s1 + $0x44] ss:$8 sps:$4 sm:$0xff]  }
   0x6   :  { %v2590_v13 = vld [vmem:[%s3901_s1 + $0x434] ss:$8 sps:$4 sm:$0xff]   ;;  %v2593_v15 = vld [vmem:[%s3901_s1 + $0x430] ss:$8 sps:$4 sm:$0xff]   ;;  %v2596_v17 = vld [vmem:[%s3901_s1 + $0x444] ss:$8 sps:$4 sm:$0xff]  }
   0x7   :  { %1757 = vmatpush1.bf16.msra.mxu1 %v2580_v6  ;;  %v2598_v18 = vld [vmem:[%s3901_s1 + $0x40] ss:$8 sps:$4 sm:$0xff]   ;;  %v2600_v20 = vld [vmem:[%s3901_s1 + $0x54] ss:$8 sps:$4 sm:$0xff]   ;;  %v2604_v22 = vld [vmem:[%s3901_s1 + $0x50] ss:$8 sps:$4 sm:$0xff]  }
   0x8   :  { %1969 = vmatpush1.bf16.msra.mxu0 %v2581_v7  ;;  %1758 = vmatprep.subr.bf16.mxu1 %v2582_v8  ;;  %v2599_v19 = vld [vmem:[%s3901_s1 + $0x440] ss:$8 sps:$4 sm:$0xff]   ;;  %v2602_v21 = vld [vmem:[%s3901_s1 + $0x454] ss:$8 sps:$4 sm:$0xff]   ;;  %v2605_v23 = vld [vmem:[%s3901_s1 + $0x450] ss:$8 sps:$4 sm:$0xff]  }
   0x9   :  { %1970 = vmatprep.subr.bf16.mxu0 %v2584_v9  ;;  %v2606_v24 = vld [vmem:[%s3901_s1 + $0x64] ss:$8 sps:$4 sm:$0xff]   ;;  %v2610_v26 = vld [vmem:[%s3901_s1 + $0x60] ss:$8 sps:$4 sm:$0xff]   ;;  %v2612_v28 = vld [vmem:[%s3901_s1 + $0x74] ss:$8 sps:$4 sm:$0xff]  }
   0xa   :  { %v2608_v25 = vld [vmem:[%s3901_s1 + $0x464] ss:$8 sps:$4 sm:$0xff]   ;;  %v2611_v27 = vld [vmem:[%s3901_s1 + $0x460] ss:$8 sps:$4 sm:$0xff]   ;;  %v2614_v29 = vld [vmem:[%s3901_s1 + $0x474] ss:$8 sps:$4 sm:$0xff]  }
   0xb   :  { %1759 = vmatpush1.bf16.msra.mxu1 %v2586_v10  ;;  %v2616_v30 = vld [vmem:[%s3901_s1 + $0x70] ss:$8 sps:$4 sm:$0xff]   ;;  %v2618_v32 = vld [vmem:[%s3901_s1 + $0x84] ss:$8 sps:$4 sm:$0xff]   ;;  %v2622_v34 = vld [vmem:[%s3901_s1 + $0x80] ss:$8 sps:$4 sm:$0xff]  }
   0xc   :  { %1971 = vmatpush1.bf16.msra.mxu0 %v2587_v11  ;;  %1760 = vmatprep.subr.bf16.mxu1 %v2588_v12  ;;  %v2617_v31 = vld [vmem:[%s3901_s1 + $0x470] ss:$8 sps:$4 sm:$0xff]   ;;  %v2620_v33 = vld [vmem:[%s3901_s1 + $0x484] ss:$8 sps:$4 sm:$0xff]   ;;  %v2623_v35 = vld [vmem:[%s3901_s1 + $0x480] ss:$8 sps:$4 sm:$0xff]  }
   0xd   :  { %1972 = vmatprep.subr.bf16.mxu0 %v2590_v13  ;;  %v2624_v36 = vld [vmem:[%s3901_s1 + $0x94] ss:$8 sps:$4 sm:$0xff]   ;;  %v2628_v38 = vld [vmem:[%s3901_s1 + $0x90] ss:$8 sps:$4 sm:$0xff]   ;;  %v2630_v40 = vld [vmem:[%s3901_s1 + $0xa4] ss:$8 sps:$4 sm:$0xff]  }
   0xe   :  { %v2626_v37 = vld [vmem:[%s3901_s1 + $0x494] ss:$8 sps:$4 sm:$0xff]   ;;  %v2629_v39 = vld [vmem:[%s3901_s1 + $0x490] ss:$8 sps:$4 sm:$0xff]   ;;  %v2632_v41 = vld [vmem:[%s3901_s1 + $0x4a4] ss:$8 sps:$4 sm:$0xff]  }
   0xf   :  { %1761 = vmatpush1.bf16.msra.mxu1 %v2592_v14  ;;  %v2634_v42 = vld [vmem:[%s3901_s1 + $0xa0] ss:$8 sps:$4 sm:$0xff]   ;;  %v2636_v44 = vld [vmem:[%s3901_s1 + $0xb4] ss:$8 sps:$4 sm:$0xff]   ;;  %v2640_v46 = vld [vmem:[%s3901_s1 + $0xb0] ss:$8 sps:$4 sm:$0xff]  }
  0x10   :  { %1973 = vmatpush1.bf16.msra.mxu0 %v2593_v15  ;;  %1762 = vmatprep.subr.bf16.mxu1 %v2594_v16  ;;  %v2635_v43 = vld [vmem:[%s3901_s1 + $0x4a0] ss:$8 sps:$4 sm:$0xff]   ;;  %v2638_v45 = vld [vmem:[%s3901_s1 + $0x4b4] ss:$8 sps:$4 sm:$0xff]   ;;  %v2641_v47 = vld [vmem:[%s3901_s1 + $0x4b0] ss:$8 sps:$4 sm:$0xff]  }
  0x11   :  { %1974 = vmatprep.subr.bf16.mxu0 %v2596_v17  ;;  %v14_v48 = vld [vmem:[%s3902_s0] sm:$0xff]  ;;  %v2648_v58 = vld [vmem:[%s3901_s1 + $0xd4] ss:$8 sps:$4 sm:$0xff]   ;;  %v2652_v60 = vld [vmem:[%s3901_s1 + $0xd0] ss:$8 sps:$4 sm:$0xff]  }
  0x12   :  { %v22_v49 = vld [vmem:[%s3902_s0 + $0x40] sm:$0xff]  ;;  %v2650_v59 = vld [vmem:[%s3901_s1 + $0x4d4] ss:$8 sps:$4 sm:$0xff]   ;;  %v2653_v61 = vld [vmem:[%s3901_s1 + $0x4d0] ss:$8 sps:$4 sm:$0xff]  }
  0x13   :  { %1763 = vmatpush1.bf16.msra.mxu1 %v2598_v18  ;;  %v2642_v50 = vld [vmem:[%s3901_s1 + $0xc4] ss:$8 sps:$4 sm:$0xff]   ;;  %v2211_v52 = vcombine.high %v14_v48, %v22_v49  ;;  %v2646_v56 = vld [vmem:[%s3901_s1 + $0xc0] ss:$8 sps:$4 sm:$0xff]   ;;  %v2660_v2 = vld [vmem:[%s3901_s1 + $0xf4] ss:$8 sps:$4 sm:$0xff]   ;;  %v2210_v8 = vcombine.low %v14_v48, %v22_v49 }
  0x14   :  { %1975 = vmatpush1.bf16.msra.mxu0 %v2599_v19  ;;  %1764 = vmatprep.subr.bf16.mxu1 %v2600_v20  ;;  %v2644_v51 = vld [vmem:[%s3901_s1 + $0x4c4] ss:$8 sps:$4 sm:$0xff]   ;;  %v2647_v57 = vld [vmem:[%s3901_s1 + $0x4c0] ss:$8 sps:$4 sm:$0xff]   ;;  %v2662_v3 = vld [vmem:[%s3901_s1 + $0x4f4] ss:$8 sps:$4 sm:$0xff]  }
  0x15   :  { %1976 = vmatprep.subr.bf16.mxu0 %v2602_v21  ;;  %v18_v53 = vld [vmem:[%s3902_s0 + $0x20] sm:$0xff]  ;;  %1786 = vmatprep.mubr.bf16.mxu1 %v2211_v52  ;;  %v2664_v4 = vld [vmem:[%s3901_s1 + $0xf0] ss:$8 sps:$4 sm:$0xff]   ;;  %v2674_v12 = vld [vmem:[%s3901_s1 + $0x114] ss:$8 sps:$4 sm:$0xff]  }
  0x16   :  { %v26_v54 = vld [vmem:[%s3902_s0 + $0x60] sm:$0xff]  ;;  %v2665_v5 = vld [vmem:[%s3901_s1 + $0x4f0] ss:$8 sps:$4 sm:$0xff]   ;;  %v2677_v13 = vld [vmem:[%s3901_s1 + $0x514] ss:$8 sps:$4 sm:$0xff]  }
  0x17   :  { %1765 = vmatpush1.bf16.msra.mxu1 %v2604_v22  ;;  %v2219_v55 = vcombine.high %v18_v53, %v26_v54  ;;  %v2654_v62 = vld [vmem:[%s3901_s1 + $0xe4] ss:$8 sps:$4 sm:$0xff]   ;;  %v2658_v0 = vld [vmem:[%s3901_s1 + $0xe0] ss:$8 sps:$4 sm:$0xff]   ;;  %v2218_v10 = vcombine.low %v18_v53, %v26_v54  ;;  %v2672_v14 = vld [vmem:[%s3901_s1 + $0x110] ss:$8 sps:$4 sm:$0xff]  }
  0x18   :  { %1977 = vmatpush1.bf16.msra.mxu0 %v2605_v23  ;;  %1766 = vmatprep.subr.bf16.mxu1 %v2606_v24  ;;  %v2656_v63 = vld [vmem:[%s3901_s1 + $0x4e4] ss:$8 sps:$4 sm:$0xff]   ;;  %v2659_v1 = vld [vmem:[%s3901_s1 + $0x4e0] ss:$8 sps:$4 sm:$0xff]   ;;  %v2675_v15 = vld [vmem:[%s3901_s1 + $0x510] ss:$8 sps:$4 sm:$0xff]  }
  0x19   :  { %1978 = vmatprep.subr.bf16.mxu0 %v2608_v25  ;;  %1998 = vmatprep.mubr.bf16.mxu0 %v2219_v55  ;;  %v2668_v6 = vld [vmem:[%s3901_s1 + $0x104] ss:$8 sps:$4 sm:$0xff]   ;;  %v2666_v9 = vld [vmem:[%s3901_s1 + $0x100] ss:$8 sps:$4 sm:$0xff]   ;;  %v2686_v20 = vld [vmem:[%s3901_s1 + $0x134] ss:$8 sps:$4 sm:$0xff]  }
  0x1a   :  { %v2671_v7 = vld [vmem:[%s3901_s1 + $0x504] ss:$8 sps:$4 sm:$0xff]   ;;  %v2669_v11 = vld [vmem:[%s3901_s1 + $0x500] ss:$8 sps:$4 sm:$0xff]   ;;  %v2689_v21 = vld [vmem:[%s3901_s1 + $0x534] ss:$8 sps:$4 sm:$0xff]  }
  0x1b   :  { %1767 = vmatpush1.bf16.msra.mxu1 %v2610_v26  ;;  %v2680_v16 = vld [vmem:[%s3901_s1 + $0x124] ss:$8 sps:$4 sm:$0xff]   ;;  %v2678_v18 = vld [vmem:[%s3901_s1 + $0x120] ss:$8 sps:$4 sm:$0xff]   ;;  %v2684_v22 = vld [vmem:[%s3901_s1 + $0x130] ss:$8 sps:$4 sm:$0xff]  }
  0x1c   :  { %1979 = vmatpush1.bf16.msra.mxu0 %v2611_v27  ;;  %1768 = vmatprep.subr.bf16.mxu1 %v2612_v28  ;;  %v2683_v17 = vld [vmem:[%s3901_s1 + $0x524] ss:$8 sps:$4 sm:$0xff]   ;;  %v2681_v19 = vld [vmem:[%s3901_s1 + $0x520] ss:$8 sps:$4 sm:$0xff]   ;;  %v2687_v23 = vld [vmem:[%s3901_s1 + $0x530] ss:$8 sps:$4 sm:$0xff]  }
  0x1d   :  { %1980 = vmatprep.subr.bf16.mxu0 %v2614_v29  ;;  %v2692_v24 = vld [vmem:[%s3901_s1 + $0x144] ss:$8 sps:$4 sm:$0xff]   ;;  %v2690_v26 = vld [vmem:[%s3901_s1 + $0x140] ss:$8 sps:$4 sm:$0xff]   ;;  %v2698_v28 = vld [vmem:[%s3901_s1 + $0x154] ss:$8 sps:$4 sm:$0xff]  }
  0x1e   :  { %v2695_v25 = vld [vmem:[%s3901_s1 + $0x544] ss:$8 sps:$4 sm:$0xff]   ;;  %v2693_v27 = vld [vmem:[%s3901_s1 + $0x540] ss:$8 sps:$4 sm:$0xff]   ;;  %v2701_v29 = vld [vmem:[%s3901_s1 + $0x554] ss:$8 sps:$4 sm:$0xff]  }
  0x1f   :  { %1769 = vmatpush1.bf16.msra.mxu1 %v2616_v30  ;;  %v30_v30 = vld [vmem:[%s3902_s0 + $0x80] sm:$0xff]  ;;  %v3295_v49 = vld [vmem:[%s3902_s0 + $0x28] sm:$0xff]  ;;  %v2711_v52 = vld [vmem:[%s3901_s1 + $0x570] ss:$8 sps:$4 sm:$0xff]  }
  0x20   :  { %1981 = vmatpush1.bf16.msra.mxu0 %v2617_v31  ;;  %1770 = vmatprep.subr.bf16.mxu1 %v2618_v32  ;;  %v38_v31 = vld [vmem:[%s3902_s0 + $0xc0] sm:$0xff]  ;;  %v2696_v32 = vld [vmem:[%s3901_s1 + $0x150] ss:$8 sps:$4 sm:$0xff]  }
  0x21   :  { %1982 = vmatprep.subr.bf16.mxu0 %v2620_v33  ;;  %v2227_v33 = vcombine.high %v30_v30, %v38_v31  ;;  %v2716_v54 = vld [vmem:[%s3901_s1 + $0x184] ss:$8 sps:$4 sm:$0xff]  }
  0x22   :  { %v2719_v55 = vld [vmem:[%s3901_s1 + $0x584] ss:$8 sps:$4 sm:$0xff]  }
  0x23   :  { %1771 = vmatpush1.bf16.msra.mxu1 %v2622_v34  ;;  %v2699_v34 = vld [vmem:[%s3901_s1 + $0x550] ss:$8 sps:$4 sm:$0xff]  }
  0x24   :  { %1983 = vmatpush1.bf16.msra.mxu0 %v2623_v35  ;;  %1772 = vmatprep.subr.bf16.mxu1 %v2624_v36  ;;  %v34_v35 = vld [vmem:[%s3902_s0 + $0xa0] sm:$0xff] }
  0x25   :  { %1984 = vmatprep.subr.bf16.mxu0 %v2626_v37  ;;  %v42_v36 = vld [vmem:[%s3902_s0 + $0xe0] sm:$0xff]  ;;  %v2226_v37 = vcombine.low %v30_v30, %v38_v31  ;;  %v2770_v30 = vld [vmem:[%s3901_s1 + $0x214] ss:$8 sps:$4 sm:$0xff]  }
  0x26   :  { %v2773_v31 = vld [vmem:[%s3901_s1 + $0x614] ss:$8 sps:$4 sm:$0xff]  }
  0x27   :  { %1773 = vmatpush1.bf16.msra.mxu1 %v2628_v38  ;;  %v2704_v38 = vld [vmem:[%s3901_s1 + $0x164] ss:$8 sps:$4 sm:$0xff]  }
  0x28   :  { %1985 = vmatpush1.bf16.msra.mxu0 %v2629_v39  ;;  %1774 = vmatprep.subr.bf16.mxu1 %v2630_v40  ;;  %v2235_v39 = vcombine.high %v34_v35, %v42_v36  ;;  %v2234_v40 = vcombine.low %v34_v35, %v42_v36  ;;  %v2768_v36 = vld [vmem:[%s3901_s1 + $0x210] ss:$8 sps:$4 sm:$0xff]  }
  0x29   :  { %1986 = vmatprep.subr.bf16.mxu0 %v2632_v41  ;;  %v2707_v41 = vld [vmem:[%s3901_s1 + $0x564] ss:$8 sps:$4 sm:$0xff]  }
  0x2b   :  { %1775 = vmatpush1.bf16.msra.mxu1 %v2634_v42  ;;  %v2702_v42 = vld [vmem:[%s3901_s1 + $0x160] ss:$8 sps:$4 sm:$0xff]  }
  0x2c   :  { %1987 = vmatpush1.bf16.msra.mxu0 %v2635_v43  ;;  %1776 = vmatprep.subr.bf16.mxu1 %v2636_v44  ;;  %v2705_v43 = vld [vmem:[%s3901_s1 + $0x560] ss:$8 sps:$4 sm:$0xff]  }
  0x2d   :  { %1988 = vmatprep.subr.bf16.mxu0 %v2638_v45  ;;  %v3277_v44 = vld [vmem:[%s3902_s0 + $0x8] sm:$0xff] }
  0x2e   :  { %v3282_v45 = vld [vmem:[%s3902_s0 + $0x48] sm:$0xff] }
  0x2f   :  { %1777 = vmatpush1.bf16.msra.mxu1 %v2640_v46  ;;  %v2710_v46 = vld [vmem:[%s3901_s1 + $0x174] ss:$8 sps:$4 sm:$0xff]   ;;  %v2213_v48 = vcombine.high %v3277_v44, %v3282_v45 }
  0x30   :  { %1989 = vmatpush1.bf16.msra.mxu0 %v2641_v47  ;;  %1778 = vmatprep.subr.bf16.mxu1 %v2642_v50  ;;  %v2713_v47 = vld [vmem:[%s3901_s1 + $0x574] ss:$8 sps:$4 sm:$0xff]   ;;  %v3300_v50 = vld [vmem:[%s3902_s0 + $0x68] sm:$0xff] }
  0x31   :  { %1990 = vmatprep.subr.bf16.mxu0 %v2644_v51  ;;  %v2708_v51 = vld [vmem:[%s3901_s1 + $0x170] ss:$8 sps:$4 sm:$0xff]   ;;  %v2221_v53 = vcombine.high %v3295_v49, %v3300_v50 }
  0x33   :  { %1779 = vmatpush1.bf16.msra.mxu1 %v2646_v56  ;;  %v2714_v56 = vld [vmem:[%s3901_s1 + $0x180] ss:$8 sps:$4 sm:$0xff]  }
  0x34   :  { %1991 = vmatpush1.bf16.msra.mxu0 %v2647_v57  ;;  %1780 = vmatprep.subr.bf16.mxu1 %v2648_v58  ;;  %v2717_v57 = vld [vmem:[%s3901_s1 + $0x580] ss:$8 sps:$4 sm:$0xff]   ;;  %v2722_v58 = vld [vmem:[%s3901_s1 + $0x194] ss:$8 sps:$4 sm:$0xff]  }
  0x35   :  { %1992 = vmatprep.subr.bf16.mxu0 %v2650_v59  ;;  %v2725_v59 = vld [vmem:[%s3901_s1 + $0x594] ss:$8 sps:$4 sm:$0xff]  }
  0x37   :  { %1781 = vmatpush1.bf16.msra.mxu1 %v2652_v60  ;;  %v2720_v60 = vld [vmem:[%s3901_s1 + $0x190] ss:$8 sps:$4 sm:$0xff]  }
  0x38   :  { %1993 = vmatpush1.bf16.msra.mxu0 %v2653_v61  ;;  %1782 = vmatprep.subr.bf16.mxu1 %v2654_v62  ;;  %v2723_v61 = vld [vmem:[%s3901_s1 + $0x590] ss:$8 sps:$4 sm:$0xff]   ;;  %v2728_v62 = vld [vmem:[%s3901_s1 + $0x1a4] ss:$8 sps:$4 sm:$0xff]  }
  0x39   :  { %1994 = vmatprep.subr.bf16.mxu0 %v2656_v63  ;;  %v2731_v63 = vld [vmem:[%s3901_s1 + $0x5a4] ss:$8 sps:$4 sm:$0xff]  }
  0x3b   :  { %1783 = vmatpush1.bf16.msra.mxu1 %v2658_v0  ;;  %v2726_v0 = vld [vmem:[%s3901_s1 + $0x1a0] ss:$8 sps:$4 sm:$0xff]  }
  0x3c   :  { %1995 = vmatpush1.bf16.msra.mxu0 %v2659_v1  ;;  %1784 = vmatprep.subr.bf16.mxu1 %v2660_v2  ;;  %v2729_v1 = vld [vmem:[%s3901_s1 + $0x5a0] ss:$8 sps:$4 sm:$0xff]   ;;  %v2734_v2 = vld [vmem:[%s3901_s1 + $0x1b4] ss:$8 sps:$4 sm:$0xff]  }
  0x3d   :  { %1996 = vmatprep.subr.bf16.mxu0 %v2662_v3  ;;  %v2737_v3 = vld [vmem:[%s3901_s1 + $0x5b4] ss:$8 sps:$4 sm:$0xff]  }
  0x3f   :  { %1785 = vmatpush1.bf16.msra.mxu1 %v2664_v4  ;;  %v2732_v4 = vld [vmem:[%s3901_s1 + $0x1b0] ss:$8 sps:$4 sm:$0xff]  }
  0x40   :  { %1997 = vmatpush1.bf16.msra.mxu0 %v2665_v5  ;;  %1807 = vmatprep.subr.bf16.mxu1 %v2668_v6  ;;  %v2735_v5 = vld [vmem:[%s3901_s1 + $0x5b0] ss:$8 sps:$4 sm:$0xff]   ;;  %v2740_v6 = vld [vmem:[%s3901_s1 + $0x1c4] ss:$8 sps:$4 sm:$0xff]  }
  0x41   :  { %2019 = vmatprep.subr.bf16.mxu0 %v2671_v7  ;;  %v2743_v7 = vld [vmem:[%s3901_s1 + $0x5c4] ss:$8 sps:$4 sm:$0xff]  }
  0x42   :  { %1787 = vmatmul.mubr.bf16.vlgmr.msra.gmra.mrb[0].mxu1 %v2210_v8  ;;  %v2738_v8 = vld [vmem:[%s3901_s1 + $0x1c0] ss:$8 sps:$4 sm:$0xff]  }
  0x43   :  { %1999 = vmatmul.mubr.bf16.vlgmr.msra.gmra.mrb[0].mxu0 %v2218_v10  ;;  %1808 = vmatpush1.bf16.msra.mxu1 %v2666_v9  ;;  %v2741_v9 = vld [vmem:[%s3901_s1 + $0x5c0] ss:$8 sps:$4 sm:$0xff]   ;;  %v2746_v10 = vld [vmem:[%s3901_s1 + $0x1d4] ss:$8 sps:$4 sm:$0xff]  }
  0x44   :  { %2020 = vmatpush1.bf16.msra.mxu0 %v2669_v11  ;;  %1809 = vmatprep.subr.bf16.mxu1 %v2674_v12  ;;  %v2749_v11 = vld [vmem:[%s3901_s1 + $0x5d4] ss:$8 sps:$4 sm:$0xff]   ;;  %v2744_v12 = vld [vmem:[%s3901_s1 + $0x1d0] ss:$8 sps:$4 sm:$0xff]  }
  0x45   :  { %2021 = vmatprep.subr.bf16.mxu0 %v2677_v13  ;;  %1796 = vmatprep.mubr.bf16.mxu1 %v2227_v33  ;;  %v2747_v13 = vld [vmem:[%s3901_s1 + $0x5d0] ss:$8 sps:$4 sm:$0xff]   ;;  %v43_v33 = vld [vmem:[%s3902_s0 + $0xe8] sm:$0xff] }
  0x46   :  { %2008 = vmatprep.mubr.bf16.mxu0 %v2235_v39  ;;  %v2779_v39 = vld [vmem:[%s3901_s1 + $0x624] ss:$8 sps:$4 sm:$0xff]  }
  0x47   :  { %1810 = vmatpush1.bf16.msra.mxu1 %v2672_v14  ;;  %v2752_v14 = vld [vmem:[%s3901_s1 + $0x1e4] ss:$8 sps:$4 sm:$0xff]  }
  0x48   :  { %2022 = vmatpush1.bf16.msra.mxu0 %v2675_v15  ;;  %1811 = vmatprep.subr.bf16.mxu1 %v2680_v16  ;;  %v2755_v15 = vld [vmem:[%s3901_s1 + $0x5e4] ss:$8 sps:$4 sm:$0xff]   ;;  %v2750_v16 = vld [vmem:[%s3901_s1 + $0x1e0] ss:$8 sps:$4 sm:$0xff]  }
  0x49   :  { %2023 = vmatprep.subr.bf16.mxu0 %v2683_v17  ;;  %v2753_v17 = vld [vmem:[%s3901_s1 + $0x5e0] ss:$8 sps:$4 sm:$0xff]  }
  0x4a   :  { %1797 = vmatmul.mubr.bf16.gmra.mrb[4].mxu1 %v2226_v37  ;;  %v2771_v37 = vld [vmem:[%s3901_s1 + $0x610] ss:$8 sps:$4 sm:$0xff]  }
  0x4b   :  { %1812 = vmatpush1.bf16.msra.mxu1 %v2678_v18  ;;  %2009 = vmatmul.mubr.bf16.gmra.mrb[4].mxu0 %v2234_v40  ;;  %v2758_v18 = vld [vmem:[%s3901_s1 + $0x1f4] ss:$8 sps:$4 sm:$0xff]   ;;  %v2774_v40 = vld [vmem:[%s3901_s1 + $0x220] ss:$8 sps:$4 sm:$0xff]  }
  0x4c   :  { %2024 = vmatpush1.bf16.msra.mxu0 %v2681_v19  ;;  %1813 = vmatprep.subr.bf16.mxu1 %v2686_v20  ;;  %v2761_v19 = vld [vmem:[%s3901_s1 + $0x5f4] ss:$8 sps:$4 sm:$0xff]   ;;  %v2756_v20 = vld [vmem:[%s3901_s1 + $0x1f0] ss:$8 sps:$4 sm:$0xff]  }
  0x4d   :  { %2025 = vmatprep.subr.bf16.mxu0 %v2689_v21  ;;  %1839 = vmatprep.mubr.bf16.mxu1 %v2213_v48  ;;  %v2759_v21 = vld [vmem:[%s3901_s1 + $0x5f0] ss:$8 sps:$4 sm:$0xff]   ;;  %v2782_v48 = vld [vmem:[%s3901_s1 + $0x234] ss:$8 sps:$4 sm:$0xff]  }
  0x4e   :  { %2051 = vmatprep.mubr.bf16.mxu0 %v2221_v53  ;;  %v2783_v53 = vld [vmem:[%s3901_s1 + $0x630] ss:$8 sps:$4 sm:$0xff]  }
  0x4f   :  { %1814 = vmatpush1.bf16.msra.mxu1 %v2684_v22  ;;  %v2764_v22 = vld [vmem:[%s3901_s1 + $0x204] ss:$8 sps:$4 sm:$0xff]  }
  0x50   :  { %2026 = vmatpush1.bf16.msra.mxu0 %v2687_v23  ;;  %1815 = vmatprep.subr.bf16.mxu1 %v2692_v24  ;;  %v2767_v23 = vld [vmem:[%s3901_s1 + $0x604] ss:$8 sps:$4 sm:$0xff]   ;;  %v2762_v24 = vld [vmem:[%s3901_s1 + $0x200] ss:$8 sps:$4 sm:$0xff]  }
  0x51   :  { %2027 = vmatprep.subr.bf16.mxu0 %v2695_v25  ;;  %v2765_v25 = vld [vmem:[%s3901_s1 + $0x600] ss:$8 sps:$4 sm:$0xff]  }
  0x53   :  { %1816 = vmatpush1.bf16.msra.mxu1 %v2690_v26  ;;  %v31_v26 = vld [vmem:[%s3902_s0 + $0x88] sm:$0xff] }
  0x54   :  { %2028 = vmatpush1.bf16.msra.mxu0 %v2693_v27  ;;  %1817 = vmatprep.subr.bf16.mxu1 %v2698_v28  ;;  %v2212_v27 = vcombine.low %v3277_v44, %v3282_v45  ;;  %v2220_v28 = vcombine.low %v3295_v49, %v3300_v50  ;;  %v3466_v45 = vld [vmem:[%s3902_s0 + $0x50] sm:$0xff] }
  0x55   :  { %2029 = vmatprep.subr.bf16.mxu0 %v2701_v29  ;;  %v39_v29 = vld [vmem:[%s3902_s0 + $0xc8] sm:$0xff]  ;;  %v2785_v49 = vld [vmem:[%s3901_s1 + $0x634] ss:$8 sps:$4 sm:$0xff]  }
  0x57   :  { %1818 = vmatpush1.bf16.msra.mxu1 %v2696_v32  ;;  %v35_v32 = vld [vmem:[%s3902_s0 + $0xa8] sm:$0xff] }
  0x58   :  { %2030 = vmatpush1.bf16.msra.mxu0 %v2699_v34  ;;  %1819 = vmatprep.subr.bf16.mxu1 %v2704_v38  ;;  %v2229_v34 = vcombine.high %v31_v26, %v39_v29  ;;  %v2237_v35 = vcombine.high %v35_v32, %v43_v33  ;;  %v2776_v38 = vld [vmem:[%s3901_s1 + $0x224] ss:$8 sps:$4 sm:$0xff]   ;;  %v2236_v44 = vcombine.low %v35_v32, %v43_v33  ;;  %v2846_v32 = vld [vmem:[%s3901_s1 + $0x2e0] ss:$8 sps:$4 sm:$0xff]  }
  0x59   :  { %2031 = vmatprep.subr.bf16.mxu0 %v2707_v41  ;;  %v2777_v41 = vld [vmem:[%s3901_s1 + $0x620] ss:$8 sps:$4 sm:$0xff]  }
  0x5a   :  { %v2849_v33 = vld [vmem:[%s3901_s1 + $0x6e0] ss:$8 sps:$4 sm:$0xff]  }
  0x5b   :  { %1820 = vmatpush1.bf16.msra.mxu1 %v2702_v42  ;;  %v3461_v42 = vld [vmem:[%s3902_s0 + $0x10] sm:$0xff] }
  0x5c   :  { %2032 = vmatpush1.bf16.msra.mxu0 %v2705_v43  ;;  %1821 = vmatprep.subr.bf16.mxu1 %v2710_v46  ;;  %v2228_v43 = vcombine.low %v31_v26, %v39_v29  ;;  %v3471_v46 = vld [vmem:[%s3902_s0 + $0x30] sm:$0xff]  ;;  %v2215_v50 = vcombine.high %v3461_v42, %v3466_v45 }
  0x5d   :  { %2033 = vmatprep.subr.bf16.mxu0 %v2713_v47  ;;  %v3476_v47 = vld [vmem:[%s3902_s0 + $0x70] sm:$0xff] }
  0x5e   :  { %v2842_v26 = vld [vmem:[%s3901_s1 + $0x2d4] ss:$8 sps:$4 sm:$0xff]   ;;  %v2843_v29 = vld [vmem:[%s3901_s1 + $0x6d0] ss:$8 sps:$4 sm:$0xff]  }
  0x5f   :  { %1822 = vmatpush1.bf16.msra.mxu1 %v2708_v51  ;;  %v2223_v51 = vcombine.high %v3471_v46, %v3476_v47 }
  0x60   :  { %2034 = vmatpush1.bf16.msra.mxu0 %v2711_v52  ;;  %1823 = vmatprep.subr.bf16.mxu1 %v2716_v54  ;;  %v2780_v52 = vld [vmem:[%s3901_s1 + $0x230] ss:$8 sps:$4 sm:$0xff]   ;;  %v2788_v54 = vld [vmem:[%s3901_s1 + $0x244] ss:$8 sps:$4 sm:$0xff]  }
  0x61   :  { %2035 = vmatprep.subr.bf16.mxu0 %v2719_v55  ;;  %v2791_v55 = vld [vmem:[%s3901_s1 + $0x644] ss:$8 sps:$4 sm:$0xff]  }
  0x63   :  { %1824 = vmatpush1.bf16.msra.mxu1 %v2714_v56  ;;  %v2786_v56 = vld [vmem:[%s3901_s1 + $0x240] ss:$8 sps:$4 sm:$0xff]  }
  0x64   :  { %2036 = vmatpush1.bf16.msra.mxu0 %v2717_v57  ;;  %1825 = vmatprep.subr.bf16.mxu1 %v2722_v58  ;;  %v2789_v57 = vld [vmem:[%s3901_s1 + $0x640] ss:$8 sps:$4 sm:$0xff]   ;;  %v2794_v58 = vld [vmem:[%s3901_s1 + $0x254] ss:$8 sps:$4 sm:$0xff]  }
  0x65   :  { %2037 = vmatprep.subr.bf16.mxu0 %v2725_v59  ;;  %v2797_v59 = vld [vmem:[%s3901_s1 + $0x654] ss:$8 sps:$4 sm:$0xff]  }
  0x67   :  { %1826 = vmatpush1.bf16.msra.mxu1 %v2720_v60  ;;  %v2792_v60 = vld [vmem:[%s3901_s1 + $0x250] ss:$8 sps:$4 sm:$0xff]  }
  0x68   :  { %2038 = vmatpush1.bf16.msra.mxu0 %v2723_v61  ;;  %1827 = vmatprep.subr.bf16.mxu1 %v2728_v62  ;;  %v2795_v61 = vld [vmem:[%s3901_s1 + $0x650] ss:$8 sps:$4 sm:$0xff]   ;;  %v2800_v62 = vld [vmem:[%s3901_s1 + $0x264] ss:$8 sps:$4 sm:$0xff]  }
  0x69   :  { %2039 = vmatprep.subr.bf16.mxu0 %v2731_v63  ;;  %v2803_v63 = vld [vmem:[%s3901_s1 + $0x664] ss:$8 sps:$4 sm:$0xff]  }
  0x6b   :  { %1828 = vmatpush1.bf16.msra.mxu1 %v2726_v0  ;;  %v2798_v0 = vld [vmem:[%s3901_s1 + $0x260] ss:$8 sps:$4 sm:$0xff]  }
  0x6c   :  { %2040 = vmatpush1.bf16.msra.mxu0 %v2729_v1  ;;  %1829 = vmatprep.subr.bf16.mxu1 %v2734_v2  ;;  %v2801_v1 = vld [vmem:[%s3901_s1 + $0x660] ss:$8 sps:$4 sm:$0xff]   ;;  %v2806_v2 = vld [vmem:[%s3901_s1 + $0x274] ss:$8 sps:$4 sm:$0xff]  }
  0x6d   :  { %2041 = vmatprep.subr.bf16.mxu0 %v2737_v3  ;;  %v2809_v3 = vld [vmem:[%s3901_s1 + $0x674] ss:$8 sps:$4 sm:$0xff]  }
  0x6f   :  { %1830 = vmatpush1.bf16.msra.mxu1 %v2732_v4  ;;  %v2804_v4 = vld [vmem:[%s3901_s1 + $0x270] ss:$8 sps:$4 sm:$0xff]  }
  0x70   :  { %2042 = vmatpush1.bf16.msra.mxu0 %v2735_v5  ;;  %1831 = vmatprep.subr.bf16.mxu1 %v2740_v6  ;;  %v2807_v5 = vld [vmem:[%s3901_s1 + $0x670] ss:$8 sps:$4 sm:$0xff]   ;;  %v2812_v6 = vld [vmem:[%s3901_s1 + $0x284] ss:$8 sps:$4 sm:$0xff]  }
  0x71   :  { %2043 = vmatprep.subr.bf16.mxu0 %v2743_v7  ;;  %v2815_v7 = vld [vmem:[%s3901_s1 + $0x684] ss:$8 sps:$4 sm:$0xff]  }
  0x73   :  { %1832 = vmatpush1.bf16.msra.mxu1 %v2738_v8  ;;  %v2810_v8 = vld [vmem:[%s3901_s1 + $0x280] ss:$8 sps:$4 sm:$0xff]  }
  0x74   :  { %2044 = vmatpush1.bf16.msra.mxu0 %v2741_v9  ;;  %1833 = vmatprep.subr.bf16.mxu1 %v2746_v10  ;;  %v2813_v9 = vld [vmem:[%s3901_s1 + $0x680] ss:$8 sps:$4 sm:$0xff]   ;;  %v2818_v10 = vld [vmem:[%s3901_s1 + $0x294] ss:$8 sps:$4 sm:$0xff]  }
  0x75   :  { %2045 = vmatprep.subr.bf16.mxu0 %v2749_v11  ;;  %v2821_v11 = vld [vmem:[%s3901_s1 + $0x694] ss:$8 sps:$4 sm:$0xff]  }
  0x77   :  { %1834 = vmatpush1.bf16.msra.mxu1 %v2744_v12  ;;  %v2816_v12 = vld [vmem:[%s3901_s1 + $0x290] ss:$8 sps:$4 sm:$0xff]  }
  0x78   :  { %2046 = vmatpush1.bf16.msra.mxu0 %v2747_v13  ;;  %1835 = vmatprep.subr.bf16.mxu1 %v2752_v14  ;;  %v2819_v13 = vld [vmem:[%s3901_s1 + $0x690] ss:$8 sps:$4 sm:$0xff]   ;;  %v2824_v14 = vld [vmem:[%s3901_s1 + $0x2a4] ss:$8 sps:$4 sm:$0xff]  }
  0x79   :  { %2047 = vmatprep.subr.bf16.mxu0 %v2755_v15  ;;  %v2827_v15 = vld [vmem:[%s3901_s1 + $0x6a4] ss:$8 sps:$4 sm:$0xff]  }
  0x7b   :  { %1836 = vmatpush1.bf16.msra.mxu1 %v2750_v16  ;;  %v2822_v16 = vld [vmem:[%s3901_s1 + $0x2a0] ss:$8 sps:$4 sm:$0xff]  }
  0x7c   :  { %2048 = vmatpush1.bf16.msra.mxu0 %v2753_v17  ;;  %1837 = vmatprep.subr.bf16.mxu1 %v2758_v18  ;;  %v2825_v17 = vld [vmem:[%s3901_s1 + $0x6a0] ss:$8 sps:$4 sm:$0xff]   ;;  %v2830_v18 = vld [vmem:[%s3901_s1 + $0x2b4] ss:$8 sps:$4 sm:$0xff]  }
  0x7d   :  { %2049 = vmatprep.subr.bf16.mxu0 %v2761_v19  ;;  %v2833_v19 = vld [vmem:[%s3901_s1 + $0x6b4] ss:$8 sps:$4 sm:$0xff]  }
  0x7f   :  { %1838 = vmatpush1.bf16.msra.mxu1 %v2756_v20  ;;  %v2828_v20 = vld [vmem:[%s3901_s1 + $0x2b0] ss:$8 sps:$4 sm:$0xff]  }
  0x80   :  { %2050 = vmatpush1.bf16.msra.mxu0 %v2759_v21  ;;  %1860 = vmatprep.subr.bf16.mxu1 %v2764_v22  ;;  %v2831_v21 = vld [vmem:[%s3901_s1 + $0x6b0] ss:$8 sps:$4 sm:$0xff]   ;;  %v2836_v22 = vld [vmem:[%s3901_s1 + $0x2c4] ss:$8 sps:$4 sm:$0xff]  }
  0x81   :  { %2072 = vmatprep.subr.bf16.mxu0 %v2767_v23  ;;  %v2839_v23 = vld [vmem:[%s3901_s1 + $0x6c4] ss:$8 sps:$4 sm:$0xff]  }
  0x82   :  { %1840 = vmatmul.mubr.bf16.vlgmr.msra.gmra.mrb[0].mxu1 %v2212_v27  ;;  %v2845_v27 = vld [vmem:[%s3901_s1 + $0x6d4] ss:$8 sps:$4 sm:$0xff]  }
  0x83   :  { %2052 = vmatmul.mubr.bf16.vlgmr.msra.gmra.mrb[0].mxu0 %v2220_v28  ;;  %1861 = vmatpush1.bf16.msra.mxu1 %v2762_v24  ;;  %v2834_v24 = vld [vmem:[%s3901_s1 + $0x2c0] ss:$8 sps:$4 sm:$0xff]   ;;  %v2840_v28 = vld [vmem:[%s3901_s1 + $0x2d0] ss:$8 sps:$4 sm:$0xff]  }
  0x84   :  { %2073 = vmatpush1.bf16.msra.mxu0 %v2765_v25  ;;  %1862 = vmatprep.subr.bf16.mxu1 %v2770_v30  ;;  %v2837_v25 = vld [vmem:[%s3901_s1 + $0x6c0] ss:$8 sps:$4 sm:$0xff]   ;;  %v2848_v30 = vld [vmem:[%s3901_s1 + $0x2e4] ss:$8 sps:$4 sm:$0xff]  }
  0x85   :  { %2074 = vmatprep.subr.bf16.mxu0 %v2773_v31  ;;  %1849 = vmatprep.mubr.bf16.mxu1 %v2229_v34  ;;  %v2851_v31 = vld [vmem:[%s3901_s1 + $0x6e4] ss:$8 sps:$4 sm:$0xff]   ;;  %v2854_v34 = vld [vmem:[%s3901_s1 + $0x2f4] ss:$8 sps:$4 sm:$0xff]  }
  0x86   :  { %2061 = vmatprep.mubr.bf16.mxu0 %v2237_v35  ;;  %v2857_v35 = vld [vmem:[%s3901_s1 + $0x6f4] ss:$8 sps:$4 sm:$0xff]  }
  0x87   :  { %1863 = vmatpush1.bf16.msra.mxu1 %v2768_v36  ;;  %v2852_v36 = vld [vmem:[%s3901_s1 + $0x2f0] ss:$8 sps:$4 sm:$0xff]  }
  0x88   :  { %2075 = vmatpush1.bf16.msra.mxu0 %v2771_v37  ;;  %1864 = vmatprep.subr.bf16.mxu1 %v2776_v38  ;;  %v2855_v37 = vld [vmem:[%s3901_s1 + $0x6f0] ss:$8 sps:$4 sm:$0xff]   ;;  %v2860_v38 = vld [vmem:[%s3901_s1 + $0x304] ss:$8 sps:$4 sm:$0xff]  }
  0x89   :  { %2076 = vmatprep.subr.bf16.mxu0 %v2779_v39  ;;  %v2863_v39 = vld [vmem:[%s3901_s1 + $0x704] ss:$8 sps:$4 sm:$0xff]  }
  0x8a   :  { %1850 = vmatmul.mubr.bf16.gmra.mrb[4].mxu1 %v2228_v43  ;;  %v2222_v43 = vcombine.low %v3471_v46, %v3476_v47  ;;  %v2866_v46 = vld [vmem:[%s3901_s1 + $0x314] ss:$8 sps:$4 sm:$0xff]  }
  0x8b   :  { %2062 = vmatmul.mubr.bf16.gmra.mrb[4].mxu0 %v2236_v44  ;;  %1865 = vmatpush1.bf16.msra.mxu1 %v2774_v40  ;;  %v32_v40 = vld [vmem:[%s3902_s0 + $0x90] sm:$0xff] }
  0x8c   :  { %2077 = vmatpush1.bf16.msra.mxu0 %v2777_v41  ;;  %1866 = vmatprep.subr.bf16.mxu1 %v2782_v48  ;;  %v2214_v41 = vcombine.low %v3461_v42, %v3466_v45  ;;  %v40_v44 = vld [vmem:[%s3902_s0 + $0xd0] sm:$0xff]  ;;  %v2858_v42 = vld [vmem:[%s3901_s1 + $0x300] ss:$8 sps:$4 sm:$0xff]  }
  0x8d   :  { %2078 = vmatprep.subr.bf16.mxu0 %v2785_v49  ;;  %1892 = vmatprep.mubr.bf16.mxu1 %v2215_v50  ;;  %v36_v48 = vld [vmem:[%s3902_s0 + $0xb0] sm:$0xff]  ;;  %v2861_v45 = vld [vmem:[%s3901_s1 + $0x700] ss:$8 sps:$4 sm:$0xff]   ;;  %v2231_v50 = vcombine.high %v32_v40, %v40_v44 }
  0x8e   :  { %2104 = vmatprep.mubr.bf16.mxu0 %v2223_v51  ;;  %v44_v49 = vld [vmem:[%s3902_s0 + $0xf0] sm:$0xff] }
  0x8f   :  { %1867 = vmatpush1.bf16.msra.mxu1 %v2780_v52  ;;  %v2869_v47 = vld [vmem:[%s3901_s1 + $0x714] ss:$8 sps:$4 sm:$0xff]   ;;  %v2239_v51 = vcombine.high %v36_v48, %v44_v49  ;;  %v2864_v52 = vld [vmem:[%s3901_s1 + $0x310] ss:$8 sps:$4 sm:$0xff]  }
  0x90   :  { %2079 = vmatpush1.bf16.msra.mxu0 %v2783_v53  ;;  %1868 = vmatprep.subr.bf16.mxu1 %v2788_v54  ;;  %v2867_v53 = vld [vmem:[%s3901_s1 + $0x710] ss:$8 sps:$4 sm:$0xff]   ;;  %v2872_v54 = vld [vmem:[%s3901_s1 + $0x324] ss:$8 sps:$4 sm:$0xff]  }
  0x91   :  { %2080 = vmatprep.subr.bf16.mxu0 %v2791_v55  ;;  %v2875_v55 = vld [vmem:[%s3901_s1 + $0x724] ss:$8 sps:$4 sm:$0xff]  }
  0x93   :  { %1869 = vmatpush1.bf16.msra.mxu1 %v2786_v56  ;;  %v3687_v56 = vld [vmem:[%s3902_s0 + $0x18] sm:$0xff] }
  0x94   :  { %2081 = vmatpush1.bf16.msra.mxu0 %v2789_v57  ;;  %1870 = vmatprep.subr.bf16.mxu1 %v2794_v58  ;;  %v2230_v57 = vcombine.low %v32_v40, %v40_v44  ;;  %v2238_v58 = vcombine.low %v36_v48, %v44_v49  ;;  %v2930_v40 = vld [vmem:[%s3901_s1 + $0x3c0] ss:$8 sps:$4 sm:$0xff]   ;;  %v2941_v44 = vld [vmem:[%s3901_s1 + $0x7d4] ss:$8 sps:$4 sm:$0xff]   ;;  %v2936_v48 = vld [vmem:[%s3901_s1 + $0x3d0] ss:$8 sps:$4 sm:$0xff]  }
  0x95   :  { %2082 = vmatprep.subr.bf16.mxu0 %v2797_v59  ;;  %v3692_v59 = vld [vmem:[%s3902_s0 + $0x58] sm:$0xff] }
  0x96   :  { %v2939_v49 = vld [vmem:[%s3901_s1 + $0x7d0] ss:$8 sps:$4 sm:$0xff]  }
  0x97   :  { %1871 = vmatpush1.bf16.msra.mxu1 %v2792_v60  ;;  %v3697_v60 = vld [vmem:[%s3902_s0 + $0x38] sm:$0xff] }
  0x98   :  { %2083 = vmatpush1.bf16.msra.mxu0 %v2795_v61  ;;  %1872 = vmatprep.subr.bf16.mxu1 %v2800_v62  ;;  %v3702_v61 = vld [vmem:[%s3902_s0 + $0x78] sm:$0xff]  ;;  %v2870_v62 = vld [vmem:[%s3901_s1 + $0x320] ss:$8 sps:$4 sm:$0xff]  }
  0x99   :  { %2084 = vmatprep.subr.bf16.mxu0 %v2803_v63  ;;  %v2873_v63 = vld [vmem:[%s3901_s1 + $0x720] ss:$8 sps:$4 sm:$0xff]  }
  0x9b   :  { %1873 = vmatpush1.bf16.msra.mxu1 %v2798_v0  ;;  %v2878_v0 = vld [vmem:[%s3901_s1 + $0x334] ss:$8 sps:$4 sm:$0xff]  }
  0x9c   :  { %2085 = vmatpush1.bf16.msra.mxu0 %v2801_v1  ;;  %1874 = vmatprep.subr.bf16.mxu1 %v2806_v2  ;;  %v2881_v1 = vld [vmem:[%s3901_s1 + $0x734] ss:$8 sps:$4 sm:$0xff]   ;;  %v2217_v2 = vcombine.high %v3687_v56, %v3692_v59 }
  0x9d   :  { %2086 = vmatprep.subr.bf16.mxu0 %v2809_v3  ;;  %v2225_v3 = vcombine.high %v3697_v60, %v3702_v61 }
  0x9f   :  { %1875 = vmatpush1.bf16.msra.mxu1 %v2804_v4  ;;  %v2876_v4 = vld [vmem:[%s3901_s1 + $0x330] ss:$8 sps:$4 sm:$0xff]  }
  0xa0   :  { %2087 = vmatpush1.bf16.msra.mxu0 %v2807_v5  ;;  %1876 = vmatprep.subr.bf16.mxu1 %v2812_v6  ;;  %v2879_v5 = vld [vmem:[%s3901_s1 + $0x730] ss:$8 sps:$4 sm:$0xff]   ;;  %v2884_v6 = vld [vmem:[%s3901_s1 + $0x344] ss:$8 sps:$4 sm:$0xff]  }
  0xa1   :  { %2088 = vmatprep.subr.bf16.mxu0 %v2815_v7  ;;  %v2887_v7 = vld [vmem:[%s3901_s1 + $0x744] ss:$8 sps:$4 sm:$0xff]  }
  0xa3   :  { %1877 = vmatpush1.bf16.msra.mxu1 %v2810_v8  ;;  %v2882_v8 = vld [vmem:[%s3901_s1 + $0x340] ss:$8 sps:$4 sm:$0xff]  }
  0xa4   :  { %2089 = vmatpush1.bf16.msra.mxu0 %v2813_v9  ;;  %1878 = vmatprep.subr.bf16.mxu1 %v2818_v10  ;;  %v2885_v9 = vld [vmem:[%s3901_s1 + $0x740] ss:$8 sps:$4 sm:$0xff]   ;;  %v2890_v10 = vld [vmem:[%s3901_s1 + $0x354] ss:$8 sps:$4 sm:$0xff]  }
  0xa5   :  { %2090 = vmatprep.subr.bf16.mxu0 %v2821_v11  ;;  %v2893_v11 = vld [vmem:[%s3901_s1 + $0x754] ss:$8 sps:$4 sm:$0xff]  }
  0xa7   :  { %1879 = vmatpush1.bf16.msra.mxu1 %v2816_v12  ;;  %v2888_v12 = vld [vmem:[%s3901_s1 + $0x350] ss:$8 sps:$4 sm:$0xff]  }
  0xa8   :  { %2091 = vmatpush1.bf16.msra.mxu0 %v2819_v13  ;;  %1880 = vmatprep.subr.bf16.mxu1 %v2824_v14  ;;  %v2891_v13 = vld [vmem:[%s3901_s1 + $0x750] ss:$8 sps:$4 sm:$0xff]   ;;  %v2896_v14 = vld [vmem:[%s3901_s1 + $0x364] ss:$8 sps:$4 sm:$0xff]  }
  0xa9   :  { %2092 = vmatprep.subr.bf16.mxu0 %v2827_v15  ;;  %v2899_v15 = vld [vmem:[%s3901_s1 + $0x764] ss:$8 sps:$4 sm:$0xff]  }
  0xab   :  { %1881 = vmatpush1.bf16.msra.mxu1 %v2822_v16  ;;  %v2894_v16 = vld [vmem:[%s3901_s1 + $0x360] ss:$8 sps:$4 sm:$0xff]  }
  0xac   :  { %2093 = vmatpush1.bf16.msra.mxu0 %v2825_v17  ;;  %1882 = vmatprep.subr.bf16.mxu1 %v2830_v18  ;;  %v2897_v17 = vld [vmem:[%s3901_s1 + $0x760] ss:$8 sps:$4 sm:$0xff]   ;;  %v2902_v18 = vld [vmem:[%s3901_s1 + $0x374] ss:$8 sps:$4 sm:$0xff]  }
  0xad   :  { %2094 = vmatprep.subr.bf16.mxu0 %v2833_v19  ;;  %v2905_v19 = vld [vmem:[%s3901_s1 + $0x774] ss:$8 sps:$4 sm:$0xff]  }
  0xaf   :  { %1883 = vmatpush1.bf16.msra.mxu1 %v2828_v20  ;;  %v2900_v20 = vld [vmem:[%s3901_s1 + $0x370] ss:$8 sps:$4 sm:$0xff]  }
  0xb0   :  { %2095 = vmatpush1.bf16.msra.mxu0 %v2831_v21  ;;  %1884 = vmatprep.subr.bf16.mxu1 %v2836_v22  ;;  %v2903_v21 = vld [vmem:[%s3901_s1 + $0x770] ss:$8 sps:$4 sm:$0xff]   ;;  %v2908_v22 = vld [vmem:[%s3901_s1 + $0x384] ss:$8 sps:$4 sm:$0xff]  }
  0xb1   :  { %2096 = vmatprep.subr.bf16.mxu0 %v2839_v23  ;;  %v2911_v23 = vld [vmem:[%s3901_s1 + $0x784] ss:$8 sps:$4 sm:$0xff]  }
  0xb3   :  { %1885 = vmatpush1.bf16.msra.mxu1 %v2834_v24  ;;  %v2906_v24 = vld [vmem:[%s3901_s1 + $0x380] ss:$8 sps:$4 sm:$0xff]  }
  0xb4   :  { %2097 = vmatpush1.bf16.msra.mxu0 %v2837_v25  ;;  %1886 = vmatprep.subr.bf16.mxu1 %v2842_v26  ;;  %v2909_v25 = vld [vmem:[%s3901_s1 + $0x780] ss:$8 sps:$4 sm:$0xff]   ;;  %v2914_v26 = vld [vmem:[%s3901_s1 + $0x394] ss:$8 sps:$4 sm:$0xff]  }
  0xb5   :  { %2098 = vmatprep.subr.bf16.mxu0 %v2845_v27  ;;  %v2917_v27 = vld [vmem:[%s3901_s1 + $0x794] ss:$8 sps:$4 sm:$0xff]  }
  0xb7   :  { %1887 = vmatpush1.bf16.msra.mxu1 %v2840_v28  ;;  %v2912_v28 = vld [vmem:[%s3901_s1 + $0x390] ss:$8 sps:$4 sm:$0xff]  }
  0xb8   :  { %2099 = vmatpush1.bf16.msra.mxu0 %v2843_v29  ;;  %1888 = vmatprep.subr.bf16.mxu1 %v2848_v30  ;;  %v2915_v29 = vld [vmem:[%s3901_s1 + $0x790] ss:$8 sps:$4 sm:$0xff]   ;;  %v2920_v30 = vld [vmem:[%s3901_s1 + $0x3a4] ss:$8 sps:$4 sm:$0xff]  }
  0xb9   :  { %2100 = vmatprep.subr.bf16.mxu0 %v2851_v31  ;;  %v2923_v31 = vld [vmem:[%s3901_s1 + $0x7a4] ss:$8 sps:$4 sm:$0xff]  }
  0xbb   :  { %1889 = vmatpush1.bf16.msra.mxu1 %v2846_v32  ;;  %v2918_v32 = vld [vmem:[%s3901_s1 + $0x3a0] ss:$8 sps:$4 sm:$0xff]  }
  0xbc   :  { %2101 = vmatpush1.bf16.msra.mxu0 %v2849_v33  ;;  %1890 = vmatprep.subr.bf16.mxu1 %v2854_v34  ;;  %v2921_v33 = vld [vmem:[%s3901_s1 + $0x7a0] ss:$8 sps:$4 sm:$0xff]   ;;  %v2926_v34 = vld [vmem:[%s3901_s1 + $0x3b4] ss:$8 sps:$4 sm:$0xff]  }
  0xbd   :  { %2102 = vmatprep.subr.bf16.mxu0 %v2857_v35  ;;  %v2929_v35 = vld [vmem:[%s3901_s1 + $0x7b4] ss:$8 sps:$4 sm:$0xff]  }
  0xbf   :  { %1891 = vmatpush1.bf16.msra.mxu1 %v2852_v36  ;;  %v2924_v36 = vld [vmem:[%s3901_s1 + $0x3b0] ss:$8 sps:$4 sm:$0xff]  }
  0xc0   :  { %2103 = vmatpush1.bf16.msra.mxu0 %v2855_v37  ;;  %1913 = vmatprep.subr.bf16.mxu1 %v2860_v38  ;;  %v2927_v37 = vld [vmem:[%s3901_s1 + $0x7b0] ss:$8 sps:$4 sm:$0xff]   ;;  %v2932_v38 = vld [vmem:[%s3901_s1 + $0x3c4] ss:$8 sps:$4 sm:$0xff]  }
  0xc1   :  { %2125 = vmatprep.subr.bf16.mxu0 %v2863_v39  ;;  %v2935_v39 = vld [vmem:[%s3901_s1 + $0x7c4] ss:$8 sps:$4 sm:$0xff]  }
  0xc2   :  { %1893 = vmatmul.mubr.bf16.vlgmr.msra.gmra.mrb[0].mxu1 %v2214_v41  ;;  %v2933_v41 = vld [vmem:[%s3901_s1 + $0x7c0] ss:$8 sps:$4 sm:$0xff]  }
  0xc3   :  { %2105 = vmatmul.mubr.bf16.vlgmr.msra.gmra.mrb[0].mxu0 %v2222_v43  ;;  %1914 = vmatpush1.bf16.msra.mxu1 %v2858_v42  ;;  %v2938_v43 = vld [vmem:[%s3901_s1 + $0x3d4] ss:$8 sps:$4 sm:$0xff]   ;;  %v2944_v42 = vld [vmem:[%s3901_s1 + $0x3e4] ss:$8 sps:$4 sm:$0xff]  }
  0xc4   :  { %2126 = vmatpush1.bf16.msra.mxu0 %v2861_v45  ;;  %1915 = vmatprep.subr.bf16.mxu1 %v2866_v46  ;;  %v2947_v45 = vld [vmem:[%s3901_s1 + $0x7e4] ss:$8 sps:$4 sm:$0xff]   ;;  %v2942_v46 = vld [vmem:[%s3901_s1 + $0x3e0] ss:$8 sps:$4 sm:$0xff]  }
  0xc5   :  { %2127 = vmatprep.subr.bf16.mxu0 %v2869_v47  ;;  %1902 = vmatprep.mubr.bf16.mxu1 %v2231_v50  ;;  %v2945_v47 = vld [vmem:[%s3901_s1 + $0x7e0] ss:$8 sps:$4 sm:$0xff]   ;;  %v2950_v50 = vld [vmem:[%s3901_s1 + $0x3f4] ss:$8 sps:$4 sm:$0xff]  }
  0xc6   :  { %2114 = vmatprep.mubr.bf16.mxu0 %v2239_v51  ;;  %v2953_v51 = vld [vmem:[%s3901_s1 + $0x7f4] ss:$8 sps:$4 sm:$0xff]  }
  0xc7   :  { %1916 = vmatpush1.bf16.msra.mxu1 %v2864_v52  ;;  %v2948_v52 = vld [vmem:[%s3901_s1 + $0x3f0] ss:$8 sps:$4 sm:$0xff]  }
  0xc8   :  { %2128 = vmatpush1.bf16.msra.mxu0 %v2867_v53  ;;  %1917 = vmatprep.subr.bf16.mxu1 %v2872_v54  ;;  %v2951_v53 = vld [vmem:[%s3901_s1 + $0x7f0] ss:$8 sps:$4 sm:$0xff]  }
  0xc9   :  { %2129 = vmatprep.subr.bf16.mxu0 %v2875_v55  ;;  %v33_v54 = vld [vmem:[%s3902_s0 + $0x98] sm:$0xff] }
  0xca   :  { %1903 = vmatmul.mubr.bf16.gmra.mrb[4].mxu1 %v2230_v57  ;;  %v41_v55 = vld [vmem:[%s3902_s0 + $0xd8] sm:$0xff] }
  0xcb   :  { %2115 = vmatmul.mubr.bf16.gmra.mrb[4].mxu0 %v2238_v58  ;;  %1918 = vmatpush1.bf16.msra.mxu1 %v2870_v62  ;;  %v37_v57 = vld [vmem:[%s3902_s0 + $0xb8] sm:$0xff]  ;;  %v2216_v62 = vcombine.low %v3687_v56, %v3692_v59  ;;  %v302_v56 = vld [vmem:[%s3903_s2] sm:$0x3] }
  0xcc   :  { %2130 = vmatpush1.bf16.msra.mxu0 %v2873_v63  ;;  %1919 = vmatprep.subr.bf16.mxu1 %v2878_v0  ;;  %v45_v58 = vld [vmem:[%s3902_s0 + $0xf8] sm:$0xff]  ;;  %v2224_v63 = vcombine.low %v3697_v60, %v3702_v61  ;;  %v2233_v0 = vcombine.high %v33_v54, %v41_v55 }
  0xcd   :  { %2131 = vmatprep.subr.bf16.mxu0 %v2881_v1  ;;  %1945 = vmatprep.mubr.bf16.mxu1 %v2217_v2  ;;  %v2241_v1 = vcombine.high %v37_v57, %v45_v58  ;;  %v2232_v2 = vcombine.low %v33_v54, %v41_v55 }
  0xce   :  { %2157 = vmatprep.mubr.bf16.mxu0 %v2225_v3  ;;  %v2240_v3 = vcombine.low %v37_v57, %v45_v58 }
  0xcf   :  { %1920 = vmatpush1.bf16.msra.mxu1 %v2876_v4  ;;  %v304_v4 = vlaneseq }
  0xd0   :  { %2132 = vmatpush1.bf16.msra.mxu0 %v2879_v5  ;;  %1921 = vmatprep.subr.bf16.mxu1 %v2884_v6 }
  0xd1   :  { %2133 = vmatprep.subr.bf16.mxu0 %v2887_v7  ;;  %v305_v5 = vshrl.u32 %v304_v4, 7 }
  0xd3   :  { %1922 = vmatpush1.bf16.msra.mxu1 %v2882_v8  ;;  %v306_v6 = vsub.s32 0, %v305_v5  ;;  %v310_v59 = vsub.s32 1, %v305_v5 }
  0xd4   :  { %2134 = vmatpush1.bf16.msra.mxu0 %v2885_v9  ;;  %1923 = vmatprep.subr.bf16.mxu1 %v2890_v10 }
  0xd5   :  { %2135 = vmatprep.subr.bf16.mxu0 %v2893_v11  ;;  %v307_v60 = vrot.slane %v302_v56, %v306_v6  ;;  %v311_v61 = vrot.slane %v302_v56, %v310_v59 }
  0xd7   :  { %1924 = vmatpush1.bf16.msra.mxu1 %v2888_v12 }
  0xd8   :  { %2136 = vmatpush1.bf16.msra.mxu0 %v2891_v13  ;;  %1925 = vmatprep.subr.bf16.mxu1 %v2896_v14 }
  0xd9   :  { %2137 = vmatprep.subr.bf16.mxu0 %v2899_v15 }
  0xdb   :  { %1926 = vmatpush1.bf16.msra.mxu1 %v2894_v16 }
  0xdc   :  { %2138 = vmatpush1.bf16.msra.mxu0 %v2897_v17  ;;  %1927 = vmatprep.subr.bf16.mxu1 %v2902_v18 }
  0xdd   :  { %2139 = vmatprep.subr.bf16.mxu0 %v2905_v19 }
  0xdf   :  { %1928 = vmatpush1.bf16.msra.mxu1 %v2900_v20 }
  0xe0   :  { %2140 = vmatpush1.bf16.msra.mxu0 %v2903_v21  ;;  %1929 = vmatprep.subr.bf16.mxu1 %v2908_v22 }
  0xe1   :  { %2141 = vmatprep.subr.bf16.mxu0 %v2911_v23 }
  0xe3   :  { %1930 = vmatpush1.bf16.msra.mxu1 %v2906_v24 }
  0xe4   :  { %2142 = vmatpush1.bf16.msra.mxu0 %v2909_v25  ;;  %1931 = vmatprep.subr.bf16.mxu1 %v2914_v26 }
  0xe5   :  { %2143 = vmatprep.subr.bf16.mxu0 %v2917_v27 }
  0xe7   :  { %1932 = vmatpush1.bf16.msra.mxu1 %v2912_v28 }
  0xe8   :  { %2144 = vmatpush1.bf16.msra.mxu0 %v2915_v29  ;;  %1933 = vmatprep.subr.bf16.mxu1 %v2920_v30 }
  0xe9   :  { %2145 = vmatprep.subr.bf16.mxu0 %v2923_v31 }
  0xeb   :  { %1934 = vmatpush1.bf16.msra.mxu1 %v2918_v32 }
  0xec   :  { %2146 = vmatpush1.bf16.msra.mxu0 %v2921_v33  ;;  %1935 = vmatprep.subr.bf16.mxu1 %v2926_v34 }
  0xed   :  { %2147 = vmatprep.subr.bf16.mxu0 %v2929_v35 }
  0xef   :  { %1936 = vmatpush1.bf16.msra.mxu1 %v2924_v36 }
  0xf0   :  { %2148 = vmatpush1.bf16.msra.mxu0 %v2927_v37  ;;  %1937 = vmatprep.subr.bf16.mxu1 %v2932_v38 }
  0xf1   :  { %2149 = vmatprep.subr.bf16.mxu0 %v2935_v39 }
  0xf3   :  { %1938 = vmatpush1.bf16.msra.mxu1 %v2930_v40 }
  0xf4   :  { %2150 = vmatpush1.bf16.msra.mxu0 %v2933_v41  ;;  %1939 = vmatprep.subr.bf16.mxu1 %v2938_v43 }
  0xf5   :  { %2151 = vmatprep.subr.bf16.mxu0 %v2941_v44 }
  0xf7   :  { %1940 = vmatpush1.bf16.msra.mxu1 %v2936_v48 }
  0xf8   :  { %2152 = vmatpush1.bf16.msra.mxu0 %v2939_v49  ;;  %1941 = vmatprep.subr.bf16.mxu1 %v2944_v42 }
  0xf9   :  { %2153 = vmatprep.subr.bf16.mxu0 %v2947_v45 }
  0xfb   :  { %1942 = vmatpush1.bf16.msra.mxu1 %v2942_v46 }
  0xfc   :  { %2154 = vmatpush1.bf16.msra.mxu0 %v2945_v47  ;;  %1943 = vmatprep.subr.bf16.mxu1 %v2950_v50 }
  0xfd   :  { %2155 = vmatprep.subr.bf16.mxu0 %v2953_v51 }
  0xff   :  { %1944 = vmatpush1.bf16.msra.mxu1 %v2948_v52 }
 0x100   :  { %2156 = vmatpush1.bf16.msra.mxu0 %v2951_v53 }
 0x102   :  { %1946 = vmatmul.mubr.bf16.vlgmr.msra.gmra.mrb[0].mxu1 %v2216_v62 }
 0x103   :  { %2158 = vmatmul.mubr.bf16.vlgmr.msra.gmra.mrb[0].mxu0 %v2224_v63  ;;  %1955 = vmatprep.mubr.bf16.mxu1 %v2233_v0 }
 0x104   :  { %2167 = vmatprep.mubr.bf16.mxu0 %v2241_v1 }
 0x10a   :  { %1956 = vmatmul.mubr.bf16.gmra.mrb[4].mxu1 %v2232_v2 }
 0x10b   :  { %2168 = vmatmul.mubr.bf16.gmra.mrb[4].mxu0 %v2240_v3 }
 0x1d5   :  { %v1947_v7 = vpop.f32.mrb[0].mxu1 }
 0x1d6   :  { %v2159_v8 = vpop.f32.mrb[0].mxu0  ;;  %v2506_v9 = vadd.f32 %v1947_v7, %v307_v60  ;;  %v1949_v10 = vpop.f32.mrb[1].mxu1 }
 0x1d7   :  { %v2161_v11 = vpop.f32.mrb[1].mxu0  ;;  %v2508_v12 = vadd.f32 %v1949_v10, %v311_v61  ;;  %v1951_v13 = vpop.f32.mrb[2].mxu1 }
 0x1d8   :  { %v2163_v14 = vpop.f32.mrb[2].mxu0  ;;  %v2507_v15 = vadd.f32 %v2506_v9, %v2159_v8  ;;  %v2510_v16 = vadd.f32 %v1951_v13, %v307_v60  ;;  %v1953_v17 = vpop.f32.mrb[3].mxu1 }
 0x1d9   :  { %v2165_v18 = vpop.f32.mrb[3].mxu0  ;;  %v2509_v19 = vadd.f32 %v2508_v12, %v2161_v11  ;;  %v2512_v20 = vadd.f32 %v1953_v17, %v311_v61 }
 0x1da   :  { %v2511_v21 = vadd.f32 %v2510_v16, %v2163_v14 }
 0x1db   :  { %v2502_v22 = vpack.c.bf16 %v2509_v19, %v2507_v15  ;;  %v2513_v23 = vadd.f32 %v2512_v20, %v2165_v18 }
 0x1dd   :  { %2202 = vst [vmem:[%s3904_s3] sm:$0xff] %v2502_v22  ;;  %v2503_v24 = vpack.c.bf16 %v2513_v23, %v2511_v21  ;;  %v1957_v25 = vpop.f32.mrb[4].mxu1 }
 0x1de   :  { %v2169_v26 = vpop.f32.mrb[4].mxu0  ;;  %v2514_v27 = vadd.f32 %v1957_v25, %v307_v60  ;;  %v1959_v28 = vpop.f32.mrb[5].mxu1 }
 0x1df   :  { %v2171_v29 = vpop.f32.mrb[5].mxu0  ;;  %2203 = vst [vmem:[%s3904_s3 + $0x8] sm:$0xff] %v2503_v24  ;;  %v2516_v30 = vadd.f32 %v1959_v28, %v311_v61  ;;  %v1961_v31 = vpop.f32.mrb[6].mxu1 }
 0x1e0   :  { %v2173_v32 = vpop.f32.mrb[6].mxu0  ;;  %v2515_v33 = vadd.f32 %v2514_v27, %v2169_v26  ;;  %v2518_v34 = vadd.f32 %v1961_v31, %v307_v60  ;;  %v1963_v35 = vpop.f32.mrb[7].mxu1 }
 0x1e1   :  { %v2175_v36 = vpop.f32.mrb[7].mxu0  ;;  %v2517_v37 = vadd.f32 %v2516_v30, %v2171_v29  ;;  %v2520_v38 = vadd.f32 %v1963_v35, %v311_v61 }
 0x1e2   :  { %v2519_v39 = vadd.f32 %v2518_v34, %v2173_v32 }
 0x1e3   :  { %v2504_v40 = vpack.c.bf16 %v2517_v37, %v2515_v33  ;;  %v2521_v41 = vadd.f32 %v2520_v38, %v2175_v36 }
 0x1e5   :  { %2204 = vst [vmem:[%s3904_s3 + $0x10] sm:$0xff] %v2504_v40  ;;  %v2505_v43 = vpack.c.bf16 %v2521_v41, %v2519_v39 }
 0x1e7   :  { %2205 = vst [vmem:[%s3904_s3 + $0x18] sm:$0xff] %v2505_v43 }

// kernel: discriminator_forward.14
= control target key start
LH: loop header
LB: loop body
LE: loop exit
PB: predicated region body
PF: predicated region fallthrough
CT: control target
= control target key end

     0   :  { %s498_s6 = smov 0   ;;  %s500_s7 = smov 0   ;;  %s601_s0 = inlined_call_operand.vmem [shape: bf16[2,9,512], index: 0, kind: input, shape index: {}]   ;;  %s602_s1 = inlined_call_operand.vmem [shape: bf16[2,9,512], index: 1, kind: output, shape index: {}]  }
   0x1   :  { %s502_s8 = smov 0   ;;  %s504_s9 = smov 0  }
   0x2   :  { %s506_s10 = smov 0   ;;  %s508_s11 = smov 0  }
   0x3   :  { %s510_s12 = smov 0  }
   0x4 LB: > { %s20_s13 = sadd.s32 1, %s478_s10  ;;  %s23_s14 = sadd.s32 1, %s482_s11  ;;  %s486_s12 = sphi %s510_s12, %s11_s12   ;;  %s482_s11 = sphi %s508_s11, %s609_s11   ;;  %s478_s10 = sphi %s506_s10, %s608_s10   ;;  %s474_s9 = sphi %s504_s9, %s607_s9   ;;  %s470_s8 = sphi %s502_s8, %s606_s8   ;;  %s466_s7 = sphi %s500_s7, %s605_s7   ;;  %s462_s6 = sphi %s498_s6, %s604_s6  }
   0x5   : > { %p21_p0 = scmp.ge.s32.totalorder %s20_s13, 4  ;;  %s355_s15 = sadd.s32 4294967295, %s486_s12  }
   0x6   : > { %p39_p1 = scmp.ne.s32.totalorder %s466_s7, %s462_s6  ;;  %p40_p2 = scmp.eq.s32.totalorder %s486_s12, 0 }
   0x7   : > { %s611_s13 = smov (%p21_p0, %s20_s13), 0  ;;  %s613_s14 = smov (!%p21_p0, %s23_s14), %s482_s11 }
   0x8   : > { %p25_p3 = scmp.ge.s32.totalorder %s613_s14, 2  ;;  %p71_p4 = scmp.eq.s32.totalorder %s355_s15, 7 }
   0x9   : > { %s28_s16 = ssub.s32 %s478_s10, %s611_s13  ;;  %p41_p5 = por %p40_p2, %p39_p1 }
   0xa   : > { %s615_s14 = smov (%p25_p3, %s613_s14), 0  ;;  %p546_p6 = por %p71_p4, %p39_p1 }
   0xb   : > { %s27_s18 = ssub.s32 %s482_s11, %s615_s14  ;;  %s32_s20 = sadd.s32 1, %s466_s7 }
   0xc   : > { %s29_s19 = sor.u32 %s28_s16, %s27_s18  ;;  %p358_p8 = scmp.ge.s32.totalorder %s486_s12, 8 }
   0xd   : > { %p30_p7 = scmp.eq.s32.totalorder %s29_s19, 0 }
   0xe   : > { %93 = sbr.rel (%p358_p8) target bundleno = 28 (0x1c), region = 16 }
   0xf   : > { %s554_s21 = scalar_select %p30_p7, %s466_s7, %s32_s20  }
  0x15   : > { %96 = sbr.rel (!%p41_p5) target bundleno = 28 (0x1c), region = 20  ;;  %s98_s22 = sand.u32 (%p41_p5), 1, %s466_s7  }
  0x16   : > { %s360_s23 = sshll.u32 (%p41_p5), %s482_s11, 3  ;;  %s359_s24 = sshll.u32 (%p41_p5), %s98_s22, 3 }
  0x17   : > { %s102_s25 = sadd.s32 (%p41_p5), %s478_s10, %s360_s23  ;;  %s100_s30 = scalar_lea.vmem (%p41_p5), [#allocation2], %s359_s24 }
  0x18   : > { %s361_s26 = sshll.u32 (%p41_p5), %s102_s25, 2 }
  0x19   : > { %s104_s29 = scalar_lea.vmem (%p41_p5), %s601_s0, %s361_s26 }
  0x1a   : > { %v120_v0 = vld [vmem:[%s104_s29] sm:$0xf] (%p41_p5)  ;;  %v122_v1 = vld [vmem:[%s104_s29 + $0x10] sm:$0xf] (%p41_p5) }
  0x1b   : > { %121 = vst [vmem:[%s100_s30] sm:$0xf] (%p41_p5), %v120_v0  ;;  %123 = vst [vmem:[%s100_s30 + $0x4] sm:$0xf] (%p41_p5), %v122_v1 }
  0x1c PF: > { %p362_p9 = scmp.ge.s32.totalorder %s486_s12, 1  ;;  %p149_p10 = scmp.lt.s32.totalorder %s486_s12, 9 }
  0x1e   : > { %p150_p11 = pnand %p362_p9, %p149_p10 }
  0x1f   : > { %s156_s2 = sand.u32 (!%p150_p11), 1, %s462_s6   ;;  %vm178_vm0 = vcmask (!%p150_p11), 1040384   ;;  %vm224_vm1 = vsmask.f32 (!%p150_p11), 256 }
  0x20   : > { %153 = sbr.rel (%p150_p11) target bundleno = 90 (0x5a), region = 61  ;;  %s566_s3 = sshll.u32 (!%p150_p11), %s156_s2, 3  ;;  %vm225_vm4 = vmand (!%p150_p11), %vm178_vm0, %vm224_vm1 }
  0x21   : > { %s158_s4 = scalar_lea.vmem (!%p150_p11), [#allocation2], %s566_s3  ;;  %s173_s5 = scalar_lea.vmem (!%p150_p11), [#allocation3], %s566_s3 }
  0x22   : > { %v174_v2 = vld [vmem:[%s158_s4] sm:$0xf] (!%p150_p11)  ;;  %v175_v3 = vld [vmem:[%s158_s4 + $0x4] sm:$0x1] (!%p150_p11)  ;;  %v226_v39 = vld [vmem:[%s173_s5 + $0x4] sm:$0x1] (!%p150_p11) }
  0x23   : > { %v176_v4 = vunpack.c.l.bf16 (!%p150_p11), %v174_v2  ;;  %v177_v5 = vunpack.c.l.bf16 (!%p150_p11), %v175_v3 }
  0x25   : > { %v179_v6 = vsel (!%p150_p11), %vm178_vm0, %v177_v5, 0.0  ;;  %v187_v7 = vmul.f32 (!%p150_p11), %v176_v4, %v176_v4  ;;  %v188_v8 = vmul.f32 (!%p150_p11), %v177_v5, %v177_v5 }
  0x26   : > { %v180_v9 = vadd.f32 (!%p150_p11), %v179_v6, %v176_v4 }
  0x27   : > { %v189_v10 = vsel %vm178_vm0, %v188_v8, 0.0  ;;  %s368_s6 = sshll.u32 (%p546_p6), %s474_s9, 3 }
  0x28   : > { %v181_v11 = vrot.slane %v180_v9, 4  ;;  %v190_v12 = vadd.f32 %v189_v10, %v187_v7  ;;  %s237_s15 = sadd.s32 (%p546_p6), %s470_s8, %s368_s6 }
  0x29   : > { %s369_s16 = sshll.u32 (%p546_p6), %s237_s15, 2 }
  0x2a   : > { %v182_v13 = vadd.f32 %v181_v11, %v180_v9  ;;  %v191_v14 = vrot.slane %v190_v12, 4  ;;  %s239_s20 = scalar_lea.vmem (%p546_p6), %s602_s1, %s369_s16 }
  0x2c   : > { %v183_v15 = vrot.slane %v182_v13, 2  ;;  %v192_v16 = vadd.f32 %v191_v14, %v190_v12 }
  0x2e   : > { %v184_v17 = vadd.f32 %v183_v15, %v182_v13  ;;  %v193_v18 = vrot.slane %v192_v16, 2 }
  0x30   : > { %v185_v19 = vrot.slane %v184_v17, 1  ;;  %v194_v20 = vadd.f32 %v193_v18, %v192_v16 }
  0x32   : > { %v186_v21 = vadd.f32 %v185_v19, %v184_v17  ;;  %v195_v22 = vrot.slane %v194_v20, 1 }
  0x34   : > { %v196_v23 = vadd.f32 %v195_v22, %v194_v20  ;;  %v197_v24 = vmul.f32 0.11111111, %v186_v21 }
  0x36   : > { %v198_v25 = vmul.f32 0.11111111, %v196_v23  ;;  %v199_v26 = vmul.f32 %v197_v24, %v197_v24  ;;  %v202_v30 = vsub.f32 %v176_v4, %v197_v24  ;;  %v203_v31 = vsub.f32 %v177_v5, %v197_v24 }
  0x38   : > { %v200_v27 = vsub.f32 %v198_v25, %v199_v26 }
  0x3a   : > { %v201_v28 = vmax.f32 %v200_v27, 0.0 }
  0x3c   : > { %v204_v29 = vadd.f32 1e-05, %v201_v28 }
  0x3e   : > { %430 = vrsqrt.f32 %v204_v29 }
  0x48   : > { %v431_v32 = vpop.eup %430 }
  0x49   : > { %v206_v33 = vmul.f32 %v431_v32, %v202_v30  ;;  %v207_v34 = vmul.f32 %v431_v32, %v203_v31 }
  0x4b   : > { %vm208_vm2 = vcmp.gt.f32.partialorder %v206_v33, 0.0  ;;  %v210_v35 = vmul.f32 0.2, %v206_v33  ;;  %vm209_vm3 = vcmp.gt.f32.partialorder %v207_v34, 0.0  ;;  %v211_v36 = vmul.f32 0.2, %v207_v34 }
  0x4c   : > { %235 = sbr.rel (!%p546_p6) target bundleno = 90 (0x5a), region = 69 }
  0x4d   : > { %v212_v37 = vsel %vm208_vm2, %v206_v33, %v210_v35  ;;  %v213_v38 = vsel %vm209_vm3, %v207_v34, %v211_v36 }
  0x4e   : > { %v372_v40 = vpack.c.bf16 %v212_v37, %v212_v37  ;;  %v373_v41 = vpack.c.bf16 %v213_v38, %v213_v38 }
  0x50   : > { %222 = vst [vmem:[%s173_s5] sm:$0xf] %v372_v40  ;;  %v227_v42 = vsel %vm225_vm4, %v373_v41, %v226_v39 }
  0x51   : > { %228 = vst [vmem:[%s173_s5 + $0x4] sm:$0x1] %v227_v42 }
  0x57   : > { %v255_v43 = vld [vmem:[%s173_s5] sm:$0xf] }
  0x58   : > { %v257_v44 = vld [vmem:[%s173_s5 + $0x4] sm:$0xf]  ;;  %256 = vst [vmem:[%s239_s20] sm:$0xf] %v255_v43 }
  0x59   : > { %258 = vst [vmem:[%s239_s20 + $0x10] sm:$0xf] %v257_v44 }
  0x5a PF: > { %s11_s12 = sadd.s32 1, %s486_s12   ;;  %s604_s6 = smov %s466_s7 }
  0x5b   : > { %p8_p12 = scmp.ge.s32.totalorder %s11_s12, 10   ;;  %s605_s7 = smov %s554_s21 }
  0x5c   : > { %s606_s8 = smov %s478_s10  ;;  %s607_s9 = smov %s482_s11 }
  0x5d   : > { %s608_s10 = smov %s611_s13  ;;  %s609_s11 = smov %s615_s14 }
  0x5e   :  { %10 = sbr.rel (!%p8_p12) target bundleno = 4 (0x4), region = 141 }

// kernel: discriminator_forward.13
= control target key start
LH: loop header
LB: loop body
LE: loop exit
PB: predicated region body
PF: predicated region fallthrough
CT: control target
= control target key end

     0   :  { %s14647_s1 = inlined_call_operand.vmem [shape: bf16[4096,512], index: 1, kind: input, shape index: {}]   ;;  %s14648_s0 = inlined_call_operand.vmem [shape: bf16[32,4096], index: 0, kind: input, shape index: {}]   ;;  %s14649_s2 = inlined_call_operand.vmem [shape: f32[1,512], index: 2, kind: input, shape index: {}]   ;;  %s14650_s3 = inlined_call_operand.vmem [shape: bf16[32,512], index: 3, kind: output, shape index: {}]  }
   0x1   :  { %v9680_v0 = vld [vmem:[%s14647_s1 + $0x4] ss:$16 sps:$4 sm:$0xff]   ;;  %v9682_v1 = vld [vmem:[%s14647_s1 + $0xc] ss:$16 sps:$4 sm:$0xff]   ;;  %v9684_v2 = vld [vmem:[%s14647_s1] ss:$16 sps:$4 sm:$0xff]  }
   0x2   :  { %6564 = vmatprep.subr.bf16.mxu0 %v9680_v0  ;;  %v9685_v3 = vld [vmem:[%s14647_s1 + $0x8] ss:$16 sps:$4 sm:$0xff]   ;;  %7412 = vmatprep.subr.bf16.mxu1 %v9682_v1  ;;  %v9686_v4 = vld [vmem:[%s14647_s1 + $0x24] ss:$16 sps:$4 sm:$0xff]   ;;  %v9688_v5 = vld [vmem:[%s14647_s1 + $0x2c] ss:$16 sps:$4 sm:$0xff]  }
   0x3   :  { %6565 = vmatpush1.bf16.msra.mxu0 %v9684_v2  ;;  %7413 = vmatpush1.bf16.msra.mxu1 %v9685_v3  ;;  %v9690_v6 = vld [vmem:[%s14647_s1 + $0x20] ss:$16 sps:$4 sm:$0xff]   ;;  %v9691_v7 = vld [vmem:[%s14647_s1 + $0x28] ss:$16 sps:$4 sm:$0xff]   ;;  %v9692_v8 = vld [vmem:[%s14647_s1 + $0x44] ss:$16 sps:$4 sm:$0xff]  }
   0x4   :  { %6566 = vmatprep.subr.bf16.mxu0 %v9686_v4  ;;  %7414 = vmatprep.subr.bf16.mxu1 %v9688_v5  ;;  %v9694_v9 = vld [vmem:[%s14647_s1 + $0x4c] ss:$16 sps:$4 sm:$0xff]   ;;  %v9696_v10 = vld [vmem:[%s14647_s1 + $0x40] ss:$16 sps:$4 sm:$0xff]   ;;  %v9697_v11 = vld [vmem:[%s14647_s1 + $0x48] ss:$16 sps:$4 sm:$0xff]  }
   0x5   :  { %v9698_v12 = vld [vmem:[%s14647_s1 + $0x64] ss:$16 sps:$4 sm:$0xff]   ;;  %v9700_v13 = vld [vmem:[%s14647_s1 + $0x6c] ss:$16 sps:$4 sm:$0xff]   ;;  %v9702_v14 = vld [vmem:[%s14647_s1 + $0x60] ss:$16 sps:$4 sm:$0xff]  }
   0x6   :  { %v9703_v15 = vld [vmem:[%s14647_s1 + $0x68] ss:$16 sps:$4 sm:$0xff]   ;;  %v9704_v16 = vld [vmem:[%s14647_s1 + $0x84] ss:$16 sps:$4 sm:$0xff]   ;;  %v9706_v17 = vld [vmem:[%s14647_s1 + $0x8c] ss:$16 sps:$4 sm:$0xff]  }
   0x7   :  { %6567 = vmatpush1.bf16.msra.mxu0 %v9690_v6  ;;  %7415 = vmatpush1.bf16.msra.mxu1 %v9691_v7  ;;  %v9708_v18 = vld [vmem:[%s14647_s1 + $0x80] ss:$16 sps:$4 sm:$0xff]   ;;  %v9709_v19 = vld [vmem:[%s14647_s1 + $0x88] ss:$16 sps:$4 sm:$0xff]   ;;  %v9710_v20 = vld [vmem:[%s14647_s1 + $0xa4] ss:$16 sps:$4 sm:$0xff]  }
   0x8   :  { %6568 = vmatprep.subr.bf16.mxu0 %v9692_v8  ;;  %7416 = vmatprep.subr.bf16.mxu1 %v9694_v9  ;;  %v9712_v21 = vld [vmem:[%s14647_s1 + $0xac] ss:$16 sps:$4 sm:$0xff]   ;;  %v9714_v22 = vld [vmem:[%s14647_s1 + $0xa0] ss:$16 sps:$4 sm:$0xff]   ;;  %v9715_v23 = vld [vmem:[%s14647_s1 + $0xa8] ss:$16 sps:$4 sm:$0xff]  }
   0x9   :  { %v9716_v24 = vld [vmem:[%s14647_s1 + $0xc4] ss:$16 sps:$4 sm:$0xff]   ;;  %v9718_v25 = vld [vmem:[%s14647_s1 + $0xcc] ss:$16 sps:$4 sm:$0xff]   ;;  %v9720_v26 = vld [vmem:[%s14647_s1 + $0xc0] ss:$16 sps:$4 sm:$0xff]  }
   0xa   :  { %v9721_v27 = vld [vmem:[%s14647_s1 + $0xc8] ss:$16 sps:$4 sm:$0xff]   ;;  %v9722_v28 = vld [vmem:[%s14647_s1 + $0xe4] ss:$16 sps:$4 sm:$0xff]   ;;  %v9724_v29 = vld [vmem:[%s14647_s1 + $0xec] ss:$16 sps:$4 sm:$0xff]  }
   0xb   :  { %6569 = vmatpush1.bf16.msra.mxu0 %v9696_v10  ;;  %7417 = vmatpush1.bf16.msra.mxu1 %v9697_v11  ;;  %v9726_v30 = vld [vmem:[%s14647_s1 + $0xe0] ss:$16 sps:$4 sm:$0xff]   ;;  %v9727_v31 = vld [vmem:[%s14647_s1 + $0xe8] ss:$16 sps:$4 sm:$0xff]   ;;  %v9728_v32 = vld [vmem:[%s14647_s1 + $0x104] ss:$16 sps:$4 sm:$0xff]  }
   0xc   :  { %6570 = vmatprep.subr.bf16.mxu0 %v9698_v12  ;;  %7418 = vmatprep.subr.bf16.mxu1 %v9700_v13  ;;  %v9730_v33 = vld [vmem:[%s14647_s1 + $0x10c] ss:$16 sps:$4 sm:$0xff]   ;;  %v9732_v34 = vld [vmem:[%s14647_s1 + $0x100] ss:$16 sps:$4 sm:$0xff]   ;;  %v9733_v35 = vld [vmem:[%s14647_s1 + $0x108] ss:$16 sps:$4 sm:$0xff]  }
   0xd   :  { %v9734_v36 = vld [vmem:[%s14647_s1 + $0x124] ss:$16 sps:$4 sm:$0xff]   ;;  %v9736_v37 = vld [vmem:[%s14647_s1 + $0x12c] ss:$16 sps:$4 sm:$0xff]   ;;  %v9738_v38 = vld [vmem:[%s14647_s1 + $0x120] ss:$16 sps:$4 sm:$0xff]  }
   0xe   :  { %v9739_v39 = vld [vmem:[%s14647_s1 + $0x128] ss:$16 sps:$4 sm:$0xff]   ;;  %v9740_v40 = vld [vmem:[%s14647_s1 + $0x144] ss:$16 sps:$4 sm:$0xff]   ;;  %v9742_v41 = vld [vmem:[%s14647_s1 + $0x14c] ss:$16 sps:$4 sm:$0xff]  }
   0xf   :  { %6571 = vmatpush1.bf16.msra.mxu0 %v9702_v14  ;;  %7419 = vmatpush1.bf16.msra.mxu1 %v9703_v15  ;;  %v9744_v42 = vld [vmem:[%s14647_s1 + $0x140] ss:$16 sps:$4 sm:$0xff]   ;;  %v9745_v43 = vld [vmem:[%s14647_s1 + $0x148] ss:$16 sps:$4 sm:$0xff]   ;;  %v9746_v44 = vld [vmem:[%s14647_s1 + $0x164] ss:$16 sps:$4 sm:$0xff]  }
  0x10   :  { %6572 = vmatprep.subr.bf16.mxu0 %v9704_v16  ;;  %7420 = vmatprep.subr.bf16.mxu1 %v9706_v17  ;;  %v9748_v45 = vld [vmem:[%s14647_s1 + $0x16c] ss:$16 sps:$4 sm:$0xff]   ;;  %v14_v46 = vld [vmem:[%s14648_s0] sm:$0xff]  ;;  %v9751_v49 = vld [vmem:[%s14647_s1 + $0x168] ss:$16 sps:$4 sm:$0xff]  }
  0x11   :  { %v30_v47 = vld [vmem:[%s14648_s0 + $0x80] sm:$0xff]  ;;  %v9754_v52 = vld [vmem:[%s14647_s1 + $0x18c] ss:$16 sps:$4 sm:$0xff]   ;;  %v9757_v54 = vld [vmem:[%s14647_s1 + $0x188] ss:$16 sps:$4 sm:$0xff]  }
  0x12   :  { %v9750_v48 = vld [vmem:[%s14647_s1 + $0x160] ss:$16 sps:$4 sm:$0xff]   ;;  %v8321_v50 = vcombine.high %v14_v46, %v30_v47  ;;  %v9752_v51 = vld [vmem:[%s14647_s1 + $0x184] ss:$16 sps:$4 sm:$0xff]   ;;  %v9760_v56 = vld [vmem:[%s14647_s1 + $0x1ac] ss:$16 sps:$4 sm:$0xff]   ;;  %v8320_v5 = vcombine.low %v14_v46, %v30_v47 }
  0x13   :  { %6573 = vmatpush1.bf16.msra.mxu0 %v9708_v18  ;;  %7421 = vmatpush1.bf16.msra.mxu1 %v9709_v19  ;;  %v9756_v53 = vld [vmem:[%s14647_s1 + $0x180] ss:$16 sps:$4 sm:$0xff]   ;;  %v9758_v55 = vld [vmem:[%s14647_s1 + $0x1a4] ss:$16 sps:$4 sm:$0xff]   ;;  %v9763_v58 = vld [vmem:[%s14647_s1 + $0x1a8] ss:$16 sps:$4 sm:$0xff]  }
  0x14   :  { %6574 = vmatprep.subr.bf16.mxu0 %v9710_v20  ;;  %7422 = vmatprep.subr.bf16.mxu1 %v9712_v21  ;;  %v9762_v57 = vld [vmem:[%s14647_s1 + $0x1a0] ss:$16 sps:$4 sm:$0xff]   ;;  %v9764_v59 = vld [vmem:[%s14647_s1 + $0x1c4] ss:$16 sps:$4 sm:$0xff]   ;;  %v9766_v60 = vld [vmem:[%s14647_s1 + $0x1cc] ss:$16 sps:$4 sm:$0xff]  }
  0x15   :  { %6596 = vmatprep.mubr.bf16.mxu0 %v8321_v50  ;;  %7444 = vmatprep.mubr.bf16.mxu1 %v8321_v50  ;;  %v9768_v61 = vld [vmem:[%s14647_s1 + $0x1c0] ss:$16 sps:$4 sm:$0xff]   ;;  %v9769_v62 = vld [vmem:[%s14647_s1 + $0x1c8] ss:$16 sps:$4 sm:$0xff]   ;;  %v9770_v63 = vld [vmem:[%s14647_s1 + $0x1e4] ss:$16 sps:$4 sm:$0xff]  }
  0x16   :  { %v9772_v0 = vld [vmem:[%s14647_s1 + $0x1ec] ss:$16 sps:$4 sm:$0xff]   ;;  %v9774_v1 = vld [vmem:[%s14647_s1 + $0x1e0] ss:$16 sps:$4 sm:$0xff]   ;;  %v9775_v2 = vld [vmem:[%s14647_s1 + $0x1e8] ss:$16 sps:$4 sm:$0xff]  }
  0x17   :  { %6575 = vmatpush1.bf16.msra.mxu0 %v9714_v22  ;;  %7423 = vmatpush1.bf16.msra.mxu1 %v9715_v23  ;;  %v9778_v3 = vld [vmem:[%s14647_s1 + $0x204] ss:$16 sps:$4 sm:$0xff]   ;;  %v9781_v4 = vld [vmem:[%s14647_s1 + $0x20c] ss:$16 sps:$4 sm:$0xff]   ;;  %v9776_v6 = vld [vmem:[%s14647_s1 + $0x200] ss:$16 sps:$4 sm:$0xff]  }
  0x18   :  { %6576 = vmatprep.subr.bf16.mxu0 %v9716_v24  ;;  %7424 = vmatprep.subr.bf16.mxu1 %v9718_v25  ;;  %v9779_v7 = vld [vmem:[%s14647_s1 + $0x208] ss:$16 sps:$4 sm:$0xff]   ;;  %v9784_v8 = vld [vmem:[%s14647_s1 + $0x224] ss:$16 sps:$4 sm:$0xff]   ;;  %v9787_v9 = vld [vmem:[%s14647_s1 + $0x22c] ss:$16 sps:$4 sm:$0xff]  }
  0x19   :  { %v9782_v10 = vld [vmem:[%s14647_s1 + $0x220] ss:$16 sps:$4 sm:$0xff]   ;;  %v9785_v11 = vld [vmem:[%s14647_s1 + $0x228] ss:$16 sps:$4 sm:$0xff]   ;;  %v9790_v12 = vld [vmem:[%s14647_s1 + $0x244] ss:$16 sps:$4 sm:$0xff]  }
  0x1a   :  { %v9793_v13 = vld [vmem:[%s14647_s1 + $0x24c] ss:$16 sps:$4 sm:$0xff]   ;;  %v9788_v14 = vld [vmem:[%s14647_s1 + $0x240] ss:$16 sps:$4 sm:$0xff]   ;;  %v9791_v15 = vld [vmem:[%s14647_s1 + $0x248] ss:$16 sps:$4 sm:$0xff]  }
  0x1b   :  { %6577 = vmatpush1.bf16.msra.mxu0 %v9720_v26  ;;  %7425 = vmatpush1.bf16.msra.mxu1 %v9721_v27  ;;  %v9796_v16 = vld [vmem:[%s14647_s1 + $0x264] ss:$16 sps:$4 sm:$0xff]   ;;  %v9799_v17 = vld [vmem:[%s14647_s1 + $0x26c] ss:$16 sps:$4 sm:$0xff]   ;;  %v9794_v18 = vld [vmem:[%s14647_s1 + $0x260] ss:$16 sps:$4 sm:$0xff]  }
  0x1c   :  { %6578 = vmatprep.subr.bf16.mxu0 %v9722_v28  ;;  %7426 = vmatprep.subr.bf16.mxu1 %v9724_v29  ;;  %v9797_v19 = vld [vmem:[%s14647_s1 + $0x268] ss:$16 sps:$4 sm:$0xff]   ;;  %v9802_v20 = vld [vmem:[%s14647_s1 + $0x284] ss:$16 sps:$4 sm:$0xff]   ;;  %v9805_v21 = vld [vmem:[%s14647_s1 + $0x28c] ss:$16 sps:$4 sm:$0xff]  }
  0x1d   :  { %v9800_v22 = vld [vmem:[%s14647_s1 + $0x280] ss:$16 sps:$4 sm:$0xff]   ;;  %v9803_v23 = vld [vmem:[%s14647_s1 + $0x288] ss:$16 sps:$4 sm:$0xff]   ;;  %v9808_v24 = vld [vmem:[%s14647_s1 + $0x2a4] ss:$16 sps:$4 sm:$0xff]  }
  0x1e   :  { %v9811_v25 = vld [vmem:[%s14647_s1 + $0x2ac] ss:$16 sps:$4 sm:$0xff]   ;;  %v46_v26 = vld [vmem:[%s14648_s0 + $0x100] sm:$0xff]  ;;  %v9827_v46 = vld [vmem:[%s14647_s1 + $0x308] ss:$16 sps:$4 sm:$0xff]  }
  0x1f   :  { %6579 = vmatpush1.bf16.msra.mxu0 %v9726_v30  ;;  %7427 = vmatpush1.bf16.msra.mxu1 %v9727_v31  ;;  %v62_v27 = vld [vmem:[%s14648_s0 + $0x180] sm:$0xff]  ;;  %v9809_v30 = vld [vmem:[%s14647_s1 + $0x2a8] ss:$16 sps:$4 sm:$0xff]  }
  0x20   :  { %6580 = vmatprep.subr.bf16.mxu0 %v9728_v32  ;;  %7428 = vmatprep.subr.bf16.mxu1 %v9730_v33  ;;  %v8353_v28 = vcombine.high %v46_v26, %v62_v27  ;;  %v9806_v29 = vld [vmem:[%s14647_s1 + $0x2a0] ss:$16 sps:$4 sm:$0xff]   ;;  %v8352_v31 = vcombine.low %v46_v26, %v62_v27  ;;  %v9814_v32 = vld [vmem:[%s14647_s1 + $0x2c4] ss:$16 sps:$4 sm:$0xff]   ;;  %v9817_v33 = vld [vmem:[%s14647_s1 + $0x2cc] ss:$16 sps:$4 sm:$0xff]  }
  0x21   :  { %v9832_v47 = vld [vmem:[%s14647_s1 + $0x324] ss:$16 sps:$4 sm:$0xff]   ;;  %v9833_v50 = vld [vmem:[%s14647_s1 + $0x328] ss:$16 sps:$4 sm:$0xff]  }
  0x22   :  { %v11690_v27 = vld [vmem:[%s14648_s0 + $0x90] sm:$0xff] }
  0x23   :  { %6581 = vmatpush1.bf16.msra.mxu0 %v9732_v34  ;;  %7429 = vmatpush1.bf16.msra.mxu1 %v9733_v35  ;;  %v11521_v34 = vld [vmem:[%s14648_s0 + $0x8] sm:$0xff] }
  0x24   :  { %6582 = vmatprep.subr.bf16.mxu0 %v9734_v36  ;;  %7430 = vmatprep.subr.bf16.mxu1 %v9736_v37  ;;  %v11526_v35 = vld [vmem:[%s14648_s0 + $0x88] sm:$0xff]  ;;  %v9812_v36 = vld [vmem:[%s14647_s1 + $0x2c0] ss:$16 sps:$4 sm:$0xff]  }
  0x25   :  { %v9815_v37 = vld [vmem:[%s14647_s1 + $0x2c8] ss:$16 sps:$4 sm:$0xff]  }
  0x27   :  { %6583 = vmatpush1.bf16.msra.mxu0 %v9738_v38  ;;  %7431 = vmatpush1.bf16.msra.mxu1 %v9739_v39  ;;  %v8323_v38 = vcombine.high %v11521_v34, %v11526_v35  ;;  %v9820_v39 = vld [vmem:[%s14647_s1 + $0x2e4] ss:$16 sps:$4 sm:$0xff]  }
  0x28   :  { %6584 = vmatprep.subr.bf16.mxu0 %v9740_v40  ;;  %7432 = vmatprep.subr.bf16.mxu1 %v9742_v41  ;;  %v9823_v40 = vld [vmem:[%s14647_s1 + $0x2ec] ss:$16 sps:$4 sm:$0xff]   ;;  %v9818_v41 = vld [vmem:[%s14647_s1 + $0x2e0] ss:$16 sps:$4 sm:$0xff]  }
  0x2b   :  { %6585 = vmatpush1.bf16.msra.mxu0 %v9744_v42  ;;  %7433 = vmatpush1.bf16.msra.mxu1 %v9745_v43  ;;  %v9821_v42 = vld [vmem:[%s14647_s1 + $0x2e8] ss:$16 sps:$4 sm:$0xff]   ;;  %v9826_v43 = vld [vmem:[%s14647_s1 + $0x304] ss:$16 sps:$4 sm:$0xff]  }
  0x2c   :  { %6586 = vmatprep.subr.bf16.mxu0 %v9746_v44  ;;  %7434 = vmatprep.subr.bf16.mxu1 %v9748_v45  ;;  %v9829_v44 = vld [vmem:[%s14647_s1 + $0x30c] ss:$16 sps:$4 sm:$0xff]   ;;  %v9824_v45 = vld [vmem:[%s14647_s1 + $0x300] ss:$16 sps:$4 sm:$0xff]  }
  0x2f   :  { %6587 = vmatpush1.bf16.msra.mxu0 %v9750_v48  ;;  %7435 = vmatpush1.bf16.msra.mxu1 %v9751_v49  ;;  %v9835_v48 = vld [vmem:[%s14647_s1 + $0x32c] ss:$16 sps:$4 sm:$0xff]   ;;  %v9830_v49 = vld [vmem:[%s14647_s1 + $0x320] ss:$16 sps:$4 sm:$0xff]  }
  0x30   :  { %6588 = vmatprep.subr.bf16.mxu0 %v9752_v51  ;;  %7436 = vmatprep.subr.bf16.mxu1 %v9754_v52  ;;  %v9838_v51 = vld [vmem:[%s14647_s1 + $0x344] ss:$16 sps:$4 sm:$0xff]   ;;  %v9841_v52 = vld [vmem:[%s14647_s1 + $0x34c] ss:$16 sps:$4 sm:$0xff]  }
  0x33   :  { %6589 = vmatpush1.bf16.msra.mxu0 %v9756_v53  ;;  %7437 = vmatpush1.bf16.msra.mxu1 %v9757_v54  ;;  %v9836_v53 = vld [vmem:[%s14647_s1 + $0x340] ss:$16 sps:$4 sm:$0xff]   ;;  %v9839_v54 = vld [vmem:[%s14647_s1 + $0x348] ss:$16 sps:$4 sm:$0xff]  }
  0x34   :  { %6590 = vmatprep.subr.bf16.mxu0 %v9758_v55  ;;  %7438 = vmatprep.subr.bf16.mxu1 %v9760_v56  ;;  %v9844_v55 = vld [vmem:[%s14647_s1 + $0x364] ss:$16 sps:$4 sm:$0xff]   ;;  %v9847_v56 = vld [vmem:[%s14647_s1 + $0x36c] ss:$16 sps:$4 sm:$0xff]  }
  0x37   :  { %6591 = vmatpush1.bf16.msra.mxu0 %v9762_v57  ;;  %7439 = vmatpush1.bf16.msra.mxu1 %v9763_v58  ;;  %v9842_v57 = vld [vmem:[%s14647_s1 + $0x360] ss:$16 sps:$4 sm:$0xff]   ;;  %v9845_v58 = vld [vmem:[%s14647_s1 + $0x368] ss:$16 sps:$4 sm:$0xff]  }
  0x38   :  { %6592 = vmatprep.subr.bf16.mxu0 %v9764_v59  ;;  %7440 = vmatprep.subr.bf16.mxu1 %v9766_v60  ;;  %v9850_v59 = vld [vmem:[%s14647_s1 + $0x384] ss:$16 sps:$4 sm:$0xff]   ;;  %v9853_v60 = vld [vmem:[%s14647_s1 + $0x38c] ss:$16 sps:$4 sm:$0xff]  }
  0x3b   :  { %6593 = vmatpush1.bf16.msra.mxu0 %v9768_v61  ;;  %7441 = vmatpush1.bf16.msra.mxu1 %v9769_v62  ;;  %v9848_v61 = vld [vmem:[%s14647_s1 + $0x380] ss:$16 sps:$4 sm:$0xff]   ;;  %v9851_v62 = vld [vmem:[%s14647_s1 + $0x388] ss:$16 sps:$4 sm:$0xff]  }
  0x3c   :  { %6594 = vmatprep.subr.bf16.mxu0 %v9770_v63  ;;  %7442 = vmatprep.subr.bf16.mxu1 %v9772_v0  ;;  %v9856_v63 = vld [vmem:[%s14647_s1 + $0x3a4] ss:$16 sps:$4 sm:$0xff]   ;;  %v9859_v0 = vld [vmem:[%s14647_s1 + $0x3ac] ss:$16 sps:$4 sm:$0xff]  }
  0x3f   :  { %6595 = vmatpush1.bf16.msra.mxu0 %v9774_v1  ;;  %7443 = vmatpush1.bf16.msra.mxu1 %v9775_v2  ;;  %v9854_v1 = vld [vmem:[%s14647_s1 + $0x3a0] ss:$16 sps:$4 sm:$0xff]   ;;  %v9857_v2 = vld [vmem:[%s14647_s1 + $0x3a8] ss:$16 sps:$4 sm:$0xff]  }
  0x40   :  { %6617 = vmatprep.subr.bf16.mxu0 %v9778_v3  ;;  %7465 = vmatprep.subr.bf16.mxu1 %v9781_v4  ;;  %v9862_v3 = vld [vmem:[%s14647_s1 + $0x3c4] ss:$16 sps:$4 sm:$0xff]   ;;  %v9865_v4 = vld [vmem:[%s14647_s1 + $0x3cc] ss:$16 sps:$4 sm:$0xff]  }
  0x42   :  { %6597 = vmatmul.mubr.bf16.vlgmr.msra.gmra.mrb[0].mxu0 %v8320_v5  ;;  %7445 = vmatmul.mubr.bf16.vlgmr.msra.gmra.mrb[0].mxu1 %v8320_v5  ;;  %v9860_v5 = vld [vmem:[%s14647_s1 + $0x3c0] ss:$16 sps:$4 sm:$0xff]  }
  0x43   :  { %6618 = vmatpush1.bf16.msra.mxu0 %v9776_v6  ;;  %7466 = vmatpush1.bf16.msra.mxu1 %v9779_v7  ;;  %v9863_v6 = vld [vmem:[%s14647_s1 + $0x3c8] ss:$16 sps:$4 sm:$0xff]   ;;  %v9868_v7 = vld [vmem:[%s14647_s1 + $0x3e4] ss:$16 sps:$4 sm:$0xff]  }
  0x44   :  { %6619 = vmatprep.subr.bf16.mxu0 %v9784_v8  ;;  %7467 = vmatprep.subr.bf16.mxu1 %v9787_v9  ;;  %v9871_v8 = vld [vmem:[%s14647_s1 + $0x3ec] ss:$16 sps:$4 sm:$0xff]   ;;  %v9866_v9 = vld [vmem:[%s14647_s1 + $0x3e0] ss:$16 sps:$4 sm:$0xff]  }
  0x45   :  { %6606 = vmatprep.mubr.bf16.mxu0 %v8353_v28  ;;  %7454 = vmatprep.mubr.bf16.mxu1 %v8353_v28  ;;  %v9884_v28 = vld [vmem:[%s14647_s1 + $0x440] ss:$16 sps:$4 sm:$0xff]  }
  0x47   :  { %6620 = vmatpush1.bf16.msra.mxu0 %v9782_v10  ;;  %7468 = vmatpush1.bf16.msra.mxu1 %v9785_v11  ;;  %v9869_v10 = vld [vmem:[%s14647_s1 + $0x3e8] ss:$16 sps:$4 sm:$0xff]   ;;  %v9874_v11 = vld [vmem:[%s14647_s1 + $0x404] ss:$16 sps:$4 sm:$0xff]  }
  0x48   :  { %6621 = vmatprep.subr.bf16.mxu0 %v9790_v12  ;;  %7469 = vmatprep.subr.bf16.mxu1 %v9793_v13  ;;  %v9877_v12 = vld [vmem:[%s14647_s1 + $0x40c] ss:$16 sps:$4 sm:$0xff]   ;;  %v9872_v13 = vld [vmem:[%s14647_s1 + $0x400] ss:$16 sps:$4 sm:$0xff]  }
  0x4a   :  { %6607 = vmatmul.mubr.bf16.gmra.mrb[4].mxu0 %v8352_v31  ;;  %7455 = vmatmul.mubr.bf16.gmra.mrb[4].mxu1 %v8352_v31  ;;  %v9895_v31 = vld [vmem:[%s14647_s1 + $0x46c] ss:$16 sps:$4 sm:$0xff]  }
  0x4b   :  { %6622 = vmatpush1.bf16.msra.mxu0 %v9788_v14  ;;  %7470 = vmatpush1.bf16.msra.mxu1 %v9791_v15  ;;  %v9875_v14 = vld [vmem:[%s14647_s1 + $0x408] ss:$16 sps:$4 sm:$0xff]   ;;  %v8322_v15 = vcombine.low %v11521_v34, %v11526_v35  ;;  %v9898_v35 = vld [vmem:[%s14647_s1 + $0x484] ss:$16 sps:$4 sm:$0xff]  }
  0x4c   :  { %6623 = vmatprep.subr.bf16.mxu0 %v9796_v16  ;;  %7471 = vmatprep.subr.bf16.mxu1 %v9799_v17  ;;  %v47_v16 = vld [vmem:[%s14648_s0 + $0x108] sm:$0xff] }
  0x4d   :  { %6649 = vmatprep.mubr.bf16.mxu0 %v8323_v38  ;;  %7497 = vmatprep.mubr.bf16.mxu1 %v8323_v38  ;;  %v63_v17 = vld [vmem:[%s14648_s0 + $0x188] sm:$0xff] }
  0x4e   :  { %v8354_v26 = vcombine.low %v47_v16, %v63_v17  ;;  %v9893_v34 = vld [vmem:[%s14647_s1 + $0x468] ss:$16 sps:$4 sm:$0xff]  }
  0x4f   :  { %6624 = vmatpush1.bf16.msra.mxu0 %v9794_v18  ;;  %7472 = vmatpush1.bf16.msra.mxu1 %v9797_v19  ;;  %v9880_v18 = vld [vmem:[%s14647_s1 + $0x424] ss:$16 sps:$4 sm:$0xff]   ;;  %v9883_v19 = vld [vmem:[%s14647_s1 + $0x42c] ss:$16 sps:$4 sm:$0xff]   ;;  %v9899_v38 = vld [vmem:[%s14647_s1 + $0x488] ss:$16 sps:$4 sm:$0xff]  }
  0x50   :  { %6625 = vmatprep.subr.bf16.mxu0 %v9802_v20  ;;  %7473 = vmatprep.subr.bf16.mxu1 %v9805_v21  ;;  %v8355_v20 = vcombine.high %v47_v16, %v63_v17  ;;  %v9878_v21 = vld [vmem:[%s14647_s1 + $0x420] ss:$16 sps:$4 sm:$0xff]   ;;  %v9967_v16 = vld [vmem:[%s14647_s1 + $0x5ec] ss:$16 sps:$4 sm:$0xff]  }
  0x51   :  { %v9962_v17 = vld [vmem:[%s14647_s1 + $0x5e0] ss:$16 sps:$4 sm:$0xff]  }
  0x53   :  { %6626 = vmatpush1.bf16.msra.mxu0 %v9800_v22  ;;  %7474 = vmatpush1.bf16.msra.mxu1 %v9803_v23  ;;  %v9881_v22 = vld [vmem:[%s14647_s1 + $0x428] ss:$16 sps:$4 sm:$0xff]   ;;  %v9886_v23 = vld [vmem:[%s14647_s1 + $0x444] ss:$16 sps:$4 sm:$0xff]  }
  0x54   :  { %6627 = vmatprep.subr.bf16.mxu0 %v9808_v24  ;;  %7475 = vmatprep.subr.bf16.mxu1 %v9811_v25  ;;  %v9889_v24 = vld [vmem:[%s14647_s1 + $0x44c] ss:$16 sps:$4 sm:$0xff]   ;;  %v11685_v25 = vld [vmem:[%s14648_s0 + $0x10] sm:$0xff] }
  0x57   :  { %6628 = vmatpush1.bf16.msra.mxu0 %v9806_v29  ;;  %7476 = vmatpush1.bf16.msra.mxu1 %v9809_v30  ;;  %v9887_v29 = vld [vmem:[%s14647_s1 + $0x448] ss:$16 sps:$4 sm:$0xff]   ;;  %v9892_v30 = vld [vmem:[%s14647_s1 + $0x464] ss:$16 sps:$4 sm:$0xff]  }
  0x58   :  { %6629 = vmatprep.subr.bf16.mxu0 %v9814_v32  ;;  %7477 = vmatprep.subr.bf16.mxu1 %v9817_v33  ;;  %v8325_v32 = vcombine.high %v11685_v25, %v11690_v27  ;;  %v9890_v33 = vld [vmem:[%s14647_s1 + $0x460] ss:$16 sps:$4 sm:$0xff]  }
  0x5b   :  { %6630 = vmatpush1.bf16.msra.mxu0 %v9812_v36  ;;  %7478 = vmatpush1.bf16.msra.mxu1 %v9815_v37  ;;  %v9901_v36 = vld [vmem:[%s14647_s1 + $0x48c] ss:$16 sps:$4 sm:$0xff]   ;;  %v9896_v37 = vld [vmem:[%s14647_s1 + $0x480] ss:$16 sps:$4 sm:$0xff]  }
  0x5c   :  { %6631 = vmatprep.subr.bf16.mxu0 %v9820_v39  ;;  %7479 = vmatprep.subr.bf16.mxu1 %v9823_v40  ;;  %v9904_v39 = vld [vmem:[%s14647_s1 + $0x4a4] ss:$16 sps:$4 sm:$0xff]   ;;  %v9907_v40 = vld [vmem:[%s14647_s1 + $0x4ac] ss:$16 sps:$4 sm:$0xff]  }
  0x5f   :  { %6632 = vmatpush1.bf16.msra.mxu0 %v9818_v41  ;;  %7480 = vmatpush1.bf16.msra.mxu1 %v9821_v42  ;;  %v9902_v41 = vld [vmem:[%s14647_s1 + $0x4a0] ss:$16 sps:$4 sm:$0xff]   ;;  %v9905_v42 = vld [vmem:[%s14647_s1 + $0x4a8] ss:$16 sps:$4 sm:$0xff]  }
  0x60   :  { %6633 = vmatprep.subr.bf16.mxu0 %v9826_v43  ;;  %7481 = vmatprep.subr.bf16.mxu1 %v9829_v44  ;;  %v9910_v43 = vld [vmem:[%s14647_s1 + $0x4c4] ss:$16 sps:$4 sm:$0xff]   ;;  %v9913_v44 = vld [vmem:[%s14647_s1 + $0x4cc] ss:$16 sps:$4 sm:$0xff]  }
  0x63   :  { %6634 = vmatpush1.bf16.msra.mxu0 %v9824_v45  ;;  %7482 = vmatpush1.bf16.msra.mxu1 %v9827_v46  ;;  %v9908_v45 = vld [vmem:[%s14647_s1 + $0x4c0] ss:$16 sps:$4 sm:$0xff]   ;;  %v9911_v46 = vld [vmem:[%s14647_s1 + $0x4c8] ss:$16 sps:$4 sm:$0xff]  }
  0x64   :  { %6635 = vmatprep.subr.bf16.mxu0 %v9832_v47  ;;  %7483 = vmatprep.subr.bf16.mxu1 %v9835_v48  ;;  %v9916_v47 = vld [vmem:[%s14647_s1 + $0x4e4] ss:$16 sps:$4 sm:$0xff]   ;;  %v9919_v48 = vld [vmem:[%s14647_s1 + $0x4ec] ss:$16 sps:$4 sm:$0xff]  }
  0x67   :  { %6636 = vmatpush1.bf16.msra.mxu0 %v9830_v49  ;;  %7484 = vmatpush1.bf16.msra.mxu1 %v9833_v50  ;;  %v9914_v49 = vld [vmem:[%s14647_s1 + $0x4e0] ss:$16 sps:$4 sm:$0xff]   ;;  %v9917_v50 = vld [vmem:[%s14647_s1 + $0x4e8] ss:$16 sps:$4 sm:$0xff]  }
  0x68   :  { %6637 = vmatprep.subr.bf16.mxu0 %v9838_v51  ;;  %7485 = vmatprep.subr.bf16.mxu1 %v9841_v52  ;;  %v9922_v51 = vld [vmem:[%s14647_s1 + $0x504] ss:$16 sps:$4 sm:$0xff]   ;;  %v9925_v52 = vld [vmem:[%s14647_s1 + $0x50c] ss:$16 sps:$4 sm:$0xff]  }
  0x6b   :  { %6638 = vmatpush1.bf16.msra.mxu0 %v9836_v53  ;;  %7486 = vmatpush1.bf16.msra.mxu1 %v9839_v54  ;;  %v9920_v53 = vld [vmem:[%s14647_s1 + $0x500] ss:$16 sps:$4 sm:$0xff]   ;;  %v9923_v54 = vld [vmem:[%s14647_s1 + $0x508] ss:$16 sps:$4 sm:$0xff]  }
  0x6c   :  { %6639 = vmatprep.subr.bf16.mxu0 %v9844_v55  ;;  %7487 = vmatprep.subr.bf16.mxu1 %v9847_v56  ;;  %v9928_v55 = vld [vmem:[%s14647_s1 + $0x524] ss:$16 sps:$4 sm:$0xff]   ;;  %v9931_v56 = vld [vmem:[%s14647_s1 + $0x52c] ss:$16 sps:$4 sm:$0xff]  }
  0x6f   :  { %6640 = vmatpush1.bf16.msra.mxu0 %v9842_v57  ;;  %7488 = vmatpush1.bf16.msra.mxu1 %v9845_v58  ;;  %v9926_v57 = vld [vmem:[%s14647_s1 + $0x520] ss:$16 sps:$4 sm:$0xff]   ;;  %v9929_v58 = vld [vmem:[%s14647_s1 + $0x528] ss:$16 sps:$4 sm:$0xff]  }
  0x70   :  { %6641 = vmatprep.subr.bf16.mxu0 %v9850_v59  ;;  %7489 = vmatprep.subr.bf16.mxu1 %v9853_v60  ;;  %v9934_v59 = vld [vmem:[%s14647_s1 + $0x544] ss:$16 sps:$4 sm:$0xff]   ;;  %v9937_v60 = vld [vmem:[%s14647_s1 + $0x54c] ss:$16 sps:$4 sm:$0xff]  }
  0x73   :  { %6642 = vmatpush1.bf16.msra.mxu0 %v9848_v61  ;;  %7490 = vmatpush1.bf16.msra.mxu1 %v9851_v62  ;;  %v9932_v61 = vld [vmem:[%s14647_s1 + $0x540] ss:$16 sps:$4 sm:$0xff]   ;;  %v9935_v62 = vld [vmem:[%s14647_s1 + $0x548] ss:$16 sps:$4 sm:$0xff]  }
  0x74   :  { %6643 = vmatprep.subr.bf16.mxu0 %v9856_v63  ;;  %7491 = vmatprep.subr.bf16.mxu1 %v9859_v0  ;;  %v9940_v63 = vld [vmem:[%s14647_s1 + $0x564] ss:$16 sps:$4 sm:$0xff]   ;;  %v9943_v0 = vld [vmem:[%s14647_s1 + $0x56c] ss:$16 sps:$4 sm:$0xff]  }
  0x77   :  { %6644 = vmatpush1.bf16.msra.mxu0 %v9854_v1  ;;  %7492 = vmatpush1.bf16.msra.mxu1 %v9857_v2  ;;  %v9938_v1 = vld [vmem:[%s14647_s1 + $0x560] ss:$16 sps:$4 sm:$0xff]   ;;  %v9941_v2 = vld [vmem:[%s14647_s1 + $0x568] ss:$16 sps:$4 sm:$0xff]  }
  0x78   :  { %6645 = vmatprep.subr.bf16.mxu0 %v9862_v3  ;;  %7493 = vmatprep.subr.bf16.mxu1 %v9865_v4  ;;  %v9946_v3 = vld [vmem:[%s14647_s1 + $0x584] ss:$16 sps:$4 sm:$0xff]   ;;  %v9949_v4 = vld [vmem:[%s14647_s1 + $0x58c] ss:$16 sps:$4 sm:$0xff]  }
  0x7b   :  { %6646 = vmatpush1.bf16.msra.mxu0 %v9860_v5  ;;  %7494 = vmatpush1.bf16.msra.mxu1 %v9863_v6  ;;  %v9944_v5 = vld [vmem:[%s14647_s1 + $0x580] ss:$16 sps:$4 sm:$0xff]   ;;  %v9947_v6 = vld [vmem:[%s14647_s1 + $0x588] ss:$16 sps:$4 sm:$0xff]  }
  0x7c   :  { %6647 = vmatprep.subr.bf16.mxu0 %v9868_v7  ;;  %7495 = vmatprep.subr.bf16.mxu1 %v9871_v8  ;;  %v9952_v7 = vld [vmem:[%s14647_s1 + $0x5a4] ss:$16 sps:$4 sm:$0xff]   ;;  %v9955_v8 = vld [vmem:[%s14647_s1 + $0x5ac] ss:$16 sps:$4 sm:$0xff]  }
  0x7f   :  { %6648 = vmatpush1.bf16.msra.mxu0 %v9866_v9  ;;  %7496 = vmatpush1.bf16.msra.mxu1 %v9869_v10  ;;  %v9950_v9 = vld [vmem:[%s14647_s1 + $0x5a0] ss:$16 sps:$4 sm:$0xff]   ;;  %v9953_v10 = vld [vmem:[%s14647_s1 + $0x5a8] ss:$16 sps:$4 sm:$0xff]  }
  0x80   :  { %6670 = vmatprep.subr.bf16.mxu0 %v9874_v11  ;;  %7518 = vmatprep.subr.bf16.mxu1 %v9877_v12  ;;  %v9958_v11 = vld [vmem:[%s14647_s1 + $0x5c4] ss:$16 sps:$4 sm:$0xff]   ;;  %v9961_v12 = vld [vmem:[%s14647_s1 + $0x5cc] ss:$16 sps:$4 sm:$0xff]  }
  0x82   :  { %6650 = vmatmul.mubr.bf16.vlgmr.msra.gmra.mrb[0].mxu0 %v8322_v15  ;;  %7498 = vmatmul.mubr.bf16.vlgmr.msra.gmra.mrb[0].mxu1 %v8322_v15  ;;  %v9964_v15 = vld [vmem:[%s14647_s1 + $0x5e4] ss:$16 sps:$4 sm:$0xff]  }
  0x83   :  { %6671 = vmatpush1.bf16.msra.mxu0 %v9872_v13  ;;  %7519 = vmatpush1.bf16.msra.mxu1 %v9875_v14  ;;  %v9956_v13 = vld [vmem:[%s14647_s1 + $0x5c0] ss:$16 sps:$4 sm:$0xff]   ;;  %v9959_v14 = vld [vmem:[%s14647_s1 + $0x5c8] ss:$16 sps:$4 sm:$0xff]  }
  0x84   :  { %6672 = vmatprep.subr.bf16.mxu0 %v9880_v18  ;;  %7520 = vmatprep.subr.bf16.mxu1 %v9883_v19  ;;  %v9965_v18 = vld [vmem:[%s14647_s1 + $0x5e8] ss:$16 sps:$4 sm:$0xff]   ;;  %v9970_v19 = vld [vmem:[%s14647_s1 + $0x604] ss:$16 sps:$4 sm:$0xff]  }
  0x85   :  { %6659 = vmatprep.mubr.bf16.mxu0 %v8355_v20  ;;  %7507 = vmatprep.mubr.bf16.mxu1 %v8355_v20  ;;  %v9973_v20 = vld [vmem:[%s14647_s1 + $0x60c] ss:$16 sps:$4 sm:$0xff]  }
  0x87   :  { %6673 = vmatpush1.bf16.msra.mxu0 %v9878_v21  ;;  %7521 = vmatpush1.bf16.msra.mxu1 %v9881_v22  ;;  %v48_v21 = vld [vmem:[%s14648_s0 + $0x110] sm:$0xff]  ;;  %v8324_v22 = vcombine.low %v11685_v25, %v11690_v27  ;;  %v9979_v27 = vld [vmem:[%s14647_s1 + $0x62c] ss:$16 sps:$4 sm:$0xff]  }
  0x88   :  { %6674 = vmatprep.subr.bf16.mxu0 %v9886_v23  ;;  %7522 = vmatprep.subr.bf16.mxu1 %v9889_v24  ;;  %v64_v23 = vld [vmem:[%s14648_s0 + $0x190] sm:$0xff] }
  0x89   :  { %v9968_v24 = vld [vmem:[%s14647_s1 + $0x600] ss:$16 sps:$4 sm:$0xff]   ;;  %v9976_v25 = vld [vmem:[%s14647_s1 + $0x624] ss:$16 sps:$4 sm:$0xff]  }
  0x8a   :  { %6660 = vmatmul.mubr.bf16.gmra.mrb[4].mxu0 %v8354_v26  ;;  %7508 = vmatmul.mubr.bf16.gmra.mrb[4].mxu1 %v8354_v26  ;;  %v9971_v26 = vld [vmem:[%s14647_s1 + $0x608] ss:$16 sps:$4 sm:$0xff]  }
  0x8b   :  { %6675 = vmatpush1.bf16.msra.mxu0 %v9884_v28  ;;  %7523 = vmatpush1.bf16.msra.mxu1 %v9887_v29  ;;  %v8357_v28 = vcombine.high %v48_v21, %v64_v23  ;;  %v9974_v29 = vld [vmem:[%s14647_s1 + $0x620] ss:$16 sps:$4 sm:$0xff]  }
  0x8c   :  { %6676 = vmatprep.subr.bf16.mxu0 %v9892_v30  ;;  %7524 = vmatprep.subr.bf16.mxu1 %v9895_v31  ;;  %v9977_v30 = vld [vmem:[%s14647_s1 + $0x628] ss:$16 sps:$4 sm:$0xff]   ;;  %v9982_v31 = vld [vmem:[%s14647_s1 + $0x644] ss:$16 sps:$4 sm:$0xff]  }
  0x8d   :  { %6702 = vmatprep.mubr.bf16.mxu0 %v8325_v32  ;;  %7550 = vmatprep.mubr.bf16.mxu1 %v8325_v32  ;;  %v9985_v32 = vld [vmem:[%s14647_s1 + $0x64c] ss:$16 sps:$4 sm:$0xff]  }
  0x8f   :  { %6677 = vmatpush1.bf16.msra.mxu0 %v9890_v33  ;;  %7525 = vmatpush1.bf16.msra.mxu1 %v9893_v34  ;;  %v11897_v33 = vld [vmem:[%s14648_s0 + $0x18] sm:$0xff]  ;;  %v8356_v34 = vcombine.low %v48_v21, %v64_v23  ;;  %v10052_v21 = vld [vmem:[%s14647_s1 + $0x7c0] ss:$16 sps:$4 sm:$0xff]   ;;  %v10060_v23 = vld [vmem:[%s14647_s1 + $0x7e4] ss:$16 sps:$4 sm:$0xff]  }
  0x90   :  { %6678 = vmatprep.subr.bf16.mxu0 %v9898_v35  ;;  %7526 = vmatprep.subr.bf16.mxu1 %v9901_v36  ;;  %v11902_v35 = vld [vmem:[%s14648_s0 + $0x98] sm:$0xff]  ;;  %v9980_v36 = vld [vmem:[%s14647_s1 + $0x640] ss:$16 sps:$4 sm:$0xff]  }
  0x93   :  { %6679 = vmatpush1.bf16.msra.mxu0 %v9896_v37  ;;  %7527 = vmatpush1.bf16.msra.mxu1 %v9899_v38  ;;  %v9983_v37 = vld [vmem:[%s14647_s1 + $0x648] ss:$16 sps:$4 sm:$0xff]   ;;  %v9988_v38 = vld [vmem:[%s14647_s1 + $0x664] ss:$16 sps:$4 sm:$0xff]  }
  0x94   :  { %6680 = vmatprep.subr.bf16.mxu0 %v9904_v39  ;;  %7528 = vmatprep.subr.bf16.mxu1 %v9907_v40  ;;  %v9991_v39 = vld [vmem:[%s14647_s1 + $0x66c] ss:$16 sps:$4 sm:$0xff]   ;;  %v8327_v40 = vcombine.high %v11897_v33, %v11902_v35 }
  0x97   :  { %6681 = vmatpush1.bf16.msra.mxu0 %v9902_v41  ;;  %7529 = vmatpush1.bf16.msra.mxu1 %v9905_v42  ;;  %v9986_v41 = vld [vmem:[%s14647_s1 + $0x660] ss:$16 sps:$4 sm:$0xff]   ;;  %v9989_v42 = vld [vmem:[%s14647_s1 + $0x668] ss:$16 sps:$4 sm:$0xff]  }
  0x98   :  { %6682 = vmatprep.subr.bf16.mxu0 %v9910_v43  ;;  %7530 = vmatprep.subr.bf16.mxu1 %v9913_v44  ;;  %v9994_v43 = vld [vmem:[%s14647_s1 + $0x684] ss:$16 sps:$4 sm:$0xff]   ;;  %v9997_v44 = vld [vmem:[%s14647_s1 + $0x68c] ss:$16 sps:$4 sm:$0xff]  }
  0x9b   :  { %6683 = vmatpush1.bf16.msra.mxu0 %v9908_v45  ;;  %7531 = vmatpush1.bf16.msra.mxu1 %v9911_v46  ;;  %v9992_v45 = vld [vmem:[%s14647_s1 + $0x680] ss:$16 sps:$4 sm:$0xff]   ;;  %v9995_v46 = vld [vmem:[%s14647_s1 + $0x688] ss:$16 sps:$4 sm:$0xff]  }
  0x9c   :  { %6684 = vmatprep.subr.bf16.mxu0 %v9916_v47  ;;  %7532 = vmatprep.subr.bf16.mxu1 %v9919_v48  ;;  %v10000_v47 = vld [vmem:[%s14647_s1 + $0x6a4] ss:$16 sps:$4 sm:$0xff]   ;;  %v10003_v48 = vld [vmem:[%s14647_s1 + $0x6ac] ss:$16 sps:$4 sm:$0xff]  }
  0x9f   :  { %6685 = vmatpush1.bf16.msra.mxu0 %v9914_v49  ;;  %7533 = vmatpush1.bf16.msra.mxu1 %v9917_v50  ;;  %v9998_v49 = vld [vmem:[%s14647_s1 + $0x6a0] ss:$16 sps:$4 sm:$0xff]   ;;  %v10001_v50 = vld [vmem:[%s14647_s1 + $0x6a8] ss:$16 sps:$4 sm:$0xff]  }
  0xa0   :  { %6686 = vmatprep.subr.bf16.mxu0 %v9922_v51  ;;  %7534 = vmatprep.subr.bf16.mxu1 %v9925_v52  ;;  %v10006_v51 = vld [vmem:[%s14647_s1 + $0x6c4] ss:$16 sps:$4 sm:$0xff]   ;;  %v10009_v52 = vld [vmem:[%s14647_s1 + $0x6cc] ss:$16 sps:$4 sm:$0xff]  }
  0xa3   :  { %6687 = vmatpush1.bf16.msra.mxu0 %v9920_v53  ;;  %7535 = vmatpush1.bf16.msra.mxu1 %v9923_v54  ;;  %v10004_v53 = vld [vmem:[%s14647_s1 + $0x6c0] ss:$16 sps:$4 sm:$0xff]   ;;  %v10007_v54 = vld [vmem:[%s14647_s1 + $0x6c8] ss:$16 sps:$4 sm:$0xff]  }
  0xa4   :  { %6688 = vmatprep.subr.bf16.mxu0 %v9928_v55  ;;  %7536 = vmatprep.subr.bf16.mxu1 %v9931_v56  ;;  %v10012_v55 = vld [vmem:[%s14647_s1 + $0x6e4] ss:$16 sps:$4 sm:$0xff]   ;;  %v10015_v56 = vld [vmem:[%s14647_s1 + $0x6ec] ss:$16 sps:$4 sm:$0xff]  }
  0xa7   :  { %6689 = vmatpush1.bf16.msra.mxu0 %v9926_v57  ;;  %7537 = vmatpush1.bf16.msra.mxu1 %v9929_v58  ;;  %v10010_v57 = vld [vmem:[%s14647_s1 + $0x6e0] ss:$16 sps:$4 sm:$0xff]   ;;  %v10013_v58 = vld [vmem:[%s14647_s1 + $0x6e8] ss:$16 sps:$4 sm:$0xff]  }
  0xa8   :  { %6690 = vmatprep.subr.bf16.mxu0 %v9934_v59  ;;  %7538 = vmatprep.subr.bf16.mxu1 %v9937_v60  ;;  %v10018_v59 = vld [vmem:[%s14647_s1 + $0x704] ss:$16 sps:$4 sm:$0xff]   ;;  %v10021_v60 = vld [vmem:[%s14647_s1 + $0x70c] ss:$16 sps:$4 sm:$0xff]  }
  0xab   :  { %6691 = vmatpush1.bf16.msra.mxu0 %v9932_v61  ;;  %7539 = vmatpush1.bf16.msra.mxu1 %v9935_v62  ;;  %v10016_v61 = vld [vmem:[%s14647_s1 + $0x700] ss:$16 sps:$4 sm:$0xff]   ;;  %v10019_v62 = vld [vmem:[%s14647_s1 + $0x708] ss:$16 sps:$4 sm:$0xff]  }
  0xac   :  { %6692 = vmatprep.subr.bf16.mxu0 %v9940_v63  ;;  %7540 = vmatprep.subr.bf16.mxu1 %v9943_v0  ;;  %v10024_v63 = vld [vmem:[%s14647_s1 + $0x724] ss:$16 sps:$4 sm:$0xff]   ;;  %v10027_v0 = vld [vmem:[%s14647_s1 + $0x72c] ss:$16 sps:$4 sm:$0xff]  }
  0xaf   :  { %6693 = vmatpush1.bf16.msra.mxu0 %v9938_v1  ;;  %7541 = vmatpush1.bf16.msra.mxu1 %v9941_v2  ;;  %v10022_v1 = vld [vmem:[%s14647_s1 + $0x720] ss:$16 sps:$4 sm:$0xff]   ;;  %v10025_v2 = vld [vmem:[%s14647_s1 + $0x728] ss:$16 sps:$4 sm:$0xff]  }
  0xb0   :  { %6694 = vmatprep.subr.bf16.mxu0 %v9946_v3  ;;  %7542 = vmatprep.subr.bf16.mxu1 %v9949_v4  ;;  %v10030_v3 = vld [vmem:[%s14647_s1 + $0x744] ss:$16 sps:$4 sm:$0xff]   ;;  %v10033_v4 = vld [vmem:[%s14647_s1 + $0x74c] ss:$16 sps:$4 sm:$0xff]  }
  0xb3   :  { %6695 = vmatpush1.bf16.msra.mxu0 %v9944_v5  ;;  %7543 = vmatpush1.bf16.msra.mxu1 %v9947_v6  ;;  %v10028_v5 = vld [vmem:[%s14647_s1 + $0x740] ss:$16 sps:$4 sm:$0xff]   ;;  %v10031_v6 = vld [vmem:[%s14647_s1 + $0x748] ss:$16 sps:$4 sm:$0xff]  }
  0xb4   :  { %6696 = vmatprep.subr.bf16.mxu0 %v9952_v7  ;;  %7544 = vmatprep.subr.bf16.mxu1 %v9955_v8  ;;  %v10036_v7 = vld [vmem:[%s14647_s1 + $0x764] ss:$16 sps:$4 sm:$0xff]   ;;  %v10039_v8 = vld [vmem:[%s14647_s1 + $0x76c] ss:$16 sps:$4 sm:$0xff]  }
  0xb7   :  { %6697 = vmatpush1.bf16.msra.mxu0 %v9950_v9  ;;  %7545 = vmatpush1.bf16.msra.mxu1 %v9953_v10  ;;  %v10034_v9 = vld [vmem:[%s14647_s1 + $0x760] ss:$16 sps:$4 sm:$0xff]   ;;  %v10037_v10 = vld [vmem:[%s14647_s1 + $0x768] ss:$16 sps:$4 sm:$0xff]  }
  0xb8   :  { %6698 = vmatprep.subr.bf16.mxu0 %v9958_v11  ;;  %7546 = vmatprep.subr.bf16.mxu1 %v9961_v12  ;;  %v10042_v11 = vld [vmem:[%s14647_s1 + $0x784] ss:$16 sps:$4 sm:$0xff]   ;;  %v10045_v12 = vld [vmem:[%s14647_s1 + $0x78c] ss:$16 sps:$4 sm:$0xff]  }
  0xbb   :  { %6699 = vmatpush1.bf16.msra.mxu0 %v9956_v13  ;;  %7547 = vmatpush1.bf16.msra.mxu1 %v9959_v14  ;;  %v10040_v13 = vld [vmem:[%s14647_s1 + $0x780] ss:$16 sps:$4 sm:$0xff]   ;;  %v10043_v14 = vld [vmem:[%s14647_s1 + $0x788] ss:$16 sps:$4 sm:$0xff]  }
  0xbc   :  { %6700 = vmatprep.subr.bf16.mxu0 %v9964_v15  ;;  %7548 = vmatprep.subr.bf16.mxu1 %v9967_v16  ;;  %v10048_v15 = vld [vmem:[%s14647_s1 + $0x7a4] ss:$16 sps:$4 sm:$0xff]   ;;  %v10051_v16 = vld [vmem:[%s14647_s1 + $0x7ac] ss:$16 sps:$4 sm:$0xff]  }
  0xbf   :  { %6701 = vmatpush1.bf16.msra.mxu0 %v9962_v17  ;;  %7549 = vmatpush1.bf16.msra.mxu1 %v9965_v18  ;;  %v10046_v17 = vld [vmem:[%s14647_s1 + $0x7a0] ss:$16 sps:$4 sm:$0xff]   ;;  %v10049_v18 = vld [vmem:[%s14647_s1 + $0x7a8] ss:$16 sps:$4 sm:$0xff]  }
  0xc0   :  { %6723 = vmatprep.subr.bf16.mxu0 %v9970_v19  ;;  %7571 = vmatprep.subr.bf16.mxu1 %v9973_v20  ;;  %v10054_v19 = vld [vmem:[%s14647_s1 + $0x7c4] ss:$16 sps:$4 sm:$0xff]   ;;  %v10057_v20 = vld [vmem:[%s14647_s1 + $0x7cc] ss:$16 sps:$4 sm:$0xff]  }
  0xc2   :  { %6703 = vmatmul.mubr.bf16.vlgmr.msra.gmra.mrb[0].mxu0 %v8324_v22  ;;  %7551 = vmatmul.mubr.bf16.vlgmr.msra.gmra.mrb[0].mxu1 %v8324_v22  ;;  %v10055_v22 = vld [vmem:[%s14647_s1 + $0x7c8] ss:$16 sps:$4 sm:$0xff]  }
  0xc3   :  { %6724 = vmatpush1.bf16.msra.mxu0 %v9968_v24  ;;  %7572 = vmatpush1.bf16.msra.mxu1 %v9971_v26  ;;  %v10063_v24 = vld [vmem:[%s14647_s1 + $0x7ec] ss:$16 sps:$4 sm:$0xff]   ;;  %v10058_v26 = vld [vmem:[%s14647_s1 + $0x7e0] ss:$16 sps:$4 sm:$0xff]  }
  0xc4   :  { %6725 = vmatprep.subr.bf16.mxu0 %v9976_v25  ;;  %7573 = vmatprep.subr.bf16.mxu1 %v9979_v27  ;;  %v10061_v25 = vld [vmem:[%s14647_s1 + $0x7e8] ss:$16 sps:$4 sm:$0xff]   ;;  %v10066_v27 = vld [vmem:[%s14647_s1 + $0x804] ss:$16 sps:$4 sm:$0xff]  }
  0xc5   :  { %6712 = vmatprep.mubr.bf16.mxu0 %v8357_v28  ;;  %7560 = vmatprep.mubr.bf16.mxu1 %v8357_v28  ;;  %v10069_v28 = vld [vmem:[%s14647_s1 + $0x80c] ss:$16 sps:$4 sm:$0xff]  }
  0xc7   :  { %6726 = vmatpush1.bf16.msra.mxu0 %v9974_v29  ;;  %7574 = vmatpush1.bf16.msra.mxu1 %v9977_v30  ;;  %v49_v29 = vld [vmem:[%s14648_s0 + $0x118] sm:$0xff]  ;;  %v8326_v30 = vcombine.low %v11897_v33, %v11902_v35 }
  0xc8   :  { %6727 = vmatprep.subr.bf16.mxu0 %v9982_v31  ;;  %7575 = vmatprep.subr.bf16.mxu1 %v9985_v32  ;;  %v65_v31 = vld [vmem:[%s14648_s0 + $0x198] sm:$0xff]  ;;  %v10064_v32 = vld [vmem:[%s14647_s1 + $0x800] ss:$16 sps:$4 sm:$0xff]  }
  0xc9   :  { %v10075_v33 = vld [vmem:[%s14647_s1 + $0x82c] ss:$16 sps:$4 sm:$0xff]   ;;  %v8359_v35 = vcombine.high %v49_v29, %v65_v31 }
  0xca   :  { %6713 = vmatmul.mubr.bf16.gmra.mrb[4].mxu0 %v8356_v34  ;;  %7561 = vmatmul.mubr.bf16.gmra.mrb[4].mxu1 %v8356_v34  ;;  %v10067_v34 = vld [vmem:[%s14647_s1 + $0x808] ss:$16 sps:$4 sm:$0xff]  }
  0xcb   :  { %6728 = vmatpush1.bf16.msra.mxu0 %v9980_v36  ;;  %7576 = vmatpush1.bf16.msra.mxu1 %v9983_v37  ;;  %v10072_v36 = vld [vmem:[%s14647_s1 + $0x824] ss:$16 sps:$4 sm:$0xff]   ;;  %v10070_v37 = vld [vmem:[%s14647_s1 + $0x820] ss:$16 sps:$4 sm:$0xff]  }
  0xcc   :  { %6729 = vmatprep.subr.bf16.mxu0 %v9988_v38  ;;  %7577 = vmatprep.subr.bf16.mxu1 %v9991_v39  ;;  %v10073_v38 = vld [vmem:[%s14647_s1 + $0x828] ss:$16 sps:$4 sm:$0xff]   ;;  %v10078_v39 = vld [vmem:[%s14647_s1 + $0x844] ss:$16 sps:$4 sm:$0xff]  }
  0xcd   :  { %6755 = vmatprep.mubr.bf16.mxu0 %v8327_v40  ;;  %7603 = vmatprep.mubr.bf16.mxu1 %v8327_v40  ;;  %v10081_v40 = vld [vmem:[%s14647_s1 + $0x84c] ss:$16 sps:$4 sm:$0xff]  }
  0xcf   :  { %6730 = vmatpush1.bf16.msra.mxu0 %v9986_v41  ;;  %7578 = vmatpush1.bf16.msra.mxu1 %v9989_v42  ;;  %v12109_v41 = vld [vmem:[%s14648_s0 + $0x20] sm:$0xff]  ;;  %v8358_v42 = vcombine.low %v49_v29, %v65_v31 }
  0xd0   :  { %6731 = vmatprep.subr.bf16.mxu0 %v9994_v43  ;;  %7579 = vmatprep.subr.bf16.mxu1 %v9997_v44  ;;  %v12114_v43 = vld [vmem:[%s14648_s0 + $0xa0] sm:$0xff] }
  0xd1   :  { %v10076_v44 = vld [vmem:[%s14647_s1 + $0x840] ss:$16 sps:$4 sm:$0xff]   ;;  %v10156_v31 = vld [vmem:[%s14647_s1 + $0x9e4] ss:$16 sps:$4 sm:$0xff]  }
  0xd2   :  { %v10148_v29 = vld [vmem:[%s14647_s1 + $0x9c0] ss:$16 sps:$4 sm:$0xff]  }
  0xd3   :  { %6732 = vmatpush1.bf16.msra.mxu0 %v9992_v45  ;;  %7580 = vmatpush1.bf16.msra.mxu1 %v9995_v46  ;;  %v10079_v45 = vld [vmem:[%s14647_s1 + $0x848] ss:$16 sps:$4 sm:$0xff]   ;;  %v10084_v46 = vld [vmem:[%s14647_s1 + $0x864] ss:$16 sps:$4 sm:$0xff]  }
  0xd4   :  { %6733 = vmatprep.subr.bf16.mxu0 %v10000_v47  ;;  %7581 = vmatprep.subr.bf16.mxu1 %v10003_v48  ;;  %v10087_v47 = vld [vmem:[%s14647_s1 + $0x86c] ss:$16 sps:$4 sm:$0xff]   ;;  %v8329_v48 = vcombine.high %v12109_v41, %v12114_v43 }
  0xd7   :  { %6734 = vmatpush1.bf16.msra.mxu0 %v9998_v49  ;;  %7582 = vmatpush1.bf16.msra.mxu1 %v10001_v50  ;;  %v10082_v49 = vld [vmem:[%s14647_s1 + $0x860] ss:$16 sps:$4 sm:$0xff]   ;;  %v10085_v50 = vld [vmem:[%s14647_s1 + $0x868] ss:$16 sps:$4 sm:$0xff]  }
  0xd8   :  { %6735 = vmatprep.subr.bf16.mxu0 %v10006_v51  ;;  %7583 = vmatprep.subr.bf16.mxu1 %v10009_v52  ;;  %v10090_v51 = vld [vmem:[%s14647_s1 + $0x884] ss:$16 sps:$4 sm:$0xff]   ;;  %v10093_v52 = vld [vmem:[%s14647_s1 + $0x88c] ss:$16 sps:$4 sm:$0xff]  }
  0xdb   :  { %6736 = vmatpush1.bf16.msra.mxu0 %v10004_v53  ;;  %7584 = vmatpush1.bf16.msra.mxu1 %v10007_v54  ;;  %v10088_v53 = vld [vmem:[%s14647_s1 + $0x880] ss:$16 sps:$4 sm:$0xff]   ;;  %v10091_v54 = vld [vmem:[%s14647_s1 + $0x888] ss:$16 sps:$4 sm:$0xff]  }
  0xdc   :  { %6737 = vmatprep.subr.bf16.mxu0 %v10012_v55  ;;  %7585 = vmatprep.subr.bf16.mxu1 %v10015_v56  ;;  %v10096_v55 = vld [vmem:[%s14647_s1 + $0x8a4] ss:$16 sps:$4 sm:$0xff]   ;;  %v10099_v56 = vld [vmem:[%s14647_s1 + $0x8ac] ss:$16 sps:$4 sm:$0xff]  }
  0xdf   :  { %6738 = vmatpush1.bf16.msra.mxu0 %v10010_v57  ;;  %7586 = vmatpush1.bf16.msra.mxu1 %v10013_v58  ;;  %v10094_v57 = vld [vmem:[%s14647_s1 + $0x8a0] ss:$16 sps:$4 sm:$0xff]   ;;  %v10097_v58 = vld [vmem:[%s14647_s1 + $0x8a8] ss:$16 sps:$4 sm:$0xff]  }
  0xe0   :  { %6739 = vmatprep.subr.bf16.mxu0 %v10018_v59  ;;  %7587 = vmatprep.subr.bf16.mxu1 %v10021_v60  ;;  %v10102_v59 = vld [vmem:[%s14647_s1 + $0x8c4] ss:$16 sps:$4 sm:$0xff]   ;;  %v10105_v60 = vld [vmem:[%s14647_s1 + $0x8cc] ss:$16 sps:$4 sm:$0xff]  }
  0xe3   :  { %6740 = vmatpush1.bf16.msra.mxu0 %v10016_v61  ;;  %7588 = vmatpush1.bf16.msra.mxu1 %v10019_v62  ;;  %v10100_v61 = vld [vmem:[%s14647_s1 + $0x8c0] ss:$16 sps:$4 sm:$0xff]   ;;  %v10103_v62 = vld [vmem:[%s14647_s1 + $0x8c8] ss:$16 sps:$4 sm:$0xff]  }
  0xe4   :  { %6741 = vmatprep.subr.bf16.mxu0 %v10024_v63  ;;  %7589 = vmatprep.subr.bf16.mxu1 %v10027_v0  ;;  %v10108_v63 = vld [vmem:[%s14647_s1 + $0x8e4] ss:$16 sps:$4 sm:$0xff]   ;;  %v10111_v0 = vld [vmem:[%s14647_s1 + $0x8ec] ss:$16 sps:$4 sm:$0xff]  }
  0xe7   :  { %6742 = vmatpush1.bf16.msra.mxu0 %v10022_v1  ;;  %7590 = vmatpush1.bf16.msra.mxu1 %v10025_v2  ;;  %v10106_v1 = vld [vmem:[%s14647_s1 + $0x8e0] ss:$16 sps:$4 sm:$0xff]   ;;  %v10109_v2 = vld [vmem:[%s14647_s1 + $0x8e8] ss:$16 sps:$4 sm:$0xff]  }
  0xe8   :  { %6743 = vmatprep.subr.bf16.mxu0 %v10030_v3  ;;  %7591 = vmatprep.subr.bf16.mxu1 %v10033_v4  ;;  %v10114_v3 = vld [vmem:[%s14647_s1 + $0x904] ss:$16 sps:$4 sm:$0xff]   ;;  %v10117_v4 = vld [vmem:[%s14647_s1 + $0x90c] ss:$16 sps:$4 sm:$0xff]  }
  0xeb   :  { %6744 = vmatpush1.bf16.msra.mxu0 %v10028_v5  ;;  %7592 = vmatpush1.bf16.msra.mxu1 %v10031_v6  ;;  %v10112_v5 = vld [vmem:[%s14647_s1 + $0x900] ss:$16 sps:$4 sm:$0xff]   ;;  %v10115_v6 = vld [vmem:[%s14647_s1 + $0x908] ss:$16 sps:$4 sm:$0xff]  }
  0xec   :  { %6745 = vmatprep.subr.bf16.mxu0 %v10036_v7  ;;  %7593 = vmatprep.subr.bf16.mxu1 %v10039_v8  ;;  %v10120_v7 = vld [vmem:[%s14647_s1 + $0x924] ss:$16 sps:$4 sm:$0xff]   ;;  %v10123_v8 = vld [vmem:[%s14647_s1 + $0x92c] ss:$16 sps:$4 sm:$0xff]  }
  0xef   :  { %6746 = vmatpush1.bf16.msra.mxu0 %v10034_v9  ;;  %7594 = vmatpush1.bf16.msra.mxu1 %v10037_v10  ;;  %v10118_v9 = vld [vmem:[%s14647_s1 + $0x920] ss:$16 sps:$4 sm:$0xff]   ;;  %v10121_v10 = vld [vmem:[%s14647_s1 + $0x928] ss:$16 sps:$4 sm:$0xff]  }
  0xf0   :  { %6747 = vmatprep.subr.bf16.mxu0 %v10042_v11  ;;  %7595 = vmatprep.subr.bf16.mxu1 %v10045_v12  ;;  %v10126_v11 = vld [vmem:[%s14647_s1 + $0x944] ss:$16 sps:$4 sm:$0xff]   ;;  %v10129_v12 = vld [vmem:[%s14647_s1 + $0x94c] ss:$16 sps:$4 sm:$0xff]  }
  0xf3   :  { %6748 = vmatpush1.bf16.msra.mxu0 %v10040_v13  ;;  %7596 = vmatpush1.bf16.msra.mxu1 %v10043_v14  ;;  %v10124_v13 = vld [vmem:[%s14647_s1 + $0x940] ss:$16 sps:$4 sm:$0xff]   ;;  %v10127_v14 = vld [vmem:[%s14647_s1 + $0x948] ss:$16 sps:$4 sm:$0xff]  }
  0xf4   :  { %6749 = vmatprep.subr.bf16.mxu0 %v10048_v15  ;;  %7597 = vmatprep.subr.bf16.mxu1 %v10051_v16  ;;  %v10132_v15 = vld [vmem:[%s14647_s1 + $0x964] ss:$16 sps:$4 sm:$0xff]   ;;  %v10135_v16 = vld [vmem:[%s14647_s1 + $0x96c] ss:$16 sps:$4 sm:$0xff]  }
  0xf7   :  { %6750 = vmatpush1.bf16.msra.mxu0 %v10046_v17  ;;  %7598 = vmatpush1.bf16.msra.mxu1 %v10049_v18  ;;  %v10130_v17 = vld [vmem:[%s14647_s1 + $0x960] ss:$16 sps:$4 sm:$0xff]   ;;  %v10133_v18 = vld [vmem:[%s14647_s1 + $0x968] ss:$16 sps:$4 sm:$0xff]  }
  0xf8   :  { %6751 = vmatprep.subr.bf16.mxu0 %v10054_v19  ;;  %7599 = vmatprep.subr.bf16.mxu1 %v10057_v20  ;;  %v10138_v19 = vld [vmem:[%s14647_s1 + $0x984] ss:$16 sps:$4 sm:$0xff]   ;;  %v10141_v20 = vld [vmem:[%s14647_s1 + $0x98c] ss:$16 sps:$4 sm:$0xff]  }
  0xfb   :  { %6752 = vmatpush1.bf16.msra.mxu0 %v10052_v21  ;;  %7600 = vmatpush1.bf16.msra.mxu1 %v10055_v22  ;;  %v10136_v21 = vld [vmem:[%s14647_s1 + $0x980] ss:$16 sps:$4 sm:$0xff]   ;;  %v10139_v22 = vld [vmem:[%s14647_s1 + $0x988] ss:$16 sps:$4 sm:$0xff]  }
  0xfc   :  { %6753 = vmatprep.subr.bf16.mxu0 %v10060_v23  ;;  %7601 = vmatprep.subr.bf16.mxu1 %v10063_v24  ;;  %v10144_v23 = vld [vmem:[%s14647_s1 + $0x9a4] ss:$16 sps:$4 sm:$0xff]   ;;  %v10147_v24 = vld [vmem:[%s14647_s1 + $0x9ac] ss:$16 sps:$4 sm:$0xff]  }
  0xff   :  { %6754 = vmatpush1.bf16.msra.mxu0 %v10058_v26  ;;  %7602 = vmatpush1.bf16.msra.mxu1 %v10061_v25  ;;  %v10142_v26 = vld [vmem:[%s14647_s1 + $0x9a0] ss:$16 sps:$4 sm:$0xff]   ;;  %v10145_v25 = vld [vmem:[%s14647_s1 + $0x9a8] ss:$16 sps:$4 sm:$0xff]  }
 0x100   :  { %6776 = vmatprep.subr.bf16.mxu0 %v10066_v27  ;;  %7624 = vmatprep.subr.bf16.mxu1 %v10069_v28  ;;  %v10150_v27 = vld [vmem:[%s14647_s1 + $0x9c4] ss:$16 sps:$4 sm:$0xff]   ;;  %v10153_v28 = vld [vmem:[%s14647_s1 + $0x9cc] ss:$16 sps:$4 sm:$0xff]  }
 0x102   :  { %6756 = vmatmul.mubr.bf16.vlgmr.msra.gmra.mrb[0].mxu0 %v8326_v30  ;;  %7604 = vmatmul.mubr.bf16.vlgmr.msra.gmra.mrb[0].mxu1 %v8326_v30  ;;  %v10151_v30 = vld [vmem:[%s14647_s1 + $0x9c8] ss:$16 sps:$4 sm:$0xff]  }
 0x103   :  { %6777 = vmatpush1.bf16.msra.mxu0 %v10064_v32  ;;  %7625 = vmatpush1.bf16.msra.mxu1 %v10067_v34  ;;  %v10159_v32 = vld [vmem:[%s14647_s1 + $0x9ec] ss:$16 sps:$4 sm:$0xff]   ;;  %v10154_v34 = vld [vmem:[%s14647_s1 + $0x9e0] ss:$16 sps:$4 sm:$0xff]  }
 0x104   :  { %6778 = vmatprep.subr.bf16.mxu0 %v10072_v36  ;;  %7626 = vmatprep.subr.bf16.mxu1 %v10075_v33  ;;  %v10157_v36 = vld [vmem:[%s14647_s1 + $0x9e8] ss:$16 sps:$4 sm:$0xff]   ;;  %v10162_v33 = vld [vmem:[%s14647_s1 + $0xa04] ss:$16 sps:$4 sm:$0xff]  }
 0x105   :  { %6765 = vmatprep.mubr.bf16.mxu0 %v8359_v35  ;;  %7613 = vmatprep.mubr.bf16.mxu1 %v8359_v35  ;;  %v10165_v35 = vld [vmem:[%s14647_s1 + $0xa0c] ss:$16 sps:$4 sm:$0xff]  }
 0x107   :  { %6779 = vmatpush1.bf16.msra.mxu0 %v10070_v37  ;;  %7627 = vmatpush1.bf16.msra.mxu1 %v10073_v38  ;;  %v50_v37 = vld [vmem:[%s14648_s0 + $0x120] sm:$0xff] }
 0x108   :  { %6780 = vmatprep.subr.bf16.mxu0 %v10078_v39  ;;  %7628 = vmatprep.subr.bf16.mxu1 %v10081_v40  ;;  %v66_v38 = vld [vmem:[%s14648_s0 + $0x1a0] sm:$0xff]  ;;  %v8328_v39 = vcombine.low %v12109_v41, %v12114_v43  ;;  %v10171_v41 = vld [vmem:[%s14647_s1 + $0xa2c] ss:$16 sps:$4 sm:$0xff]  }
 0x109   :  { %v10160_v40 = vld [vmem:[%s14647_s1 + $0xa00] ss:$16 sps:$4 sm:$0xff]  }
 0x10a   :  { %6766 = vmatmul.mubr.bf16.gmra.mrb[4].mxu0 %v8358_v42  ;;  %7614 = vmatmul.mubr.bf16.gmra.mrb[4].mxu1 %v8358_v42  ;;  %v10163_v42 = vld [vmem:[%s14647_s1 + $0xa08] ss:$16 sps:$4 sm:$0xff]   ;;  %v10166_v43 = vld [vmem:[%s14647_s1 + $0xa20] ss:$16 sps:$4 sm:$0xff]  }
 0x10b   :  { %6781 = vmatpush1.bf16.msra.mxu0 %v10076_v44  ;;  %7629 = vmatpush1.bf16.msra.mxu1 %v10079_v45  ;;  %v10168_v44 = vld [vmem:[%s14647_s1 + $0xa24] ss:$16 sps:$4 sm:$0xff]   ;;  %v10169_v45 = vld [vmem:[%s14647_s1 + $0xa28] ss:$16 sps:$4 sm:$0xff]  }
 0x10c   :  { %6782 = vmatprep.subr.bf16.mxu0 %v10084_v46  ;;  %7630 = vmatprep.subr.bf16.mxu1 %v10087_v47  ;;  %v8361_v46 = vcombine.high %v50_v37, %v66_v38  ;;  %v10174_v47 = vld [vmem:[%s14647_s1 + $0xa44] ss:$16 sps:$4 sm:$0xff]  }
 0x10d   :  { %6808 = vmatprep.mubr.bf16.mxu0 %v8329_v48  ;;  %7656 = vmatprep.mubr.bf16.mxu1 %v8329_v48  ;;  %v10177_v48 = vld [vmem:[%s14647_s1 + $0xa4c] ss:$16 sps:$4 sm:$0xff]  }
 0x10f   :  { %6783 = vmatpush1.bf16.msra.mxu0 %v10082_v49  ;;  %7631 = vmatpush1.bf16.msra.mxu1 %v10085_v50  ;;  %v12321_v49 = vld [vmem:[%s14648_s0 + $0x28] sm:$0xff] }
 0x110   :  { %6784 = vmatprep.subr.bf16.mxu0 %v10090_v51  ;;  %7632 = vmatprep.subr.bf16.mxu1 %v10093_v52  ;;  %v12326_v50 = vld [vmem:[%s14648_s0 + $0xa8] sm:$0xff]  ;;  %v8360_v51 = vcombine.low %v50_v37, %v66_v38  ;;  %v10172_v52 = vld [vmem:[%s14647_s1 + $0xa40] ss:$16 sps:$4 sm:$0xff]  }
 0x111   :  { %v10244_v37 = vld [vmem:[%s14647_s1 + $0xbc0] ss:$16 sps:$4 sm:$0xff]   ;;  %v10247_v38 = vld [vmem:[%s14647_s1 + $0xbc8] ss:$16 sps:$4 sm:$0xff]  }
 0x113   :  { %6785 = vmatpush1.bf16.msra.mxu0 %v10088_v53  ;;  %7633 = vmatpush1.bf16.msra.mxu1 %v10091_v54  ;;  %v10175_v53 = vld [vmem:[%s14647_s1 + $0xa48] ss:$16 sps:$4 sm:$0xff]   ;;  %v10180_v54 = vld [vmem:[%s14647_s1 + $0xa64] ss:$16 sps:$4 sm:$0xff]  }
 0x114   :  { %6786 = vmatprep.subr.bf16.mxu0 %v10096_v55  ;;  %7634 = vmatprep.subr.bf16.mxu1 %v10099_v56  ;;  %v10183_v55 = vld [vmem:[%s14647_s1 + $0xa6c] ss:$16 sps:$4 sm:$0xff]   ;;  %v8331_v56 = vcombine.high %v12321_v49, %v12326_v50 }
 0x117   :  { %6787 = vmatpush1.bf16.msra.mxu0 %v10094_v57  ;;  %7635 = vmatpush1.bf16.msra.mxu1 %v10097_v58  ;;  %v10178_v57 = vld [vmem:[%s14647_s1 + $0xa60] ss:$16 sps:$4 sm:$0xff]   ;;  %v10181_v58 = vld [vmem:[%s14647_s1 + $0xa68] ss:$16 sps:$4 sm:$0xff]  }
 0x118   :  { %6788 = vmatprep.subr.bf16.mxu0 %v10102_v59  ;;  %7636 = vmatprep.subr.bf16.mxu1 %v10105_v60  ;;  %v10186_v59 = vld [vmem:[%s14647_s1 + $0xa84] ss:$16 sps:$4 sm:$0xff]   ;;  %v10189_v60 = vld [vmem:[%s14647_s1 + $0xa8c] ss:$16 sps:$4 sm:$0xff]  }
 0x11b   :  { %6789 = vmatpush1.bf16.msra.mxu0 %v10100_v61  ;;  %7637 = vmatpush1.bf16.msra.mxu1 %v10103_v62  ;;  %v10184_v61 = vld [vmem:[%s14647_s1 + $0xa80] ss:$16 sps:$4 sm:$0xff]   ;;  %v10187_v62 = vld [vmem:[%s14647_s1 + $0xa88] ss:$16 sps:$4 sm:$0xff]  }
 0x11c   :  { %6790 = vmatprep.subr.bf16.mxu0 %v10108_v63  ;;  %7638 = vmatprep.subr.bf16.mxu1 %v10111_v0  ;;  %v10192_v63 = vld [vmem:[%s14647_s1 + $0xaa4] ss:$16 sps:$4 sm:$0xff]   ;;  %v10195_v0 = vld [vmem:[%s14647_s1 + $0xaac] ss:$16 sps:$4 sm:$0xff]  }
 0x11f   :  { %6791 = vmatpush1.bf16.msra.mxu0 %v10106_v1  ;;  %7639 = vmatpush1.bf16.msra.mxu1 %v10109_v2  ;;  %v10190_v1 = vld [vmem:[%s14647_s1 + $0xaa0] ss:$16 sps:$4 sm:$0xff]   ;;  %v10193_v2 = vld [vmem:[%s14647_s1 + $0xaa8] ss:$16 sps:$4 sm:$0xff]  }
 0x120   :  { %6792 = vmatprep.subr.bf16.mxu0 %v10114_v3  ;;  %7640 = vmatprep.subr.bf16.mxu1 %v10117_v4  ;;  %v10198_v3 = vld [vmem:[%s14647_s1 + $0xac4] ss:$16 sps:$4 sm:$0xff]   ;;  %v10201_v4 = vld [vmem:[%s14647_s1 + $0xacc] ss:$16 sps:$4 sm:$0xff]  }
 0x123   :  { %6793 = vmatpush1.bf16.msra.mxu0 %v10112_v5  ;;  %7641 = vmatpush1.bf16.msra.mxu1 %v10115_v6  ;;  %v10196_v5 = vld [vmem:[%s14647_s1 + $0xac0] ss:$16 sps:$4 sm:$0xff]   ;;  %v10199_v6 = vld [vmem:[%s14647_s1 + $0xac8] ss:$16 sps:$4 sm:$0xff]  }
 0x124   :  { %6794 = vmatprep.subr.bf16.mxu0 %v10120_v7  ;;  %7642 = vmatprep.subr.bf16.mxu1 %v10123_v8  ;;  %v10204_v7 = vld [vmem:[%s14647_s1 + $0xae4] ss:$16 sps:$4 sm:$0xff]   ;;  %v10207_v8 = vld [vmem:[%s14647_s1 + $0xaec] ss:$16 sps:$4 sm:$0xff]  }
 0x127   :  { %6795 = vmatpush1.bf16.msra.mxu0 %v10118_v9  ;;  %7643 = vmatpush1.bf16.msra.mxu1 %v10121_v10  ;;  %v10202_v9 = vld [vmem:[%s14647_s1 + $0xae0] ss:$16 sps:$4 sm:$0xff]   ;;  %v10205_v10 = vld [vmem:[%s14647_s1 + $0xae8] ss:$16 sps:$4 sm:$0xff]  }
 0x128   :  { %6796 = vmatprep.subr.bf16.mxu0 %v10126_v11  ;;  %7644 = vmatprep.subr.bf16.mxu1 %v10129_v12  ;;  %v10210_v11 = vld [vmem:[%s14647_s1 + $0xb04] ss:$16 sps:$4 sm:$0xff]   ;;  %v10213_v12 = vld [vmem:[%s14647_s1 + $0xb0c] ss:$16 sps:$4 sm:$0xff]  }
 0x12b   :  { %6797 = vmatpush1.bf16.msra.mxu0 %v10124_v13  ;;  %7645 = vmatpush1.bf16.msra.mxu1 %v10127_v14  ;;  %v10208_v13 = vld [vmem:[%s14647_s1 + $0xb00] ss:$16 sps:$4 sm:$0xff]   ;;  %v10211_v14 = vld [vmem:[%s14647_s1 + $0xb08] ss:$16 sps:$4 sm:$0xff]  }
 0x12c   :  { %6798 = vmatprep.subr.bf16.mxu0 %v10132_v15  ;;  %7646 = vmatprep.subr.bf16.mxu1 %v10135_v16  ;;  %v10216_v15 = vld [vmem:[%s14647_s1 + $0xb24] ss:$16 sps:$4 sm:$0xff]   ;;  %v10219_v16 = vld [vmem:[%s14647_s1 + $0xb2c] ss:$16 sps:$4 sm:$0xff]  }
 0x12f   :  { %6799 = vmatpush1.bf16.msra.mxu0 %v10130_v17  ;;  %7647 = vmatpush1.bf16.msra.mxu1 %v10133_v18  ;;  %v10214_v17 = vld [vmem:[%s14647_s1 + $0xb20] ss:$16 sps:$4 sm:$0xff]   ;;  %v10217_v18 = vld [vmem:[%s14647_s1 + $0xb28] ss:$16 sps:$4 sm:$0xff]  }
 0x130   :  { %6800 = vmatprep.subr.bf16.mxu0 %v10138_v19  ;;  %7648 = vmatprep.subr.bf16.mxu1 %v10141_v20  ;;  %v10222_v19 = vld [vmem:[%s14647_s1 + $0xb44] ss:$16 sps:$4 sm:$0xff]   ;;  %v10225_v20 = vld [vmem:[%s14647_s1 + $0xb4c] ss:$16 sps:$4 sm:$0xff]  }
 0x133   :  { %6801 = vmatpush1.bf16.msra.mxu0 %v10136_v21  ;;  %7649 = vmatpush1.bf16.msra.mxu1 %v10139_v22  ;;  %v10220_v21 = vld [vmem:[%s14647_s1 + $0xb40] ss:$16 sps:$4 sm:$0xff]   ;;  %v10223_v22 = vld [vmem:[%s14647_s1 + $0xb48] ss:$16 sps:$4 sm:$0xff]  }
 0x134   :  { %6802 = vmatprep.subr.bf16.mxu0 %v10144_v23  ;;  %7650 = vmatprep.subr.bf16.mxu1 %v10147_v24  ;;  %v10228_v23 = vld [vmem:[%s14647_s1 + $0xb64] ss:$16 sps:$4 sm:$0xff]   ;;  %v10231_v24 = vld [vmem:[%s14647_s1 + $0xb6c] ss:$16 sps:$4 sm:$0xff]  }
 0x137   :  { %6803 = vmatpush1.bf16.msra.mxu0 %v10142_v26  ;;  %7651 = vmatpush1.bf16.msra.mxu1 %v10145_v25  ;;  %v10226_v26 = vld [vmem:[%s14647_s1 + $0xb60] ss:$16 sps:$4 sm:$0xff]   ;;  %v10229_v25 = vld [vmem:[%s14647_s1 + $0xb68] ss:$16 sps:$4 sm:$0xff]  }
 0x138   :  { %6804 = vmatprep.subr.bf16.mxu0 %v10150_v27  ;;  %7652 = vmatprep.subr.bf16.mxu1 %v10153_v28  ;;  %v10234_v27 = vld [vmem:[%s14647_s1 + $0xb84] ss:$16 sps:$4 sm:$0xff]   ;;  %v10237_v28 = vld [vmem:[%s14647_s1 + $0xb8c] ss:$16 sps:$4 sm:$0xff]  }
 0x13b   :  { %6805 = vmatpush1.bf16.msra.mxu0 %v10148_v29  ;;  %7653 = vmatpush1.bf16.msra.mxu1 %v10151_v30  ;;  %v10232_v29 = vld [vmem:[%s14647_s1 + $0xb80] ss:$16 sps:$4 sm:$0xff]   ;;  %v10235_v30 = vld [vmem:[%s14647_s1 + $0xb88] ss:$16 sps:$4 sm:$0xff]  }
 0x13c   :  { %6806 = vmatprep.subr.bf16.mxu0 %v10156_v31  ;;  %7654 = vmatprep.subr.bf16.mxu1 %v10159_v32  ;;  %v10240_v31 = vld [vmem:[%s14647_s1 + $0xba4] ss:$16 sps:$4 sm:$0xff]   ;;  %v10243_v32 = vld [vmem:[%s14647_s1 + $0xbac] ss:$16 sps:$4 sm:$0xff]  }
 0x13f   :  { %6807 = vmatpush1.bf16.msra.mxu0 %v10154_v34  ;;  %7655 = vmatpush1.bf16.msra.mxu1 %v10157_v36  ;;  %v10238_v34 = vld [vmem:[%s14647_s1 + $0xba0] ss:$16 sps:$4 sm:$0xff]   ;;  %v10241_v36 = vld [vmem:[%s14647_s1 + $0xba8] ss:$16 sps:$4 sm:$0xff]  }
 0x140   :  { %6829 = vmatprep.subr.bf16.mxu0 %v10162_v33  ;;  %7677 = vmatprep.subr.bf16.mxu1 %v10165_v35  ;;  %v10246_v33 = vld [vmem:[%s14647_s1 + $0xbc4] ss:$16 sps:$4 sm:$0xff]   ;;  %v10249_v35 = vld [vmem:[%s14647_s1 + $0xbcc] ss:$16 sps:$4 sm:$0xff]  }
 0x142   :  { %6809 = vmatmul.mubr.bf16.vlgmr.msra.gmra.mrb[0].mxu0 %v8328_v39  ;;  %7657 = vmatmul.mubr.bf16.vlgmr.msra.gmra.mrb[0].mxu1 %v8328_v39  ;;  %v10252_v39 = vld [vmem:[%s14647_s1 + $0xbe4] ss:$16 sps:$4 sm:$0xff]  }
 0x143   :  { %6830 = vmatpush1.bf16.msra.mxu0 %v10160_v40  ;;  %7678 = vmatpush1.bf16.msra.mxu1 %v10163_v42  ;;  %v10255_v40 = vld [vmem:[%s14647_s1 + $0xbec] ss:$16 sps:$4 sm:$0xff]   ;;  %v10250_v42 = vld [vmem:[%s14647_s1 + $0xbe0] ss:$16 sps:$4 sm:$0xff]  }
 0x144   :  { %6831 = vmatprep.subr.bf16.mxu0 %v10168_v44  ;;  %7679 = vmatprep.subr.bf16.mxu1 %v10171_v41  ;;  %v10253_v44 = vld [vmem:[%s14647_s1 + $0xbe8] ss:$16 sps:$4 sm:$0xff]   ;;  %v10258_v41 = vld [vmem:[%s14647_s1 + $0xc04] ss:$16 sps:$4 sm:$0xff]  }
 0x145   :  { %6818 = vmatprep.mubr.bf16.mxu0 %v8361_v46  ;;  %7666 = vmatprep.mubr.bf16.mxu1 %v8361_v46  ;;  %v67_v46 = vld [vmem:[%s14648_s0 + $0x1a8] sm:$0xff] }
 0x147   :  { %6832 = vmatpush1.bf16.msra.mxu0 %v10166_v43  ;;  %7680 = vmatpush1.bf16.msra.mxu1 %v10169_v45  ;;  %v10261_v43 = vld [vmem:[%s14647_s1 + $0xc0c] ss:$16 sps:$4 sm:$0xff]  }
 0x148   :  { %6833 = vmatprep.subr.bf16.mxu0 %v10174_v47  ;;  %7681 = vmatprep.subr.bf16.mxu1 %v10177_v48  ;;  %v51_v45 = vld [vmem:[%s14648_s0 + $0x128] sm:$0xff]  ;;  %v8330_v47 = vcombine.low %v12321_v49, %v12326_v50  ;;  %v10256_v48 = vld [vmem:[%s14647_s1 + $0xc00] ss:$16 sps:$4 sm:$0xff]  }
 0x149   :  { %v10267_v49 = vld [vmem:[%s14647_s1 + $0xc2c] ss:$16 sps:$4 sm:$0xff]   ;;  %v10262_v50 = vld [vmem:[%s14647_s1 + $0xc20] ss:$16 sps:$4 sm:$0xff]  }
 0x14a   :  { %6819 = vmatmul.mubr.bf16.gmra.mrb[4].mxu0 %v8360_v51  ;;  %7667 = vmatmul.mubr.bf16.gmra.mrb[4].mxu1 %v8360_v51  ;;  %v10259_v51 = vld [vmem:[%s14647_s1 + $0xc08] ss:$16 sps:$4 sm:$0xff]  }
 0x14b   :  { %6834 = vmatpush1.bf16.msra.mxu0 %v10172_v52  ;;  %7682 = vmatpush1.bf16.msra.mxu1 %v10175_v53  ;;  %v10264_v52 = vld [vmem:[%s14647_s1 + $0xc24] ss:$16 sps:$4 sm:$0xff]   ;;  %v10265_v53 = vld [vmem:[%s14647_s1 + $0xc28] ss:$16 sps:$4 sm:$0xff]  }
 0x14c   :  { %6835 = vmatprep.subr.bf16.mxu0 %v10180_v54  ;;  %7683 = vmatprep.subr.bf16.mxu1 %v10183_v55  ;;  %v8363_v54 = vcombine.high %v51_v45, %v67_v46  ;;  %v10270_v55 = vld [vmem:[%s14647_s1 + $0xc44] ss:$16 sps:$4 sm:$0xff]  }
 0x14d   :  { %6861 = vmatprep.mubr.bf16.mxu0 %v8331_v56  ;;  %7709 = vmatprep.mubr.bf16.mxu1 %v8331_v56  ;;  %v10273_v56 = vld [vmem:[%s14647_s1 + $0xc4c] ss:$16 sps:$4 sm:$0xff]  }
 0x14f   :  { %6836 = vmatpush1.bf16.msra.mxu0 %v10178_v57  ;;  %7684 = vmatpush1.bf16.msra.mxu1 %v10181_v58  ;;  %v12533_v57 = vld [vmem:[%s14648_s0 + $0x30] sm:$0xff] }
 0x150   :  { %6837 = vmatprep.subr.bf16.mxu0 %v10186_v59  ;;  %7685 = vmatprep.subr.bf16.mxu1 %v10189_v60  ;;  %v12538_v58 = vld [vmem:[%s14648_s0 + $0xb0] sm:$0xff]  ;;  %v8362_v59 = vcombine.low %v51_v45, %v67_v46  ;;  %v10343_v46 = vld [vmem:[%s14647_s1 + $0xdc8] ss:$16 sps:$4 sm:$0xff]  }
 0x151   :  { %v10268_v60 = vld [vmem:[%s14647_s1 + $0xc40] ss:$16 sps:$4 sm:$0xff]  }
 0x152   :  { %v10340_v45 = vld [vmem:[%s14647_s1 + $0xdc0] ss:$16 sps:$4 sm:$0xff]  }
 0x153   :  { %6838 = vmatpush1.bf16.msra.mxu0 %v10184_v61  ;;  %7686 = vmatpush1.bf16.msra.mxu1 %v10187_v62  ;;  %v10271_v61 = vld [vmem:[%s14647_s1 + $0xc48] ss:$16 sps:$4 sm:$0xff]   ;;  %v10276_v62 = vld [vmem:[%s14647_s1 + $0xc64] ss:$16 sps:$4 sm:$0xff]  }
 0x154   :  { %6839 = vmatprep.subr.bf16.mxu0 %v10192_v63  ;;  %7687 = vmatprep.subr.bf16.mxu1 %v10195_v0  ;;  %v10279_v63 = vld [vmem:[%s14647_s1 + $0xc6c] ss:$16 sps:$4 sm:$0xff]   ;;  %v8333_v0 = vcombine.high %v12533_v57, %v12538_v58 }
 0x157   :  { %6840 = vmatpush1.bf16.msra.mxu0 %v10190_v1  ;;  %7688 = vmatpush1.bf16.msra.mxu1 %v10193_v2  ;;  %v10274_v1 = vld [vmem:[%s14647_s1 + $0xc60] ss:$16 sps:$4 sm:$0xff]   ;;  %v10277_v2 = vld [vmem:[%s14647_s1 + $0xc68] ss:$16 sps:$4 sm:$0xff]  }
 0x158   :  { %6841 = vmatprep.subr.bf16.mxu0 %v10198_v3  ;;  %7689 = vmatprep.subr.bf16.mxu1 %v10201_v4  ;;  %v10282_v3 = vld [vmem:[%s14647_s1 + $0xc84] ss:$16 sps:$4 sm:$0xff]   ;;  %v10285_v4 = vld [vmem:[%s14647_s1 + $0xc8c] ss:$16 sps:$4 sm:$0xff]  }
 0x15b   :  { %6842 = vmatpush1.bf16.msra.mxu0 %v10196_v5  ;;  %7690 = vmatpush1.bf16.msra.mxu1 %v10199_v6  ;;  %v10280_v5 = vld [vmem:[%s14647_s1 + $0xc80] ss:$16 sps:$4 sm:$0xff]   ;;  %v10283_v6 = vld [vmem:[%s14647_s1 + $0xc88] ss:$16 sps:$4 sm:$0xff]  }
 0x15c   :  { %6843 = vmatprep.subr.bf16.mxu0 %v10204_v7  ;;  %7691 = vmatprep.subr.bf16.mxu1 %v10207_v8  ;;  %v10288_v7 = vld [vmem:[%s14647_s1 + $0xca4] ss:$16 sps:$4 sm:$0xff]   ;;  %v10291_v8 = vld [vmem:[%s14647_s1 + $0xcac] ss:$16 sps:$4 sm:$0xff]  }
 0x15f   :  { %6844 = vmatpush1.bf16.msra.mxu0 %v10202_v9  ;;  %7692 = vmatpush1.bf16.msra.mxu1 %v10205_v10  ;;  %v10286_v9 = vld [vmem:[%s14647_s1 + $0xca0] ss:$16 sps:$4 sm:$0xff]   ;;  %v10289_v10 = vld [vmem:[%s14647_s1 + $0xca8] ss:$16 sps:$4 sm:$0xff]  }
 0x160   :  { %6845 = vmatprep.subr.bf16.mxu0 %v10210_v11  ;;  %7693 = vmatprep.subr.bf16.mxu1 %v10213_v12  ;;  %v10294_v11 = vld [vmem:[%s14647_s1 + $0xcc4] ss:$16 sps:$4 sm:$0xff]   ;;  %v10297_v12 = vld [vmem:[%s14647_s1 + $0xccc] ss:$16 sps:$4 sm:$0xff]  }
 0x163   :  { %6846 = vmatpush1.bf16.msra.mxu0 %v10208_v13  ;;  %7694 = vmatpush1.bf16.msra.mxu1 %v10211_v14  ;;  %v10292_v13 = vld [vmem:[%s14647_s1 + $0xcc0] ss:$16 sps:$4 sm:$0xff]   ;;  %v10295_v14 = vld [vmem:[%s14647_s1 + $0xcc8] ss:$16 sps:$4 sm:$0xff]  }
 0x164   :  { %6847 = vmatprep.subr.bf16.mxu0 %v10216_v15  ;;  %7695 = vmatprep.subr.bf16.mxu1 %v10219_v16  ;;  %v10300_v15 = vld [vmem:[%s14647_s1 + $0xce4] ss:$16 sps:$4 sm:$0xff]   ;;  %v10303_v16 = vld [vmem:[%s14647_s1 + $0xcec] ss:$16 sps:$4 sm:$0xff]  }
 0x167   :  { %6848 = vmatpush1.bf16.msra.mxu0 %v10214_v17  ;;  %7696 = vmatpush1.bf16.msra.mxu1 %v10217_v18  ;;  %v10298_v17 = vld [vmem:[%s14647_s1 + $0xce0] ss:$16 sps:$4 sm:$0xff]   ;;  %v10301_v18 = vld [vmem:[%s14647_s1 + $0xce8] ss:$16 sps:$4 sm:$0xff]  }
 0x168   :  { %6849 = vmatprep.subr.bf16.mxu0 %v10222_v19  ;;  %7697 = vmatprep.subr.bf16.mxu1 %v10225_v20  ;;  %v10306_v19 = vld [vmem:[%s14647_s1 + $0xd04] ss:$16 sps:$4 sm:$0xff]   ;;  %v10309_v20 = vld [vmem:[%s14647_s1 + $0xd0c] ss:$16 sps:$4 sm:$0xff]  }
 0x16b   :  { %6850 = vmatpush1.bf16.msra.mxu0 %v10220_v21  ;;  %7698 = vmatpush1.bf16.msra.mxu1 %v10223_v22  ;;  %v10304_v21 = vld [vmem:[%s14647_s1 + $0xd00] ss:$16 sps:$4 sm:$0xff]   ;;  %v10307_v22 = vld [vmem:[%s14647_s1 + $0xd08] ss:$16 sps:$4 sm:$0xff]  }
 0x16c   :  { %6851 = vmatprep.subr.bf16.mxu0 %v10228_v23  ;;  %7699 = vmatprep.subr.bf16.mxu1 %v10231_v24  ;;  %v10312_v23 = vld [vmem:[%s14647_s1 + $0xd24] ss:$16 sps:$4 sm:$0xff]   ;;  %v10315_v24 = vld [vmem:[%s14647_s1 + $0xd2c] ss:$16 sps:$4 sm:$0xff]  }
 0x16f   :  { %6852 = vmatpush1.bf16.msra.mxu0 %v10226_v26  ;;  %7700 = vmatpush1.bf16.msra.mxu1 %v10229_v25  ;;  %v10310_v26 = vld [vmem:[%s14647_s1 + $0xd20] ss:$16 sps:$4 sm:$0xff]   ;;  %v10313_v25 = vld [vmem:[%s14647_s1 + $0xd28] ss:$16 sps:$4 sm:$0xff]  }
 0x170   :  { %6853 = vmatprep.subr.bf16.mxu0 %v10234_v27  ;;  %7701 = vmatprep.subr.bf16.mxu1 %v10237_v28  ;;  %v10318_v27 = vld [vmem:[%s14647_s1 + $0xd44] ss:$16 sps:$4 sm:$0xff]   ;;  %v10321_v28 = vld [vmem:[%s14647_s1 + $0xd4c] ss:$16 sps:$4 sm:$0xff]  }
 0x173   :  { %6854 = vmatpush1.bf16.msra.mxu0 %v10232_v29  ;;  %7702 = vmatpush1.bf16.msra.mxu1 %v10235_v30  ;;  %v10316_v29 = vld [vmem:[%s14647_s1 + $0xd40] ss:$16 sps:$4 sm:$0xff]   ;;  %v10319_v30 = vld [vmem:[%s14647_s1 + $0xd48] ss:$16 sps:$4 sm:$0xff]  }
 0x174   :  { %6855 = vmatprep.subr.bf16.mxu0 %v10240_v31  ;;  %7703 = vmatprep.subr.bf16.mxu1 %v10243_v32  ;;  %v10324_v31 = vld [vmem:[%s14647_s1 + $0xd64] ss:$16 sps:$4 sm:$0xff]   ;;  %v10327_v32 = vld [vmem:[%s14647_s1 + $0xd6c] ss:$16 sps:$4 sm:$0xff]  }
 0x177   :  { %6856 = vmatpush1.bf16.msra.mxu0 %v10238_v34  ;;  %7704 = vmatpush1.bf16.msra.mxu1 %v10241_v36  ;;  %v10322_v34 = vld [vmem:[%s14647_s1 + $0xd60] ss:$16 sps:$4 sm:$0xff]   ;;  %v10325_v36 = vld [vmem:[%s14647_s1 + $0xd68] ss:$16 sps:$4 sm:$0xff]  }
 0x178   :  { %6857 = vmatprep.subr.bf16.mxu0 %v10246_v33  ;;  %7705 = vmatprep.subr.bf16.mxu1 %v10249_v35  ;;  %v10330_v33 = vld [vmem:[%s14647_s1 + $0xd84] ss:$16 sps:$4 sm:$0xff]   ;;  %v10333_v35 = vld [vmem:[%s14647_s1 + $0xd8c] ss:$16 sps:$4 sm:$0xff]  }
 0x17b   :  { %6858 = vmatpush1.bf16.msra.mxu0 %v10244_v37  ;;  %7706 = vmatpush1.bf16.msra.mxu1 %v10247_v38  ;;  %v10328_v37 = vld [vmem:[%s14647_s1 + $0xd80] ss:$16 sps:$4 sm:$0xff]   ;;  %v10331_v38 = vld [vmem:[%s14647_s1 + $0xd88] ss:$16 sps:$4 sm:$0xff]  }
 0x17c   :  { %6859 = vmatprep.subr.bf16.mxu0 %v10252_v39  ;;  %7707 = vmatprep.subr.bf16.mxu1 %v10255_v40  ;;  %v10336_v39 = vld [vmem:[%s14647_s1 + $0xda4] ss:$16 sps:$4 sm:$0xff]   ;;  %v10339_v40 = vld [vmem:[%s14647_s1 + $0xdac] ss:$16 sps:$4 sm:$0xff]  }
 0x17f   :  { %6860 = vmatpush1.bf16.msra.mxu0 %v10250_v42  ;;  %7708 = vmatpush1.bf16.msra.mxu1 %v10253_v44  ;;  %v10334_v42 = vld [vmem:[%s14647_s1 + $0xda0] ss:$16 sps:$4 sm:$0xff]   ;;  %v10337_v44 = vld [vmem:[%s14647_s1 + $0xda8] ss:$16 sps:$4 sm:$0xff]  }
 0x180   :  { %6882 = vmatprep.subr.bf16.mxu0 %v10258_v41  ;;  %7730 = vmatprep.subr.bf16.mxu1 %v10261_v43  ;;  %v10342_v41 = vld [vmem:[%s14647_s1 + $0xdc4] ss:$16 sps:$4 sm:$0xff]   ;;  %v10345_v43 = vld [vmem:[%s14647_s1 + $0xdcc] ss:$16 sps:$4 sm:$0xff]  }
 0x182   :  { %6862 = vmatmul.mubr.bf16.vlgmr.msra.gmra.mrb[0].mxu0 %v8330_v47  ;;  %7710 = vmatmul.mubr.bf16.vlgmr.msra.gmra.mrb[0].mxu1 %v8330_v47  ;;  %v10348_v47 = vld [vmem:[%s14647_s1 + $0xde4] ss:$16 sps:$4 sm:$0xff]  }
 0x183   :  { %6883 = vmatpush1.bf16.msra.mxu0 %v10256_v48  ;;  %7731 = vmatpush1.bf16.msra.mxu1 %v10259_v51  ;;  %v10351_v48 = vld [vmem:[%s14647_s1 + $0xdec] ss:$16 sps:$4 sm:$0xff]   ;;  %v10346_v51 = vld [vmem:[%s14647_s1 + $0xde0] ss:$16 sps:$4 sm:$0xff]  }
 0x184   :  { %6884 = vmatprep.subr.bf16.mxu0 %v10264_v52  ;;  %7732 = vmatprep.subr.bf16.mxu1 %v10267_v49  ;;  %v10349_v52 = vld [vmem:[%s14647_s1 + $0xde8] ss:$16 sps:$4 sm:$0xff]   ;;  %v10354_v49 = vld [vmem:[%s14647_s1 + $0xe04] ss:$16 sps:$4 sm:$0xff]  }
 0x185   :  { %6871 = vmatprep.mubr.bf16.mxu0 %v8363_v54  ;;  %7719 = vmatprep.mubr.bf16.mxu1 %v8363_v54  ;;  %v68_v54 = vld [vmem:[%s14648_s0 + $0x1b0] sm:$0xff] }
 0x187   :  { %6885 = vmatpush1.bf16.msra.mxu0 %v10262_v50  ;;  %7733 = vmatpush1.bf16.msra.mxu1 %v10265_v53  ;;  %v10357_v50 = vld [vmem:[%s14647_s1 + $0xe0c] ss:$16 sps:$4 sm:$0xff]   ;;  %v52_v53 = vld [vmem:[%s14648_s0 + $0x130] sm:$0xff] }
 0x188   :  { %6886 = vmatprep.subr.bf16.mxu0 %v10270_v55  ;;  %7734 = vmatprep.subr.bf16.mxu1 %v10273_v56  ;;  %v8332_v55 = vcombine.low %v12533_v57, %v12538_v58  ;;  %v10352_v56 = vld [vmem:[%s14647_s1 + $0xe00] ss:$16 sps:$4 sm:$0xff]   ;;  %v10363_v57 = vld [vmem:[%s14647_s1 + $0xe2c] ss:$16 sps:$4 sm:$0xff]  }
 0x189   :  { %v10358_v58 = vld [vmem:[%s14647_s1 + $0xe20] ss:$16 sps:$4 sm:$0xff]  }
 0x18a   :  { %6872 = vmatmul.mubr.bf16.gmra.mrb[4].mxu0 %v8362_v59  ;;  %7720 = vmatmul.mubr.bf16.gmra.mrb[4].mxu1 %v8362_v59  ;;  %v10355_v59 = vld [vmem:[%s14647_s1 + $0xe08] ss:$16 sps:$4 sm:$0xff]  }
 0x18b   :  { %6887 = vmatpush1.bf16.msra.mxu0 %v10268_v60  ;;  %7735 = vmatpush1.bf16.msra.mxu1 %v10271_v61  ;;  %v10360_v60 = vld [vmem:[%s14647_s1 + $0xe24] ss:$16 sps:$4 sm:$0xff]   ;;  %v10361_v61 = vld [vmem:[%s14647_s1 + $0xe28] ss:$16 sps:$4 sm:$0xff]  }
 0x18c   :  { %6888 = vmatprep.subr.bf16.mxu0 %v10276_v62  ;;  %7736 = vmatprep.subr.bf16.mxu1 %v10279_v63  ;;  %v8365_v62 = vcombine.high %v52_v53, %v68_v54  ;;  %v10366_v63 = vld [vmem:[%s14647_s1 + $0xe44] ss:$16 sps:$4 sm:$0xff]  }
 0x18d   :  { %6914 = vmatprep.mubr.bf16.mxu0 %v8333_v0  ;;  %7762 = vmatprep.mubr.bf16.mxu1 %v8333_v0  ;;  %v10369_v0 = vld [vmem:[%s14647_s1 + $0xe4c] ss:$16 sps:$4 sm:$0xff]  }
 0x18f   :  { %6889 = vmatpush1.bf16.msra.mxu0 %v10274_v1  ;;  %7737 = vmatpush1.bf16.msra.mxu1 %v10277_v2  ;;  %v12745_v1 = vld [vmem:[%s14648_s0 + $0x38] sm:$0xff] }
 0x190   :  { %6890 = vmatprep.subr.bf16.mxu0 %v10282_v3  ;;  %7738 = vmatprep.subr.bf16.mxu1 %v10285_v4  ;;  %v12750_v2 = vld [vmem:[%s14648_s0 + $0xb8] sm:$0xff]  ;;  %v8364_v3 = vcombine.low %v52_v53, %v68_v54  ;;  %v10364_v4 = vld [vmem:[%s14647_s1 + $0xe40] ss:$16 sps:$4 sm:$0xff]  }
 0x191   :  { %v10436_v53 = vld [vmem:[%s14647_s1 + $0xfc0] ss:$16 sps:$4 sm:$0xff]   ;;  %v10439_v54 = vld [vmem:[%s14647_s1 + $0xfc8] ss:$16 sps:$4 sm:$0xff]  }
 0x193   :  { %6891 = vmatpush1.bf16.msra.mxu0 %v10280_v5  ;;  %7739 = vmatpush1.bf16.msra.mxu1 %v10283_v6  ;;  %v10367_v5 = vld [vmem:[%s14647_s1 + $0xe48] ss:$16 sps:$4 sm:$0xff]   ;;  %v10372_v6 = vld [vmem:[%s14647_s1 + $0xe64] ss:$16 sps:$4 sm:$0xff]  }
 0x194   :  { %6892 = vmatprep.subr.bf16.mxu0 %v10288_v7  ;;  %7740 = vmatprep.subr.bf16.mxu1 %v10291_v8  ;;  %v10375_v7 = vld [vmem:[%s14647_s1 + $0xe6c] ss:$16 sps:$4 sm:$0xff]   ;;  %v8335_v8 = vcombine.high %v12745_v1, %v12750_v2 }
 0x197   :  { %6893 = vmatpush1.bf16.msra.mxu0 %v10286_v9  ;;  %7741 = vmatpush1.bf16.msra.mxu1 %v10289_v10  ;;  %v10370_v9 = vld [vmem:[%s14647_s1 + $0xe60] ss:$16 sps:$4 sm:$0xff]   ;;  %v10373_v10 = vld [vmem:[%s14647_s1 + $0xe68] ss:$16 sps:$4 sm:$0xff]  }
 0x198   :  { %6894 = vmatprep.subr.bf16.mxu0 %v10294_v11  ;;  %7742 = vmatprep.subr.bf16.mxu1 %v10297_v12  ;;  %v10378_v11 = vld [vmem:[%s14647_s1 + $0xe84] ss:$16 sps:$4 sm:$0xff]   ;;  %v10381_v12 = vld [vmem:[%s14647_s1 + $0xe8c] ss:$16 sps:$4 sm:$0xff]  }
 0x19b   :  { %6895 = vmatpush1.bf16.msra.mxu0 %v10292_v13  ;;  %7743 = vmatpush1.bf16.msra.mxu1 %v10295_v14  ;;  %v10376_v13 = vld [vmem:[%s14647_s1 + $0xe80] ss:$16 sps:$4 sm:$0xff]   ;;  %v10379_v14 = vld [vmem:[%s14647_s1 + $0xe88] ss:$16 sps:$4 sm:$0xff]  }
 0x19c   :  { %6896 = vmatprep.subr.bf16.mxu0 %v10300_v15  ;;  %7744 = vmatprep.subr.bf16.mxu1 %v10303_v16  ;;  %v10384_v15 = vld [vmem:[%s14647_s1 + $0xea4] ss:$16 sps:$4 sm:$0xff]   ;;  %v10387_v16 = vld [vmem:[%s14647_s1 + $0xeac] ss:$16 sps:$4 sm:$0xff]  }
 0x19f   :  { %6897 = vmatpush1.bf16.msra.mxu0 %v10298_v17  ;;  %7745 = vmatpush1.bf16.msra.mxu1 %v10301_v18  ;;  %v10382_v17 = vld [vmem:[%s14647_s1 + $0xea0] ss:$16 sps:$4 sm:$0xff]   ;;  %v10385_v18 = vld [vmem:[%s14647_s1 + $0xea8] ss:$16 sps:$4 sm:$0xff]  }
 0x1a0   :  { %6898 = vmatprep.subr.bf16.mxu0 %v10306_v19  ;;  %7746 = vmatprep.subr.bf16.mxu1 %v10309_v20  ;;  %v10390_v19 = vld [vmem:[%s14647_s1 + $0xec4] ss:$16 sps:$4 sm:$0xff]   ;;  %v10393_v20 = vld [vmem:[%s14647_s1 + $0xecc] ss:$16 sps:$4 sm:$0xff]  }
 0x1a3   :  { %6899 = vmatpush1.bf16.msra.mxu0 %v10304_v21  ;;  %7747 = vmatpush1.bf16.msra.mxu1 %v10307_v22  ;;  %v10388_v21 = vld [vmem:[%s14647_s1 + $0xec0] ss:$16 sps:$4 sm:$0xff]   ;;  %v10391_v22 = vld [vmem:[%s14647_s1 + $0xec8] ss:$16 sps:$4 sm:$0xff]  }
 0x1a4   :  { %6900 = vmatprep.subr.bf16.mxu0 %v10312_v23  ;;  %7748 = vmatprep.subr.bf16.mxu1 %v10315_v24  ;;  %v10396_v23 = vld [vmem:[%s14647_s1 + $0xee4] ss:$16 sps:$4 sm:$0xff]   ;;  %v10399_v24 = vld [vmem:[%s14647_s1 + $0xeec] ss:$16 sps:$4 sm:$0xff]  }
 0x1a7   :  { %6901 = vmatpush1.bf16.msra.mxu0 %v10310_v26  ;;  %7749 = vmatpush1.bf16.msra.mxu1 %v10313_v25  ;;  %v10394_v26 = vld [vmem:[%s14647_s1 + $0xee0] ss:$16 sps:$4 sm:$0xff]   ;;  %v10397_v25 = vld [vmem:[%s14647_s1 + $0xee8] ss:$16 sps:$4 sm:$0xff]  }
 0x1a8   :  { %6902 = vmatprep.subr.bf16.mxu0 %v10318_v27  ;;  %7750 = vmatprep.subr.bf16.mxu1 %v10321_v28  ;;  %v10402_v27 = vld [vmem:[%s14647_s1 + $0xf04] ss:$16 sps:$4 sm:$0xff]   ;;  %v10405_v28 = vld [vmem:[%s14647_s1 + $0xf0c] ss:$16 sps:$4 sm:$0xff]  }
 0x1ab   :  { %6903 = vmatpush1.bf16.msra.mxu0 %v10316_v29  ;;  %7751 = vmatpush1.bf16.msra.mxu1 %v10319_v30  ;;  %v10400_v29 = vld [vmem:[%s14647_s1 + $0xf00] ss:$16 sps:$4 sm:$0xff]   ;;  %v10403_v30 = vld [vmem:[%s14647_s1 + $0xf08] ss:$16 sps:$4 sm:$0xff]  }
 0x1ac   :  { %6904 = vmatprep.subr.bf16.mxu0 %v10324_v31  ;;  %7752 = vmatprep.subr.bf16.mxu1 %v10327_v32  ;;  %v10408_v31 = vld [vmem:[%s14647_s1 + $0xf24] ss:$16 sps:$4 sm:$0xff]   ;;  %v10411_v32 = vld [vmem:[%s14647_s1 + $0xf2c] ss:$16 sps:$4 sm:$0xff]  }
 0x1af   :  { %6905 = vmatpush1.bf16.msra.mxu0 %v10322_v34  ;;  %7753 = vmatpush1.bf16.msra.mxu1 %v10325_v36  ;;  %v10406_v34 = vld [vmem:[%s14647_s1 + $0xf20] ss:$16 sps:$4 sm:$0xff]   ;;  %v10409_v36 = vld [vmem:[%s14647_s1 + $0xf28] ss:$16 sps:$4 sm:$0xff]  }
 0x1b0   :  { %6906 = vmatprep.subr.bf16.mxu0 %v10330_v33  ;;  %7754 = vmatprep.subr.bf16.mxu1 %v10333_v35  ;;  %v10414_v33 = vld [vmem:[%s14647_s1 + $0xf44] ss:$16 sps:$4 sm:$0xff]   ;;  %v10417_v35 = vld [vmem:[%s14647_s1 + $0xf4c] ss:$16 sps:$4 sm:$0xff]  }
 0x1b3   :  { %6907 = vmatpush1.bf16.msra.mxu0 %v10328_v37  ;;  %7755 = vmatpush1.bf16.msra.mxu1 %v10331_v38  ;;  %v10412_v37 = vld [vmem:[%s14647_s1 + $0xf40] ss:$16 sps:$4 sm:$0xff]   ;;  %v10415_v38 = vld [vmem:[%s14647_s1 + $0xf48] ss:$16 sps:$4 sm:$0xff]  }
 0x1b4   :  { %6908 = vmatprep.subr.bf16.mxu0 %v10336_v39  ;;  %7756 = vmatprep.subr.bf16.mxu1 %v10339_v40  ;;  %v10420_v39 = vld [vmem:[%s14647_s1 + $0xf64] ss:$16 sps:$4 sm:$0xff]   ;;  %v10423_v40 = vld [vmem:[%s14647_s1 + $0xf6c] ss:$16 sps:$4 sm:$0xff]  }
 0x1b7   :  { %6909 = vmatpush1.bf16.msra.mxu0 %v10334_v42  ;;  %7757 = vmatpush1.bf16.msra.mxu1 %v10337_v44  ;;  %v10418_v42 = vld [vmem:[%s14647_s1 + $0xf60] ss:$16 sps:$4 sm:$0xff]   ;;  %v10421_v44 = vld [vmem:[%s14647_s1 + $0xf68] ss:$16 sps:$4 sm:$0xff]  }
 0x1b8   :  { %6910 = vmatprep.subr.bf16.mxu0 %v10342_v41  ;;  %7758 = vmatprep.subr.bf16.mxu1 %v10345_v43  ;;  %v10426_v41 = vld [vmem:[%s14647_s1 + $0xf84] ss:$16 sps:$4 sm:$0xff]   ;;  %v10429_v43 = vld [vmem:[%s14647_s1 + $0xf8c] ss:$16 sps:$4 sm:$0xff]  }
 0x1bb   :  { %6911 = vmatpush1.bf16.msra.mxu0 %v10340_v45  ;;  %7759 = vmatpush1.bf16.msra.mxu1 %v10343_v46  ;;  %v10424_v45 = vld [vmem:[%s14647_s1 + $0xf80] ss:$16 sps:$4 sm:$0xff]   ;;  %v10427_v46 = vld [vmem:[%s14647_s1 + $0xf88] ss:$16 sps:$4 sm:$0xff]  }
 0x1bc   :  { %6912 = vmatprep.subr.bf16.mxu0 %v10348_v47  ;;  %7760 = vmatprep.subr.bf16.mxu1 %v10351_v48  ;;  %v10432_v47 = vld [vmem:[%s14647_s1 + $0xfa4] ss:$16 sps:$4 sm:$0xff]   ;;  %v10435_v48 = vld [vmem:[%s14647_s1 + $0xfac] ss:$16 sps:$4 sm:$0xff]  }
 0x1bf   :  { %6913 = vmatpush1.bf16.msra.mxu0 %v10346_v51  ;;  %7761 = vmatpush1.bf16.msra.mxu1 %v10349_v52  ;;  %v10430_v51 = vld [vmem:[%s14647_s1 + $0xfa0] ss:$16 sps:$4 sm:$0xff]   ;;  %v10433_v52 = vld [vmem:[%s14647_s1 + $0xfa8] ss:$16 sps:$4 sm:$0xff]  }
 0x1c0   :  { %6935 = vmatprep.subr.bf16.mxu0 %v10354_v49  ;;  %7783 = vmatprep.subr.bf16.mxu1 %v10357_v50  ;;  %v10438_v49 = vld [vmem:[%s14647_s1 + $0xfc4] ss:$16 sps:$4 sm:$0xff]   ;;  %v10441_v50 = vld [vmem:[%s14647_s1 + $0xfcc] ss:$16 sps:$4 sm:$0xff]  }
 0x1c2   :  { %6915 = vmatmul.mubr.bf16.vlgmr.msra.gmra.mrb[0].mxu0 %v8332_v55  ;;  %7763 = vmatmul.mubr.bf16.vlgmr.msra.gmra.mrb[0].mxu1 %v8332_v55  ;;  %v10444_v55 = vld [vmem:[%s14647_s1 + $0xfe4] ss:$16 sps:$4 sm:$0xff]  }
 0x1c3   :  { %6936 = vmatpush1.bf16.msra.mxu0 %v10352_v56  ;;  %7784 = vmatpush1.bf16.msra.mxu1 %v10355_v59  ;;  %v10447_v56 = vld [vmem:[%s14647_s1 + $0xfec] ss:$16 sps:$4 sm:$0xff]   ;;  %v10442_v59 = vld [vmem:[%s14647_s1 + $0xfe0] ss:$16 sps:$4 sm:$0xff]  }
 0x1c4   :  { %6937 = vmatprep.subr.bf16.mxu0 %v10360_v60  ;;  %7785 = vmatprep.subr.bf16.mxu1 %v10363_v57  ;;  %v10445_v60 = vld [vmem:[%s14647_s1 + $0xfe8] ss:$16 sps:$4 sm:$0xff]   ;;  %v10450_v57 = vld [vmem:[%s14647_s1 + $0x1004] ss:$16 sps:$4 sm:$0xff]  }
 0x1c5   :  { %6924 = vmatprep.mubr.bf16.mxu0 %v8365_v62  ;;  %7772 = vmatprep.mubr.bf16.mxu1 %v8365_v62  ;;  %v69_v62 = vld [vmem:[%s14648_s0 + $0x1b8] sm:$0xff] }
 0x1c7   :  { %6938 = vmatpush1.bf16.msra.mxu0 %v10358_v58  ;;  %7786 = vmatpush1.bf16.msra.mxu1 %v10361_v61  ;;  %v10453_v58 = vld [vmem:[%s14647_s1 + $0x100c] ss:$16 sps:$4 sm:$0xff]  }
 0x1c8   :  { %6939 = vmatprep.subr.bf16.mxu0 %v10366_v63  ;;  %7787 = vmatprep.subr.bf16.mxu1 %v10369_v0  ;;  %v53_v61 = vld [vmem:[%s14648_s0 + $0x138] sm:$0xff]  ;;  %v8334_v63 = vcombine.low %v12745_v1, %v12750_v2  ;;  %v10448_v0 = vld [vmem:[%s14647_s1 + $0x1000] ss:$16 sps:$4 sm:$0xff]  }
 0x1c9   :  { %v10459_v1 = vld [vmem:[%s14647_s1 + $0x102c] ss:$16 sps:$4 sm:$0xff]   ;;  %v10454_v2 = vld [vmem:[%s14647_s1 + $0x1020] ss:$16 sps:$4 sm:$0xff]  }
 0x1ca   :  { %6925 = vmatmul.mubr.bf16.gmra.mrb[4].mxu0 %v8364_v3  ;;  %7773 = vmatmul.mubr.bf16.gmra.mrb[4].mxu1 %v8364_v3  ;;  %v10451_v3 = vld [vmem:[%s14647_s1 + $0x1008] ss:$16 sps:$4 sm:$0xff]  }
 0x1cb   :  { %6940 = vmatpush1.bf16.msra.mxu0 %v10364_v4  ;;  %7788 = vmatpush1.bf16.msra.mxu1 %v10367_v5  ;;  %v10456_v4 = vld [vmem:[%s14647_s1 + $0x1024] ss:$16 sps:$4 sm:$0xff]   ;;  %v10457_v5 = vld [vmem:[%s14647_s1 + $0x1028] ss:$16 sps:$4 sm:$0xff]  }
 0x1cc   :  { %6941 = vmatprep.subr.bf16.mxu0 %v10372_v6  ;;  %7789 = vmatprep.subr.bf16.mxu1 %v10375_v7  ;;  %v8367_v6 = vcombine.high %v53_v61, %v69_v62  ;;  %v10462_v7 = vld [vmem:[%s14647_s1 + $0x1044] ss:$16 sps:$4 sm:$0xff]  }
 0x1cd   :  { %6967 = vmatprep.mubr.bf16.mxu0 %v8335_v8  ;;  %7815 = vmatprep.mubr.bf16.mxu1 %v8335_v8  ;;  %v10465_v8 = vld [vmem:[%s14647_s1 + $0x104c] ss:$16 sps:$4 sm:$0xff]  }
 0x1cf   :  { %6942 = vmatpush1.bf16.msra.mxu0 %v10370_v9  ;;  %7790 = vmatpush1.bf16.msra.mxu1 %v10373_v10  ;;  %v12957_v9 = vld [vmem:[%s14648_s0 + $0x40] sm:$0xff] }
 0x1d0   :  { %6943 = vmatprep.subr.bf16.mxu0 %v10378_v11  ;;  %7791 = vmatprep.subr.bf16.mxu1 %v10381_v12  ;;  %v12962_v10 = vld [vmem:[%s14648_s0 + $0xc0] sm:$0xff]  ;;  %v8366_v11 = vcombine.low %v53_v61, %v69_v62  ;;  %v10535_v62 = vld [vmem:[%s14647_s1 + $0x11c8] ss:$16 sps:$4 sm:$0xff]  }
 0x1d1   :  { %v10460_v12 = vld [vmem:[%s14647_s1 + $0x1040] ss:$16 sps:$4 sm:$0xff]  }
 0x1d2   :  { %v10532_v61 = vld [vmem:[%s14647_s1 + $0x11c0] ss:$16 sps:$4 sm:$0xff]  }
 0x1d3   :  { %6944 = vmatpush1.bf16.msra.mxu0 %v10376_v13  ;;  %7792 = vmatpush1.bf16.msra.mxu1 %v10379_v14  ;;  %v10463_v13 = vld [vmem:[%s14647_s1 + $0x1048] ss:$16 sps:$4 sm:$0xff]   ;;  %v10468_v14 = vld [vmem:[%s14647_s1 + $0x1064] ss:$16 sps:$4 sm:$0xff]  }
 0x1d4   :  { %6945 = vmatprep.subr.bf16.mxu0 %v10384_v15  ;;  %7793 = vmatprep.subr.bf16.mxu1 %v10387_v16  ;;  %v10471_v15 = vld [vmem:[%s14647_s1 + $0x106c] ss:$16 sps:$4 sm:$0xff]   ;;  %v8337_v16 = vcombine.high %v12957_v9, %v12962_v10 }
 0x1d7   :  { %6946 = vmatpush1.bf16.msra.mxu0 %v10382_v17  ;;  %7794 = vmatpush1.bf16.msra.mxu1 %v10385_v18  ;;  %v10466_v17 = vld [vmem:[%s14647_s1 + $0x1060] ss:$16 sps:$4 sm:$0xff]   ;;  %v10469_v18 = vld [vmem:[%s14647_s1 + $0x1068] ss:$16 sps:$4 sm:$0xff]  }
 0x1d8   :  { %6947 = vmatprep.subr.bf16.mxu0 %v10390_v19  ;;  %7795 = vmatprep.subr.bf16.mxu1 %v10393_v20  ;;  %v10474_v19 = vld [vmem:[%s14647_s1 + $0x1084] ss:$16 sps:$4 sm:$0xff]   ;;  %v10477_v20 = vld [vmem:[%s14647_s1 + $0x108c] ss:$16 sps:$4 sm:$0xff]  }
 0x1db   :  { %6948 = vmatpush1.bf16.msra.mxu0 %v10388_v21  ;;  %7796 = vmatpush1.bf16.msra.mxu1 %v10391_v22  ;;  %v10472_v21 = vld [vmem:[%s14647_s1 + $0x1080] ss:$16 sps:$4 sm:$0xff]   ;;  %v10475_v22 = vld [vmem:[%s14647_s1 + $0x1088] ss:$16 sps:$4 sm:$0xff]  }
 0x1dc   :  { %6949 = vmatprep.subr.bf16.mxu0 %v10396_v23  ;;  %7797 = vmatprep.subr.bf16.mxu1 %v10399_v24  ;;  %v10480_v23 = vld [vmem:[%s14647_s1 + $0x10a4] ss:$16 sps:$4 sm:$0xff]   ;;  %v10483_v24 = vld [vmem:[%s14647_s1 + $0x10ac] ss:$16 sps:$4 sm:$0xff]  }
 0x1df   :  { %6950 = vmatpush1.bf16.msra.mxu0 %v10394_v26  ;;  %7798 = vmatpush1.bf16.msra.mxu1 %v10397_v25  ;;  %v10478_v26 = vld [vmem:[%s14647_s1 + $0x10a0] ss:$16 sps:$4 sm:$0xff]   ;;  %v10481_v25 = vld [vmem:[%s14647_s1 + $0x10a8] ss:$16 sps:$4 sm:$0xff]  }
 0x1e0   :  { %6951 = vmatprep.subr.bf16.mxu0 %v10402_v27  ;;  %7799 = vmatprep.subr.bf16.mxu1 %v10405_v28  ;;  %v10486_v27 = vld [vmem:[%s14647_s1 + $0x10c4] ss:$16 sps:$4 sm:$0xff]   ;;  %v10489_v28 = vld [vmem:[%s14647_s1 + $0x10cc] ss:$16 sps:$4 sm:$0xff]  }
 0x1e3   :  { %6952 = vmatpush1.bf16.msra.mxu0 %v10400_v29  ;;  %7800 = vmatpush1.bf16.msra.mxu1 %v10403_v30  ;;  %v10484_v29 = vld [vmem:[%s14647_s1 + $0x10c0] ss:$16 sps:$4 sm:$0xff]   ;;  %v10487_v30 = vld [vmem:[%s14647_s1 + $0x10c8] ss:$16 sps:$4 sm:$0xff]  }
 0x1e4   :  { %6953 = vmatprep.subr.bf16.mxu0 %v10408_v31  ;;  %7801 = vmatprep.subr.bf16.mxu1 %v10411_v32  ;;  %v10492_v31 = vld [vmem:[%s14647_s1 + $0x10e4] ss:$16 sps:$4 sm:$0xff]   ;;  %v10495_v32 = vld [vmem:[%s14647_s1 + $0x10ec] ss:$16 sps:$4 sm:$0xff]  }
 0x1e7   :  { %6954 = vmatpush1.bf16.msra.mxu0 %v10406_v34  ;;  %7802 = vmatpush1.bf16.msra.mxu1 %v10409_v36  ;;  %v10490_v34 = vld [vmem:[%s14647_s1 + $0x10e0] ss:$16 sps:$4 sm:$0xff]   ;;  %v10493_v36 = vld [vmem:[%s14647_s1 + $0x10e8] ss:$16 sps:$4 sm:$0xff]  }
 0x1e8   :  { %6955 = vmatprep.subr.bf16.mxu0 %v10414_v33  ;;  %7803 = vmatprep.subr.bf16.mxu1 %v10417_v35  ;;  %v10498_v33 = vld [vmem:[%s14647_s1 + $0x1104] ss:$16 sps:$4 sm:$0xff]   ;;  %v10501_v35 = vld [vmem:[%s14647_s1 + $0x110c] ss:$16 sps:$4 sm:$0xff]  }
 0x1eb   :  { %6956 = vmatpush1.bf16.msra.mxu0 %v10412_v37  ;;  %7804 = vmatpush1.bf16.msra.mxu1 %v10415_v38  ;;  %v10496_v37 = vld [vmem:[%s14647_s1 + $0x1100] ss:$16 sps:$4 sm:$0xff]   ;;  %v10499_v38 = vld [vmem:[%s14647_s1 + $0x1108] ss:$16 sps:$4 sm:$0xff]  }
 0x1ec   :  { %6957 = vmatprep.subr.bf16.mxu0 %v10420_v39  ;;  %7805 = vmatprep.subr.bf16.mxu1 %v10423_v40  ;;  %v10504_v39 = vld [vmem:[%s14647_s1 + $0x1124] ss:$16 sps:$4 sm:$0xff]   ;;  %v10507_v40 = vld [vmem:[%s14647_s1 + $0x112c] ss:$16 sps:$4 sm:$0xff]  }
 0x1ef   :  { %6958 = vmatpush1.bf16.msra.mxu0 %v10418_v42  ;;  %7806 = vmatpush1.bf16.msra.mxu1 %v10421_v44  ;;  %v10502_v42 = vld [vmem:[%s14647_s1 + $0x1120] ss:$16 sps:$4 sm:$0xff]   ;;  %v10505_v44 = vld [vmem:[%s14647_s1 + $0x1128] ss:$16 sps:$4 sm:$0xff]  }
 0x1f0   :  { %6959 = vmatprep.subr.bf16.mxu0 %v10426_v41  ;;  %7807 = vmatprep.subr.bf16.mxu1 %v10429_v43  ;;  %v10510_v41 = vld [vmem:[%s14647_s1 + $0x1144] ss:$16 sps:$4 sm:$0xff]   ;;  %v10513_v43 = vld [vmem:[%s14647_s1 + $0x114c] ss:$16 sps:$4 sm:$0xff]  }
 0x1f3   :  { %6960 = vmatpush1.bf16.msra.mxu0 %v10424_v45  ;;  %7808 = vmatpush1.bf16.msra.mxu1 %v10427_v46  ;;  %v10508_v45 = vld [vmem:[%s14647_s1 + $0x1140] ss:$16 sps:$4 sm:$0xff]   ;;  %v10511_v46 = vld [vmem:[%s14647_s1 + $0x1148] ss:$16 sps:$4 sm:$0xff]  }
 0x1f4   :  { %6961 = vmatprep.subr.bf16.mxu0 %v10432_v47  ;;  %7809 = vmatprep.subr.bf16.mxu1 %v10435_v48  ;;  %v10516_v47 = vld [vmem:[%s14647_s1 + $0x1164] ss:$16 sps:$4 sm:$0xff]   ;;  %v10519_v48 = vld [vmem:[%s14647_s1 + $0x116c] ss:$16 sps:$4 sm:$0xff]  }
 0x1f7   :  { %6962 = vmatpush1.bf16.msra.mxu0 %v10430_v51  ;;  %7810 = vmatpush1.bf16.msra.mxu1 %v10433_v52  ;;  %v10514_v51 = vld [vmem:[%s14647_s1 + $0x1160] ss:$16 sps:$4 sm:$0xff]   ;;  %v10517_v52 = vld [vmem:[%s14647_s1 + $0x1168] ss:$16 sps:$4 sm:$0xff]  }
 0x1f8   :  { %6963 = vmatprep.subr.bf16.mxu0 %v10438_v49  ;;  %7811 = vmatprep.subr.bf16.mxu1 %v10441_v50  ;;  %v10522_v49 = vld [vmem:[%s14647_s1 + $0x1184] ss:$16 sps:$4 sm:$0xff]   ;;  %v10525_v50 = vld [vmem:[%s14647_s1 + $0x118c] ss:$16 sps:$4 sm:$0xff]  }
 0x1fb   :  { %6964 = vmatpush1.bf16.msra.mxu0 %v10436_v53  ;;  %7812 = vmatpush1.bf16.msra.mxu1 %v10439_v54  ;;  %v10520_v53 = vld [vmem:[%s14647_s1 + $0x1180] ss:$16 sps:$4 sm:$0xff]   ;;  %v10523_v54 = vld [vmem:[%s14647_s1 + $0x1188] ss:$16 sps:$4 sm:$0xff]  }
 0x1fc   :  { %6965 = vmatprep.subr.bf16.mxu0 %v10444_v55  ;;  %7813 = vmatprep.subr.bf16.mxu1 %v10447_v56  ;;  %v10528_v55 = vld [vmem:[%s14647_s1 + $0x11a4] ss:$16 sps:$4 sm:$0xff]   ;;  %v10531_v56 = vld [vmem:[%s14647_s1 + $0x11ac] ss:$16 sps:$4 sm:$0xff]  }
 0x1ff   :  { %6966 = vmatpush1.bf16.msra.mxu0 %v10442_v59  ;;  %7814 = vmatpush1.bf16.msra.mxu1 %v10445_v60  ;;  %v10526_v59 = vld [vmem:[%s14647_s1 + $0x11a0] ss:$16 sps:$4 sm:$0xff]   ;;  %v10529_v60 = vld [vmem:[%s14647_s1 + $0x11a8] ss:$16 sps:$4 sm:$0xff]  }
 0x200   :  { %6988 = vmatprep.subr.bf16.mxu0 %v10450_v57  ;;  %7836 = vmatprep.subr.bf16.mxu1 %v10453_v58  ;;  %v10534_v57 = vld [vmem:[%s14647_s1 + $0x11c4] ss:$16 sps:$4 sm:$0xff]   ;;  %v10537_v58 = vld [vmem:[%s14647_s1 + $0x11cc] ss:$16 sps:$4 sm:$0xff]  }
 0x202   :  { %6968 = vmatmul.mubr.bf16.vlgmr.msra.gmra.mrb[0].mxu0 %v8334_v63  ;;  %7816 = vmatmul.mubr.bf16.vlgmr.msra.gmra.mrb[0].mxu1 %v8334_v63  ;;  %v10540_v63 = vld [vmem:[%s14647_s1 + $0x11e4] ss:$16 sps:$4 sm:$0xff]  }
 0x203   :  { %6989 = vmatpush1.bf16.msra.mxu0 %v10448_v0  ;;  %7837 = vmatpush1.bf16.msra.mxu1 %v10451_v3  ;;  %v10543_v0 = vld [vmem:[%s14647_s1 + $0x11ec] ss:$16 sps:$4 sm:$0xff]   ;;  %v10538_v3 = vld [vmem:[%s14647_s1 + $0x11e0] ss:$16 sps:$4 sm:$0xff]  }
 0x204   :  { %6990 = vmatprep.subr.bf16.mxu0 %v10456_v4  ;;  %7838 = vmatprep.subr.bf16.mxu1 %v10459_v1  ;;  %v10541_v4 = vld [vmem:[%s14647_s1 + $0x11e8] ss:$16 sps:$4 sm:$0xff]   ;;  %v10546_v1 = vld [vmem:[%s14647_s1 + $0x1204] ss:$16 sps:$4 sm:$0xff]  }
 0x205   :  { %6977 = vmatprep.mubr.bf16.mxu0 %v8367_v6  ;;  %7825 = vmatprep.mubr.bf16.mxu1 %v8367_v6  ;;  %v70_v6 = vld [vmem:[%s14648_s0 + $0x1c0] sm:$0xff] }
 0x207   :  { %6991 = vmatpush1.bf16.msra.mxu0 %v10454_v2  ;;  %7839 = vmatpush1.bf16.msra.mxu1 %v10457_v5  ;;  %v10549_v2 = vld [vmem:[%s14647_s1 + $0x120c] ss:$16 sps:$4 sm:$0xff]   ;;  %v54_v5 = vld [vmem:[%s14648_s0 + $0x140] sm:$0xff] }
 0x208   :  { %6992 = vmatprep.subr.bf16.mxu0 %v10462_v7  ;;  %7840 = vmatprep.subr.bf16.mxu1 %v10465_v8  ;;  %v8336_v7 = vcombine.low %v12957_v9, %v12962_v10  ;;  %v10544_v8 = vld [vmem:[%s14647_s1 + $0x1200] ss:$16 sps:$4 sm:$0xff]   ;;  %v10555_v9 = vld [vmem:[%s14647_s1 + $0x122c] ss:$16 sps:$4 sm:$0xff]  }
 0x209   :  { %v10550_v10 = vld [vmem:[%s14647_s1 + $0x1220] ss:$16 sps:$4 sm:$0xff]  }
 0x20a   :  { %6978 = vmatmul.mubr.bf16.gmra.mrb[4].mxu0 %v8366_v11  ;;  %7826 = vmatmul.mubr.bf16.gmra.mrb[4].mxu1 %v8366_v11  ;;  %v10547_v11 = vld [vmem:[%s14647_s1 + $0x1208] ss:$16 sps:$4 sm:$0xff]  }
 0x20b   :  { %6993 = vmatpush1.bf16.msra.mxu0 %v10460_v12  ;;  %7841 = vmatpush1.bf16.msra.mxu1 %v10463_v13  ;;  %v10552_v12 = vld [vmem:[%s14647_s1 + $0x1224] ss:$16 sps:$4 sm:$0xff]   ;;  %v10553_v13 = vld [vmem:[%s14647_s1 + $0x1228] ss:$16 sps:$4 sm:$0xff]  }
 0x20c   :  { %6994 = vmatprep.subr.bf16.mxu0 %v10468_v14  ;;  %7842 = vmatprep.subr.bf16.mxu1 %v10471_v15  ;;  %v8369_v14 = vcombine.high %v54_v5, %v70_v6  ;;  %v10558_v15 = vld [vmem:[%s14647_s1 + $0x1244] ss:$16 sps:$4 sm:$0xff]  }
 0x20d   :  { %7020 = vmatprep.mubr.bf16.mxu0 %v8337_v16  ;;  %7868 = vmatprep.mubr.bf16.mxu1 %v8337_v16  ;;  %v10561_v16 = vld [vmem:[%s14647_s1 + $0x124c] ss:$16 sps:$4 sm:$0xff]  }
 0x20f   :  { %6995 = vmatpush1.bf16.msra.mxu0 %v10466_v17  ;;  %7843 = vmatpush1.bf16.msra.mxu1 %v10469_v18  ;;  %v13169_v17 = vld [vmem:[%s14648_s0 + $0x48] sm:$0xff] }
 0x210   :  { %6996 = vmatprep.subr.bf16.mxu0 %v10474_v19  ;;  %7844 = vmatprep.subr.bf16.mxu1 %v10477_v20  ;;  %v13174_v18 = vld [vmem:[%s14648_s0 + $0xc8] sm:$0xff]  ;;  %v8368_v19 = vcombine.low %v54_v5, %v70_v6  ;;  %v10556_v20 = vld [vmem:[%s14647_s1 + $0x1240] ss:$16 sps:$4 sm:$0xff]  }
 0x211   :  { %v10628_v5 = vld [vmem:[%s14647_s1 + $0x13c0] ss:$16 sps:$4 sm:$0xff]   ;;  %v10631_v6 = vld [vmem:[%s14647_s1 + $0x13c8] ss:$16 sps:$4 sm:$0xff]  }
 0x213   :  { %6997 = vmatpush1.bf16.msra.mxu0 %v10472_v21  ;;  %7845 = vmatpush1.bf16.msra.mxu1 %v10475_v22  ;;  %v10559_v21 = vld [vmem:[%s14647_s1 + $0x1248] ss:$16 sps:$4 sm:$0xff]   ;;  %v10564_v22 = vld [vmem:[%s14647_s1 + $0x1264] ss:$16 sps:$4 sm:$0xff]  }
 0x214   :  { %6998 = vmatprep.subr.bf16.mxu0 %v10480_v23  ;;  %7846 = vmatprep.subr.bf16.mxu1 %v10483_v24  ;;  %v10567_v23 = vld [vmem:[%s14647_s1 + $0x126c] ss:$16 sps:$4 sm:$0xff]   ;;  %v8339_v24 = vcombine.high %v13169_v17, %v13174_v18 }
 0x217   :  { %6999 = vmatpush1.bf16.msra.mxu0 %v10478_v26  ;;  %7847 = vmatpush1.bf16.msra.mxu1 %v10481_v25  ;;  %v10562_v26 = vld [vmem:[%s14647_s1 + $0x1260] ss:$16 sps:$4 sm:$0xff]   ;;  %v10565_v25 = vld [vmem:[%s14647_s1 + $0x1268] ss:$16 sps:$4 sm:$0xff]  }
 0x218   :  { %7000 = vmatprep.subr.bf16.mxu0 %v10486_v27  ;;  %7848 = vmatprep.subr.bf16.mxu1 %v10489_v28  ;;  %v10570_v27 = vld [vmem:[%s14647_s1 + $0x1284] ss:$16 sps:$4 sm:$0xff]   ;;  %v10573_v28 = vld [vmem:[%s14647_s1 + $0x128c] ss:$16 sps:$4 sm:$0xff]  }
 0x21b   :  { %7001 = vmatpush1.bf16.msra.mxu0 %v10484_v29  ;;  %7849 = vmatpush1.bf16.msra.mxu1 %v10487_v30  ;;  %v10568_v29 = vld [vmem:[%s14647_s1 + $0x1280] ss:$16 sps:$4 sm:$0xff]   ;;  %v10571_v30 = vld [vmem:[%s14647_s1 + $0x1288] ss:$16 sps:$4 sm:$0xff]  }
 0x21c   :  { %7002 = vmatprep.subr.bf16.mxu0 %v10492_v31  ;;  %7850 = vmatprep.subr.bf16.mxu1 %v10495_v32  ;;  %v10576_v31 = vld [vmem:[%s14647_s1 + $0x12a4] ss:$16 sps:$4 sm:$0xff]   ;;  %v10579_v32 = vld [vmem:[%s14647_s1 + $0x12ac] ss:$16 sps:$4 sm:$0xff]  }
 0x21f   :  { %7003 = vmatpush1.bf16.msra.mxu0 %v10490_v34  ;;  %7851 = vmatpush1.bf16.msra.mxu1 %v10493_v36  ;;  %v10574_v34 = vld [vmem:[%s14647_s1 + $0x12a0] ss:$16 sps:$4 sm:$0xff]   ;;  %v10577_v36 = vld [vmem:[%s14647_s1 + $0x12a8] ss:$16 sps:$4 sm:$0xff]  }
 0x220   :  { %7004 = vmatprep.subr.bf16.mxu0 %v10498_v33  ;;  %7852 = vmatprep.subr.bf16.mxu1 %v10501_v35  ;;  %v10582_v33 = vld [vmem:[%s14647_s1 + $0x12c4] ss:$16 sps:$4 sm:$0xff]   ;;  %v10585_v35 = vld [vmem:[%s14647_s1 + $0x12cc] ss:$16 sps:$4 sm:$0xff]  }
 0x223   :  { %7005 = vmatpush1.bf16.msra.mxu0 %v10496_v37  ;;  %7853 = vmatpush1.bf16.msra.mxu1 %v10499_v38  ;;  %v10580_v37 = vld [vmem:[%s14647_s1 + $0x12c0] ss:$16 sps:$4 sm:$0xff]   ;;  %v10583_v38 = vld [vmem:[%s14647_s1 + $0x12c8] ss:$16 sps:$4 sm:$0xff]  }
 0x224   :  { %7006 = vmatprep.subr.bf16.mxu0 %v10504_v39  ;;  %7854 = vmatprep.subr.bf16.mxu1 %v10507_v40  ;;  %v10588_v39 = vld [vmem:[%s14647_s1 + $0x12e4] ss:$16 sps:$4 sm:$0xff]   ;;  %v10591_v40 = vld [vmem:[%s14647_s1 + $0x12ec] ss:$16 sps:$4 sm:$0xff]  }
 0x227   :  { %7007 = vmatpush1.bf16.msra.mxu0 %v10502_v42  ;;  %7855 = vmatpush1.bf16.msra.mxu1 %v10505_v44  ;;  %v10586_v42 = vld [vmem:[%s14647_s1 + $0x12e0] ss:$16 sps:$4 sm:$0xff]   ;;  %v10589_v44 = vld [vmem:[%s14647_s1 + $0x12e8] ss:$16 sps:$4 sm:$0xff]  }
 0x228   :  { %7008 = vmatprep.subr.bf16.mxu0 %v10510_v41  ;;  %7856 = vmatprep.subr.bf16.mxu1 %v10513_v43  ;;  %v10594_v41 = vld [vmem:[%s14647_s1 + $0x1304] ss:$16 sps:$4 sm:$0xff]   ;;  %v10597_v43 = vld [vmem:[%s14647_s1 + $0x130c] ss:$16 sps:$4 sm:$0xff]  }
 0x22b   :  { %7009 = vmatpush1.bf16.msra.mxu0 %v10508_v45  ;;  %7857 = vmatpush1.bf16.msra.mxu1 %v10511_v46  ;;  %v10592_v45 = vld [vmem:[%s14647_s1 + $0x1300] ss:$16 sps:$4 sm:$0xff]   ;;  %v10595_v46 = vld [vmem:[%s14647_s1 + $0x1308] ss:$16 sps:$4 sm:$0xff]  }
 0x22c   :  { %7010 = vmatprep.subr.bf16.mxu0 %v10516_v47  ;;  %7858 = vmatprep.subr.bf16.mxu1 %v10519_v48  ;;  %v10600_v47 = vld [vmem:[%s14647_s1 + $0x1324] ss:$16 sps:$4 sm:$0xff]   ;;  %v10603_v48 = vld [vmem:[%s14647_s1 + $0x132c] ss:$16 sps:$4 sm:$0xff]  }
 0x22f   :  { %7011 = vmatpush1.bf16.msra.mxu0 %v10514_v51  ;;  %7859 = vmatpush1.bf16.msra.mxu1 %v10517_v52  ;;  %v10598_v51 = vld [vmem:[%s14647_s1 + $0x1320] ss:$16 sps:$4 sm:$0xff]   ;;  %v10601_v52 = vld [vmem:[%s14647_s1 + $0x1328] ss:$16 sps:$4 sm:$0xff]  }
 0x230   :  { %7012 = vmatprep.subr.bf16.mxu0 %v10522_v49  ;;  %7860 = vmatprep.subr.bf16.mxu1 %v10525_v50  ;;  %v10606_v49 = vld [vmem:[%s14647_s1 + $0x1344] ss:$16 sps:$4 sm:$0xff]   ;;  %v10609_v50 = vld [vmem:[%s14647_s1 + $0x134c] ss:$16 sps:$4 sm:$0xff]  }
 0x233   :  { %7013 = vmatpush1.bf16.msra.mxu0 %v10520_v53  ;;  %7861 = vmatpush1.bf16.msra.mxu1 %v10523_v54  ;;  %v10604_v53 = vld [vmem:[%s14647_s1 + $0x1340] ss:$16 sps:$4 sm:$0xff]   ;;  %v10607_v54 = vld [vmem:[%s14647_s1 + $0x1348] ss:$16 sps:$4 sm:$0xff]  }
 0x234   :  { %7014 = vmatprep.subr.bf16.mxu0 %v10528_v55  ;;  %7862 = vmatprep.subr.bf16.mxu1 %v10531_v56  ;;  %v10612_v55 = vld [vmem:[%s14647_s1 + $0x1364] ss:$16 sps:$4 sm:$0xff]   ;;  %v10615_v56 = vld [vmem:[%s14647_s1 + $0x136c] ss:$16 sps:$4 sm:$0xff]  }
 0x237   :  { %7015 = vmatpush1.bf16.msra.mxu0 %v10526_v59  ;;  %7863 = vmatpush1.bf16.msra.mxu1 %v10529_v60  ;;  %v10610_v59 = vld [vmem:[%s14647_s1 + $0x1360] ss:$16 sps:$4 sm:$0xff]   ;;  %v10613_v60 = vld [vmem:[%s14647_s1 + $0x1368] ss:$16 sps:$4 sm:$0xff]  }
 0x238   :  { %7016 = vmatprep.subr.bf16.mxu0 %v10534_v57  ;;  %7864 = vmatprep.subr.bf16.mxu1 %v10537_v58  ;;  %v10618_v57 = vld [vmem:[%s14647_s1 + $0x1384] ss:$16 sps:$4 sm:$0xff]   ;;  %v10621_v58 = vld [vmem:[%s14647_s1 + $0x138c] ss:$16 sps:$4 sm:$0xff]  }
 0x23b   :  { %7017 = vmatpush1.bf16.msra.mxu0 %v10532_v61  ;;  %7865 = vmatpush1.bf16.msra.mxu1 %v10535_v62  ;;  %v10616_v61 = vld [vmem:[%s14647_s1 + $0x1380] ss:$16 sps:$4 sm:$0xff]   ;;  %v10619_v62 = vld [vmem:[%s14647_s1 + $0x1388] ss:$16 sps:$4 sm:$0xff]  }
 0x23c   :  { %7018 = vmatprep.subr.bf16.mxu0 %v10540_v63  ;;  %7866 = vmatprep.subr.bf16.mxu1 %v10543_v0  ;;  %v10624_v63 = vld [vmem:[%s14647_s1 + $0x13a4] ss:$16 sps:$4 sm:$0xff]   ;;  %v10627_v0 = vld [vmem:[%s14647_s1 + $0x13ac] ss:$16 sps:$4 sm:$0xff]  }
 0x23f   :  { %7019 = vmatpush1.bf16.msra.mxu0 %v10538_v3  ;;  %7867 = vmatpush1.bf16.msra.mxu1 %v10541_v4  ;;  %v10622_v3 = vld [vmem:[%s14647_s1 + $0x13a0] ss:$16 sps:$4 sm:$0xff]   ;;  %v10625_v4 = vld [vmem:[%s14647_s1 + $0x13a8] ss:$16 sps:$4 sm:$0xff]  }
 0x240   :  { %7041 = vmatprep.subr.bf16.mxu0 %v10546_v1  ;;  %7889 = vmatprep.subr.bf16.mxu1 %v10549_v2  ;;  %v10630_v1 = vld [vmem:[%s14647_s1 + $0x13c4] ss:$16 sps:$4 sm:$0xff]   ;;  %v10633_v2 = vld [vmem:[%s14647_s1 + $0x13cc] ss:$16 sps:$4 sm:$0xff]  }
 0x242   :  { %7021 = vmatmul.mubr.bf16.vlgmr.msra.gmra.mrb[0].mxu0 %v8336_v7  ;;  %7869 = vmatmul.mubr.bf16.vlgmr.msra.gmra.mrb[0].mxu1 %v8336_v7  ;;  %v10636_v7 = vld [vmem:[%s14647_s1 + $0x13e4] ss:$16 sps:$4 sm:$0xff]  }
 0x243   :  { %7042 = vmatpush1.bf16.msra.mxu0 %v10544_v8  ;;  %7890 = vmatpush1.bf16.msra.mxu1 %v10547_v11  ;;  %v10639_v8 = vld [vmem:[%s14647_s1 + $0x13ec] ss:$16 sps:$4 sm:$0xff]   ;;  %v10634_v11 = vld [vmem:[%s14647_s1 + $0x13e0] ss:$16 sps:$4 sm:$0xff]  }
 0x244   :  { %7043 = vmatprep.subr.bf16.mxu0 %v10552_v12  ;;  %7891 = vmatprep.subr.bf16.mxu1 %v10555_v9  ;;  %v10637_v12 = vld [vmem:[%s14647_s1 + $0x13e8] ss:$16 sps:$4 sm:$0xff]   ;;  %v10642_v9 = vld [vmem:[%s14647_s1 + $0x1404] ss:$16 sps:$4 sm:$0xff]  }
 0x245   :  { %7030 = vmatprep.mubr.bf16.mxu0 %v8369_v14  ;;  %7878 = vmatprep.mubr.bf16.mxu1 %v8369_v14  ;;  %v55_v14 = vld [vmem:[%s14648_s0 + $0x148] sm:$0xff] }
 0x247   :  { %7044 = vmatpush1.bf16.msra.mxu0 %v10550_v10  ;;  %7892 = vmatpush1.bf16.msra.mxu1 %v10553_v13  ;;  %v10645_v10 = vld [vmem:[%s14647_s1 + $0x140c] ss:$16 sps:$4 sm:$0xff]   ;;  %v8338_v13 = vcombine.low %v13169_v17, %v13174_v18  ;;  %v10648_v17 = vld [vmem:[%s14647_s1 + $0x1424] ss:$16 sps:$4 sm:$0xff]  }
 0x248   :  { %7045 = vmatprep.subr.bf16.mxu0 %v10558_v15  ;;  %7893 = vmatprep.subr.bf16.mxu1 %v10561_v16  ;;  %v71_v15 = vld [vmem:[%s14648_s0 + $0x1c8] sm:$0xff]  ;;  %v10640_v16 = vld [vmem:[%s14647_s1 + $0x1400] ss:$16 sps:$4 sm:$0xff]  }
 0x249   :  { %v10651_v18 = vld [vmem:[%s14647_s1 + $0x142c] ss:$16 sps:$4 sm:$0xff]  }
 0x24a   :  { %7031 = vmatmul.mubr.bf16.gmra.mrb[4].mxu0 %v8368_v19  ;;  %7879 = vmatmul.mubr.bf16.gmra.mrb[4].mxu1 %v8368_v19  ;;  %v10643_v19 = vld [vmem:[%s14647_s1 + $0x1408] ss:$16 sps:$4 sm:$0xff]  }
 0x24b   :  { %7046 = vmatpush1.bf16.msra.mxu0 %v10556_v20  ;;  %7894 = vmatpush1.bf16.msra.mxu1 %v10559_v21  ;;  %v8371_v20 = vcombine.high %v55_v14, %v71_v15  ;;  %v10646_v21 = vld [vmem:[%s14647_s1 + $0x1420] ss:$16 sps:$4 sm:$0xff]  }
 0x24c   :  { %7047 = vmatprep.subr.bf16.mxu0 %v10564_v22  ;;  %7895 = vmatprep.subr.bf16.mxu1 %v10567_v23  ;;  %v10649_v22 = vld [vmem:[%s14647_s1 + $0x1428] ss:$16 sps:$4 sm:$0xff]   ;;  %v10654_v23 = vld [vmem:[%s14647_s1 + $0x1444] ss:$16 sps:$4 sm:$0xff]  }
 0x24d   :  { %7073 = vmatprep.mubr.bf16.mxu0 %v8339_v24  ;;  %7921 = vmatprep.mubr.bf16.mxu1 %v8339_v24  ;;  %v10657_v24 = vld [vmem:[%s14647_s1 + $0x144c] ss:$16 sps:$4 sm:$0xff]  }
 0x24f   :  { %7048 = vmatpush1.bf16.msra.mxu0 %v10562_v26  ;;  %7896 = vmatpush1.bf16.msra.mxu1 %v10565_v25  ;;  %v8370_v26 = vcombine.low %v55_v14, %v71_v15  ;;  %v13381_v25 = vld [vmem:[%s14648_s0 + $0x50] sm:$0xff]  ;;  %v10727_v14 = vld [vmem:[%s14647_s1 + $0x15c8] ss:$16 sps:$4 sm:$0xff]  }
 0x250   :  { %7049 = vmatprep.subr.bf16.mxu0 %v10570_v27  ;;  %7897 = vmatprep.subr.bf16.mxu1 %v10573_v28  ;;  %v13386_v27 = vld [vmem:[%s14648_s0 + $0xd0] sm:$0xff] }
 0x251   :  { %v10652_v28 = vld [vmem:[%s14647_s1 + $0x1440] ss:$16 sps:$4 sm:$0xff]   ;;  %v10732_v15 = vld [vmem:[%s14647_s1 + $0x15e4] ss:$16 sps:$4 sm:$0xff]  }
 0x253   :  { %7050 = vmatpush1.bf16.msra.mxu0 %v10568_v29  ;;  %7898 = vmatpush1.bf16.msra.mxu1 %v10571_v30  ;;  %v10655_v29 = vld [vmem:[%s14647_s1 + $0x1448] ss:$16 sps:$4 sm:$0xff]   ;;  %v10660_v30 = vld [vmem:[%s14647_s1 + $0x1464] ss:$16 sps:$4 sm:$0xff]  }
 0x254   :  { %7051 = vmatprep.subr.bf16.mxu0 %v10576_v31  ;;  %7899 = vmatprep.subr.bf16.mxu1 %v10579_v32  ;;  %v10663_v31 = vld [vmem:[%s14647_s1 + $0x146c] ss:$16 sps:$4 sm:$0xff]   ;;  %v8341_v32 = vcombine.high %v13381_v25, %v13386_v27 }
 0x257   :  { %7052 = vmatpush1.bf16.msra.mxu0 %v10574_v34  ;;  %7900 = vmatpush1.bf16.msra.mxu1 %v10577_v36  ;;  %v10658_v34 = vld [vmem:[%s14647_s1 + $0x1460] ss:$16 sps:$4 sm:$0xff]   ;;  %v10661_v36 = vld [vmem:[%s14647_s1 + $0x1468] ss:$16 sps:$4 sm:$0xff]  }
 0x258   :  { %7053 = vmatprep.subr.bf16.mxu0 %v10582_v33  ;;  %7901 = vmatprep.subr.bf16.mxu1 %v10585_v35  ;;  %v10666_v33 = vld [vmem:[%s14647_s1 + $0x1484] ss:$16 sps:$4 sm:$0xff]   ;;  %v10669_v35 = vld [vmem:[%s14647_s1 + $0x148c] ss:$16 sps:$4 sm:$0xff]  }
 0x25b   :  { %7054 = vmatpush1.bf16.msra.mxu0 %v10580_v37  ;;  %7902 = vmatpush1.bf16.msra.mxu1 %v10583_v38  ;;  %v10664_v37 = vld [vmem:[%s14647_s1 + $0x1480] ss:$16 sps:$4 sm:$0xff]   ;;  %v10667_v38 = vld [vmem:[%s14647_s1 + $0x1488] ss:$16 sps:$4 sm:$0xff]  }
 0x25c   :  { %7055 = vmatprep.subr.bf16.mxu0 %v10588_v39  ;;  %7903 = vmatprep.subr.bf16.mxu1 %v10591_v40  ;;  %v10672_v39 = vld [vmem:[%s14647_s1 + $0x14a4] ss:$16 sps:$4 sm:$0xff]   ;;  %v10675_v40 = vld [vmem:[%s14647_s1 + $0x14ac] ss:$16 sps:$4 sm:$0xff]  }
 0x25f   :  { %7056 = vmatpush1.bf16.msra.mxu0 %v10586_v42  ;;  %7904 = vmatpush1.bf16.msra.mxu1 %v10589_v44  ;;  %v10670_v42 = vld [vmem:[%s14647_s1 + $0x14a0] ss:$16 sps:$4 sm:$0xff]   ;;  %v10673_v44 = vld [vmem:[%s14647_s1 + $0x14a8] ss:$16 sps:$4 sm:$0xff]  }
 0x260   :  { %7057 = vmatprep.subr.bf16.mxu0 %v10594_v41  ;;  %7905 = vmatprep.subr.bf16.mxu1 %v10597_v43  ;;  %v10678_v41 = vld [vmem:[%s14647_s1 + $0x14c4] ss:$16 sps:$4 sm:$0xff]   ;;  %v10681_v43 = vld [vmem:[%s14647_s1 + $0x14cc] ss:$16 sps:$4 sm:$0xff]  }
 0x263   :  { %7058 = vmatpush1.bf16.msra.mxu0 %v10592_v45  ;;  %7906 = vmatpush1.bf16.msra.mxu1 %v10595_v46  ;;  %v10676_v45 = vld [vmem:[%s14647_s1 + $0x14c0] ss:$16 sps:$4 sm:$0xff]   ;;  %v10679_v46 = vld [vmem:[%s14647_s1 + $0x14c8] ss:$16 sps:$4 sm:$0xff]  }
 0x264   :  { %7059 = vmatprep.subr.bf16.mxu0 %v10600_v47  ;;  %7907 = vmatprep.subr.bf16.mxu1 %v10603_v48  ;;  %v10684_v47 = vld [vmem:[%s14647_s1 + $0x14e4] ss:$16 sps:$4 sm:$0xff]   ;;  %v10687_v48 = vld [vmem:[%s14647_s1 + $0x14ec] ss:$16 sps:$4 sm:$0xff]  }
 0x267   :  { %7060 = vmatpush1.bf16.msra.mxu0 %v10598_v51  ;;  %7908 = vmatpush1.bf16.msra.mxu1 %v10601_v52  ;;  %v10682_v51 = vld [vmem:[%s14647_s1 + $0x14e0] ss:$16 sps:$4 sm:$0xff]   ;;  %v10685_v52 = vld [vmem:[%s14647_s1 + $0x14e8] ss:$16 sps:$4 sm:$0xff]  }
 0x268   :  { %7061 = vmatprep.subr.bf16.mxu0 %v10606_v49  ;;  %7909 = vmatprep.subr.bf16.mxu1 %v10609_v50  ;;  %v10690_v49 = vld [vmem:[%s14647_s1 + $0x1504] ss:$16 sps:$4 sm:$0xff]   ;;  %v10693_v50 = vld [vmem:[%s14647_s1 + $0x150c] ss:$16 sps:$4 sm:$0xff]  }
 0x26b   :  { %7062 = vmatpush1.bf16.msra.mxu0 %v10604_v53  ;;  %7910 = vmatpush1.bf16.msra.mxu1 %v10607_v54  ;;  %v10688_v53 = vld [vmem:[%s14647_s1 + $0x1500] ss:$16 sps:$4 sm:$0xff]   ;;  %v10691_v54 = vld [vmem:[%s14647_s1 + $0x1508] ss:$16 sps:$4 sm:$0xff]  }
 0x26c   :  { %7063 = vmatprep.subr.bf16.mxu0 %v10612_v55  ;;  %7911 = vmatprep.subr.bf16.mxu1 %v10615_v56  ;;  %v10696_v55 = vld [vmem:[%s14647_s1 + $0x1524] ss:$16 sps:$4 sm:$0xff]   ;;  %v10699_v56 = vld [vmem:[%s14647_s1 + $0x152c] ss:$16 sps:$4 sm:$0xff]  }
 0x26f   :  { %7064 = vmatpush1.bf16.msra.mxu0 %v10610_v59  ;;  %7912 = vmatpush1.bf16.msra.mxu1 %v10613_v60  ;;  %v10694_v59 = vld [vmem:[%s14647_s1 + $0x1520] ss:$16 sps:$4 sm:$0xff]   ;;  %v10697_v60 = vld [vmem:[%s14647_s1 + $0x1528] ss:$16 sps:$4 sm:$0xff]  }
 0x270   :  { %7065 = vmatprep.subr.bf16.mxu0 %v10618_v57  ;;  %7913 = vmatprep.subr.bf16.mxu1 %v10621_v58  ;;  %v10702_v57 = vld [vmem:[%s14647_s1 + $0x1544] ss:$16 sps:$4 sm:$0xff]   ;;  %v10705_v58 = vld [vmem:[%s14647_s1 + $0x154c] ss:$16 sps:$4 sm:$0xff]  }
 0x273   :  { %7066 = vmatpush1.bf16.msra.mxu0 %v10616_v61  ;;  %7914 = vmatpush1.bf16.msra.mxu1 %v10619_v62  ;;  %v10700_v61 = vld [vmem:[%s14647_s1 + $0x1540] ss:$16 sps:$4 sm:$0xff]   ;;  %v10703_v62 = vld [vmem:[%s14647_s1 + $0x1548] ss:$16 sps:$4 sm:$0xff]  }
 0x274   :  { %7067 = vmatprep.subr.bf16.mxu0 %v10624_v63  ;;  %7915 = vmatprep.subr.bf16.mxu1 %v10627_v0  ;;  %v10708_v63 = vld [vmem:[%s14647_s1 + $0x1564] ss:$16 sps:$4 sm:$0xff]   ;;  %v10711_v0 = vld [vmem:[%s14647_s1 + $0x156c] ss:$16 sps:$4 sm:$0xff]  }
 0x277   :  { %7068 = vmatpush1.bf16.msra.mxu0 %v10622_v3  ;;  %7916 = vmatpush1.bf16.msra.mxu1 %v10625_v4  ;;  %v10706_v3 = vld [vmem:[%s14647_s1 + $0x1560] ss:$16 sps:$4 sm:$0xff]   ;;  %v10709_v4 = vld [vmem:[%s14647_s1 + $0x1568] ss:$16 sps:$4 sm:$0xff]  }
 0x278   :  { %7069 = vmatprep.subr.bf16.mxu0 %v10630_v1  ;;  %7917 = vmatprep.subr.bf16.mxu1 %v10633_v2  ;;  %v10714_v1 = vld [vmem:[%s14647_s1 + $0x1584] ss:$16 sps:$4 sm:$0xff]   ;;  %v10717_v2 = vld [vmem:[%s14647_s1 + $0x158c] ss:$16 sps:$4 sm:$0xff]  }
 0x27b   :  { %7070 = vmatpush1.bf16.msra.mxu0 %v10628_v5  ;;  %7918 = vmatpush1.bf16.msra.mxu1 %v10631_v6  ;;  %v10712_v5 = vld [vmem:[%s14647_s1 + $0x1580] ss:$16 sps:$4 sm:$0xff]   ;;  %v10715_v6 = vld [vmem:[%s14647_s1 + $0x1588] ss:$16 sps:$4 sm:$0xff]  }
 0x27c   :  { %7071 = vmatprep.subr.bf16.mxu0 %v10636_v7  ;;  %7919 = vmatprep.subr.bf16.mxu1 %v10639_v8  ;;  %v10720_v7 = vld [vmem:[%s14647_s1 + $0x15a4] ss:$16 sps:$4 sm:$0xff]   ;;  %v10723_v8 = vld [vmem:[%s14647_s1 + $0x15ac] ss:$16 sps:$4 sm:$0xff]  }
 0x27f   :  { %7072 = vmatpush1.bf16.msra.mxu0 %v10634_v11  ;;  %7920 = vmatpush1.bf16.msra.mxu1 %v10637_v12  ;;  %v10718_v11 = vld [vmem:[%s14647_s1 + $0x15a0] ss:$16 sps:$4 sm:$0xff]   ;;  %v10721_v12 = vld [vmem:[%s14647_s1 + $0x15a8] ss:$16 sps:$4 sm:$0xff]  }
 0x280   :  { %7094 = vmatprep.subr.bf16.mxu0 %v10642_v9  ;;  %7942 = vmatprep.subr.bf16.mxu1 %v10645_v10  ;;  %v10726_v9 = vld [vmem:[%s14647_s1 + $0x15c4] ss:$16 sps:$4 sm:$0xff]   ;;  %v10729_v10 = vld [vmem:[%s14647_s1 + $0x15cc] ss:$16 sps:$4 sm:$0xff]  }
 0x282   :  { %7074 = vmatmul.mubr.bf16.vlgmr.msra.gmra.mrb[0].mxu0 %v8338_v13  ;;  %7922 = vmatmul.mubr.bf16.vlgmr.msra.gmra.mrb[0].mxu1 %v8338_v13  ;;  %v10724_v13 = vld [vmem:[%s14647_s1 + $0x15c0] ss:$16 sps:$4 sm:$0xff]  }
 0x283   :  { %7095 = vmatpush1.bf16.msra.mxu0 %v10640_v16  ;;  %7943 = vmatpush1.bf16.msra.mxu1 %v10643_v19  ;;  %v10735_v16 = vld [vmem:[%s14647_s1 + $0x15ec] ss:$16 sps:$4 sm:$0xff]   ;;  %v10730_v19 = vld [vmem:[%s14647_s1 + $0x15e0] ss:$16 sps:$4 sm:$0xff]  }
 0x284   :  { %7096 = vmatprep.subr.bf16.mxu0 %v10648_v17  ;;  %7944 = vmatprep.subr.bf16.mxu1 %v10651_v18  ;;  %v10733_v17 = vld [vmem:[%s14647_s1 + $0x15e8] ss:$16 sps:$4 sm:$0xff]   ;;  %v10738_v18 = vld [vmem:[%s14647_s1 + $0x1604] ss:$16 sps:$4 sm:$0xff]  }
 0x285   :  { %7083 = vmatprep.mubr.bf16.mxu0 %v8371_v20  ;;  %7931 = vmatprep.mubr.bf16.mxu1 %v8371_v20  ;;  %v10741_v20 = vld [vmem:[%s14647_s1 + $0x160c] ss:$16 sps:$4 sm:$0xff]  }
 0x287   :  { %7097 = vmatpush1.bf16.msra.mxu0 %v10646_v21  ;;  %7945 = vmatpush1.bf16.msra.mxu1 %v10649_v22  ;;  %v8340_v21 = vcombine.low %v13381_v25, %v13386_v27  ;;  %v56_v22 = vld [vmem:[%s14648_s0 + $0x150] sm:$0xff]  ;;  %v10747_v27 = vld [vmem:[%s14647_s1 + $0x162c] ss:$16 sps:$4 sm:$0xff]  }
 0x288   :  { %7098 = vmatprep.subr.bf16.mxu0 %v10654_v23  ;;  %7946 = vmatprep.subr.bf16.mxu1 %v10657_v24  ;;  %v72_v23 = vld [vmem:[%s14648_s0 + $0x1d0] sm:$0xff] }
 0x289   :  { %v10736_v24 = vld [vmem:[%s14647_s1 + $0x1600] ss:$16 sps:$4 sm:$0xff]   ;;  %v10744_v25 = vld [vmem:[%s14647_s1 + $0x1624] ss:$16 sps:$4 sm:$0xff]  }
 0x28a   :  { %7084 = vmatmul.mubr.bf16.gmra.mrb[4].mxu0 %v8370_v26  ;;  %7932 = vmatmul.mubr.bf16.gmra.mrb[4].mxu1 %v8370_v26  ;;  %v10739_v26 = vld [vmem:[%s14647_s1 + $0x1608] ss:$16 sps:$4 sm:$0xff]  }
 0x28b   :  { %7099 = vmatpush1.bf16.msra.mxu0 %v10652_v28  ;;  %7947 = vmatpush1.bf16.msra.mxu1 %v10655_v29  ;;  %v8373_v28 = vcombine.high %v56_v22, %v72_v23  ;;  %v10742_v29 = vld [vmem:[%s14647_s1 + $0x1620] ss:$16 sps:$4 sm:$0xff]  }
 0x28c   :  { %7100 = vmatprep.subr.bf16.mxu0 %v10660_v30  ;;  %7948 = vmatprep.subr.bf16.mxu1 %v10663_v31  ;;  %v10745_v30 = vld [vmem:[%s14647_s1 + $0x1628] ss:$16 sps:$4 sm:$0xff]   ;;  %v10750_v31 = vld [vmem:[%s14647_s1 + $0x1644] ss:$16 sps:$4 sm:$0xff]  }
 0x28d   :  { %7126 = vmatprep.mubr.bf16.mxu0 %v8341_v32  ;;  %7974 = vmatprep.mubr.bf16.mxu1 %v8341_v32  ;;  %v10753_v32 = vld [vmem:[%s14647_s1 + $0x164c] ss:$16 sps:$4 sm:$0xff]  }
 0x28f   :  { %7101 = vmatpush1.bf16.msra.mxu0 %v10658_v34  ;;  %7949 = vmatpush1.bf16.msra.mxu1 %v10661_v36  ;;  %v8372_v34 = vcombine.low %v56_v22, %v72_v23  ;;  %v13593_v36 = vld [vmem:[%s14648_s0 + $0x58] sm:$0xff]  ;;  %v10828_v23 = vld [vmem:[%s14647_s1 + $0x17e4] ss:$16 sps:$4 sm:$0xff]  }
 0x290   :  { %7102 = vmatprep.subr.bf16.mxu0 %v10666_v33  ;;  %7950 = vmatprep.subr.bf16.mxu1 %v10669_v35  ;;  %v13598_v33 = vld [vmem:[%s14648_s0 + $0xd8] sm:$0xff]  ;;  %v10748_v35 = vld [vmem:[%s14647_s1 + $0x1640] ss:$16 sps:$4 sm:$0xff]  }
 0x291   :  { %v10823_v22 = vld [vmem:[%s14647_s1 + $0x17c8] ss:$16 sps:$4 sm:$0xff]  }
 0x293   :  { %7103 = vmatpush1.bf16.msra.mxu0 %v10664_v37  ;;  %7951 = vmatpush1.bf16.msra.mxu1 %v10667_v38  ;;  %v10751_v37 = vld [vmem:[%s14647_s1 + $0x1648] ss:$16 sps:$4 sm:$0xff]   ;;  %v10756_v38 = vld [vmem:[%s14647_s1 + $0x1664] ss:$16 sps:$4 sm:$0xff]  }
 0x294   :  { %7104 = vmatprep.subr.bf16.mxu0 %v10672_v39  ;;  %7952 = vmatprep.subr.bf16.mxu1 %v10675_v40  ;;  %v10759_v39 = vld [vmem:[%s14647_s1 + $0x166c] ss:$16 sps:$4 sm:$0xff]   ;;  %v8343_v40 = vcombine.high %v13593_v36, %v13598_v33 }
 0x297   :  { %7105 = vmatpush1.bf16.msra.mxu0 %v10670_v42  ;;  %7953 = vmatpush1.bf16.msra.mxu1 %v10673_v44  ;;  %v10754_v42 = vld [vmem:[%s14647_s1 + $0x1660] ss:$16 sps:$4 sm:$0xff]   ;;  %v10757_v44 = vld [vmem:[%s14647_s1 + $0x1668] ss:$16 sps:$4 sm:$0xff]  }
 0x298   :  { %7106 = vmatprep.subr.bf16.mxu0 %v10678_v41  ;;  %7954 = vmatprep.subr.bf16.mxu1 %v10681_v43  ;;  %v10762_v41 = vld [vmem:[%s14647_s1 + $0x1684] ss:$16 sps:$4 sm:$0xff]   ;;  %v10765_v43 = vld [vmem:[%s14647_s1 + $0x168c] ss:$16 sps:$4 sm:$0xff]  }
 0x29b   :  { %7107 = vmatpush1.bf16.msra.mxu0 %v10676_v45  ;;  %7955 = vmatpush1.bf16.msra.mxu1 %v10679_v46  ;;  %v10760_v45 = vld [vmem:[%s14647_s1 + $0x1680] ss:$16 sps:$4 sm:$0xff]   ;;  %v10763_v46 = vld [vmem:[%s14647_s1 + $0x1688] ss:$16 sps:$4 sm:$0xff]  }
 0x29c   :  { %7108 = vmatprep.subr.bf16.mxu0 %v10684_v47  ;;  %7956 = vmatprep.subr.bf16.mxu1 %v10687_v48  ;;  %v10768_v47 = vld [vmem:[%s14647_s1 + $0x16a4] ss:$16 sps:$4 sm:$0xff]   ;;  %v10771_v48 = vld [vmem:[%s14647_s1 + $0x16ac] ss:$16 sps:$4 sm:$0xff]  }
 0x29f   :  { %7109 = vmatpush1.bf16.msra.mxu0 %v10682_v51  ;;  %7957 = vmatpush1.bf16.msra.mxu1 %v10685_v52  ;;  %v10766_v51 = vld [vmem:[%s14647_s1 + $0x16a0] ss:$16 sps:$4 sm:$0xff]   ;;  %v10769_v52 = vld [vmem:[%s14647_s1 + $0x16a8] ss:$16 sps:$4 sm:$0xff]  }
 0x2a0   :  { %7110 = vmatprep.subr.bf16.mxu0 %v10690_v49  ;;  %7958 = vmatprep.subr.bf16.mxu1 %v10693_v50  ;;  %v10774_v49 = vld [vmem:[%s14647_s1 + $0x16c4] ss:$16 sps:$4 sm:$0xff]   ;;  %v10777_v50 = vld [vmem:[%s14647_s1 + $0x16cc] ss:$16 sps:$4 sm:$0xff]  }
 0x2a3   :  { %7111 = vmatpush1.bf16.msra.mxu0 %v10688_v53  ;;  %7959 = vmatpush1.bf16.msra.mxu1 %v10691_v54  ;;  %v10772_v53 = vld [vmem:[%s14647_s1 + $0x16c0] ss:$16 sps:$4 sm:$0xff]   ;;  %v10775_v54 = vld [vmem:[%s14647_s1 + $0x16c8] ss:$16 sps:$4 sm:$0xff]  }
 0x2a4   :  { %7112 = vmatprep.subr.bf16.mxu0 %v10696_v55  ;;  %7960 = vmatprep.subr.bf16.mxu1 %v10699_v56  ;;  %v10780_v55 = vld [vmem:[%s14647_s1 + $0x16e4] ss:$16 sps:$4 sm:$0xff]   ;;  %v10783_v56 = vld [vmem:[%s14647_s1 + $0x16ec] ss:$16 sps:$4 sm:$0xff]  }
 0x2a7   :  { %7113 = vmatpush1.bf16.msra.mxu0 %v10694_v59  ;;  %7961 = vmatpush1.bf16.msra.mxu1 %v10697_v60  ;;  %v10778_v59 = vld [vmem:[%s14647_s1 + $0x16e0] ss:$16 sps:$4 sm:$0xff]   ;;  %v10781_v60 = vld [vmem:[%s14647_s1 + $0x16e8] ss:$16 sps:$4 sm:$0xff]  }
 0x2a8   :  { %7114 = vmatprep.subr.bf16.mxu0 %v10702_v57  ;;  %7962 = vmatprep.subr.bf16.mxu1 %v10705_v58  ;;  %v10786_v57 = vld [vmem:[%s14647_s1 + $0x1704] ss:$16 sps:$4 sm:$0xff]   ;;  %v10789_v58 = vld [vmem:[%s14647_s1 + $0x170c] ss:$16 sps:$4 sm:$0xff]  }
 0x2ab   :  { %7115 = vmatpush1.bf16.msra.mxu0 %v10700_v61  ;;  %7963 = vmatpush1.bf16.msra.mxu1 %v10703_v62  ;;  %v10784_v61 = vld [vmem:[%s14647_s1 + $0x1700] ss:$16 sps:$4 sm:$0xff]   ;;  %v10787_v62 = vld [vmem:[%s14647_s1 + $0x1708] ss:$16 sps:$4 sm:$0xff]  }
 0x2ac   :  { %7116 = vmatprep.subr.bf16.mxu0 %v10708_v63  ;;  %7964 = vmatprep.subr.bf16.mxu1 %v10711_v0  ;;  %v10792_v63 = vld [vmem:[%s14647_s1 + $0x1724] ss:$16 sps:$4 sm:$0xff]   ;;  %v10795_v0 = vld [vmem:[%s14647_s1 + $0x172c] ss:$16 sps:$4 sm:$0xff]  }
 0x2af   :  { %7117 = vmatpush1.bf16.msra.mxu0 %v10706_v3  ;;  %7965 = vmatpush1.bf16.msra.mxu1 %v10709_v4  ;;  %v10790_v3 = vld [vmem:[%s14647_s1 + $0x1720] ss:$16 sps:$4 sm:$0xff]   ;;  %v10793_v4 = vld [vmem:[%s14647_s1 + $0x1728] ss:$16 sps:$4 sm:$0xff]  }
 0x2b0   :  { %7118 = vmatprep.subr.bf16.mxu0 %v10714_v1  ;;  %7966 = vmatprep.subr.bf16.mxu1 %v10717_v2  ;;  %v10798_v1 = vld [vmem:[%s14647_s1 + $0x1744] ss:$16 sps:$4 sm:$0xff]   ;;  %v10801_v2 = vld [vmem:[%s14647_s1 + $0x174c] ss:$16 sps:$4 sm:$0xff]  }
 0x2b3   :  { %7119 = vmatpush1.bf16.msra.mxu0 %v10712_v5  ;;  %7967 = vmatpush1.bf16.msra.mxu1 %v10715_v6  ;;  %v10796_v5 = vld [vmem:[%s14647_s1 + $0x1740] ss:$16 sps:$4 sm:$0xff]   ;;  %v10799_v6 = vld [vmem:[%s14647_s1 + $0x1748] ss:$16 sps:$4 sm:$0xff]  }
 0x2b4   :  { %7120 = vmatprep.subr.bf16.mxu0 %v10720_v7  ;;  %7968 = vmatprep.subr.bf16.mxu1 %v10723_v8  ;;  %v10804_v7 = vld [vmem:[%s14647_s1 + $0x1764] ss:$16 sps:$4 sm:$0xff]   ;;  %v10807_v8 = vld [vmem:[%s14647_s1 + $0x176c] ss:$16 sps:$4 sm:$0xff]  }
 0x2b7   :  { %7121 = vmatpush1.bf16.msra.mxu0 %v10718_v11  ;;  %7969 = vmatpush1.bf16.msra.mxu1 %v10721_v12  ;;  %v10802_v11 = vld [vmem:[%s14647_s1 + $0x1760] ss:$16 sps:$4 sm:$0xff]   ;;  %v10805_v12 = vld [vmem:[%s14647_s1 + $0x1768] ss:$16 sps:$4 sm:$0xff]  }
 0x2b8   :  { %7122 = vmatprep.subr.bf16.mxu0 %v10726_v9  ;;  %7970 = vmatprep.subr.bf16.mxu1 %v10729_v10  ;;  %v10810_v9 = vld [vmem:[%s14647_s1 + $0x1784] ss:$16 sps:$4 sm:$0xff]   ;;  %v10813_v10 = vld [vmem:[%s14647_s1 + $0x178c] ss:$16 sps:$4 sm:$0xff]  }
 0x2bb   :  { %7123 = vmatpush1.bf16.msra.mxu0 %v10724_v13  ;;  %7971 = vmatpush1.bf16.msra.mxu1 %v10727_v14  ;;  %v10808_v13 = vld [vmem:[%s14647_s1 + $0x1780] ss:$16 sps:$4 sm:$0xff]   ;;  %v10811_v14 = vld [vmem:[%s14647_s1 + $0x1788] ss:$16 sps:$4 sm:$0xff]  }
 0x2bc   :  { %7124 = vmatprep.subr.bf16.mxu0 %v10732_v15  ;;  %7972 = vmatprep.subr.bf16.mxu1 %v10735_v16  ;;  %v10816_v15 = vld [vmem:[%s14647_s1 + $0x17a4] ss:$16 sps:$4 sm:$0xff]   ;;  %v10819_v16 = vld [vmem:[%s14647_s1 + $0x17ac] ss:$16 sps:$4 sm:$0xff]  }
 0x2bf   :  { %7125 = vmatpush1.bf16.msra.mxu0 %v10730_v19  ;;  %7973 = vmatpush1.bf16.msra.mxu1 %v10733_v17  ;;  %v10814_v19 = vld [vmem:[%s14647_s1 + $0x17a0] ss:$16 sps:$4 sm:$0xff]   ;;  %v10817_v17 = vld [vmem:[%s14647_s1 + $0x17a8] ss:$16 sps:$4 sm:$0xff]  }
 0x2c0   :  { %7147 = vmatprep.subr.bf16.mxu0 %v10738_v18  ;;  %7995 = vmatprep.subr.bf16.mxu1 %v10741_v20  ;;  %v10822_v18 = vld [vmem:[%s14647_s1 + $0x17c4] ss:$16 sps:$4 sm:$0xff]   ;;  %v10825_v20 = vld [vmem:[%s14647_s1 + $0x17cc] ss:$16 sps:$4 sm:$0xff]  }
 0x2c2   :  { %7127 = vmatmul.mubr.bf16.vlgmr.msra.gmra.mrb[0].mxu0 %v8340_v21  ;;  %7975 = vmatmul.mubr.bf16.vlgmr.msra.gmra.mrb[0].mxu1 %v8340_v21  ;;  %v10820_v21 = vld [vmem:[%s14647_s1 + $0x17c0] ss:$16 sps:$4 sm:$0xff]  }
 0x2c3   :  { %7148 = vmatpush1.bf16.msra.mxu0 %v10736_v24  ;;  %7996 = vmatpush1.bf16.msra.mxu1 %v10739_v26  ;;  %v10831_v24 = vld [vmem:[%s14647_s1 + $0x17ec] ss:$16 sps:$4 sm:$0xff]   ;;  %v10826_v26 = vld [vmem:[%s14647_s1 + $0x17e0] ss:$16 sps:$4 sm:$0xff]  }
 0x2c4   :  { %7149 = vmatprep.subr.bf16.mxu0 %v10744_v25  ;;  %7997 = vmatprep.subr.bf16.mxu1 %v10747_v27  ;;  %v10829_v25 = vld [vmem:[%s14647_s1 + $0x17e8] ss:$16 sps:$4 sm:$0xff]   ;;  %v10834_v27 = vld [vmem:[%s14647_s1 + $0x1804] ss:$16 sps:$4 sm:$0xff]  }
 0x2c5   :  { %7136 = vmatprep.mubr.bf16.mxu0 %v8373_v28  ;;  %7984 = vmatprep.mubr.bf16.mxu1 %v8373_v28  ;;  %v10837_v28 = vld [vmem:[%s14647_s1 + $0x180c] ss:$16 sps:$4 sm:$0xff]  }
 0x2c7   :  { %7150 = vmatpush1.bf16.msra.mxu0 %v10742_v29  ;;  %7998 = vmatpush1.bf16.msra.mxu1 %v10745_v30  ;;  %v8342_v29 = vcombine.low %v13593_v36, %v13598_v33  ;;  %v57_v30 = vld [vmem:[%s14648_s0 + $0x158] sm:$0xff]  ;;  %v10840_v36 = vld [vmem:[%s14647_s1 + $0x1824] ss:$16 sps:$4 sm:$0xff]  }
 0x2c8   :  { %7151 = vmatprep.subr.bf16.mxu0 %v10750_v31  ;;  %7999 = vmatprep.subr.bf16.mxu1 %v10753_v32  ;;  %v73_v31 = vld [vmem:[%s14648_s0 + $0x1d8] sm:$0xff]  ;;  %v10832_v32 = vld [vmem:[%s14647_s1 + $0x1800] ss:$16 sps:$4 sm:$0xff]  }
 0x2c9   :  { %v10843_v33 = vld [vmem:[%s14647_s1 + $0x182c] ss:$16 sps:$4 sm:$0xff]  }
 0x2ca   :  { %7137 = vmatmul.mubr.bf16.gmra.mrb[4].mxu0 %v8372_v34  ;;  %7985 = vmatmul.mubr.bf16.gmra.mrb[4].mxu1 %v8372_v34  ;;  %v10835_v34 = vld [vmem:[%s14647_s1 + $0x1808] ss:$16 sps:$4 sm:$0xff]  }
 0x2cb   :  { %7152 = vmatpush1.bf16.msra.mxu0 %v10748_v35  ;;  %8000 = vmatpush1.bf16.msra.mxu1 %v10751_v37  ;;  %v8375_v35 = vcombine.high %v57_v30, %v73_v31  ;;  %v10838_v37 = vld [vmem:[%s14647_s1 + $0x1820] ss:$16 sps:$4 sm:$0xff]  }
 0x2cc   :  { %7153 = vmatprep.subr.bf16.mxu0 %v10756_v38  ;;  %8001 = vmatprep.subr.bf16.mxu1 %v10759_v39  ;;  %v10841_v38 = vld [vmem:[%s14647_s1 + $0x1828] ss:$16 sps:$4 sm:$0xff]   ;;  %v10846_v39 = vld [vmem:[%s14647_s1 + $0x1844] ss:$16 sps:$4 sm:$0xff]  }
 0x2cd   :  { %7179 = vmatprep.mubr.bf16.mxu0 %v8343_v40  ;;  %8027 = vmatprep.mubr.bf16.mxu1 %v8343_v40  ;;  %v10849_v40 = vld [vmem:[%s14647_s1 + $0x184c] ss:$16 sps:$4 sm:$0xff]  }
 0x2cf   :  { %7154 = vmatpush1.bf16.msra.mxu0 %v10754_v42  ;;  %8002 = vmatpush1.bf16.msra.mxu1 %v10757_v44  ;;  %v8374_v42 = vcombine.low %v57_v30, %v73_v31  ;;  %v13805_v44 = vld [vmem:[%s14648_s0 + $0x60] sm:$0xff]  ;;  %v10919_v30 = vld [vmem:[%s14647_s1 + $0x19c8] ss:$16 sps:$4 sm:$0xff]  }
 0x2d0   :  { %7155 = vmatprep.subr.bf16.mxu0 %v10762_v41  ;;  %8003 = vmatprep.subr.bf16.mxu1 %v10765_v43  ;;  %v13810_v41 = vld [vmem:[%s14648_s0 + $0xe0] sm:$0xff] }
 0x2d1   :  { %v10844_v43 = vld [vmem:[%s14647_s1 + $0x1840] ss:$16 sps:$4 sm:$0xff]   ;;  %v10924_v31 = vld [vmem:[%s14647_s1 + $0x19e4] ss:$16 sps:$4 sm:$0xff]  }
 0x2d3   :  { %7156 = vmatpush1.bf16.msra.mxu0 %v10760_v45  ;;  %8004 = vmatpush1.bf16.msra.mxu1 %v10763_v46  ;;  %v10847_v45 = vld [vmem:[%s14647_s1 + $0x1848] ss:$16 sps:$4 sm:$0xff]   ;;  %v10852_v46 = vld [vmem:[%s14647_s1 + $0x1864] ss:$16 sps:$4 sm:$0xff]  }
 0x2d4   :  { %7157 = vmatprep.subr.bf16.mxu0 %v10768_v47  ;;  %8005 = vmatprep.subr.bf16.mxu1 %v10771_v48  ;;  %v10855_v47 = vld [vmem:[%s14647_s1 + $0x186c] ss:$16 sps:$4 sm:$0xff]   ;;  %v8345_v48 = vcombine.high %v13805_v44, %v13810_v41 }
 0x2d7   :  { %7158 = vmatpush1.bf16.msra.mxu0 %v10766_v51  ;;  %8006 = vmatpush1.bf16.msra.mxu1 %v10769_v52  ;;  %v10850_v51 = vld [vmem:[%s14647_s1 + $0x1860] ss:$16 sps:$4 sm:$0xff]   ;;  %v10853_v52 = vld [vmem:[%s14647_s1 + $0x1868] ss:$16 sps:$4 sm:$0xff]  }
 0x2d8   :  { %7159 = vmatprep.subr.bf16.mxu0 %v10774_v49  ;;  %8007 = vmatprep.subr.bf16.mxu1 %v10777_v50  ;;  %v10858_v49 = vld [vmem:[%s14647_s1 + $0x1884] ss:$16 sps:$4 sm:$0xff]   ;;  %v10861_v50 = vld [vmem:[%s14647_s1 + $0x188c] ss:$16 sps:$4 sm:$0xff]  }
 0x2db   :  { %7160 = vmatpush1.bf16.msra.mxu0 %v10772_v53  ;;  %8008 = vmatpush1.bf16.msra.mxu1 %v10775_v54  ;;  %v10856_v53 = vld [vmem:[%s14647_s1 + $0x1880] ss:$16 sps:$4 sm:$0xff]   ;;  %v10859_v54 = vld [vmem:[%s14647_s1 + $0x1888] ss:$16 sps:$4 sm:$0xff]  }
 0x2dc   :  { %7161 = vmatprep.subr.bf16.mxu0 %v10780_v55  ;;  %8009 = vmatprep.subr.bf16.mxu1 %v10783_v56  ;;  %v10864_v55 = vld [vmem:[%s14647_s1 + $0x18a4] ss:$16 sps:$4 sm:$0xff]   ;;  %v10867_v56 = vld [vmem:[%s14647_s1 + $0x18ac] ss:$16 sps:$4 sm:$0xff]  }
 0x2df   :  { %7162 = vmatpush1.bf16.msra.mxu0 %v10778_v59  ;;  %8010 = vmatpush1.bf16.msra.mxu1 %v10781_v60  ;;  %v10862_v59 = vld [vmem:[%s14647_s1 + $0x18a0] ss:$16 sps:$4 sm:$0xff]   ;;  %v10865_v60 = vld [vmem:[%s14647_s1 + $0x18a8] ss:$16 sps:$4 sm:$0xff]  }
 0x2e0   :  { %7163 = vmatprep.subr.bf16.mxu0 %v10786_v57  ;;  %8011 = vmatprep.subr.bf16.mxu1 %v10789_v58  ;;  %v10870_v57 = vld [vmem:[%s14647_s1 + $0x18c4] ss:$16 sps:$4 sm:$0xff]   ;;  %v10873_v58 = vld [vmem:[%s14647_s1 + $0x18cc] ss:$16 sps:$4 sm:$0xff]  }
 0x2e3   :  { %7164 = vmatpush1.bf16.msra.mxu0 %v10784_v61  ;;  %8012 = vmatpush1.bf16.msra.mxu1 %v10787_v62  ;;  %v10868_v61 = vld [vmem:[%s14647_s1 + $0x18c0] ss:$16 sps:$4 sm:$0xff]   ;;  %v10871_v62 = vld [vmem:[%s14647_s1 + $0x18c8] ss:$16 sps:$4 sm:$0xff]  }
 0x2e4   :  { %7165 = vmatprep.subr.bf16.mxu0 %v10792_v63  ;;  %8013 = vmatprep.subr.bf16.mxu1 %v10795_v0  ;;  %v10876_v63 = vld [vmem:[%s14647_s1 + $0x18e4] ss:$16 sps:$4 sm:$0xff]   ;;  %v10879_v0 = vld [vmem:[%s14647_s1 + $0x18ec] ss:$16 sps:$4 sm:$0xff]  }
 0x2e7   :  { %7166 = vmatpush1.bf16.msra.mxu0 %v10790_v3  ;;  %8014 = vmatpush1.bf16.msra.mxu1 %v10793_v4  ;;  %v10874_v3 = vld [vmem:[%s14647_s1 + $0x18e0] ss:$16 sps:$4 sm:$0xff]   ;;  %v10877_v4 = vld [vmem:[%s14647_s1 + $0x18e8] ss:$16 sps:$4 sm:$0xff]  }
 0x2e8   :  { %7167 = vmatprep.subr.bf16.mxu0 %v10798_v1  ;;  %8015 = vmatprep.subr.bf16.mxu1 %v10801_v2  ;;  %v10882_v1 = vld [vmem:[%s14647_s1 + $0x1904] ss:$16 sps:$4 sm:$0xff]   ;;  %v10885_v2 = vld [vmem:[%s14647_s1 + $0x190c] ss:$16 sps:$4 sm:$0xff]  }
 0x2eb   :  { %7168 = vmatpush1.bf16.msra.mxu0 %v10796_v5  ;;  %8016 = vmatpush1.bf16.msra.mxu1 %v10799_v6  ;;  %v10880_v5 = vld [vmem:[%s14647_s1 + $0x1900] ss:$16 sps:$4 sm:$0xff]   ;;  %v10883_v6 = vld [vmem:[%s14647_s1 + $0x1908] ss:$16 sps:$4 sm:$0xff]  }
 0x2ec   :  { %7169 = vmatprep.subr.bf16.mxu0 %v10804_v7  ;;  %8017 = vmatprep.subr.bf16.mxu1 %v10807_v8  ;;  %v10888_v7 = vld [vmem:[%s14647_s1 + $0x1924] ss:$16 sps:$4 sm:$0xff]   ;;  %v10891_v8 = vld [vmem:[%s14647_s1 + $0x192c] ss:$16 sps:$4 sm:$0xff]  }
 0x2ef   :  { %7170 = vmatpush1.bf16.msra.mxu0 %v10802_v11  ;;  %8018 = vmatpush1.bf16.msra.mxu1 %v10805_v12  ;;  %v10886_v11 = vld [vmem:[%s14647_s1 + $0x1920] ss:$16 sps:$4 sm:$0xff]   ;;  %v10889_v12 = vld [vmem:[%s14647_s1 + $0x1928] ss:$16 sps:$4 sm:$0xff]  }
 0x2f0   :  { %7171 = vmatprep.subr.bf16.mxu0 %v10810_v9  ;;  %8019 = vmatprep.subr.bf16.mxu1 %v10813_v10  ;;  %v10894_v9 = vld [vmem:[%s14647_s1 + $0x1944] ss:$16 sps:$4 sm:$0xff]   ;;  %v10897_v10 = vld [vmem:[%s14647_s1 + $0x194c] ss:$16 sps:$4 sm:$0xff]  }
 0x2f3   :  { %7172 = vmatpush1.bf16.msra.mxu0 %v10808_v13  ;;  %8020 = vmatpush1.bf16.msra.mxu1 %v10811_v14  ;;  %v10892_v13 = vld [vmem:[%s14647_s1 + $0x1940] ss:$16 sps:$4 sm:$0xff]   ;;  %v10895_v14 = vld [vmem:[%s14647_s1 + $0x1948] ss:$16 sps:$4 sm:$0xff]  }
 0x2f4   :  { %7173 = vmatprep.subr.bf16.mxu0 %v10816_v15  ;;  %8021 = vmatprep.subr.bf16.mxu1 %v10819_v16  ;;  %v10900_v15 = vld [vmem:[%s14647_s1 + $0x1964] ss:$16 sps:$4 sm:$0xff]   ;;  %v10903_v16 = vld [vmem:[%s14647_s1 + $0x196c] ss:$16 sps:$4 sm:$0xff]  }
 0x2f7   :  { %7174 = vmatpush1.bf16.msra.mxu0 %v10814_v19  ;;  %8022 = vmatpush1.bf16.msra.mxu1 %v10817_v17  ;;  %v10898_v19 = vld [vmem:[%s14647_s1 + $0x1960] ss:$16 sps:$4 sm:$0xff]   ;;  %v10901_v17 = vld [vmem:[%s14647_s1 + $0x1968] ss:$16 sps:$4 sm:$0xff]  }
 0x2f8   :  { %7175 = vmatprep.subr.bf16.mxu0 %v10822_v18  ;;  %8023 = vmatprep.subr.bf16.mxu1 %v10825_v20  ;;  %v10906_v18 = vld [vmem:[%s14647_s1 + $0x1984] ss:$16 sps:$4 sm:$0xff]   ;;  %v10909_v20 = vld [vmem:[%s14647_s1 + $0x198c] ss:$16 sps:$4 sm:$0xff]  }
 0x2fb   :  { %7176 = vmatpush1.bf16.msra.mxu0 %v10820_v21  ;;  %8024 = vmatpush1.bf16.msra.mxu1 %v10823_v22  ;;  %v10904_v21 = vld [vmem:[%s14647_s1 + $0x1980] ss:$16 sps:$4 sm:$0xff]   ;;  %v10907_v22 = vld [vmem:[%s14647_s1 + $0x1988] ss:$16 sps:$4 sm:$0xff]  }
 0x2fc   :  { %7177 = vmatprep.subr.bf16.mxu0 %v10828_v23  ;;  %8025 = vmatprep.subr.bf16.mxu1 %v10831_v24  ;;  %v10912_v23 = vld [vmem:[%s14647_s1 + $0x19a4] ss:$16 sps:$4 sm:$0xff]   ;;  %v10915_v24 = vld [vmem:[%s14647_s1 + $0x19ac] ss:$16 sps:$4 sm:$0xff]  }
 0x2ff   :  { %7178 = vmatpush1.bf16.msra.mxu0 %v10826_v26  ;;  %8026 = vmatpush1.bf16.msra.mxu1 %v10829_v25  ;;  %v10910_v26 = vld [vmem:[%s14647_s1 + $0x19a0] ss:$16 sps:$4 sm:$0xff]   ;;  %v10913_v25 = vld [vmem:[%s14647_s1 + $0x19a8] ss:$16 sps:$4 sm:$0xff]  }
 0x300   :  { %7200 = vmatprep.subr.bf16.mxu0 %v10834_v27  ;;  %8048 = vmatprep.subr.bf16.mxu1 %v10837_v28  ;;  %v10918_v27 = vld [vmem:[%s14647_s1 + $0x19c4] ss:$16 sps:$4 sm:$0xff]   ;;  %v10921_v28 = vld [vmem:[%s14647_s1 + $0x19cc] ss:$16 sps:$4 sm:$0xff]  }
 0x302   :  { %7180 = vmatmul.mubr.bf16.vlgmr.msra.gmra.mrb[0].mxu0 %v8342_v29  ;;  %8028 = vmatmul.mubr.bf16.vlgmr.msra.gmra.mrb[0].mxu1 %v8342_v29  ;;  %v10916_v29 = vld [vmem:[%s14647_s1 + $0x19c0] ss:$16 sps:$4 sm:$0xff]  }
 0x303   :  { %7201 = vmatpush1.bf16.msra.mxu0 %v10832_v32  ;;  %8049 = vmatpush1.bf16.msra.mxu1 %v10835_v34  ;;  %v10927_v32 = vld [vmem:[%s14647_s1 + $0x19ec] ss:$16 sps:$4 sm:$0xff]   ;;  %v10922_v34 = vld [vmem:[%s14647_s1 + $0x19e0] ss:$16 sps:$4 sm:$0xff]  }
 0x304   :  { %7202 = vmatprep.subr.bf16.mxu0 %v10840_v36  ;;  %8050 = vmatprep.subr.bf16.mxu1 %v10843_v33  ;;  %v10925_v36 = vld [vmem:[%s14647_s1 + $0x19e8] ss:$16 sps:$4 sm:$0xff]   ;;  %v10930_v33 = vld [vmem:[%s14647_s1 + $0x1a04] ss:$16 sps:$4 sm:$0xff]  }
 0x305   :  { %7189 = vmatprep.mubr.bf16.mxu0 %v8375_v35  ;;  %8037 = vmatprep.mubr.bf16.mxu1 %v8375_v35  ;;  %v10933_v35 = vld [vmem:[%s14647_s1 + $0x1a0c] ss:$16 sps:$4 sm:$0xff]  }
 0x307   :  { %7203 = vmatpush1.bf16.msra.mxu0 %v10838_v37  ;;  %8051 = vmatpush1.bf16.msra.mxu1 %v10841_v38  ;;  %v8344_v37 = vcombine.low %v13805_v44, %v13810_v41  ;;  %v58_v38 = vld [vmem:[%s14648_s0 + $0x160] sm:$0xff]  ;;  %v10939_v41 = vld [vmem:[%s14647_s1 + $0x1a2c] ss:$16 sps:$4 sm:$0xff]  }
 0x308   :  { %7204 = vmatprep.subr.bf16.mxu0 %v10846_v39  ;;  %8052 = vmatprep.subr.bf16.mxu1 %v10849_v40  ;;  %v74_v39 = vld [vmem:[%s14648_s0 + $0x1e0] sm:$0xff] }
 0x309   :  { %v10928_v40 = vld [vmem:[%s14647_s1 + $0x1a00] ss:$16 sps:$4 sm:$0xff]   ;;  %v10936_v44 = vld [vmem:[%s14647_s1 + $0x1a24] ss:$16 sps:$4 sm:$0xff]  }
 0x30a   :  { %7190 = vmatmul.mubr.bf16.gmra.mrb[4].mxu0 %v8374_v42  ;;  %8038 = vmatmul.mubr.bf16.gmra.mrb[4].mxu1 %v8374_v42  ;;  %v10931_v42 = vld [vmem:[%s14647_s1 + $0x1a08] ss:$16 sps:$4 sm:$0xff]  }
 0x30b   :  { %7205 = vmatpush1.bf16.msra.mxu0 %v10844_v43  ;;  %8053 = vmatpush1.bf16.msra.mxu1 %v10847_v45  ;;  %v8377_v43 = vcombine.high %v58_v38, %v74_v39  ;;  %v10934_v45 = vld [vmem:[%s14647_s1 + $0x1a20] ss:$16 sps:$4 sm:$0xff]  }
 0x30c   :  { %7206 = vmatprep.subr.bf16.mxu0 %v10852_v46  ;;  %8054 = vmatprep.subr.bf16.mxu1 %v10855_v47  ;;  %v10937_v46 = vld [vmem:[%s14647_s1 + $0x1a28] ss:$16 sps:$4 sm:$0xff]   ;;  %v10942_v47 = vld [vmem:[%s14647_s1 + $0x1a44] ss:$16 sps:$4 sm:$0xff]  }
 0x30d   :  { %7232 = vmatprep.mubr.bf16.mxu0 %v8345_v48  ;;  %8080 = vmatprep.mubr.bf16.mxu1 %v8345_v48  ;;  %v10945_v48 = vld [vmem:[%s14647_s1 + $0x1a4c] ss:$16 sps:$4 sm:$0xff]  }
 0x30f   :  { %7207 = vmatpush1.bf16.msra.mxu0 %v10850_v51  ;;  %8055 = vmatpush1.bf16.msra.mxu1 %v10853_v52  ;;  %v8376_v51 = vcombine.low %v58_v38, %v74_v39  ;;  %v14017_v52 = vld [vmem:[%s14648_s0 + $0x68] sm:$0xff]  ;;  %v11020_v39 = vld [vmem:[%s14647_s1 + $0x1be4] ss:$16 sps:$4 sm:$0xff]  }
 0x310   :  { %7208 = vmatprep.subr.bf16.mxu0 %v10858_v49  ;;  %8056 = vmatprep.subr.bf16.mxu1 %v10861_v50  ;;  %v14022_v49 = vld [vmem:[%s14648_s0 + $0xe8] sm:$0xff]  ;;  %v10940_v50 = vld [vmem:[%s14647_s1 + $0x1a40] ss:$16 sps:$4 sm:$0xff]  }
 0x311   :  { %v11015_v38 = vld [vmem:[%s14647_s1 + $0x1bc8] ss:$16 sps:$4 sm:$0xff]  }
 0x313   :  { %7209 = vmatpush1.bf16.msra.mxu0 %v10856_v53  ;;  %8057 = vmatpush1.bf16.msra.mxu1 %v10859_v54  ;;  %v10943_v53 = vld [vmem:[%s14647_s1 + $0x1a48] ss:$16 sps:$4 sm:$0xff]   ;;  %v10948_v54 = vld [vmem:[%s14647_s1 + $0x1a64] ss:$16 sps:$4 sm:$0xff]  }
 0x314   :  { %7210 = vmatprep.subr.bf16.mxu0 %v10864_v55  ;;  %8058 = vmatprep.subr.bf16.mxu1 %v10867_v56  ;;  %v10951_v55 = vld [vmem:[%s14647_s1 + $0x1a6c] ss:$16 sps:$4 sm:$0xff]   ;;  %v8347_v56 = vcombine.high %v14017_v52, %v14022_v49 }
 0x317   :  { %7211 = vmatpush1.bf16.msra.mxu0 %v10862_v59  ;;  %8059 = vmatpush1.bf16.msra.mxu1 %v10865_v60  ;;  %v10946_v59 = vld [vmem:[%s14647_s1 + $0x1a60] ss:$16 sps:$4 sm:$0xff]   ;;  %v10949_v60 = vld [vmem:[%s14647_s1 + $0x1a68] ss:$16 sps:$4 sm:$0xff]  }
 0x318   :  { %7212 = vmatprep.subr.bf16.mxu0 %v10870_v57  ;;  %8060 = vmatprep.subr.bf16.mxu1 %v10873_v58  ;;  %v10954_v57 = vld [vmem:[%s14647_s1 + $0x1a84] ss:$16 sps:$4 sm:$0xff]   ;;  %v10957_v58 = vld [vmem:[%s14647_s1 + $0x1a8c] ss:$16 sps:$4 sm:$0xff]  }
 0x31b   :  { %7213 = vmatpush1.bf16.msra.mxu0 %v10868_v61  ;;  %8061 = vmatpush1.bf16.msra.mxu1 %v10871_v62  ;;  %v10952_v61 = vld [vmem:[%s14647_s1 + $0x1a80] ss:$16 sps:$4 sm:$0xff]   ;;  %v10955_v62 = vld [vmem:[%s14647_s1 + $0x1a88] ss:$16 sps:$4 sm:$0xff]  }
 0x31c   :  { %7214 = vmatprep.subr.bf16.mxu0 %v10876_v63  ;;  %8062 = vmatprep.subr.bf16.mxu1 %v10879_v0  ;;  %v10960_v63 = vld [vmem:[%s14647_s1 + $0x1aa4] ss:$16 sps:$4 sm:$0xff]   ;;  %v10963_v0 = vld [vmem:[%s14647_s1 + $0x1aac] ss:$16 sps:$4 sm:$0xff]  }
 0x31f   :  { %7215 = vmatpush1.bf16.msra.mxu0 %v10874_v3  ;;  %8063 = vmatpush1.bf16.msra.mxu1 %v10877_v4  ;;  %v10958_v3 = vld [vmem:[%s14647_s1 + $0x1aa0] ss:$16 sps:$4 sm:$0xff]   ;;  %v10961_v4 = vld [vmem:[%s14647_s1 + $0x1aa8] ss:$16 sps:$4 sm:$0xff]  }
 0x320   :  { %7216 = vmatprep.subr.bf16.mxu0 %v10882_v1  ;;  %8064 = vmatprep.subr.bf16.mxu1 %v10885_v2  ;;  %v10966_v1 = vld [vmem:[%s14647_s1 + $0x1ac4] ss:$16 sps:$4 sm:$0xff]   ;;  %v10969_v2 = vld [vmem:[%s14647_s1 + $0x1acc] ss:$16 sps:$4 sm:$0xff]  }
 0x323   :  { %7217 = vmatpush1.bf16.msra.mxu0 %v10880_v5  ;;  %8065 = vmatpush1.bf16.msra.mxu1 %v10883_v6  ;;  %v10964_v5 = vld [vmem:[%s14647_s1 + $0x1ac0] ss:$16 sps:$4 sm:$0xff]   ;;  %v10967_v6 = vld [vmem:[%s14647_s1 + $0x1ac8] ss:$16 sps:$4 sm:$0xff]  }
 0x324   :  { %7218 = vmatprep.subr.bf16.mxu0 %v10888_v7  ;;  %8066 = vmatprep.subr.bf16.mxu1 %v10891_v8  ;;  %v10972_v7 = vld [vmem:[%s14647_s1 + $0x1ae4] ss:$16 sps:$4 sm:$0xff]   ;;  %v10975_v8 = vld [vmem:[%s14647_s1 + $0x1aec] ss:$16 sps:$4 sm:$0xff]  }
 0x327   :  { %7219 = vmatpush1.bf16.msra.mxu0 %v10886_v11  ;;  %8067 = vmatpush1.bf16.msra.mxu1 %v10889_v12  ;;  %v10970_v11 = vld [vmem:[%s14647_s1 + $0x1ae0] ss:$16 sps:$4 sm:$0xff]   ;;  %v10973_v12 = vld [vmem:[%s14647_s1 + $0x1ae8] ss:$16 sps:$4 sm:$0xff]  }
 0x328   :  { %7220 = vmatprep.subr.bf16.mxu0 %v10894_v9  ;;  %8068 = vmatprep.subr.bf16.mxu1 %v10897_v10  ;;  %v10978_v9 = vld [vmem:[%s14647_s1 + $0x1b04] ss:$16 sps:$4 sm:$0xff]   ;;  %v10981_v10 = vld [vmem:[%s14647_s1 + $0x1b0c] ss:$16 sps:$4 sm:$0xff]  }
 0x32b   :  { %7221 = vmatpush1.bf16.msra.mxu0 %v10892_v13  ;;  %8069 = vmatpush1.bf16.msra.mxu1 %v10895_v14  ;;  %v10976_v13 = vld [vmem:[%s14647_s1 + $0x1b00] ss:$16 sps:$4 sm:$0xff]   ;;  %v10979_v14 = vld [vmem:[%s14647_s1 + $0x1b08] ss:$16 sps:$4 sm:$0xff]  }
 0x32c   :  { %7222 = vmatprep.subr.bf16.mxu0 %v10900_v15  ;;  %8070 = vmatprep.subr.bf16.mxu1 %v10903_v16  ;;  %v10984_v15 = vld [vmem:[%s14647_s1 + $0x1b24] ss:$16 sps:$4 sm:$0xff]   ;;  %v10987_v16 = vld [vmem:[%s14647_s1 + $0x1b2c] ss:$16 sps:$4 sm:$0xff]  }
 0x32f   :  { %7223 = vmatpush1.bf16.msra.mxu0 %v10898_v19  ;;  %8071 = vmatpush1.bf16.msra.mxu1 %v10901_v17  ;;  %v10982_v19 = vld [vmem:[%s14647_s1 + $0x1b20] ss:$16 sps:$4 sm:$0xff]   ;;  %v10985_v17 = vld [vmem:[%s14647_s1 + $0x1b28] ss:$16 sps:$4 sm:$0xff]  }
 0x330   :  { %7224 = vmatprep.subr.bf16.mxu0 %v10906_v18  ;;  %8072 = vmatprep.subr.bf16.mxu1 %v10909_v20  ;;  %v10990_v18 = vld [vmem:[%s14647_s1 + $0x1b44] ss:$16 sps:$4 sm:$0xff]   ;;  %v10993_v20 = vld [vmem:[%s14647_s1 + $0x1b4c] ss:$16 sps:$4 sm:$0xff]  }
 0x333   :  { %7225 = vmatpush1.bf16.msra.mxu0 %v10904_v21  ;;  %8073 = vmatpush1.bf16.msra.mxu1 %v10907_v22  ;;  %v10988_v21 = vld [vmem:[%s14647_s1 + $0x1b40] ss:$16 sps:$4 sm:$0xff]   ;;  %v10991_v22 = vld [vmem:[%s14647_s1 + $0x1b48] ss:$16 sps:$4 sm:$0xff]  }
 0x334   :  { %7226 = vmatprep.subr.bf16.mxu0 %v10912_v23  ;;  %8074 = vmatprep.subr.bf16.mxu1 %v10915_v24  ;;  %v10996_v23 = vld [vmem:[%s14647_s1 + $0x1b64] ss:$16 sps:$4 sm:$0xff]   ;;  %v10999_v24 = vld [vmem:[%s14647_s1 + $0x1b6c] ss:$16 sps:$4 sm:$0xff]  }
 0x337   :  { %7227 = vmatpush1.bf16.msra.mxu0 %v10910_v26  ;;  %8075 = vmatpush1.bf16.msra.mxu1 %v10913_v25  ;;  %v10994_v26 = vld [vmem:[%s14647_s1 + $0x1b60] ss:$16 sps:$4 sm:$0xff]   ;;  %v10997_v25 = vld [vmem:[%s14647_s1 + $0x1b68] ss:$16 sps:$4 sm:$0xff]  }
 0x338   :  { %7228 = vmatprep.subr.bf16.mxu0 %v10918_v27  ;;  %8076 = vmatprep.subr.bf16.mxu1 %v10921_v28  ;;  %v11002_v27 = vld [vmem:[%s14647_s1 + $0x1b84] ss:$16 sps:$4 sm:$0xff]   ;;  %v11005_v28 = vld [vmem:[%s14647_s1 + $0x1b8c] ss:$16 sps:$4 sm:$0xff]  }
 0x33b   :  { %7229 = vmatpush1.bf16.msra.mxu0 %v10916_v29  ;;  %8077 = vmatpush1.bf16.msra.mxu1 %v10919_v30  ;;  %v11000_v29 = vld [vmem:[%s14647_s1 + $0x1b80] ss:$16 sps:$4 sm:$0xff]   ;;  %v11003_v30 = vld [vmem:[%s14647_s1 + $0x1b88] ss:$16 sps:$4 sm:$0xff]  }
 0x33c   :  { %7230 = vmatprep.subr.bf16.mxu0 %v10924_v31  ;;  %8078 = vmatprep.subr.bf16.mxu1 %v10927_v32  ;;  %v11008_v31 = vld [vmem:[%s14647_s1 + $0x1ba4] ss:$16 sps:$4 sm:$0xff]   ;;  %v11011_v32 = vld [vmem:[%s14647_s1 + $0x1bac] ss:$16 sps:$4 sm:$0xff]  }
 0x33f   :  { %7231 = vmatpush1.bf16.msra.mxu0 %v10922_v34  ;;  %8079 = vmatpush1.bf16.msra.mxu1 %v10925_v36  ;;  %v11006_v34 = vld [vmem:[%s14647_s1 + $0x1ba0] ss:$16 sps:$4 sm:$0xff]   ;;  %v11009_v36 = vld [vmem:[%s14647_s1 + $0x1ba8] ss:$16 sps:$4 sm:$0xff]  }
 0x340   :  { %7253 = vmatprep.subr.bf16.mxu0 %v10930_v33  ;;  %8101 = vmatprep.subr.bf16.mxu1 %v10933_v35  ;;  %v11014_v33 = vld [vmem:[%s14647_s1 + $0x1bc4] ss:$16 sps:$4 sm:$0xff]   ;;  %v11017_v35 = vld [vmem:[%s14647_s1 + $0x1bcc] ss:$16 sps:$4 sm:$0xff]  }
 0x342   :  { %7233 = vmatmul.mubr.bf16.vlgmr.msra.gmra.mrb[0].mxu0 %v8344_v37  ;;  %8081 = vmatmul.mubr.bf16.vlgmr.msra.gmra.mrb[0].mxu1 %v8344_v37  ;;  %v11012_v37 = vld [vmem:[%s14647_s1 + $0x1bc0] ss:$16 sps:$4 sm:$0xff]  }
 0x343   :  { %7254 = vmatpush1.bf16.msra.mxu0 %v10928_v40  ;;  %8102 = vmatpush1.bf16.msra.mxu1 %v10931_v42  ;;  %v11023_v40 = vld [vmem:[%s14647_s1 + $0x1bec] ss:$16 sps:$4 sm:$0xff]   ;;  %v11018_v42 = vld [vmem:[%s14647_s1 + $0x1be0] ss:$16 sps:$4 sm:$0xff]  }
 0x344   :  { %7255 = vmatprep.subr.bf16.mxu0 %v10936_v44  ;;  %8103 = vmatprep.subr.bf16.mxu1 %v10939_v41  ;;  %v11021_v44 = vld [vmem:[%s14647_s1 + $0x1be8] ss:$16 sps:$4 sm:$0xff]   ;;  %v11026_v41 = vld [vmem:[%s14647_s1 + $0x1c04] ss:$16 sps:$4 sm:$0xff]  }
 0x345   :  { %7242 = vmatprep.mubr.bf16.mxu0 %v8377_v43  ;;  %8090 = vmatprep.mubr.bf16.mxu1 %v8377_v43  ;;  %v11029_v43 = vld [vmem:[%s14647_s1 + $0x1c0c] ss:$16 sps:$4 sm:$0xff]  }
 0x347   :  { %7256 = vmatpush1.bf16.msra.mxu0 %v10934_v45  ;;  %8104 = vmatpush1.bf16.msra.mxu1 %v10937_v46  ;;  %v8346_v45 = vcombine.low %v14017_v52, %v14022_v49  ;;  %v59_v46 = vld [vmem:[%s14648_s0 + $0x168] sm:$0xff]  ;;  %v11032_v52 = vld [vmem:[%s14647_s1 + $0x1c24] ss:$16 sps:$4 sm:$0xff]  }
 0x348   :  { %7257 = vmatprep.subr.bf16.mxu0 %v10942_v47  ;;  %8105 = vmatprep.subr.bf16.mxu1 %v10945_v48  ;;  %v75_v47 = vld [vmem:[%s14648_s0 + $0x1e8] sm:$0xff]  ;;  %v11024_v48 = vld [vmem:[%s14647_s1 + $0x1c00] ss:$16 sps:$4 sm:$0xff]  }
 0x349   :  { %v11035_v49 = vld [vmem:[%s14647_s1 + $0x1c2c] ss:$16 sps:$4 sm:$0xff]  }
 0x34a   :  { %7243 = vmatmul.mubr.bf16.gmra.mrb[4].mxu0 %v8376_v51  ;;  %8091 = vmatmul.mubr.bf16.gmra.mrb[4].mxu1 %v8376_v51  ;;  %v11027_v51 = vld [vmem:[%s14647_s1 + $0x1c08] ss:$16 sps:$4 sm:$0xff]  }
 0x34b   :  { %7258 = vmatpush1.bf16.msra.mxu0 %v10940_v50  ;;  %8106 = vmatpush1.bf16.msra.mxu1 %v10943_v53  ;;  %v8379_v50 = vcombine.high %v59_v46, %v75_v47  ;;  %v11030_v53 = vld [vmem:[%s14647_s1 + $0x1c20] ss:$16 sps:$4 sm:$0xff]  }
 0x34c   :  { %7259 = vmatprep.subr.bf16.mxu0 %v10948_v54  ;;  %8107 = vmatprep.subr.bf16.mxu1 %v10951_v55  ;;  %v11033_v54 = vld [vmem:[%s14647_s1 + $0x1c28] ss:$16 sps:$4 sm:$0xff]   ;;  %v11038_v55 = vld [vmem:[%s14647_s1 + $0x1c44] ss:$16 sps:$4 sm:$0xff]  }
 0x34d   :  { %7285 = vmatprep.mubr.bf16.mxu0 %v8347_v56  ;;  %8133 = vmatprep.mubr.bf16.mxu1 %v8347_v56  ;;  %v11041_v56 = vld [vmem:[%s14647_s1 + $0x1c4c] ss:$16 sps:$4 sm:$0xff]  }
 0x34f   :  { %7260 = vmatpush1.bf16.msra.mxu0 %v10946_v59  ;;  %8108 = vmatpush1.bf16.msra.mxu1 %v10949_v60  ;;  %v8378_v59 = vcombine.low %v59_v46, %v75_v47  ;;  %v14229_v60 = vld [vmem:[%s14648_s0 + $0x70] sm:$0xff]  ;;  %v11111_v46 = vld [vmem:[%s14647_s1 + $0x1dc8] ss:$16 sps:$4 sm:$0xff]  }
 0x350   :  { %7261 = vmatprep.subr.bf16.mxu0 %v10954_v57  ;;  %8109 = vmatprep.subr.bf16.mxu1 %v10957_v58  ;;  %v14234_v57 = vld [vmem:[%s14648_s0 + $0xf0] sm:$0xff] }
 0x351   :  { %v11036_v58 = vld [vmem:[%s14647_s1 + $0x1c40] ss:$16 sps:$4 sm:$0xff]   ;;  %v11116_v47 = vld [vmem:[%s14647_s1 + $0x1de4] ss:$16 sps:$4 sm:$0xff]  }
 0x353   :  { %7262 = vmatpush1.bf16.msra.mxu0 %v10952_v61  ;;  %8110 = vmatpush1.bf16.msra.mxu1 %v10955_v62  ;;  %v11039_v61 = vld [vmem:[%s14647_s1 + $0x1c48] ss:$16 sps:$4 sm:$0xff]   ;;  %v11044_v62 = vld [vmem:[%s14647_s1 + $0x1c64] ss:$16 sps:$4 sm:$0xff]  }
 0x354   :  { %7263 = vmatprep.subr.bf16.mxu0 %v10960_v63  ;;  %8111 = vmatprep.subr.bf16.mxu1 %v10963_v0  ;;  %v11047_v63 = vld [vmem:[%s14647_s1 + $0x1c6c] ss:$16 sps:$4 sm:$0xff]   ;;  %v8349_v0 = vcombine.high %v14229_v60, %v14234_v57 }
 0x357   :  { %7264 = vmatpush1.bf16.msra.mxu0 %v10958_v3  ;;  %8112 = vmatpush1.bf16.msra.mxu1 %v10961_v4  ;;  %v11042_v3 = vld [vmem:[%s14647_s1 + $0x1c60] ss:$16 sps:$4 sm:$0xff]   ;;  %v11045_v4 = vld [vmem:[%s14647_s1 + $0x1c68] ss:$16 sps:$4 sm:$0xff]  }
 0x358   :  { %7265 = vmatprep.subr.bf16.mxu0 %v10966_v1  ;;  %8113 = vmatprep.subr.bf16.mxu1 %v10969_v2  ;;  %v11050_v1 = vld [vmem:[%s14647_s1 + $0x1c84] ss:$16 sps:$4 sm:$0xff]   ;;  %v11053_v2 = vld [vmem:[%s14647_s1 + $0x1c8c] ss:$16 sps:$4 sm:$0xff]  }
 0x35b   :  { %7266 = vmatpush1.bf16.msra.mxu0 %v10964_v5  ;;  %8114 = vmatpush1.bf16.msra.mxu1 %v10967_v6  ;;  %v11048_v5 = vld [vmem:[%s14647_s1 + $0x1c80] ss:$16 sps:$4 sm:$0xff]   ;;  %v11051_v6 = vld [vmem:[%s14647_s1 + $0x1c88] ss:$16 sps:$4 sm:$0xff]  }
 0x35c   :  { %7267 = vmatprep.subr.bf16.mxu0 %v10972_v7  ;;  %8115 = vmatprep.subr.bf16.mxu1 %v10975_v8  ;;  %v11056_v7 = vld [vmem:[%s14647_s1 + $0x1ca4] ss:$16 sps:$4 sm:$0xff]   ;;  %v11059_v8 = vld [vmem:[%s14647_s1 + $0x1cac] ss:$16 sps:$4 sm:$0xff]  }
 0x35f   :  { %7268 = vmatpush1.bf16.msra.mxu0 %v10970_v11  ;;  %8116 = vmatpush1.bf16.msra.mxu1 %v10973_v12  ;;  %v11054_v11 = vld [vmem:[%s14647_s1 + $0x1ca0] ss:$16 sps:$4 sm:$0xff]   ;;  %v11057_v12 = vld [vmem:[%s14647_s1 + $0x1ca8] ss:$16 sps:$4 sm:$0xff]  }
 0x360   :  { %7269 = vmatprep.subr.bf16.mxu0 %v10978_v9  ;;  %8117 = vmatprep.subr.bf16.mxu1 %v10981_v10  ;;  %v11062_v9 = vld [vmem:[%s14647_s1 + $0x1cc4] ss:$16 sps:$4 sm:$0xff]   ;;  %v11065_v10 = vld [vmem:[%s14647_s1 + $0x1ccc] ss:$16 sps:$4 sm:$0xff]  }
 0x363   :  { %7270 = vmatpush1.bf16.msra.mxu0 %v10976_v13  ;;  %8118 = vmatpush1.bf16.msra.mxu1 %v10979_v14  ;;  %v11060_v13 = vld [vmem:[%s14647_s1 + $0x1cc0] ss:$16 sps:$4 sm:$0xff]   ;;  %v11063_v14 = vld [vmem:[%s14647_s1 + $0x1cc8] ss:$16 sps:$4 sm:$0xff]  }
 0x364   :  { %7271 = vmatprep.subr.bf16.mxu0 %v10984_v15  ;;  %8119 = vmatprep.subr.bf16.mxu1 %v10987_v16  ;;  %v11068_v15 = vld [vmem:[%s14647_s1 + $0x1ce4] ss:$16 sps:$4 sm:$0xff]   ;;  %v11071_v16 = vld [vmem:[%s14647_s1 + $0x1cec] ss:$16 sps:$4 sm:$0xff]  }
 0x367   :  { %7272 = vmatpush1.bf16.msra.mxu0 %v10982_v19  ;;  %8120 = vmatpush1.bf16.msra.mxu1 %v10985_v17  ;;  %v11066_v19 = vld [vmem:[%s14647_s1 + $0x1ce0] ss:$16 sps:$4 sm:$0xff]   ;;  %v11069_v17 = vld [vmem:[%s14647_s1 + $0x1ce8] ss:$16 sps:$4 sm:$0xff]  }
 0x368   :  { %7273 = vmatprep.subr.bf16.mxu0 %v10990_v18  ;;  %8121 = vmatprep.subr.bf16.mxu1 %v10993_v20  ;;  %v11074_v18 = vld [vmem:[%s14647_s1 + $0x1d04] ss:$16 sps:$4 sm:$0xff]   ;;  %v11077_v20 = vld [vmem:[%s14647_s1 + $0x1d0c] ss:$16 sps:$4 sm:$0xff]  }
 0x36b   :  { %7274 = vmatpush1.bf16.msra.mxu0 %v10988_v21  ;;  %8122 = vmatpush1.bf16.msra.mxu1 %v10991_v22  ;;  %v11072_v21 = vld [vmem:[%s14647_s1 + $0x1d00] ss:$16 sps:$4 sm:$0xff]   ;;  %v11075_v22 = vld [vmem:[%s14647_s1 + $0x1d08] ss:$16 sps:$4 sm:$0xff]  }
 0x36c   :  { %7275 = vmatprep.subr.bf16.mxu0 %v10996_v23  ;;  %8123 = vmatprep.subr.bf16.mxu1 %v10999_v24  ;;  %v11080_v23 = vld [vmem:[%s14647_s1 + $0x1d24] ss:$16 sps:$4 sm:$0xff]   ;;  %v11083_v24 = vld [vmem:[%s14647_s1 + $0x1d2c] ss:$16 sps:$4 sm:$0xff]  }
 0x36f   :  { %7276 = vmatpush1.bf16.msra.mxu0 %v10994_v26  ;;  %8124 = vmatpush1.bf16.msra.mxu1 %v10997_v25  ;;  %v11078_v26 = vld [vmem:[%s14647_s1 + $0x1d20] ss:$16 sps:$4 sm:$0xff]   ;;  %v11081_v25 = vld [vmem:[%s14647_s1 + $0x1d28] ss:$16 sps:$4 sm:$0xff]  }
 0x370   :  { %7277 = vmatprep.subr.bf16.mxu0 %v11002_v27  ;;  %8125 = vmatprep.subr.bf16.mxu1 %v11005_v28  ;;  %v11086_v27 = vld [vmem:[%s14647_s1 + $0x1d44] ss:$16 sps:$4 sm:$0xff]   ;;  %v11089_v28 = vld [vmem:[%s14647_s1 + $0x1d4c] ss:$16 sps:$4 sm:$0xff]  }
 0x373   :  { %7278 = vmatpush1.bf16.msra.mxu0 %v11000_v29  ;;  %8126 = vmatpush1.bf16.msra.mxu1 %v11003_v30  ;;  %v11084_v29 = vld [vmem:[%s14647_s1 + $0x1d40] ss:$16 sps:$4 sm:$0xff]   ;;  %v11087_v30 = vld [vmem:[%s14647_s1 + $0x1d48] ss:$16 sps:$4 sm:$0xff]  }
 0x374   :  { %7279 = vmatprep.subr.bf16.mxu0 %v11008_v31  ;;  %8127 = vmatprep.subr.bf16.mxu1 %v11011_v32  ;;  %v11092_v31 = vld [vmem:[%s14647_s1 + $0x1d64] ss:$16 sps:$4 sm:$0xff]   ;;  %v11095_v32 = vld [vmem:[%s14647_s1 + $0x1d6c] ss:$16 sps:$4 sm:$0xff]  }
 0x377   :  { %7280 = vmatpush1.bf16.msra.mxu0 %v11006_v34  ;;  %8128 = vmatpush1.bf16.msra.mxu1 %v11009_v36  ;;  %v11090_v34 = vld [vmem:[%s14647_s1 + $0x1d60] ss:$16 sps:$4 sm:$0xff]   ;;  %v11093_v36 = vld [vmem:[%s14647_s1 + $0x1d68] ss:$16 sps:$4 sm:$0xff]  }
 0x378   :  { %7281 = vmatprep.subr.bf16.mxu0 %v11014_v33  ;;  %8129 = vmatprep.subr.bf16.mxu1 %v11017_v35  ;;  %v11098_v33 = vld [vmem:[%s14647_s1 + $0x1d84] ss:$16 sps:$4 sm:$0xff]   ;;  %v11101_v35 = vld [vmem:[%s14647_s1 + $0x1d8c] ss:$16 sps:$4 sm:$0xff]  }
 0x37b   :  { %7282 = vmatpush1.bf16.msra.mxu0 %v11012_v37  ;;  %8130 = vmatpush1.bf16.msra.mxu1 %v11015_v38  ;;  %v11096_v37 = vld [vmem:[%s14647_s1 + $0x1d80] ss:$16 sps:$4 sm:$0xff]   ;;  %v11099_v38 = vld [vmem:[%s14647_s1 + $0x1d88] ss:$16 sps:$4 sm:$0xff]  }
 0x37c   :  { %7283 = vmatprep.subr.bf16.mxu0 %v11020_v39  ;;  %8131 = vmatprep.subr.bf16.mxu1 %v11023_v40  ;;  %v11104_v39 = vld [vmem:[%s14647_s1 + $0x1da4] ss:$16 sps:$4 sm:$0xff]   ;;  %v11107_v40 = vld [vmem:[%s14647_s1 + $0x1dac] ss:$16 sps:$4 sm:$0xff]  }
 0x37f   :  { %7284 = vmatpush1.bf16.msra.mxu0 %v11018_v42  ;;  %8132 = vmatpush1.bf16.msra.mxu1 %v11021_v44  ;;  %v11102_v42 = vld [vmem:[%s14647_s1 + $0x1da0] ss:$16 sps:$4 sm:$0xff]   ;;  %v11105_v44 = vld [vmem:[%s14647_s1 + $0x1da8] ss:$16 sps:$4 sm:$0xff]  }
 0x380   :  { %7306 = vmatprep.subr.bf16.mxu0 %v11026_v41  ;;  %8154 = vmatprep.subr.bf16.mxu1 %v11029_v43  ;;  %v11110_v41 = vld [vmem:[%s14647_s1 + $0x1dc4] ss:$16 sps:$4 sm:$0xff]   ;;  %v11113_v43 = vld [vmem:[%s14647_s1 + $0x1dcc] ss:$16 sps:$4 sm:$0xff]  }
 0x382   :  { %7286 = vmatmul.mubr.bf16.vlgmr.msra.gmra.mrb[0].mxu0 %v8346_v45  ;;  %8134 = vmatmul.mubr.bf16.vlgmr.msra.gmra.mrb[0].mxu1 %v8346_v45  ;;  %v11108_v45 = vld [vmem:[%s14647_s1 + $0x1dc0] ss:$16 sps:$4 sm:$0xff]  }
 0x383   :  { %7307 = vmatpush1.bf16.msra.mxu0 %v11024_v48  ;;  %8155 = vmatpush1.bf16.msra.mxu1 %v11027_v51  ;;  %v11119_v48 = vld [vmem:[%s14647_s1 + $0x1dec] ss:$16 sps:$4 sm:$0xff]   ;;  %v11114_v51 = vld [vmem:[%s14647_s1 + $0x1de0] ss:$16 sps:$4 sm:$0xff]  }
 0x384   :  { %7308 = vmatprep.subr.bf16.mxu0 %v11032_v52  ;;  %8156 = vmatprep.subr.bf16.mxu1 %v11035_v49  ;;  %v11117_v52 = vld [vmem:[%s14647_s1 + $0x1de8] ss:$16 sps:$4 sm:$0xff]   ;;  %v11122_v49 = vld [vmem:[%s14647_s1 + $0x1e04] ss:$16 sps:$4 sm:$0xff]  }
 0x385   :  { %7295 = vmatprep.mubr.bf16.mxu0 %v8379_v50  ;;  %8143 = vmatprep.mubr.bf16.mxu1 %v8379_v50  ;;  %v11125_v50 = vld [vmem:[%s14647_s1 + $0x1e0c] ss:$16 sps:$4 sm:$0xff]  }
 0x387   :  { %7309 = vmatpush1.bf16.msra.mxu0 %v11030_v53  ;;  %8157 = vmatpush1.bf16.msra.mxu1 %v11033_v54  ;;  %v8348_v53 = vcombine.low %v14229_v60, %v14234_v57  ;;  %v60_v54 = vld [vmem:[%s14648_s0 + $0x170] sm:$0xff]  ;;  %v11131_v57 = vld [vmem:[%s14647_s1 + $0x1e2c] ss:$16 sps:$4 sm:$0xff]  }
 0x388   :  { %7310 = vmatprep.subr.bf16.mxu0 %v11038_v55  ;;  %8158 = vmatprep.subr.bf16.mxu1 %v11041_v56  ;;  %v76_v55 = vld [vmem:[%s14648_s0 + $0x1f0] sm:$0xff] }
 0x389   :  { %v11120_v56 = vld [vmem:[%s14647_s1 + $0x1e00] ss:$16 sps:$4 sm:$0xff]   ;;  %v11128_v60 = vld [vmem:[%s14647_s1 + $0x1e24] ss:$16 sps:$4 sm:$0xff]  }
 0x38a   :  { %7296 = vmatmul.mubr.bf16.gmra.mrb[4].mxu0 %v8378_v59  ;;  %8144 = vmatmul.mubr.bf16.gmra.mrb[4].mxu1 %v8378_v59  ;;  %v11123_v59 = vld [vmem:[%s14647_s1 + $0x1e08] ss:$16 sps:$4 sm:$0xff]  }
 0x38b   :  { %7311 = vmatpush1.bf16.msra.mxu0 %v11036_v58  ;;  %8159 = vmatpush1.bf16.msra.mxu1 %v11039_v61  ;;  %v8381_v58 = vcombine.high %v60_v54, %v76_v55  ;;  %v11126_v61 = vld [vmem:[%s14647_s1 + $0x1e20] ss:$16 sps:$4 sm:$0xff]  }
 0x38c   :  { %7312 = vmatprep.subr.bf16.mxu0 %v11044_v62  ;;  %8160 = vmatprep.subr.bf16.mxu1 %v11047_v63  ;;  %v11129_v62 = vld [vmem:[%s14647_s1 + $0x1e28] ss:$16 sps:$4 sm:$0xff]   ;;  %v11134_v63 = vld [vmem:[%s14647_s1 + $0x1e44] ss:$16 sps:$4 sm:$0xff]  }
 0x38d   :  { %7338 = vmatprep.mubr.bf16.mxu0 %v8349_v0  ;;  %8186 = vmatprep.mubr.bf16.mxu1 %v8349_v0  ;;  %v11137_v0 = vld [vmem:[%s14647_s1 + $0x1e4c] ss:$16 sps:$4 sm:$0xff]  }
 0x38f   :  { %7313 = vmatpush1.bf16.msra.mxu0 %v11042_v3  ;;  %8161 = vmatpush1.bf16.msra.mxu1 %v11045_v4  ;;  %v8380_v3 = vcombine.low %v60_v54, %v76_v55  ;;  %v14441_v4 = vld [vmem:[%s14648_s0 + $0x78] sm:$0xff]  ;;  %v11212_v55 = vld [vmem:[%s14647_s1 + $0x1fe4] ss:$16 sps:$4 sm:$0xff]  }
 0x390   :  { %7314 = vmatprep.subr.bf16.mxu0 %v11050_v1  ;;  %8162 = vmatprep.subr.bf16.mxu1 %v11053_v2  ;;  %v14446_v1 = vld [vmem:[%s14648_s0 + $0xf8] sm:$0xff]  ;;  %v11132_v2 = vld [vmem:[%s14647_s1 + $0x1e40] ss:$16 sps:$4 sm:$0xff]  }
 0x391   :  { %v11207_v54 = vld [vmem:[%s14647_s1 + $0x1fc8] ss:$16 sps:$4 sm:$0xff]  }
 0x393   :  { %7315 = vmatpush1.bf16.msra.mxu0 %v11048_v5  ;;  %8163 = vmatpush1.bf16.msra.mxu1 %v11051_v6  ;;  %v11135_v5 = vld [vmem:[%s14647_s1 + $0x1e48] ss:$16 sps:$4 sm:$0xff]   ;;  %v11140_v6 = vld [vmem:[%s14647_s1 + $0x1e64] ss:$16 sps:$4 sm:$0xff]  }
 0x394   :  { %7316 = vmatprep.subr.bf16.mxu0 %v11056_v7  ;;  %8164 = vmatprep.subr.bf16.mxu1 %v11059_v8  ;;  %v11143_v7 = vld [vmem:[%s14647_s1 + $0x1e6c] ss:$16 sps:$4 sm:$0xff]   ;;  %v8351_v8 = vcombine.high %v14441_v4, %v14446_v1 }
 0x397   :  { %7317 = vmatpush1.bf16.msra.mxu0 %v11054_v11  ;;  %8165 = vmatpush1.bf16.msra.mxu1 %v11057_v12  ;;  %v11138_v11 = vld [vmem:[%s14647_s1 + $0x1e60] ss:$16 sps:$4 sm:$0xff]   ;;  %v11141_v12 = vld [vmem:[%s14647_s1 + $0x1e68] ss:$16 sps:$4 sm:$0xff]  }
 0x398   :  { %7318 = vmatprep.subr.bf16.mxu0 %v11062_v9  ;;  %8166 = vmatprep.subr.bf16.mxu1 %v11065_v10  ;;  %v11146_v9 = vld [vmem:[%s14647_s1 + $0x1e84] ss:$16 sps:$4 sm:$0xff]   ;;  %v11149_v10 = vld [vmem:[%s14647_s1 + $0x1e8c] ss:$16 sps:$4 sm:$0xff]  }
 0x39b   :  { %7319 = vmatpush1.bf16.msra.mxu0 %v11060_v13  ;;  %8167 = vmatpush1.bf16.msra.mxu1 %v11063_v14  ;;  %v11144_v13 = vld [vmem:[%s14647_s1 + $0x1e80] ss:$16 sps:$4 sm:$0xff]   ;;  %v11147_v14 = vld [vmem:[%s14647_s1 + $0x1e88] ss:$16 sps:$4 sm:$0xff]  }
 0x39c   :  { %7320 = vmatprep.subr.bf16.mxu0 %v11068_v15  ;;  %8168 = vmatprep.subr.bf16.mxu1 %v11071_v16  ;;  %v11152_v15 = vld [vmem:[%s14647_s1 + $0x1ea4] ss:$16 sps:$4 sm:$0xff]   ;;  %v11155_v16 = vld [vmem:[%s14647_s1 + $0x1eac] ss:$16 sps:$4 sm:$0xff]  }
 0x39f   :  { %7321 = vmatpush1.bf16.msra.mxu0 %v11066_v19  ;;  %8169 = vmatpush1.bf16.msra.mxu1 %v11069_v17  ;;  %v11150_v19 = vld [vmem:[%s14647_s1 + $0x1ea0] ss:$16 sps:$4 sm:$0xff]   ;;  %v11153_v17 = vld [vmem:[%s14647_s1 + $0x1ea8] ss:$16 sps:$4 sm:$0xff]  }
 0x3a0   :  { %7322 = vmatprep.subr.bf16.mxu0 %v11074_v18  ;;  %8170 = vmatprep.subr.bf16.mxu1 %v11077_v20  ;;  %v11158_v18 = vld [vmem:[%s14647_s1 + $0x1ec4] ss:$16 sps:$4 sm:$0xff]   ;;  %v11161_v20 = vld [vmem:[%s14647_s1 + $0x1ecc] ss:$16 sps:$4 sm:$0xff]  }
 0x3a3   :  { %7323 = vmatpush1.bf16.msra.mxu0 %v11072_v21  ;;  %8171 = vmatpush1.bf16.msra.mxu1 %v11075_v22  ;;  %v11156_v21 = vld [vmem:[%s14647_s1 + $0x1ec0] ss:$16 sps:$4 sm:$0xff]   ;;  %v11159_v22 = vld [vmem:[%s14647_s1 + $0x1ec8] ss:$16 sps:$4 sm:$0xff]  }
 0x3a4   :  { %7324 = vmatprep.subr.bf16.mxu0 %v11080_v23  ;;  %8172 = vmatprep.subr.bf16.mxu1 %v11083_v24  ;;  %v11164_v23 = vld [vmem:[%s14647_s1 + $0x1ee4] ss:$16 sps:$4 sm:$0xff]   ;;  %v11167_v24 = vld [vmem:[%s14647_s1 + $0x1eec] ss:$16 sps:$4 sm:$0xff]  }
 0x3a7   :  { %7325 = vmatpush1.bf16.msra.mxu0 %v11078_v26  ;;  %8173 = vmatpush1.bf16.msra.mxu1 %v11081_v25  ;;  %v11162_v26 = vld [vmem:[%s14647_s1 + $0x1ee0] ss:$16 sps:$4 sm:$0xff]   ;;  %v11165_v25 = vld [vmem:[%s14647_s1 + $0x1ee8] ss:$16 sps:$4 sm:$0xff]  }
 0x3a8   :  { %7326 = vmatprep.subr.bf16.mxu0 %v11086_v27  ;;  %8174 = vmatprep.subr.bf16.mxu1 %v11089_v28  ;;  %v11170_v27 = vld [vmem:[%s14647_s1 + $0x1f04] ss:$16 sps:$4 sm:$0xff]   ;;  %v11173_v28 = vld [vmem:[%s14647_s1 + $0x1f0c] ss:$16 sps:$4 sm:$0xff]  }
 0x3ab   :  { %7327 = vmatpush1.bf16.msra.mxu0 %v11084_v29  ;;  %8175 = vmatpush1.bf16.msra.mxu1 %v11087_v30  ;;  %v11168_v29 = vld [vmem:[%s14647_s1 + $0x1f00] ss:$16 sps:$4 sm:$0xff]   ;;  %v11171_v30 = vld [vmem:[%s14647_s1 + $0x1f08] ss:$16 sps:$4 sm:$0xff]  }
 0x3ac   :  { %7328 = vmatprep.subr.bf16.mxu0 %v11092_v31  ;;  %8176 = vmatprep.subr.bf16.mxu1 %v11095_v32  ;;  %v11176_v31 = vld [vmem:[%s14647_s1 + $0x1f24] ss:$16 sps:$4 sm:$0xff]   ;;  %v11179_v32 = vld [vmem:[%s14647_s1 + $0x1f2c] ss:$16 sps:$4 sm:$0xff]  }
 0x3af   :  { %7329 = vmatpush1.bf16.msra.mxu0 %v11090_v34  ;;  %8177 = vmatpush1.bf16.msra.mxu1 %v11093_v36  ;;  %v11174_v34 = vld [vmem:[%s14647_s1 + $0x1f20] ss:$16 sps:$4 sm:$0xff]   ;;  %v11177_v36 = vld [vmem:[%s14647_s1 + $0x1f28] ss:$16 sps:$4 sm:$0xff]  }
 0x3b0   :  { %7330 = vmatprep.subr.bf16.mxu0 %v11098_v33  ;;  %8178 = vmatprep.subr.bf16.mxu1 %v11101_v35  ;;  %v11182_v33 = vld [vmem:[%s14647_s1 + $0x1f44] ss:$16 sps:$4 sm:$0xff]   ;;  %v11185_v35 = vld [vmem:[%s14647_s1 + $0x1f4c] ss:$16 sps:$4 sm:$0xff]  }
 0x3b3   :  { %7331 = vmatpush1.bf16.msra.mxu0 %v11096_v37  ;;  %8179 = vmatpush1.bf16.msra.mxu1 %v11099_v38  ;;  %v11180_v37 = vld [vmem:[%s14647_s1 + $0x1f40] ss:$16 sps:$4 sm:$0xff]   ;;  %v11183_v38 = vld [vmem:[%s14647_s1 + $0x1f48] ss:$16 sps:$4 sm:$0xff]  }
 0x3b4   :  { %7332 = vmatprep.subr.bf16.mxu0 %v11104_v39  ;;  %8180 = vmatprep.subr.bf16.mxu1 %v11107_v40  ;;  %v11188_v39 = vld [vmem:[%s14647_s1 + $0x1f64] ss:$16 sps:$4 sm:$0xff]   ;;  %v11191_v40 = vld [vmem:[%s14647_s1 + $0x1f6c] ss:$16 sps:$4 sm:$0xff]  }
 0x3b7   :  { %7333 = vmatpush1.bf16.msra.mxu0 %v11102_v42  ;;  %8181 = vmatpush1.bf16.msra.mxu1 %v11105_v44  ;;  %v11186_v42 = vld [vmem:[%s14647_s1 + $0x1f60] ss:$16 sps:$4 sm:$0xff]   ;;  %v11189_v44 = vld [vmem:[%s14647_s1 + $0x1f68] ss:$16 sps:$4 sm:$0xff]  }
 0x3b8   :  { %7334 = vmatprep.subr.bf16.mxu0 %v11110_v41  ;;  %8182 = vmatprep.subr.bf16.mxu1 %v11113_v43  ;;  %v11194_v41 = vld [vmem:[%s14647_s1 + $0x1f84] ss:$16 sps:$4 sm:$0xff]   ;;  %v11197_v43 = vld [vmem:[%s14647_s1 + $0x1f8c] ss:$16 sps:$4 sm:$0xff]  }
 0x3bb   :  { %7335 = vmatpush1.bf16.msra.mxu0 %v11108_v45  ;;  %8183 = vmatpush1.bf16.msra.mxu1 %v11111_v46  ;;  %v11192_v45 = vld [vmem:[%s14647_s1 + $0x1f80] ss:$16 sps:$4 sm:$0xff]   ;;  %v11195_v46 = vld [vmem:[%s14647_s1 + $0x1f88] ss:$16 sps:$4 sm:$0xff]  }
 0x3bc   :  { %7336 = vmatprep.subr.bf16.mxu0 %v11116_v47  ;;  %8184 = vmatprep.subr.bf16.mxu1 %v11119_v48  ;;  %v11200_v47 = vld [vmem:[%s14647_s1 + $0x1fa4] ss:$16 sps:$4 sm:$0xff]   ;;  %v11203_v48 = vld [vmem:[%s14647_s1 + $0x1fac] ss:$16 sps:$4 sm:$0xff]  }
 0x3bf   :  { %7337 = vmatpush1.bf16.msra.mxu0 %v11114_v51  ;;  %8185 = vmatpush1.bf16.msra.mxu1 %v11117_v52  ;;  %v11198_v51 = vld [vmem:[%s14647_s1 + $0x1fa0] ss:$16 sps:$4 sm:$0xff]   ;;  %v11201_v52 = vld [vmem:[%s14647_s1 + $0x1fa8] ss:$16 sps:$4 sm:$0xff]  }
 0x3c0   :  { %7359 = vmatprep.subr.bf16.mxu0 %v11122_v49  ;;  %8207 = vmatprep.subr.bf16.mxu1 %v11125_v50  ;;  %v11206_v49 = vld [vmem:[%s14647_s1 + $0x1fc4] ss:$16 sps:$4 sm:$0xff]   ;;  %v11209_v50 = vld [vmem:[%s14647_s1 + $0x1fcc] ss:$16 sps:$4 sm:$0xff]  }
 0x3c2   :  { %7339 = vmatmul.mubr.bf16.vlgmr.msra.gmra.mrb[0].mxu0 %v8348_v53  ;;  %8187 = vmatmul.mubr.bf16.vlgmr.msra.gmra.mrb[0].mxu1 %v8348_v53  ;;  %v11204_v53 = vld [vmem:[%s14647_s1 + $0x1fc0] ss:$16 sps:$4 sm:$0xff]  }
 0x3c3   :  { %7360 = vmatpush1.bf16.msra.mxu0 %v11120_v56  ;;  %8208 = vmatpush1.bf16.msra.mxu1 %v11123_v59  ;;  %v11215_v56 = vld [vmem:[%s14647_s1 + $0x1fec] ss:$16 sps:$4 sm:$0xff]   ;;  %v11210_v59 = vld [vmem:[%s14647_s1 + $0x1fe0] ss:$16 sps:$4 sm:$0xff]  }
 0x3c4   :  { %7361 = vmatprep.subr.bf16.mxu0 %v11128_v60  ;;  %8209 = vmatprep.subr.bf16.mxu1 %v11131_v57  ;;  %v11213_v60 = vld [vmem:[%s14647_s1 + $0x1fe8] ss:$16 sps:$4 sm:$0xff]  }
 0x3c5   :  { %7348 = vmatprep.mubr.bf16.mxu0 %v8381_v58  ;;  %8196 = vmatprep.mubr.bf16.mxu1 %v8381_v58  ;;  %v61_v57 = vld [vmem:[%s14648_s0 + $0x178] sm:$0xff] }
 0x3c6   :  { %v77_v58 = vld [vmem:[%s14648_s0 + $0x1f8] sm:$0xff] }
 0x3c7   :  { %7362 = vmatpush1.bf16.msra.mxu0 %v11126_v61  ;;  %8210 = vmatpush1.bf16.msra.mxu1 %v11129_v62  ;;  %v8350_v61 = vcombine.low %v14441_v4, %v14446_v1  ;;  %v8383_v62 = vcombine.high %v61_v57, %v77_v58 }
 0x3c8   :  { %7363 = vmatprep.subr.bf16.mxu0 %v11134_v63  ;;  %8211 = vmatprep.subr.bf16.mxu1 %v11137_v0  ;;  %v8382_v63 = vcombine.low %v61_v57, %v77_v58  ;;  %v1104_v0 = vlaneseq }
 0x3ca   :  { %7349 = vmatmul.mubr.bf16.gmra.mrb[4].mxu0 %v8380_v3  ;;  %8197 = vmatmul.mubr.bf16.gmra.mrb[4].mxu1 %v8380_v3  ;;  %v1105_v3 = vshrl.u32 %v1104_v0, 7 }
 0x3cb   :  { %7364 = vmatpush1.bf16.msra.mxu0 %v11132_v2  ;;  %8212 = vmatpush1.bf16.msra.mxu1 %v11135_v5 }
 0x3cc   :  { %7365 = vmatprep.subr.bf16.mxu0 %v11140_v6  ;;  %8213 = vmatprep.subr.bf16.mxu1 %v11143_v7  ;;  %v1106_v2 = vsub.s32 0, %v1105_v3  ;;  %v1114_v5 = vsub.s32 2, %v1105_v3  ;;  %v1102_v6 = vld [vmem:[%s14649_s2] sm:$0xf]  ;;  %v1110_v7 = vsub.s32 1, %v1105_v3  ;;  %v1118_v4 = vsub.s32 3, %v1105_v3 }
 0x3cd   :  { %7391 = vmatprep.mubr.bf16.mxu0 %v8351_v8  ;;  %8239 = vmatprep.mubr.bf16.mxu1 %v8351_v8 }
 0x3ce   :  { %v1107_v1 = vrot.slane %v1102_v6, %v1106_v2  ;;  %v1115_v8 = vrot.slane %v1102_v6, %v1114_v5 }
 0x3cf   :  { %7366 = vmatpush1.bf16.msra.mxu0 %v11138_v11  ;;  %8214 = vmatpush1.bf16.msra.mxu1 %v11141_v12  ;;  %v1111_v11 = vrot.slane %v1102_v6, %v1110_v7  ;;  %v1119_v12 = vrot.slane %v1102_v6, %v1118_v4 }
 0x3d0   :  { %7367 = vmatprep.subr.bf16.mxu0 %v11146_v9  ;;  %8215 = vmatprep.subr.bf16.mxu1 %v11149_v10 }
 0x3d3   :  { %7368 = vmatpush1.bf16.msra.mxu0 %v11144_v13  ;;  %8216 = vmatpush1.bf16.msra.mxu1 %v11147_v14 }
 0x3d4   :  { %7369 = vmatprep.subr.bf16.mxu0 %v11152_v15  ;;  %8217 = vmatprep.subr.bf16.mxu1 %v11155_v16 }
 0x3d7   :  { %7370 = vmatpush1.bf16.msra.mxu0 %v11150_v19  ;;  %8218 = vmatpush1.bf16.msra.mxu1 %v11153_v17 }
 0x3d8   :  { %7371 = vmatprep.subr.bf16.mxu0 %v11158_v18  ;;  %8219 = vmatprep.subr.bf16.mxu1 %v11161_v20 }
 0x3db   :  { %7372 = vmatpush1.bf16.msra.mxu0 %v11156_v21  ;;  %8220 = vmatpush1.bf16.msra.mxu1 %v11159_v22 }
 0x3dc   :  { %7373 = vmatprep.subr.bf16.mxu0 %v11164_v23  ;;  %8221 = vmatprep.subr.bf16.mxu1 %v11167_v24 }
 0x3df   :  { %7374 = vmatpush1.bf16.msra.mxu0 %v11162_v26  ;;  %8222 = vmatpush1.bf16.msra.mxu1 %v11165_v25 }
 0x3e0   :  { %7375 = vmatprep.subr.bf16.mxu0 %v11170_v27  ;;  %8223 = vmatprep.subr.bf16.mxu1 %v11173_v28 }
 0x3e3   :  { %7376 = vmatpush1.bf16.msra.mxu0 %v11168_v29  ;;  %8224 = vmatpush1.bf16.msra.mxu1 %v11171_v30 }
 0x3e4   :  { %7377 = vmatprep.subr.bf16.mxu0 %v11176_v31  ;;  %8225 = vmatprep.subr.bf16.mxu1 %v11179_v32 }
 0x3e7   :  { %7378 = vmatpush1.bf16.msra.mxu0 %v11174_v34  ;;  %8226 = vmatpush1.bf16.msra.mxu1 %v11177_v36 }
 0x3e8   :  { %7379 = vmatprep.subr.bf16.mxu0 %v11182_v33  ;;  %8227 = vmatprep.subr.bf16.mxu1 %v11185_v35 }
 0x3eb   :  { %7380 = vmatpush1.bf16.msra.mxu0 %v11180_v37  ;;  %8228 = vmatpush1.bf16.msra.mxu1 %v11183_v38 }
 0x3ec   :  { %7381 = vmatprep.subr.bf16.mxu0 %v11188_v39  ;;  %8229 = vmatprep.subr.bf16.mxu1 %v11191_v40 }
 0x3ef   :  { %7382 = vmatpush1.bf16.msra.mxu0 %v11186_v42  ;;  %8230 = vmatpush1.bf16.msra.mxu1 %v11189_v44 }
 0x3f0   :  { %7383 = vmatprep.subr.bf16.mxu0 %v11194_v41  ;;  %8231 = vmatprep.subr.bf16.mxu1 %v11197_v43 }
 0x3f3   :  { %7384 = vmatpush1.bf16.msra.mxu0 %v11192_v45  ;;  %8232 = vmatpush1.bf16.msra.mxu1 %v11195_v46 }
 0x3f4   :  { %7385 = vmatprep.subr.bf16.mxu0 %v11200_v47  ;;  %8233 = vmatprep.subr.bf16.mxu1 %v11203_v48 }
 0x3f7   :  { %7386 = vmatpush1.bf16.msra.mxu0 %v11198_v51  ;;  %8234 = vmatpush1.bf16.msra.mxu1 %v11201_v52 }
 0x3f8   :  { %7387 = vmatprep.subr.bf16.mxu0 %v11206_v49  ;;  %8235 = vmatprep.subr.bf16.mxu1 %v11209_v50 }
 0x3fb   :  { %7388 = vmatpush1.bf16.msra.mxu0 %v11204_v53  ;;  %8236 = vmatpush1.bf16.msra.mxu1 %v11207_v54 }
 0x3fc   :  { %7389 = vmatprep.subr.bf16.mxu0 %v11212_v55  ;;  %8237 = vmatprep.subr.bf16.mxu1 %v11215_v56 }
 0x3ff   :  { %7390 = vmatpush1.bf16.msra.mxu0 %v11210_v59  ;;  %8238 = vmatpush1.bf16.msra.mxu1 %v11213_v60 }
 0x402   :  { %7392 = vmatmul.mubr.bf16.vlgmr.msra.gmra.mrb[0].mxu0 %v8350_v61  ;;  %8240 = vmatmul.mubr.bf16.vlgmr.msra.gmra.mrb[0].mxu1 %v8350_v61 }
 0x403   :  { %7401 = vmatprep.mubr.bf16.mxu0 %v8383_v62  ;;  %8249 = vmatprep.mubr.bf16.mxu1 %v8383_v62 }
 0x40a   :  { %7402 = vmatmul.mubr.bf16.gmra.mrb[4].mxu0 %v8382_v63  ;;  %8250 = vmatmul.mubr.bf16.gmra.mrb[4].mxu1 %v8382_v63 }
 0x4d5   :  { %v7393_v9 = vpop.f32.mrb[0].mxu0  ;;  %v8241_v10 = vpop.f32.mrb[0].mxu1 }
 0x4d6   :  { %v9424_v13 = vadd.f32 %v7393_v9, %v1107_v1  ;;  %v9432_v14 = vadd.f32 %v8241_v10, %v1115_v8  ;;  %v7395_v15 = vpop.f32.mrb[1].mxu0  ;;  %v8243_v16 = vpop.f32.mrb[1].mxu1 }
 0x4d7   :  { %v9425_v19 = vadd.f32 %v7395_v15, %v1111_v11  ;;  %v9433_v17 = vadd.f32 %v8243_v16, %v1119_v12  ;;  %v7397_v18 = vpop.f32.mrb[2].mxu0  ;;  %v8245_v20 = vpop.f32.mrb[2].mxu1 }
 0x4d8   :  { %v9426_v21 = vadd.f32 %v7397_v18, %v1107_v1  ;;  %v9434_v22 = vadd.f32 %v8245_v20, %v1115_v8  ;;  %v7399_v23 = vpop.f32.mrb[3].mxu0  ;;  %v8247_v24 = vpop.f32.mrb[3].mxu1 }
 0x4d9   :  { %v9416_v26 = vpack.c.bf16 %v9425_v19, %v9424_v13  ;;  %v9417_v25 = vpack.c.bf16 %v9433_v17, %v9432_v14  ;;  %v9427_v27 = vadd.f32 %v7399_v23, %v1111_v11  ;;  %v9435_v28 = vadd.f32 %v8247_v24, %v1119_v12 }
 0x4db   :  { %8308 = vst [vmem:[%s14650_s3] sm:$0xff] %v9416_v26  ;;  %8309 = vst [vmem:[%s14650_s3 + $0x8] sm:$0xff] %v9417_v25  ;;  %v9418_v29 = vpack.c.bf16 %v9427_v27, %v9426_v21  ;;  %v9419_v30 = vpack.c.bf16 %v9435_v28, %v9434_v22 }
 0x4dd   :  { %8310 = vst [vmem:[%s14650_s3 + $0x10] sm:$0xff] %v9418_v29  ;;  %8311 = vst [vmem:[%s14650_s3 + $0x18] sm:$0xff] %v9419_v30  ;;  %v7403_v31 = vpop.f32.mrb[4].mxu0  ;;  %v8251_v32 = vpop.f32.mrb[4].mxu1 }
 0x4de   :  { %v9428_v34 = vadd.f32 %v7403_v31, %v1107_v1  ;;  %v9436_v36 = vadd.f32 %v8251_v32, %v1115_v8  ;;  %v7405_v33 = vpop.f32.mrb[5].mxu0  ;;  %v8253_v35 = vpop.f32.mrb[5].mxu1 }
 0x4df   :  { %v9429_v37 = vadd.f32 %v7405_v33, %v1111_v11  ;;  %v9437_v38 = vadd.f32 %v8253_v35, %v1119_v12  ;;  %v7407_v39 = vpop.f32.mrb[6].mxu0  ;;  %v8255_v40 = vpop.f32.mrb[6].mxu1 }
 0x4e0   :  { %v9430_v42 = vadd.f32 %v7407_v39, %v1107_v1  ;;  %v9438_v44 = vadd.f32 %v8255_v40, %v1115_v8  ;;  %v7409_v41 = vpop.f32.mrb[7].mxu0  ;;  %v8257_v43 = vpop.f32.mrb[7].mxu1 }
 0x4e1   :  { %v9420_v45 = vpack.c.bf16 %v9429_v37, %v9428_v34  ;;  %v9421_v46 = vpack.c.bf16 %v9437_v38, %v9436_v36  ;;  %v9431_v47 = vadd.f32 %v7409_v41, %v1111_v11  ;;  %v9439_v48 = vadd.f32 %v8257_v43, %v1119_v12 }
 0x4e3   :  { %8312 = vst [vmem:[%s14650_s3 + $0x20] sm:$0xff] %v9420_v45  ;;  %8313 = vst [vmem:[%s14650_s3 + $0x28] sm:$0xff] %v9421_v46  ;;  %v9422_v51 = vpack.c.bf16 %v9431_v47, %v9430_v42  ;;  %v9423_v52 = vpack.c.bf16 %v9439_v48, %v9438_v44 }
 0x4e5   :  { %8314 = vst [vmem:[%s14650_s3 + $0x30] sm:$0xff] %v9422_v51  ;;  %8315 = vst [vmem:[%s14650_s3 + $0x38] sm:$0xff] %v9423_v52 }

// kernel: discriminator_forward.15
= control target key start
LH: loop header
LB: loop body
LE: loop exit
PB: predicated region body
PF: predicated region fallthrough
CT: control target
= control target key end

     0   :  { %s7763_s12 = smov 0   ;;  %s9403_s0 = inlined_call_operand.vmem [shape: bf16[2,4,8192], index: 0, kind: input, shape index: {}]   ;;  %s9404_s1 = inlined_call_operand.vmem [shape: bf16[8192,128], index: 1, kind: input, shape index: {}]   ;;  %s9405_s2 = inlined_call_operand.vmem [shape: f32[1,128], index: 2, kind: input, shape index: {}]   ;;  %s9406_s3 = inlined_call_operand.vmem [shape: f32[2,1,128], index: 3, kind: output, shape index: {}]  }
   0x1 LB: > { %s5971_s13 = sadd.s32 4294967295, %s7740_s12   ;;  %p5975_p0 = scmp.ge.s32.totalorder %s7740_s12, 1  ;;  %s7740_s12 = sphi %s7763_s12, %s13_s12  }
   0x2   : > { %p137_p1 = scmp.lt.s32.totalorder %s7740_s12, 3 }
   0x4   : > { %p138_p2 = pnand %p5975_p0, %p137_p1 }
   0x5   : > { %v7206_v0 = vld [vmem:[%s9404_s1 + $0x40] sm:$0xff] (!%p138_p2)   ;;  %v7210_v4 = vld [vmem:[%s9404_s1 + $0x48] sm:$0xff] (!%p138_p2)   ;;  %v7214_v8 = vld [vmem:[%s9404_s1 + $0x50] sm:$0xff] (!%p138_p2)   ;;  %p159_p3 = scmp.lt.s32.totalorder (!%p138_p2), %s5971_s13, 1  ;;  %v1228_v28 = vlaneseq (!%p138_p2)  ;;  %v7742_v36 = vmov (!%p138_p2), 1983009808  }
   0x6   : > { %141 = sbr.rel (%p138_p2) target bundleno = 756 (0x2f4), region = 32  ;;  %v7207_v1 = vld [vmem:[%s9404_s1 + $0xc0] sm:$0xff] (!%p138_p2)   ;;  %6493 = vmatprep.subr.bf16.mxu0 (!%p138_p2), %v7206_v0  ;;  %v7211_v5 = vld [vmem:[%s9404_s1 + $0xc8] sm:$0xff] (!%p138_p2)   ;;  %v7215_v9 = vld [vmem:[%s9404_s1 + $0xd0] sm:$0xff] (!%p138_p2)   ;;  %v1226_v37 = vunpack.c.l.s4 (!%p138_p2), %v7742_v36  ;;  %vm5912_vm0 = vcmask (!%p138_p2), 1043456  }
   0x7   : > { %v7208_v2 = vld [vmem:[%s9404_s1] sm:$0xff] (!%p138_p2)   ;;  %6515 = vmatprep.subr.bf16.mxu1 (!%p138_p2), %v7207_v1  ;;  %v7212_v6 = vld [vmem:[%s9404_s1 + $0x8] sm:$0xff] (!%p138_p2)   ;;  %v7216_v10 = vld [vmem:[%s9404_s1 + $0x10] sm:$0xff] (!%p138_p2)   ;;  %v1229_v33 = vshrl.u32 (!%p138_p2), %v1228_v28, 7 }
   0x8   : > { %v7209_v3 = vld [vmem:[%s9404_s1 + $0x80] sm:$0xff] (!%p138_p2)   ;;  %6494 = vmatpush3.bf16.msra.mxu0 (!%p138_p2), %v7208_v2  ;;  %v7213_v7 = vld [vmem:[%s9404_s1 + $0x88] sm:$0xff] (!%p138_p2)   ;;  %v7217_v11 = vld [vmem:[%s9404_s1 + $0x90] sm:$0xff] (!%p138_p2)   ;;  %v1227_v39 = vunpack.c.0.s8 (!%p138_p2), %v1226_v37 }
   0x9   : > { %6516 = vmatpush3.bf16.msra.mxu1 (!%p138_p2), %v7209_v3  ;;  %6495 = vmatprep.subr.bf16.mxu0 (!%p138_p2), %v7210_v4  ;;  %v7218_v12 = vld [vmem:[%s9404_s1 + $0x58] sm:$0xff] (!%p138_p2)   ;;  %v7222_v16 = vld [vmem:[%s9404_s1 + $0x60] sm:$0xff] (!%p138_p2)   ;;  %v7226_v20 = vld [vmem:[%s9404_s1 + $0x68] sm:$0xff] (!%p138_p2)  }
   0xa   : > { %6517 = vmatprep.subr.bf16.mxu1 (!%p138_p2), %v7211_v5  ;;  %v7219_v13 = vld [vmem:[%s9404_s1 + $0xd8] sm:$0xff] (!%p138_p2)   ;;  %v7223_v17 = vld [vmem:[%s9404_s1 + $0xe0] sm:$0xff] (!%p138_p2)   ;;  %v7227_v21 = vld [vmem:[%s9404_s1 + $0xe8] sm:$0xff] (!%p138_p2)   ;;  %v7886_v41 = vsub.s32 (!%p138_p2), %v1227_v39, %v1229_v33 }
   0xb   : > { %v7220_v14 = vld [vmem:[%s9404_s1 + $0x18] sm:$0xff] (!%p138_p2)   ;;  %v7224_v18 = vld [vmem:[%s9404_s1 + $0x20] sm:$0xff] (!%p138_p2)   ;;  %v7228_v22 = vld [vmem:[%s9404_s1 + $0x28] sm:$0xff] (!%p138_p2)  }
   0xc   : > { %6496 = vmatpush3.bf16.msra.mxu0 (!%p138_p2), %v7212_v6  ;;  %v7221_v15 = vld [vmem:[%s9404_s1 + $0x98] sm:$0xff] (!%p138_p2)   ;;  %v7225_v19 = vld [vmem:[%s9404_s1 + $0xa0] sm:$0xff] (!%p138_p2)   ;;  %v7229_v23 = vld [vmem:[%s9404_s1 + $0xa8] sm:$0xff] (!%p138_p2)  }
   0xd   : > { %6518 = vmatpush3.bf16.msra.mxu1 %v7213_v7  ;;  %6497 = vmatprep.subr.bf16.mxu0 %v7214_v8  ;;  %s9408_s13 = smov (!%p159_p3, %s5971_s13), 1  ;;  %v7230_v24 = vld [vmem:[%s9404_s1 + $0x70] sm:$0xff]   ;;  %v7234_v29 = vld [vmem:[%s9404_s1 + $0x78] sm:$0xff]   ;;  %v7239_v35 = vld [vmem:[%s9404_s1 + $0x140] sm:$0xff]  }
   0xe   : > { %6519 = vmatprep.subr.bf16.mxu1 %v7215_v9  ;;  %v7231_v25 = vld [vmem:[%s9404_s1 + $0xf0] sm:$0xff]   ;;  %s6492_s18 = sshll.u32 %s9408_s13, 7  ;;  %v7235_v30 = vld [vmem:[%s9404_s1 + $0xf8] sm:$0xff]   ;;  %v7240_v38 = vld [vmem:[%s9404_s1 + $0x1c0] sm:$0xff]   ;;  %s166_s8 = scalar_lea.vmem %s9406_s3, %s9408_s13 }
   0xf   : > { %v7232_v26 = vld [vmem:[%s9404_s1 + $0x30] sm:$0xff]   ;;  %s7871_s27 = scalar_lea.vmem %s9403_s0, %s6492_s18  ;;  %v7236_v31 = vld [vmem:[%s9404_s1 + $0x38] sm:$0xff]   ;;  %v7241_v44 = vld [vmem:[%s9404_s1 + $0x100] sm:$0xff]  }
  0x10   : > { %6498 = vmatpush3.bf16.msra.mxu0 %v7216_v10  ;;  %v7233_v27 = vld [vmem:[%s9404_s1 + $0xb0] sm:$0xff]   ;;  %v7237_v32 = vld [vmem:[%s9404_s1 + $0xb8] sm:$0xff]   ;;  %v168_v34 = vld [vmem:[%s7871_s27] sm:$0xff] }
  0x11   : > { %6520 = vmatpush3.bf16.msra.mxu1 %v7217_v11  ;;  %6499 = vmatprep.subr.bf16.mxu0 %v7218_v12  ;;  %v1224_v40 = vcombine.high %v168_v34, %v168_v34  ;;  %v1231_v42 = vrot.slane %v168_v34, %v7886_v41  ;;  %v7242_v45 = vld [vmem:[%s9404_s1 + $0x180] sm:$0xff]   ;;  %v7243_v48 = vld [vmem:[%s9404_s1 + $0x148] sm:$0xff]   ;;  %v7247_v52 = vld [vmem:[%s9404_s1 + $0x150] sm:$0xff]  }
  0x12   : > { %6521 = vmatprep.subr.bf16.mxu1 %v7219_v13  ;;  %v7244_v49 = vld [vmem:[%s9404_s1 + $0x1c8] sm:$0xff]   ;;  %v7248_v53 = vld [vmem:[%s9404_s1 + $0x1d0] sm:$0xff]   ;;  %v7251_v56 = vld [vmem:[%s9404_s1 + $0x158] sm:$0xff]  }
  0x13   : > { %v1238_v43 = vrot.slane %v1224_v40, %v7886_v41  ;;  %v1239_v46 = vcombine.high %v1231_v42, %v1231_v42  ;;  %v7245_v50 = vld [vmem:[%s9404_s1 + $0x108] sm:$0xff]   ;;  %v7249_v54 = vld [vmem:[%s9404_s1 + $0x110] sm:$0xff]   ;;  %v7252_v57 = vld [vmem:[%s9404_s1 + $0x1d8] sm:$0xff]  }
  0x14   : > { %6500 = vmatpush3.bf16.msra.mxu0 %v7220_v14  ;;  %v7246_v51 = vld [vmem:[%s9404_s1 + $0x188] sm:$0xff]   ;;  %v7250_v55 = vld [vmem:[%s9404_s1 + $0x190] sm:$0xff]   ;;  %v7253_v58 = vld [vmem:[%s9404_s1 + $0x118] sm:$0xff]  }
  0x15   : > { %6522 = vmatpush3.bf16.msra.mxu1 %v7221_v15  ;;  %6501 = vmatprep.subr.bf16.mxu0 %v7222_v16  ;;  %v1240_v47 = vcombine.high %v1238_v43, %v1238_v43  ;;  %v7254_v59 = vld [vmem:[%s9404_s1 + $0x198] sm:$0xff]   ;;  %v7255_v60 = vld [vmem:[%s9404_s1 + $0x160] sm:$0xff]   ;;  %v7259_v0 = vld [vmem:[%s9404_s1 + $0x168] sm:$0xff]  }
  0x16   : > { %6523 = vmatprep.subr.bf16.mxu1 %v7223_v17  ;;  %4664 = vmatprep.mubr.bf16.mxu0 %v1239_v46  ;;  %v7256_v61 = vld [vmem:[%s9404_s1 + $0x1e0] sm:$0xff]   ;;  %v7260_v1 = vld [vmem:[%s9404_s1 + $0x1e8] sm:$0xff]   ;;  %v7263_v4 = vld [vmem:[%s9404_s1 + $0x170] sm:$0xff]  }
  0x17   : > { %4704 = vmatprep.mubr.bf16.mxu1 %v1240_v47  ;;  %v7257_v62 = vld [vmem:[%s9404_s1 + $0x120] sm:$0xff]   ;;  %v7261_v2 = vld [vmem:[%s9404_s1 + $0x128] sm:$0xff]   ;;  %v7264_v5 = vld [vmem:[%s9404_s1 + $0x1f0] sm:$0xff]  }
  0x18   : > { %6502 = vmatpush3.bf16.msra.mxu0 %v7224_v18  ;;  %v7258_v63 = vld [vmem:[%s9404_s1 + $0x1a0] sm:$0xff]   ;;  %v7262_v3 = vld [vmem:[%s9404_s1 + $0x1a8] sm:$0xff]   ;;  %v7265_v6 = vld [vmem:[%s9404_s1 + $0x130] sm:$0xff]  }
  0x19   : > { %6524 = vmatpush3.bf16.msra.mxu1 %v7225_v19  ;;  %6503 = vmatprep.subr.bf16.mxu0 %v7226_v20  ;;  %v7266_v7 = vld [vmem:[%s9404_s1 + $0x1b0] sm:$0xff]   ;;  %v169_v8 = vld [vmem:[%s7871_s27 + $0x8] sm:$0xff]  ;;  %v7267_v9 = vld [vmem:[%s9404_s1 + $0x178] sm:$0xff]  }
  0x1a   : > { %6525 = vmatprep.subr.bf16.mxu1 %v7227_v21  ;;  %v1248_v10 = vrot.slane %v169_v8, %v7886_v41  ;;  %v1241_v11 = vcombine.high %v169_v8, %v169_v8  ;;  %v7268_v12 = vld [vmem:[%s9404_s1 + $0x1f8] sm:$0xff]   ;;  %v7272_v18 = vld [vmem:[%s9404_s1 + $0x240] sm:$0xff]   ;;  %v7282_v28 = vld [vmem:[%s9404_s1 + $0x210] sm:$0xff]  }
  0x1b   : > { %v7269_v13 = vld [vmem:[%s9404_s1 + $0x138] sm:$0xff]   ;;  %v7273_v19 = vld [vmem:[%s9404_s1 + $0x2c0] sm:$0xff]   ;;  %v7293_v39 = vld [vmem:[%s9404_s1 + $0x2e8] sm:$0xff]  }
  0x1c   : > { %6504 = vmatpush3.bf16.msra.mxu0 %v7228_v22  ;;  %v1256_v14 = vcombine.high %v1248_v10, %v1248_v10  ;;  %v1255_v15 = vrot.slane %v1241_v11, %v7886_v41  ;;  %v7270_v16 = vld [vmem:[%s9404_s1 + $0x1b8] sm:$0xff]   ;;  %v7274_v20 = vld [vmem:[%s9404_s1 + $0x200] sm:$0xff]   ;;  %v7276_v22 = vld [vmem:[%s9404_s1 + $0x248] sm:$0xff]  }
  0x1d   : > { %6526 = vmatpush3.bf16.msra.mxu1 %v7229_v23  ;;  %6505 = vmatprep.subr.bf16.mxu0 %v7230_v24  ;;  %v7275_v21 = vld [vmem:[%s9404_s1 + $0x280] sm:$0xff]   ;;  %v7277_v23 = vld [vmem:[%s9404_s1 + $0x2c8] sm:$0xff]   ;;  %v7287_v33 = vld [vmem:[%s9404_s1 + $0x298] sm:$0xff]  }
  0x1e   : > { %6527 = vmatprep.subr.bf16.mxu1 %v7231_v25  ;;  %v1257_v17 = vcombine.high %v1255_v15, %v1255_v15  ;;  %v7278_v24 = vld [vmem:[%s9404_s1 + $0x208] sm:$0xff]   ;;  %v7288_v34 = vld [vmem:[%s9404_s1 + $0x260] sm:$0xff]   ;;  %v7299_v46 = vld [vmem:[%s9404_s1 + $0x2b0] sm:$0xff]  }
  0x1f   : > { %v7279_v25 = vld [vmem:[%s9404_s1 + $0x288] sm:$0xff]   ;;  %v7290_v36 = vld [vmem:[%s9404_s1 + $0x220] sm:$0xff]   ;;  %v170_v47 = vld [vmem:[%s7871_s27 + $0x10] sm:$0xff] }
  0x20   : > { %6506 = vmatpush3.bf16.msra.mxu0 %v7232_v26  ;;  %v7280_v26 = vld [vmem:[%s9404_s1 + $0x250] sm:$0xff]   ;;  %v7291_v37 = vld [vmem:[%s9404_s1 + $0x2a0] sm:$0xff]   ;;  %v7294_v40 = vld [vmem:[%s9404_s1 + $0x228] sm:$0xff]  }
  0x21   : > { %6528 = vmatpush3.bf16.msra.mxu1 %v7233_v27  ;;  %6507 = vmatprep.subr.bf16.mxu0 %v7234_v29  ;;  %v7281_v27 = vld [vmem:[%s9404_s1 + $0x2d0] sm:$0xff]   ;;  %v7320_v8 = vld [vmem:[%s9404_s1 + $0x398] sm:$0xff]   ;;  %v7323_v11 = vld [vmem:[%s9404_s1 + $0x320] sm:$0xff]  }
  0x22   : > { %6529 = vmatprep.subr.bf16.mxu1 %v7235_v30  ;;  %v7283_v29 = vld [vmem:[%s9404_s1 + $0x290] sm:$0xff]   ;;  %v7284_v30 = vld [vmem:[%s9404_s1 + $0x258] sm:$0xff]  }
  0x24   : > { %6508 = vmatpush3.bf16.msra.mxu0 %v7236_v31  ;;  %v7285_v31 = vld [vmem:[%s9404_s1 + $0x2d8] sm:$0xff]  }
  0x25   : > { %6530 = vmatpush3.bf16.msra.mxu1 %v7237_v32  ;;  %6537 = vmatprep.subr.bf16.mxu0 %v7239_v35  ;;  %v7286_v32 = vld [vmem:[%s9404_s1 + $0x218] sm:$0xff]   ;;  %v7289_v35 = vld [vmem:[%s9404_s1 + $0x2e0] sm:$0xff]  }
  0x26   : > { %6559 = vmatprep.subr.bf16.mxu1 %v7240_v38  ;;  %v7292_v38 = vld [vmem:[%s9404_s1 + $0x268] sm:$0xff]  }
  0x27   : > { %4665 = vmatmul.mubr.bf16.vlgmr.msra.gmra.mrb[0].mxu0 %v1231_v42  ;;  %v7295_v42 = vld [vmem:[%s9404_s1 + $0x2a8] sm:$0xff]  }
  0x28   : > { %4705 = vmatmul.mubr.bf16.vlgmr.msra.gmra.mrb[0].mxu1 %v1238_v43  ;;  %6538 = vmatpush3.bf16.msra.mxu0 %v7241_v44  ;;  %v7296_v43 = vld [vmem:[%s9404_s1 + $0x270] sm:$0xff]  }
  0x29   : > { %6560 = vmatpush3.bf16.msra.mxu1 %v7242_v45  ;;  %6539 = vmatprep.subr.bf16.mxu0 %v7243_v48  ;;  %v7297_v44 = vld [vmem:[%s9404_s1 + $0x2f0] sm:$0xff]   ;;  %v7300_v48 = vld [vmem:[%s9404_s1 + $0x278] sm:$0xff]  }
  0x2a   : > { %6561 = vmatprep.subr.bf16.mxu1 %v7244_v49  ;;  %4744 = vmatprep.mubr.bf16.mxu0 %v1256_v14  ;;  %v7298_v45 = vld [vmem:[%s9404_s1 + $0x230] sm:$0xff]   ;;  %v1265_v49 = vrot.slane %v170_v47, %v7886_v41  ;;  %v7326_v14 = vld [vmem:[%s9404_s1 + $0x3e8] sm:$0xff]  }
  0x2b   : > { %4784 = vmatprep.mubr.bf16.mxu1 %v1257_v17  ;;  %v7329_v17 = vld [vmem:[%s9404_s1 + $0x370] sm:$0xff]  }
  0x2c   : > { %6540 = vmatpush3.bf16.msra.mxu0 %v7245_v50  ;;  %v1258_v50 = vcombine.high %v170_v47, %v170_v47  ;;  %v7353_v47 = vld [vmem:[%s9404_s1 + $0x498] sm:$0xff]  }
  0x2d   : > { %6562 = vmatpush3.bf16.msra.mxu1 %v7246_v51  ;;  %6541 = vmatprep.subr.bf16.mxu0 %v7247_v52  ;;  %v7301_v51 = vld [vmem:[%s9404_s1 + $0x2f8] sm:$0xff]  }
  0x2e   : > { %6563 = vmatprep.subr.bf16.mxu1 %v7248_v53  ;;  %v7302_v52 = vld [vmem:[%s9404_s1 + $0x238] sm:$0xff]   ;;  %v1273_v53 = vcombine.high %v1265_v49, %v1265_v49 }
  0x30   : > { %6542 = vmatpush3.bf16.msra.mxu0 %v7249_v54  ;;  %v1272_v54 = vrot.slane %v1258_v50, %v7886_v41  ;;  %v7356_v50 = vld [vmem:[%s9404_s1 + $0x420] sm:$0xff]  }
  0x31   : > { %6564 = vmatpush3.bf16.msra.mxu1 %v7250_v55  ;;  %6543 = vmatprep.subr.bf16.mxu0 %v7251_v56  ;;  %v7303_v55 = vld [vmem:[%s9404_s1 + $0x2b8] sm:$0xff]  }
  0x32   : > { %6565 = vmatprep.subr.bf16.mxu1 %v7252_v57  ;;  %v1274_v56 = vcombine.high %v1272_v54, %v1272_v54  ;;  %v7305_v57 = vld [vmem:[%s9404_s1 + $0x340] sm:$0xff]  }
  0x34   : > { %6544 = vmatpush3.bf16.msra.mxu0 %v7253_v58  ;;  %v7306_v58 = vld [vmem:[%s9404_s1 + $0x3c0] sm:$0xff]  }
  0x35   : > { %6566 = vmatpush3.bf16.msra.mxu1 %v7254_v59  ;;  %6545 = vmatprep.subr.bf16.mxu0 %v7255_v60  ;;  %v7307_v59 = vld [vmem:[%s9404_s1 + $0x300] sm:$0xff]  }
  0x36   : > { %6567 = vmatprep.subr.bf16.mxu1 %v7256_v61  ;;  %v7308_v60 = vld [vmem:[%s9404_s1 + $0x380] sm:$0xff]   ;;  %v7309_v61 = vld [vmem:[%s9404_s1 + $0x348] sm:$0xff]  }
  0x38   : > { %6546 = vmatpush3.bf16.msra.mxu0 %v7257_v62  ;;  %v7310_v62 = vld [vmem:[%s9404_s1 + $0x3c8] sm:$0xff]  }
  0x39   : > { %6568 = vmatpush3.bf16.msra.mxu1 %v7258_v63  ;;  %6547 = vmatprep.subr.bf16.mxu0 %v7259_v0  ;;  %v7311_v63 = vld [vmem:[%s9404_s1 + $0x308] sm:$0xff]  }
  0x3a   : > { %6569 = vmatprep.subr.bf16.mxu1 %v7260_v1  ;;  %v7312_v0 = vld [vmem:[%s9404_s1 + $0x388] sm:$0xff]   ;;  %v7313_v1 = vld [vmem:[%s9404_s1 + $0x350] sm:$0xff]  }
  0x3c   : > { %6548 = vmatpush3.bf16.msra.mxu0 %v7261_v2  ;;  %v7314_v2 = vld [vmem:[%s9404_s1 + $0x3d0] sm:$0xff]  }
  0x3d   : > { %6570 = vmatpush3.bf16.msra.mxu1 %v7262_v3  ;;  %6549 = vmatprep.subr.bf16.mxu0 %v7263_v4  ;;  %v7315_v3 = vld [vmem:[%s9404_s1 + $0x310] sm:$0xff]  }
  0x3e   : > { %6571 = vmatprep.subr.bf16.mxu1 %v7264_v5  ;;  %v7316_v4 = vld [vmem:[%s9404_s1 + $0x390] sm:$0xff]   ;;  %v7317_v5 = vld [vmem:[%s9404_s1 + $0x358] sm:$0xff]  }
  0x40   : > { %6550 = vmatpush3.bf16.msra.mxu0 %v7265_v6  ;;  %v7318_v6 = vld [vmem:[%s9404_s1 + $0x3d8] sm:$0xff]  }
  0x41   : > { %6572 = vmatpush3.bf16.msra.mxu1 %v7266_v7  ;;  %6551 = vmatprep.subr.bf16.mxu0 %v7267_v9  ;;  %v7319_v7 = vld [vmem:[%s9404_s1 + $0x318] sm:$0xff]   ;;  %v7321_v9 = vld [vmem:[%s9404_s1 + $0x360] sm:$0xff]  }
  0x42   : > { %6573 = vmatprep.subr.bf16.mxu1 %v7268_v12  ;;  %v7324_v12 = vld [vmem:[%s9404_s1 + $0x3a0] sm:$0xff]  }
  0x44   : > { %6552 = vmatpush3.bf16.msra.mxu0 %v7269_v13  ;;  %v7325_v13 = vld [vmem:[%s9404_s1 + $0x368] sm:$0xff]  }
  0x45   : > { %6574 = vmatpush3.bf16.msra.mxu1 %v7270_v16  ;;  %6581 = vmatprep.subr.bf16.mxu0 %v7272_v18  ;;  %v7328_v16 = vld [vmem:[%s9404_s1 + $0x3a8] sm:$0xff]   ;;  %v7330_v18 = vld [vmem:[%s9404_s1 + $0x3f0] sm:$0xff]  }
  0x46   : > { %6603 = vmatprep.subr.bf16.mxu1 %v7273_v19  ;;  %v7331_v19 = vld [vmem:[%s9404_s1 + $0x330] sm:$0xff]  }
  0x47   : > { %4745 = vmatmul.mubr.bf16.vlgmr.msra.gmra.mrb[4].mxu0 %v1248_v10  ;;  %v7322_v10 = vld [vmem:[%s9404_s1 + $0x3e0] sm:$0xff]  }
  0x48   : > { %4785 = vmatmul.mubr.bf16.vlgmr.msra.gmra.mrb[4].mxu1 %v1255_v15  ;;  %6582 = vmatpush3.bf16.msra.mxu0 %v7274_v20  ;;  %v7327_v15 = vld [vmem:[%s9404_s1 + $0x328] sm:$0xff]   ;;  %v7332_v20 = vld [vmem:[%s9404_s1 + $0x3b0] sm:$0xff]  }
  0x49   : > { %6604 = vmatpush3.bf16.msra.mxu1 %v7275_v21  ;;  %6583 = vmatprep.subr.bf16.mxu0 %v7276_v22  ;;  %v7333_v21 = vld [vmem:[%s9404_s1 + $0x378] sm:$0xff]  }
  0x4a   : > { %6605 = vmatprep.subr.bf16.mxu1 %v7277_v23  ;;  %4824 = vmatprep.mubr.bf16.mxu0 %v1273_v53  ;;  %v171_v22 = vld [vmem:[%s7871_s27 + $0x18] sm:$0xff]  ;;  %v7359_v53 = vld [vmem:[%s9404_s1 + $0x4e8] sm:$0xff]  }
  0x4b   : > { %4864 = vmatprep.mubr.bf16.mxu1 %v1274_v56  ;;  %v7334_v23 = vld [vmem:[%s9404_s1 + $0x3f8] sm:$0xff]   ;;  %v7362_v56 = vld [vmem:[%s9404_s1 + $0x470] sm:$0xff]  }
  0x4c   : > { %6584 = vmatpush3.bf16.msra.mxu0 %v7278_v24  ;;  %v1282_v24 = vrot.slane %v171_v22, %v7886_v41 }
  0x4d   : > { %6606 = vmatpush3.bf16.msra.mxu1 %v7279_v25  ;;  %6585 = vmatprep.subr.bf16.mxu0 %v7280_v26  ;;  %v1275_v25 = vcombine.high %v171_v22, %v171_v22  ;;  %v7335_v26 = vld [vmem:[%s9404_s1 + $0x338] sm:$0xff]   ;;  %v7387_v22 = vld [vmem:[%s9404_s1 + $0x560] sm:$0xff]  }
  0x4e   : > { %6607 = vmatprep.subr.bf16.mxu1 %v7281_v27  ;;  %v7336_v27 = vld [vmem:[%s9404_s1 + $0x3b8] sm:$0xff]  }
  0x50   : > { %6586 = vmatpush3.bf16.msra.mxu0 %v7282_v28  ;;  %v1290_v28 = vcombine.high %v1282_v24, %v1282_v24 }
  0x51   : > { %6608 = vmatpush3.bf16.msra.mxu1 %v7283_v29  ;;  %6587 = vmatprep.subr.bf16.mxu0 %v7284_v30  ;;  %v1289_v29 = vrot.slane %v1275_v25, %v7886_v41  ;;  %v7338_v30 = vld [vmem:[%s9404_s1 + $0x440] sm:$0xff]  }
  0x52   : > { %6609 = vmatprep.subr.bf16.mxu1 %v7285_v31  ;;  %v7390_v25 = vld [vmem:[%s9404_s1 + $0x5a0] sm:$0xff]  }
  0x53   : > { %v1291_v31 = vcombine.high %v1289_v29, %v1289_v29 }
  0x54   : > { %6588 = vmatpush3.bf16.msra.mxu0 %v7286_v32  ;;  %v7339_v32 = vld [vmem:[%s9404_s1 + $0x4c0] sm:$0xff]  }
  0x55   : > { %6610 = vmatpush3.bf16.msra.mxu1 %v7287_v33  ;;  %6589 = vmatprep.subr.bf16.mxu0 %v7288_v34  ;;  %v7340_v33 = vld [vmem:[%s9404_s1 + $0x400] sm:$0xff]  }
  0x56   : > { %6611 = vmatprep.subr.bf16.mxu1 %v7289_v35  ;;  %v7341_v34 = vld [vmem:[%s9404_s1 + $0x480] sm:$0xff]   ;;  %v7342_v35 = vld [vmem:[%s9404_s1 + $0x448] sm:$0xff]  }
  0x58   : > { %6590 = vmatpush3.bf16.msra.mxu0 %v7290_v36  ;;  %v7343_v36 = vld [vmem:[%s9404_s1 + $0x4c8] sm:$0xff]  }
  0x59   : > { %6612 = vmatpush3.bf16.msra.mxu1 %v7291_v37  ;;  %6591 = vmatprep.subr.bf16.mxu0 %v7292_v38  ;;  %v7344_v37 = vld [vmem:[%s9404_s1 + $0x408] sm:$0xff]  }
  0x5a   : > { %6613 = vmatprep.subr.bf16.mxu1 %v7293_v39  ;;  %v7345_v38 = vld [vmem:[%s9404_s1 + $0x488] sm:$0xff]   ;;  %v7346_v39 = vld [vmem:[%s9404_s1 + $0x450] sm:$0xff]  }
  0x5c   : > { %6592 = vmatpush3.bf16.msra.mxu0 %v7294_v40  ;;  %v7347_v40 = vld [vmem:[%s9404_s1 + $0x4d0] sm:$0xff]  }
  0x5d   : > { %6614 = vmatpush3.bf16.msra.mxu1 %v7295_v42  ;;  %6593 = vmatprep.subr.bf16.mxu0 %v7296_v43  ;;  %v7348_v42 = vld [vmem:[%s9404_s1 + $0x410] sm:$0xff]  }
  0x5e   : > { %6615 = vmatprep.subr.bf16.mxu1 %v7297_v44  ;;  %v7349_v43 = vld [vmem:[%s9404_s1 + $0x490] sm:$0xff]   ;;  %v7350_v44 = vld [vmem:[%s9404_s1 + $0x458] sm:$0xff]  }
  0x60   : > { %6594 = vmatpush3.bf16.msra.mxu0 %v7298_v45  ;;  %v7351_v45 = vld [vmem:[%s9404_s1 + $0x4d8] sm:$0xff]  }
  0x61   : > { %6616 = vmatpush3.bf16.msra.mxu1 %v7299_v46  ;;  %6595 = vmatprep.subr.bf16.mxu0 %v7300_v48  ;;  %v7352_v46 = vld [vmem:[%s9404_s1 + $0x418] sm:$0xff]   ;;  %v7354_v48 = vld [vmem:[%s9404_s1 + $0x460] sm:$0xff]  }
  0x62   : > { %6617 = vmatprep.subr.bf16.mxu1 %v7301_v51  ;;  %v7357_v51 = vld [vmem:[%s9404_s1 + $0x4a0] sm:$0xff]  }
  0x64   : > { %6596 = vmatpush3.bf16.msra.mxu0 %v7302_v52  ;;  %v7358_v52 = vld [vmem:[%s9404_s1 + $0x468] sm:$0xff]  }
  0x65   : > { %6618 = vmatpush3.bf16.msra.mxu1 %v7303_v55  ;;  %6625 = vmatprep.subr.bf16.mxu0 %v7305_v57  ;;  %v7361_v55 = vld [vmem:[%s9404_s1 + $0x4a8] sm:$0xff]   ;;  %v7363_v57 = vld [vmem:[%s9404_s1 + $0x4f0] sm:$0xff]  }
  0x66   : > { %6647 = vmatprep.subr.bf16.mxu1 %v7306_v58  ;;  %v7364_v58 = vld [vmem:[%s9404_s1 + $0x430] sm:$0xff]  }
  0x67   : > { %4825 = vmatmul.mubr.bf16.vlgmr.msra.gmra.mrb[8].mxu0 %v1265_v49  ;;  %v7355_v49 = vld [vmem:[%s9404_s1 + $0x4e0] sm:$0xff]  }
  0x68   : > { %4865 = vmatmul.mubr.bf16.vlgmr.msra.gmra.mrb[8].mxu1 %v1272_v54  ;;  %6626 = vmatpush3.bf16.msra.mxu0 %v7307_v59  ;;  %v7360_v54 = vld [vmem:[%s9404_s1 + $0x428] sm:$0xff]   ;;  %v7365_v59 = vld [vmem:[%s9404_s1 + $0x4b0] sm:$0xff]  }
  0x69   : > { %6648 = vmatpush3.bf16.msra.mxu1 %v7308_v60  ;;  %6627 = vmatprep.subr.bf16.mxu0 %v7309_v61  ;;  %v7366_v60 = vld [vmem:[%s9404_s1 + $0x478] sm:$0xff]   ;;  %v172_v61 = vld [vmem:[%s7871_s27 + $0x20] sm:$0xff] }
  0x6a   : > { %6649 = vmatprep.subr.bf16.mxu1 %v7310_v62  ;;  %4904 = vmatprep.mubr.bf16.mxu0 %v1290_v28  ;;  %v7367_v62 = vld [vmem:[%s9404_s1 + $0x4f8] sm:$0xff]   ;;  %v7393_v28 = vld [vmem:[%s9404_s1 + $0x528] sm:$0xff]  }
  0x6b   : > { %4944 = vmatprep.mubr.bf16.mxu1 %v1291_v31  ;;  %v7396_v31 = vld [vmem:[%s9404_s1 + $0x5f0] sm:$0xff]  }
  0x6c   : > { %6628 = vmatpush3.bf16.msra.mxu0 %v7311_v63  ;;  %v1299_v63 = vrot.slane %v172_v61, %v7886_v41 }
  0x6d   : > { %6650 = vmatpush3.bf16.msra.mxu1 %v7312_v0  ;;  %6629 = vmatprep.subr.bf16.mxu0 %v7313_v1  ;;  %v1292_v0 = vcombine.high %v172_v61, %v172_v61  ;;  %v7368_v1 = vld [vmem:[%s9404_s1 + $0x438] sm:$0xff]   ;;  %v7420_v61 = vld [vmem:[%s9404_s1 + $0x660] sm:$0xff]  }
  0x6e   : > { %6651 = vmatprep.subr.bf16.mxu1 %v7314_v2  ;;  %v7369_v2 = vld [vmem:[%s9404_s1 + $0x4b8] sm:$0xff]  }
  0x70   : > { %6630 = vmatpush3.bf16.msra.mxu0 %v7315_v3  ;;  %v1307_v3 = vcombine.high %v1299_v63, %v1299_v63 }
  0x71   : > { %6652 = vmatpush3.bf16.msra.mxu1 %v7316_v4  ;;  %6631 = vmatprep.subr.bf16.mxu0 %v7317_v5  ;;  %v1306_v4 = vrot.slane %v1292_v0, %v7886_v41  ;;  %v7371_v5 = vld [vmem:[%s9404_s1 + $0x540] sm:$0xff]  }
  0x72   : > { %6653 = vmatprep.subr.bf16.mxu1 %v7318_v6  ;;  %v7423_v0 = vld [vmem:[%s9404_s1 + $0x6a0] sm:$0xff]  }
  0x73   : > { %v1308_v6 = vcombine.high %v1306_v4, %v1306_v4 }
  0x74   : > { %6632 = vmatpush3.bf16.msra.mxu0 %v7319_v7  ;;  %v7372_v7 = vld [vmem:[%s9404_s1 + $0x5c0] sm:$0xff]  }
  0x75   : > { %6654 = vmatpush3.bf16.msra.mxu1 %v7320_v8  ;;  %6633 = vmatprep.subr.bf16.mxu0 %v7321_v9  ;;  %v7373_v8 = vld [vmem:[%s9404_s1 + $0x500] sm:$0xff]  }
  0x76   : > { %6655 = vmatprep.subr.bf16.mxu1 %v7322_v10  ;;  %v7374_v9 = vld [vmem:[%s9404_s1 + $0x580] sm:$0xff]   ;;  %v7375_v10 = vld [vmem:[%s9404_s1 + $0x548] sm:$0xff]  }
  0x78   : > { %6634 = vmatpush3.bf16.msra.mxu0 %v7323_v11  ;;  %v7376_v11 = vld [vmem:[%s9404_s1 + $0x5c8] sm:$0xff]  }
  0x79   : > { %6656 = vmatpush3.bf16.msra.mxu1 %v7324_v12  ;;  %6635 = vmatprep.subr.bf16.mxu0 %v7325_v13  ;;  %v7377_v12 = vld [vmem:[%s9404_s1 + $0x508] sm:$0xff]  }
  0x7a   : > { %6657 = vmatprep.subr.bf16.mxu1 %v7326_v14  ;;  %v7378_v13 = vld [vmem:[%s9404_s1 + $0x588] sm:$0xff]   ;;  %v7379_v14 = vld [vmem:[%s9404_s1 + $0x550] sm:$0xff]  }
  0x7c   : > { %6636 = vmatpush3.bf16.msra.mxu0 %v7327_v15  ;;  %v7380_v15 = vld [vmem:[%s9404_s1 + $0x5d0] sm:$0xff]  }
  0x7d   : > { %6658 = vmatpush3.bf16.msra.mxu1 %v7328_v16  ;;  %6637 = vmatprep.subr.bf16.mxu0 %v7329_v17  ;;  %v7381_v16 = vld [vmem:[%s9404_s1 + $0x510] sm:$0xff]  }
  0x7e   : > { %6659 = vmatprep.subr.bf16.mxu1 %v7330_v18  ;;  %v7382_v17 = vld [vmem:[%s9404_s1 + $0x590] sm:$0xff]   ;;  %v7383_v18 = vld [vmem:[%s9404_s1 + $0x558] sm:$0xff]  }
  0x80   : > { %6638 = vmatpush3.bf16.msra.mxu0 %v7331_v19  ;;  %v7384_v19 = vld [vmem:[%s9404_s1 + $0x5d8] sm:$0xff]  }
  0x81   : > { %6660 = vmatpush3.bf16.msra.mxu1 %v7332_v20  ;;  %6639 = vmatprep.subr.bf16.mxu0 %v7333_v21  ;;  %v7385_v20 = vld [vmem:[%s9404_s1 + $0x518] sm:$0xff]  }
  0x82   : > { %6661 = vmatprep.subr.bf16.mxu1 %v7334_v23  ;;  %v7386_v21 = vld [vmem:[%s9404_s1 + $0x598] sm:$0xff]   ;;  %v7388_v23 = vld [vmem:[%s9404_s1 + $0x5e0] sm:$0xff]  }
  0x84   : > { %6640 = vmatpush3.bf16.msra.mxu0 %v7335_v26  ;;  %v7391_v26 = vld [vmem:[%s9404_s1 + $0x568] sm:$0xff]  }
  0x85   : > { %6662 = vmatpush3.bf16.msra.mxu1 %v7336_v27  ;;  %6669 = vmatprep.subr.bf16.mxu0 %v7338_v30  ;;  %v7392_v27 = vld [vmem:[%s9404_s1 + $0x5e8] sm:$0xff]   ;;  %v7395_v30 = vld [vmem:[%s9404_s1 + $0x570] sm:$0xff]  }
  0x86   : > { %6691 = vmatprep.subr.bf16.mxu1 %v7339_v32  ;;  %v7397_v32 = vld [vmem:[%s9404_s1 + $0x530] sm:$0xff]  }
  0x87   : > { %4905 = vmatmul.mubr.bf16.vlgmr.msra.gmra.mrb[12].mxu0 %v1282_v24  ;;  %v7389_v24 = vld [vmem:[%s9404_s1 + $0x520] sm:$0xff]  }
  0x88   : > { %4945 = vmatmul.mubr.bf16.vlgmr.msra.gmra.mrb[12].mxu1 %v1289_v29  ;;  %6670 = vmatpush3.bf16.msra.mxu0 %v7340_v33  ;;  %v7394_v29 = vld [vmem:[%s9404_s1 + $0x5a8] sm:$0xff]   ;;  %v7398_v33 = vld [vmem:[%s9404_s1 + $0x5b0] sm:$0xff]  }
  0x89   : > { %6692 = vmatpush3.bf16.msra.mxu1 %v7341_v34  ;;  %6671 = vmatprep.subr.bf16.mxu0 %v7342_v35  ;;  %v7399_v34 = vld [vmem:[%s9404_s1 + $0x578] sm:$0xff]   ;;  %v173_v35 = vld [vmem:[%s7871_s27 + $0x28] sm:$0xff] }
  0x8a   : > { %6693 = vmatprep.subr.bf16.mxu1 %v7343_v36  ;;  %4984 = vmatprep.mubr.bf16.mxu0 %v1307_v3  ;;  %v7400_v36 = vld [vmem:[%s9404_s1 + $0x5f8] sm:$0xff]   ;;  %v7426_v3 = vld [vmem:[%s9404_s1 + $0x628] sm:$0xff]  }
  0x8b   : > { %5024 = vmatprep.mubr.bf16.mxu1 %v1308_v6  ;;  %v7429_v6 = vld [vmem:[%s9404_s1 + $0x6f0] sm:$0xff]  }
  0x8c   : > { %6672 = vmatpush3.bf16.msra.mxu0 %v7344_v37  ;;  %v1316_v37 = vrot.slane %v173_v35, %v7886_v41 }
  0x8d   : > { %6694 = vmatpush3.bf16.msra.mxu1 %v7345_v38  ;;  %6673 = vmatprep.subr.bf16.mxu0 %v7346_v39  ;;  %v1309_v38 = vcombine.high %v173_v35, %v173_v35  ;;  %v7401_v39 = vld [vmem:[%s9404_s1 + $0x538] sm:$0xff]   ;;  %v7453_v35 = vld [vmem:[%s9404_s1 + $0x760] sm:$0xff]  }
  0x8e   : > { %6695 = vmatprep.subr.bf16.mxu1 %v7347_v40  ;;  %v7402_v40 = vld [vmem:[%s9404_s1 + $0x5b8] sm:$0xff]  }
  0x90   : > { %6674 = vmatpush3.bf16.msra.mxu0 %v7348_v42  ;;  %v1324_v42 = vcombine.high %v1316_v37, %v1316_v37 }
  0x91   : > { %6696 = vmatpush3.bf16.msra.mxu1 %v7349_v43  ;;  %6675 = vmatprep.subr.bf16.mxu0 %v7350_v44  ;;  %v1323_v43 = vrot.slane %v1309_v38, %v7886_v41  ;;  %v7404_v44 = vld [vmem:[%s9404_s1 + $0x640] sm:$0xff]  }
  0x92   : > { %6697 = vmatprep.subr.bf16.mxu1 %v7351_v45  ;;  %v7456_v38 = vld [vmem:[%s9404_s1 + $0x7a0] sm:$0xff]  }
  0x93   : > { %v1325_v45 = vcombine.high %v1323_v43, %v1323_v43 }
  0x94   : > { %6676 = vmatpush3.bf16.msra.mxu0 %v7352_v46  ;;  %v7405_v46 = vld [vmem:[%s9404_s1 + $0x6c0] sm:$0xff]  }
  0x95   : > { %6698 = vmatpush3.bf16.msra.mxu1 %v7353_v47  ;;  %6677 = vmatprep.subr.bf16.mxu0 %v7354_v48  ;;  %v7406_v47 = vld [vmem:[%s9404_s1 + $0x600] sm:$0xff]  }
  0x96   : > { %6699 = vmatprep.subr.bf16.mxu1 %v7355_v49  ;;  %v7407_v48 = vld [vmem:[%s9404_s1 + $0x680] sm:$0xff]   ;;  %v7408_v49 = vld [vmem:[%s9404_s1 + $0x648] sm:$0xff]  }
  0x98   : > { %6678 = vmatpush3.bf16.msra.mxu0 %v7356_v50  ;;  %v7409_v50 = vld [vmem:[%s9404_s1 + $0x6c8] sm:$0xff]  }
  0x99   : > { %6700 = vmatpush3.bf16.msra.mxu1 %v7357_v51  ;;  %6679 = vmatprep.subr.bf16.mxu0 %v7358_v52  ;;  %v7410_v51 = vld [vmem:[%s9404_s1 + $0x608] sm:$0xff]  }
  0x9a   : > { %6701 = vmatprep.subr.bf16.mxu1 %v7359_v53  ;;  %v7411_v52 = vld [vmem:[%s9404_s1 + $0x688] sm:$0xff]   ;;  %v7412_v53 = vld [vmem:[%s9404_s1 + $0x650] sm:$0xff]  }
  0x9c   : > { %6680 = vmatpush3.bf16.msra.mxu0 %v7360_v54  ;;  %v7413_v54 = vld [vmem:[%s9404_s1 + $0x6d0] sm:$0xff]  }
  0x9d   : > { %6702 = vmatpush3.bf16.msra.mxu1 %v7361_v55  ;;  %6681 = vmatprep.subr.bf16.mxu0 %v7362_v56  ;;  %v7414_v55 = vld [vmem:[%s9404_s1 + $0x610] sm:$0xff]  }
  0x9e   : > { %6703 = vmatprep.subr.bf16.mxu1 %v7363_v57  ;;  %v7415_v56 = vld [vmem:[%s9404_s1 + $0x690] sm:$0xff]   ;;  %v7416_v57 = vld [vmem:[%s9404_s1 + $0x658] sm:$0xff]  }
  0xa0   : > { %6682 = vmatpush3.bf16.msra.mxu0 %v7364_v58  ;;  %v7417_v58 = vld [vmem:[%s9404_s1 + $0x6d8] sm:$0xff]  }
  0xa1   : > { %6704 = vmatpush3.bf16.msra.mxu1 %v7365_v59  ;;  %6683 = vmatprep.subr.bf16.mxu0 %v7366_v60  ;;  %v7418_v59 = vld [vmem:[%s9404_s1 + $0x618] sm:$0xff]  }
  0xa2   : > { %6705 = vmatprep.subr.bf16.mxu1 %v7367_v62  ;;  %v7419_v60 = vld [vmem:[%s9404_s1 + $0x698] sm:$0xff]   ;;  %v7421_v62 = vld [vmem:[%s9404_s1 + $0x6e0] sm:$0xff]  }
  0xa4   : > { %6684 = vmatpush3.bf16.msra.mxu0 %v7368_v1  ;;  %v7424_v1 = vld [vmem:[%s9404_s1 + $0x668] sm:$0xff]  }
  0xa5   : > { %6706 = vmatpush3.bf16.msra.mxu1 %v7369_v2  ;;  %6713 = vmatprep.subr.bf16.mxu0 %v7371_v5  ;;  %v7425_v2 = vld [vmem:[%s9404_s1 + $0x6e8] sm:$0xff]   ;;  %v7428_v5 = vld [vmem:[%s9404_s1 + $0x670] sm:$0xff]  }
  0xa6   : > { %6735 = vmatprep.subr.bf16.mxu1 %v7372_v7  ;;  %v7430_v7 = vld [vmem:[%s9404_s1 + $0x630] sm:$0xff]  }
  0xa7   : > { %4985 = vmatmul.mubr.bf16.vlgmr.msra.gmra.mrb[16].mxu0 %v1299_v63  ;;  %v7422_v63 = vld [vmem:[%s9404_s1 + $0x620] sm:$0xff]  }
  0xa8   : > { %5025 = vmatmul.mubr.bf16.vlgmr.msra.gmra.mrb[16].mxu1 %v1306_v4  ;;  %6714 = vmatpush3.bf16.msra.mxu0 %v7373_v8  ;;  %v7427_v4 = vld [vmem:[%s9404_s1 + $0x6a8] sm:$0xff]   ;;  %v7431_v8 = vld [vmem:[%s9404_s1 + $0x6b0] sm:$0xff]  }
  0xa9   : > { %6736 = vmatpush3.bf16.msra.mxu1 %v7374_v9  ;;  %6715 = vmatprep.subr.bf16.mxu0 %v7375_v10  ;;  %v7432_v9 = vld [vmem:[%s9404_s1 + $0x678] sm:$0xff]  }
  0xaa   : > { %6737 = vmatprep.subr.bf16.mxu1 %v7376_v11  ;;  %5064 = vmatprep.mubr.bf16.mxu0 %v1324_v42  ;;  %v7433_v10 = vld [vmem:[%s9404_s1 + $0x6f8] sm:$0xff]   ;;  %v174_v11 = vld [vmem:[%s7871_s27 + $0x30] sm:$0xff]  ;;  %v7459_v42 = vld [vmem:[%s9404_s1 + $0x728] sm:$0xff]  }
  0xab   : > { %5104 = vmatprep.mubr.bf16.mxu1 %v1325_v45  ;;  %v7462_v45 = vld [vmem:[%s9404_s1 + $0x7f0] sm:$0xff]  }
  0xac   : > { %6716 = vmatpush3.bf16.msra.mxu0 %v7377_v12  ;;  %v7434_v12 = vld [vmem:[%s9404_s1 + $0x638] sm:$0xff]  }
  0xad   : > { %6738 = vmatpush3.bf16.msra.mxu1 %v7378_v13  ;;  %6717 = vmatprep.subr.bf16.mxu0 %v7379_v14  ;;  %v1333_v13 = vrot.slane %v174_v11, %v7886_v41  ;;  %v1326_v14 = vcombine.high %v174_v11, %v174_v11  ;;  %v7476_v11 = vld [vmem:[%s9404_s1 + $0x808] sm:$0xff]  }
  0xae   : > { %6739 = vmatprep.subr.bf16.mxu1 %v7380_v15  ;;  %v7435_v15 = vld [vmem:[%s9404_s1 + $0x6b8] sm:$0xff]  }
  0xb0   : > { %6718 = vmatpush3.bf16.msra.mxu0 %v7381_v16  ;;  %v1341_v16 = vcombine.high %v1333_v13, %v1333_v13 }
  0xb1   : > { %6740 = vmatpush3.bf16.msra.mxu1 %v7382_v17  ;;  %6719 = vmatprep.subr.bf16.mxu0 %v7383_v18  ;;  %v1340_v17 = vrot.slane %v1326_v14, %v7886_v41  ;;  %v7437_v18 = vld [vmem:[%s9404_s1 + $0x740] sm:$0xff]   ;;  %v7479_v14 = vld [vmem:[%s9404_s1 + $0x8d0] sm:$0xff]  }
  0xb2   : > { %6741 = vmatprep.subr.bf16.mxu1 %v7384_v19  ;;  %v7438_v19 = vld [vmem:[%s9404_s1 + $0x7c0] sm:$0xff]  }
  0xb4   : > { %6720 = vmatpush3.bf16.msra.mxu0 %v7385_v20  ;;  %v1342_v20 = vcombine.high %v1340_v17, %v1340_v17 }
  0xb5   : > { %6742 = vmatpush3.bf16.msra.mxu1 %v7386_v21  ;;  %6721 = vmatprep.subr.bf16.mxu0 %v7387_v22  ;;  %v7439_v21 = vld [vmem:[%s9404_s1 + $0x700] sm:$0xff]  }
  0xb6   : > { %6743 = vmatprep.subr.bf16.mxu1 %v7388_v23  ;;  %v7440_v22 = vld [vmem:[%s9404_s1 + $0x780] sm:$0xff]   ;;  %v7441_v23 = vld [vmem:[%s9404_s1 + $0x748] sm:$0xff]  }
  0xb8   : > { %6722 = vmatpush3.bf16.msra.mxu0 %v7389_v24  ;;  %v7442_v24 = vld [vmem:[%s9404_s1 + $0x7c8] sm:$0xff]  }
  0xb9   : > { %6744 = vmatpush3.bf16.msra.mxu1 %v7390_v25  ;;  %6723 = vmatprep.subr.bf16.mxu0 %v7391_v26  ;;  %v7443_v25 = vld [vmem:[%s9404_s1 + $0x708] sm:$0xff]  }
  0xba   : > { %6745 = vmatprep.subr.bf16.mxu1 %v7392_v27  ;;  %v7444_v26 = vld [vmem:[%s9404_s1 + $0x788] sm:$0xff]   ;;  %v7445_v27 = vld [vmem:[%s9404_s1 + $0x750] sm:$0xff]  }
  0xbc   : > { %6724 = vmatpush3.bf16.msra.mxu0 %v7393_v28  ;;  %v7446_v28 = vld [vmem:[%s9404_s1 + $0x7d0] sm:$0xff]  }
  0xbd   : > { %6746 = vmatpush3.bf16.msra.mxu1 %v7394_v29  ;;  %6725 = vmatprep.subr.bf16.mxu0 %v7395_v30  ;;  %v7447_v29 = vld [vmem:[%s9404_s1 + $0x710] sm:$0xff]  }
  0xbe   : > { %6747 = vmatprep.subr.bf16.mxu1 %v7396_v31  ;;  %v7448_v30 = vld [vmem:[%s9404_s1 + $0x790] sm:$0xff]   ;;  %v7449_v31 = vld [vmem:[%s9404_s1 + $0x758] sm:$0xff]  }
  0xc0   : > { %6726 = vmatpush3.bf16.msra.mxu0 %v7397_v32  ;;  %v7450_v32 = vld [vmem:[%s9404_s1 + $0x7d8] sm:$0xff]  }
  0xc1   : > { %6748 = vmatpush3.bf16.msra.mxu1 %v7398_v33  ;;  %6727 = vmatprep.subr.bf16.mxu0 %v7399_v34  ;;  %v7451_v33 = vld [vmem:[%s9404_s1 + $0x718] sm:$0xff]  }
  0xc2   : > { %6749 = vmatprep.subr.bf16.mxu1 %v7400_v36  ;;  %v7452_v34 = vld [vmem:[%s9404_s1 + $0x798] sm:$0xff]   ;;  %v7454_v36 = vld [vmem:[%s9404_s1 + $0x7e0] sm:$0xff]  }
  0xc4   : > { %6728 = vmatpush3.bf16.msra.mxu0 %v7401_v39  ;;  %v7457_v39 = vld [vmem:[%s9404_s1 + $0x768] sm:$0xff]  }
  0xc5   : > { %6750 = vmatpush3.bf16.msra.mxu1 %v7402_v40  ;;  %6757 = vmatprep.subr.bf16.mxu0 %v7404_v44  ;;  %v7458_v40 = vld [vmem:[%s9404_s1 + $0x7e8] sm:$0xff]   ;;  %v7461_v44 = vld [vmem:[%s9404_s1 + $0x770] sm:$0xff]  }
  0xc6   : > { %6779 = vmatprep.subr.bf16.mxu1 %v7405_v46 }
  0xc7   : > { %5065 = vmatmul.mubr.bf16.vlgmr.msra.gmra.mrb[20].mxu0 %v1316_v37  ;;  %v7455_v37 = vld [vmem:[%s9404_s1 + $0x720] sm:$0xff]  }
  0xc8   : > { %5105 = vmatmul.mubr.bf16.vlgmr.msra.gmra.mrb[20].mxu1 %v1323_v43  ;;  %6758 = vmatpush3.bf16.msra.mxu0 %v7406_v47  ;;  %v7460_v43 = vld [vmem:[%s9404_s1 + $0x7a8] sm:$0xff]  }
  0xc9   : > { %6780 = vmatpush3.bf16.msra.mxu1 %v7407_v48  ;;  %6759 = vmatprep.subr.bf16.mxu0 %v7408_v49  ;;  %v7463_v48 = vld [vmem:[%s9404_s1 + $0x730] sm:$0xff]  }
  0xca   : > { %6781 = vmatprep.subr.bf16.mxu1 %v7409_v50  ;;  %5144 = vmatprep.mubr.bf16.mxu0 %v1341_v16  ;;  %v7464_v49 = vld [vmem:[%s9404_s1 + $0x7b0] sm:$0xff]  }
  0xcb   : > { %5184 = vmatprep.mubr.bf16.mxu1 %v1342_v20  ;;  %v7481_v16 = vld [vmem:[%s9404_s1 + $0x890] sm:$0xff]   ;;  %v7485_v20 = vld [vmem:[%s9404_s1 + $0x898] sm:$0xff]  }
  0xcc   : > { %6760 = vmatpush3.bf16.msra.mxu0 %v7410_v51 }
  0xcd   : > { %6782 = vmatpush3.bf16.msra.mxu1 %v7411_v52  ;;  %6761 = vmatprep.subr.bf16.mxu0 %v7412_v53 }
  0xce   : > { %6783 = vmatprep.subr.bf16.mxu1 %v7413_v54 }
  0xd0   : > { %6762 = vmatpush3.bf16.msra.mxu0 %v7414_v55 }
  0xd1   : > { %6784 = vmatpush3.bf16.msra.mxu1 %v7415_v56  ;;  %6763 = vmatprep.subr.bf16.mxu0 %v7416_v57  ;;  %v7465_v56 = vld [vmem:[%s9404_s1 + $0x778] sm:$0xff]  }
  0xd2   : > { %6785 = vmatprep.subr.bf16.mxu1 %v7417_v58  ;;  %v7466_v57 = vld [vmem:[%s9404_s1 + $0x7f8] sm:$0xff]  }
  0xd4   : > { %6764 = vmatpush3.bf16.msra.mxu0 %v7418_v59 }
  0xd5   : > { %6786 = vmatpush3.bf16.msra.mxu1 %v7419_v60  ;;  %6765 = vmatprep.subr.bf16.mxu0 %v7420_v61  ;;  %v7467_v61 = vld [vmem:[%s9404_s1 + $0x738] sm:$0xff]  }
  0xd6   : > { %6787 = vmatprep.subr.bf16.mxu1 %v7421_v62  ;;  %v175_v62 = vld [vmem:[%s7871_s27 + $0x38] sm:$0xff] }
  0xd8   : > { %6766 = vmatpush3.bf16.msra.mxu0 %v7422_v63  ;;  %v7468_v63 = vld [vmem:[%s9404_s1 + $0x7b8] sm:$0xff]  }
  0xd9   : > { %6788 = vmatpush3.bf16.msra.mxu1 %v7423_v0  ;;  %6767 = vmatprep.subr.bf16.mxu0 %v7424_v1  ;;  %v1350_v0 = vrot.slane %v175_v62, %v7886_v41  ;;  %v1343_v1 = vcombine.high %v175_v62, %v175_v62  ;;  %v7509_v62 = vld [vmem:[%s9404_s1 + $0x908] sm:$0xff]  }
  0xda   : > { %6789 = vmatprep.subr.bf16.mxu1 %v7425_v2  ;;  %v7470_v2 = vld [vmem:[%s9404_s1 + $0x840] sm:$0xff]  }
  0xdc   : > { %6768 = vmatpush3.bf16.msra.mxu0 %v7426_v3  ;;  %v1358_v3 = vcombine.high %v1350_v0, %v1350_v0 }
  0xdd   : > { %6790 = vmatpush3.bf16.msra.mxu1 %v7427_v4  ;;  %6769 = vmatprep.subr.bf16.mxu0 %v7428_v5  ;;  %v1357_v4 = vrot.slane %v1343_v1, %v7886_v41  ;;  %v7471_v5 = vld [vmem:[%s9404_s1 + $0x8c0] sm:$0xff]   ;;  %v7512_v1 = vld [vmem:[%s9404_s1 + $0x9d0] sm:$0xff]  }
  0xde   : > { %6791 = vmatprep.subr.bf16.mxu1 %v7429_v6  ;;  %v7472_v6 = vld [vmem:[%s9404_s1 + $0x800] sm:$0xff]  }
  0xe0   : > { %6770 = vmatpush3.bf16.msra.mxu0 %v7430_v7  ;;  %v1359_v7 = vcombine.high %v1357_v4, %v1357_v4 }
  0xe1   : > { %6792 = vmatpush3.bf16.msra.mxu1 %v7431_v8  ;;  %6771 = vmatprep.subr.bf16.mxu0 %v7432_v9  ;;  %v7473_v8 = vld [vmem:[%s9404_s1 + $0x880] sm:$0xff]   ;;  %v7474_v9 = vld [vmem:[%s9404_s1 + $0x848] sm:$0xff]  }
  0xe2   : > { %6793 = vmatprep.subr.bf16.mxu1 %v7433_v10  ;;  %v7475_v10 = vld [vmem:[%s9404_s1 + $0x8c8] sm:$0xff]  }
  0xe4   : > { %6772 = vmatpush3.bf16.msra.mxu0 %v7434_v12  ;;  %v7477_v12 = vld [vmem:[%s9404_s1 + $0x888] sm:$0xff]  }
  0xe5   : > { %6794 = vmatpush3.bf16.msra.mxu1 %v7435_v15  ;;  %6801 = vmatprep.subr.bf16.mxu0 %v7437_v18  ;;  %v7480_v15 = vld [vmem:[%s9404_s1 + $0x810] sm:$0xff]   ;;  %v7483_v18 = vld [vmem:[%s9404_s1 + $0x8d8] sm:$0xff]  }
  0xe6   : > { %6823 = vmatprep.subr.bf16.mxu1 %v7438_v19  ;;  %v7484_v19 = vld [vmem:[%s9404_s1 + $0x818] sm:$0xff]  }
  0xe7   : > { %5145 = vmatmul.mubr.bf16.vlgmr.msra.gmra.mrb[24].mxu0 %v1333_v13  ;;  %v7478_v13 = vld [vmem:[%s9404_s1 + $0x850] sm:$0xff]  }
  0xe8   : > { %5185 = vmatmul.mubr.bf16.vlgmr.msra.gmra.mrb[24].mxu1 %v1340_v17  ;;  %6802 = vmatpush3.bf16.msra.mxu0 %v7439_v21  ;;  %v7482_v17 = vld [vmem:[%s9404_s1 + $0x858] sm:$0xff]   ;;  %v7486_v21 = vld [vmem:[%s9404_s1 + $0x860] sm:$0xff]  }
  0xe9   : > { %6824 = vmatpush3.bf16.msra.mxu1 %v7440_v22  ;;  %6803 = vmatprep.subr.bf16.mxu0 %v7441_v23  ;;  %v7487_v22 = vld [vmem:[%s9404_s1 + $0x8e0] sm:$0xff]  }
  0xea   : > { %6825 = vmatprep.subr.bf16.mxu1 %v7442_v24  ;;  %5224 = vmatprep.mubr.bf16.mxu0 %v1358_v3  ;;  %v7488_v23 = vld [vmem:[%s9404_s1 + $0x820] sm:$0xff]   ;;  %v7514_v3 = vld [vmem:[%s9404_s1 + $0x990] sm:$0xff]  }
  0xeb   : > { %5264 = vmatprep.mubr.bf16.mxu1 %v1359_v7  ;;  %v7489_v24 = vld [vmem:[%s9404_s1 + $0x8a0] sm:$0xff]   ;;  %v7518_v7 = vld [vmem:[%s9404_s1 + $0x998] sm:$0xff]  }
  0xec   : > { %6804 = vmatpush3.bf16.msra.mxu0 %v7443_v25  ;;  %v7490_v25 = vld [vmem:[%s9404_s1 + $0x868] sm:$0xff]  }
  0xed   : > { %6826 = vmatpush3.bf16.msra.mxu1 %v7444_v26  ;;  %6805 = vmatprep.subr.bf16.mxu0 %v7445_v27  ;;  %v7491_v26 = vld [vmem:[%s9404_s1 + $0x8e8] sm:$0xff]  }
  0xee   : > { %6827 = vmatprep.subr.bf16.mxu1 %v7446_v28  ;;  %v7492_v27 = vld [vmem:[%s9404_s1 + $0x828] sm:$0xff]  }
  0xef   : > { %v7493_v28 = vld [vmem:[%s9404_s1 + $0x8a8] sm:$0xff]  }
  0xf0   : > { %6806 = vmatpush3.bf16.msra.mxu0 %v7447_v29  ;;  %v7494_v29 = vld [vmem:[%s9404_s1 + $0x870] sm:$0xff]  }
  0xf1   : > { %6828 = vmatpush3.bf16.msra.mxu1 %v7448_v30  ;;  %6807 = vmatprep.subr.bf16.mxu0 %v7449_v31  ;;  %v7495_v30 = vld [vmem:[%s9404_s1 + $0x8f0] sm:$0xff]  }
  0xf2   : > { %6829 = vmatprep.subr.bf16.mxu1 %v7450_v32 }
  0xf4   : > { %6808 = vmatpush3.bf16.msra.mxu0 %v7451_v33  ;;  %v7496_v33 = vld [vmem:[%s9404_s1 + $0x830] sm:$0xff]  }
  0xf5   : > { %6830 = vmatpush3.bf16.msra.mxu1 %v7452_v34  ;;  %6809 = vmatprep.subr.bf16.mxu0 %v7453_v35  ;;  %v7497_v34 = vld [vmem:[%s9404_s1 + $0x8b0] sm:$0xff]  }
  0xf6   : > { %6831 = vmatprep.subr.bf16.mxu1 %v7454_v36 }
  0xf8   : > { %6810 = vmatpush3.bf16.msra.mxu0 %v7455_v37 }
  0xf9   : > { %6832 = vmatpush3.bf16.msra.mxu1 %v7456_v38  ;;  %6811 = vmatprep.subr.bf16.mxu0 %v7457_v39 }
  0xfa   : > { %6833 = vmatprep.subr.bf16.mxu1 %v7458_v40  ;;  %v6509_v46 = vpop.f32.mrb[0].mxu0 }
  0xfb   : > { %v6531_v47 = vpop.f32.mrb[0].mxu1  ;;  %v6510_v50 = vpop.f32.mrb[1].mxu0 }
  0xfc   : > { %v6532_v51 = vpop.f32.mrb[1].mxu1  ;;  %v6511_v52 = vadd.f32 %v6510_v50, %v6509_v46  ;;  %v6512_v54 = vpop.f32.mrb[2].mxu0  ;;  %6812 = vmatpush3.bf16.msra.mxu0 %v7459_v42  ;;  %v7498_v42 = vld [vmem:[%s9404_s1 + $0x878] sm:$0xff]  }
  0xfd   : > { %v6533_v53 = vadd.f32 %v6532_v51, %v6531_v47  ;;  %v6534_v55 = vpop.f32.mrb[2].mxu1  ;;  %6834 = vmatpush3.bf16.msra.mxu1 %v7460_v43  ;;  %v6513_v58 = vpop.f32.mrb[3].mxu0  ;;  %6813 = vmatprep.subr.bf16.mxu0 %v7461_v44  ;;  %v7499_v43 = vld [vmem:[%s9404_s1 + $0x8f8] sm:$0xff]   ;;  %v7504_v54 = vld [vmem:[%s9404_s1 + $0x9c0] sm:$0xff]  }
  0xfe   : > { %v6535_v59 = vpop.f32.mrb[3].mxu1  ;;  %6835 = vmatprep.subr.bf16.mxu1 %v7462_v45  ;;  %v7500_v47 = vld [vmem:[%s9404_s1 + $0x838] sm:$0xff]   ;;  %v7506_v58 = vld [vmem:[%s9404_s1 + $0x980] sm:$0xff]  }
  0xff   : > { %v8568_v60 = vadd.f32 %v6533_v53, %v6511_v52  ;;  %v7503_v53 = vld [vmem:[%s9404_s1 + $0x940] sm:$0xff]  }
 0x100   : > { %6814 = vmatpush3.bf16.msra.mxu0 %v7463_v48  ;;  %v7501_v48 = vld [vmem:[%s9404_s1 + $0x8b8] sm:$0xff]  }
 0x101   : > { %6836 = vmatpush3.bf16.msra.mxu1 %v7464_v49  ;;  %6815 = vmatprep.subr.bf16.mxu0 %v7465_v56  ;;  %v176_v49 = vld [vmem:[%s7871_s27 + $0x40] sm:$0xff] }
 0x102   : > { %6837 = vmatprep.subr.bf16.mxu1 %v7466_v57  ;;  %v1367_v51 = vrot.slane %v176_v49, %v7886_v41  ;;  %v1360_v52 = vcombine.high %v176_v49, %v176_v49  ;;  %v7505_v57 = vld [vmem:[%s9404_s1 + $0x900] sm:$0xff]   ;;  %v7542_v49 = vld [vmem:[%s9404_s1 + $0xa08] sm:$0xff]  }
 0x104   : > { %6816 = vmatpush3.bf16.msra.mxu0 %v7467_v61  ;;  %v1375_v55 = vcombine.high %v1367_v51, %v1367_v51  ;;  %v1374_v56 = vrot.slane %v1360_v52, %v7886_v41  ;;  %v7508_v61 = vld [vmem:[%s9404_s1 + $0x9c8] sm:$0xff]   ;;  %v7545_v52 = vld [vmem:[%s9404_s1 + $0xad0] sm:$0xff]  }
 0x105   : > { %6838 = vmatpush3.bf16.msra.mxu1 %v7468_v63  ;;  %6845 = vmatprep.subr.bf16.mxu0 %v7470_v2  ;;  %v7510_v63 = vld [vmem:[%s9404_s1 + $0x988] sm:$0xff]   ;;  %v7513_v2 = vld [vmem:[%s9404_s1 + $0x910] sm:$0xff]  }
 0x106   : > { %6867 = vmatprep.subr.bf16.mxu1 %v7471_v5  ;;  %v1376_v59 = vcombine.high %v1374_v56, %v1374_v56  ;;  %v7516_v5 = vld [vmem:[%s9404_s1 + $0x9d8] sm:$0xff]  }
 0x107   : > { %5225 = vmatmul.mubr.bf16.vlgmr.msra.gmra.mrb[28].mxu0 %v1350_v0  ;;  %v7511_v0 = vld [vmem:[%s9404_s1 + $0x950] sm:$0xff]  }
 0x108   : > { %5265 = vmatmul.mubr.bf16.vlgmr.msra.gmra.mrb[28].mxu1 %v1357_v4  ;;  %6846 = vmatpush3.bf16.msra.mxu0 %v7472_v6  ;;  %v7515_v4 = vld [vmem:[%s9404_s1 + $0x958] sm:$0xff]  }
 0x109   : > { %6868 = vmatpush3.bf16.msra.mxu1 %v7473_v8  ;;  %6847 = vmatprep.subr.bf16.mxu0 %v7474_v9  ;;  %v7517_v6 = vld [vmem:[%s9404_s1 + $0x918] sm:$0xff]   ;;  %v7519_v8 = vld [vmem:[%s9404_s1 + $0x960] sm:$0xff]  }
 0x10a   : > { %6869 = vmatprep.subr.bf16.mxu1 %v7475_v10  ;;  %5304 = vmatprep.mubr.bf16.mxu0 %v1375_v55  ;;  %v7520_v9 = vld [vmem:[%s9404_s1 + $0x9e0] sm:$0xff]   ;;  %v7548_v55 = vld [vmem:[%s9404_s1 + $0xa58] sm:$0xff]  }
 0x10b   : > { %5344 = vmatprep.mubr.bf16.mxu1 %v1376_v59  ;;  %v7521_v10 = vld [vmem:[%s9404_s1 + $0x920] sm:$0xff]  }
 0x10c   : > { %6848 = vmatpush3.bf16.msra.mxu0 %v7476_v11  ;;  %v7522_v11 = vld [vmem:[%s9404_s1 + $0x9a0] sm:$0xff]  }
 0x10d   : > { %6870 = vmatpush3.bf16.msra.mxu1 %v7477_v12  ;;  %6849 = vmatprep.subr.bf16.mxu0 %v7478_v13  ;;  %v7523_v12 = vld [vmem:[%s9404_s1 + $0x968] sm:$0xff]   ;;  %v7552_v59 = vld [vmem:[%s9404_s1 + $0xa60] sm:$0xff]  }
 0x10e   : > { %6871 = vmatprep.subr.bf16.mxu1 %v7479_v14  ;;  %v7524_v13 = vld [vmem:[%s9404_s1 + $0x9e8] sm:$0xff]  }
 0x10f   : > { %v7525_v14 = vld [vmem:[%s9404_s1 + $0x928] sm:$0xff]  }
 0x110   : > { %6850 = vmatpush3.bf16.msra.mxu0 %v7480_v15  ;;  %v7526_v15 = vld [vmem:[%s9404_s1 + $0x9a8] sm:$0xff]  }
 0x111   : > { %6872 = vmatpush3.bf16.msra.mxu1 %v7481_v16  ;;  %6851 = vmatprep.subr.bf16.mxu0 %v7482_v17  ;;  %v7527_v16 = vld [vmem:[%s9404_s1 + $0x970] sm:$0xff]  }
 0x112   : > { %6873 = vmatprep.subr.bf16.mxu1 %v7483_v18  ;;  %v7528_v17 = vld [vmem:[%s9404_s1 + $0x9f0] sm:$0xff]  }
 0x114   : > { %6852 = vmatpush3.bf16.msra.mxu0 %v7484_v19 }
 0x115   : > { %6874 = vmatpush3.bf16.msra.mxu1 %v7485_v20  ;;  %6853 = vmatprep.subr.bf16.mxu0 %v7486_v21  ;;  %v7529_v20 = vld [vmem:[%s9404_s1 + $0x930] sm:$0xff]  }
 0x116   : > { %6875 = vmatprep.subr.bf16.mxu1 %v7487_v22  ;;  %v7530_v21 = vld [vmem:[%s9404_s1 + $0x9b0] sm:$0xff]  }
 0x118   : > { %6854 = vmatpush3.bf16.msra.mxu0 %v7488_v23 }
 0x119   : > { %6876 = vmatpush3.bf16.msra.mxu1 %v7489_v24  ;;  %6855 = vmatprep.subr.bf16.mxu0 %v7490_v25 }
 0x11a   : > { %6877 = vmatprep.subr.bf16.mxu1 %v7491_v26  ;;  %v6553_v31 = vpop.f32.mrb[4].mxu0 }
 0x11b   : > { %v6575_v32 = vpop.f32.mrb[4].mxu1  ;;  %v6554_v35 = vpop.f32.mrb[5].mxu0 }
 0x11c   : > { %v6576_v36 = vpop.f32.mrb[5].mxu1  ;;  %v6555_v37 = vadd.f32 %v6554_v35, %v6553_v31  ;;  %v6556_v39 = vpop.f32.mrb[6].mxu0  ;;  %6856 = vmatpush3.bf16.msra.mxu0 %v7492_v27 }
 0x11d   : > { %v6577_v38 = vadd.f32 %v6576_v36, %v6575_v32  ;;  %v6578_v40 = vpop.f32.mrb[6].mxu1  ;;  %6878 = vmatpush3.bf16.msra.mxu1 %v7493_v28  ;;  %v6557_v44 = vpop.f32.mrb[7].mxu0  ;;  %6857 = vmatprep.subr.bf16.mxu0 %v7494_v29  ;;  %v7531_v28 = vld [vmem:[%s9404_s1 + $0x978] sm:$0xff]   ;;  %v177_v36 = vld [vmem:[%s7871_s27 + $0x48] sm:$0xff]  ;;  %v7536_v39 = vld [vmem:[%s9404_s1 + $0xa40] sm:$0xff]  }
 0x11e   : > { %v6579_v45 = vpop.f32.mrb[7].mxu1  ;;  %6879 = vmatprep.subr.bf16.mxu1 %v7495_v30  ;;  %v4747_v46 = vadd.f32 %v6555_v37, %v8568_v60  ;;  %v7507_v60 = vld [vmem:[%s9404_s1 + $0x948] sm:$0xff]   ;;  %v7532_v29 = vld [vmem:[%s9404_s1 + $0x9f8] sm:$0xff]   ;;  %v1384_v37 = vrot.slane %v177_v36, %v7886_v41  ;;  %v7537_v40 = vld [vmem:[%s9404_s1 + $0xac0] sm:$0xff]  }
 0x11f   : > { %v7538_v44 = vld [vmem:[%s9404_s1 + $0xa00] sm:$0xff]  }
 0x120   : > { %v8677_v50 = vadd.f32 %v6577_v38, %v4747_v46  ;;  %6858 = vmatpush3.bf16.msra.mxu0 %v7496_v33  ;;  %v7533_v33 = vld [vmem:[%s9404_s1 + $0x938] sm:$0xff]   ;;  %v1377_v38 = vcombine.high %v177_v36, %v177_v36  ;;  %v7539_v45 = vld [vmem:[%s9404_s1 + $0xa80] sm:$0xff]   ;;  %v7576_v36 = vld [vmem:[%s9404_s1 + $0xb88] sm:$0xff]  }
 0x121   : > { %6880 = vmatpush3.bf16.msra.mxu1 %v7497_v34  ;;  %6859 = vmatprep.subr.bf16.mxu0 %v7498_v42  ;;  %v7534_v34 = vld [vmem:[%s9404_s1 + $0x9b8] sm:$0xff]   ;;  %v1392_v42 = vcombine.high %v1384_v37, %v1384_v37 }
 0x122   : > { %6881 = vmatprep.subr.bf16.mxu1 %v7499_v43  ;;  %v1391_v43 = vrot.slane %v1377_v38, %v7886_v41  ;;  %v7578_v38 = vld [vmem:[%s9404_s1 + $0xbd0] sm:$0xff]  }
 0x124   : > { %6860 = vmatpush3.bf16.msra.mxu0 %v7500_v47  ;;  %v1393_v46 = vcombine.high %v1391_v43, %v1391_v43  ;;  %v7540_v47 = vld [vmem:[%s9404_s1 + $0xa48] sm:$0xff]  }
 0x125   : > { %6882 = vmatpush3.bf16.msra.mxu1 %v7501_v48  ;;  %6889 = vmatprep.subr.bf16.mxu0 %v7503_v53  ;;  %v7541_v48 = vld [vmem:[%s9404_s1 + $0xac8] sm:$0xff]   ;;  %v7546_v53 = vld [vmem:[%s9404_s1 + $0xa10] sm:$0xff]  }
 0x126   : > { %6911 = vmatprep.subr.bf16.mxu1 %v7504_v54  ;;  %v7547_v54 = vld [vmem:[%s9404_s1 + $0xa90] sm:$0xff]  }
 0x127   : > { %5305 = vmatmul.mubr.bf16.vlgmr.msra.gmra.mrb[32].mxu0 %v1367_v51  ;;  %v7544_v51 = vld [vmem:[%s9404_s1 + $0xa50] sm:$0xff]  }
 0x128   : > { %5345 = vmatmul.mubr.bf16.vlgmr.msra.gmra.mrb[32].mxu1 %v1374_v56  ;;  %6890 = vmatpush3.bf16.msra.mxu0 %v7505_v57  ;;  %v7549_v56 = vld [vmem:[%s9404_s1 + $0xad8] sm:$0xff]  }
 0x129   : > { %6912 = vmatpush3.bf16.msra.mxu1 %v7506_v58  ;;  %6891 = vmatprep.subr.bf16.mxu0 %v7507_v60  ;;  %v7550_v57 = vld [vmem:[%s9404_s1 + $0xa18] sm:$0xff]   ;;  %v7553_v60 = vld [vmem:[%s9404_s1 + $0xae0] sm:$0xff]  }
 0x12a   : > { %6913 = vmatprep.subr.bf16.mxu1 %v7508_v61  ;;  %5384 = vmatprep.mubr.bf16.mxu0 %v1392_v42  ;;  %v7551_v58 = vld [vmem:[%s9404_s1 + $0xa98] sm:$0xff]   ;;  %v7554_v61 = vld [vmem:[%s9404_s1 + $0xa20] sm:$0xff]  }
 0x12b   : > { %5424 = vmatprep.mubr.bf16.mxu1 %v1393_v46  ;;  %v7581_v42 = vld [vmem:[%s9404_s1 + $0xb58] sm:$0xff]   ;;  %v7585_v46 = vld [vmem:[%s9404_s1 + $0xb60] sm:$0xff]  }
 0x12c   : > { %6892 = vmatpush3.bf16.msra.mxu0 %v7509_v62  ;;  %v7555_v62 = vld [vmem:[%s9404_s1 + $0xaa0] sm:$0xff]  }
 0x12d   : > { %6914 = vmatpush3.bf16.msra.mxu1 %v7510_v63  ;;  %6893 = vmatprep.subr.bf16.mxu0 %v7511_v0  ;;  %v7556_v63 = vld [vmem:[%s9404_s1 + $0xa68] sm:$0xff]  }
 0x12e   : > { %6915 = vmatprep.subr.bf16.mxu1 %v7512_v1  ;;  %v7557_v0 = vld [vmem:[%s9404_s1 + $0xae8] sm:$0xff]  }
 0x12f   : > { %v7558_v1 = vld [vmem:[%s9404_s1 + $0xa28] sm:$0xff]  }
 0x130   : > { %6894 = vmatpush3.bf16.msra.mxu0 %v7513_v2  ;;  %v7559_v2 = vld [vmem:[%s9404_s1 + $0xaa8] sm:$0xff]  }
 0x131   : > { %6916 = vmatpush3.bf16.msra.mxu1 %v7514_v3  ;;  %6895 = vmatprep.subr.bf16.mxu0 %v7515_v4  ;;  %v7560_v3 = vld [vmem:[%s9404_s1 + $0xa70] sm:$0xff]  }
 0x132   : > { %6917 = vmatprep.subr.bf16.mxu1 %v7516_v5 }
 0x134   : > { %6896 = vmatpush3.bf16.msra.mxu0 %v7517_v6  ;;  %v7561_v6 = vld [vmem:[%s9404_s1 + $0xaf0] sm:$0xff]  }
 0x135   : > { %6918 = vmatpush3.bf16.msra.mxu1 %v7518_v7  ;;  %6897 = vmatprep.subr.bf16.mxu0 %v7519_v8  ;;  %v7562_v7 = vld [vmem:[%s9404_s1 + $0xa30] sm:$0xff]  }
 0x136   : > { %6919 = vmatprep.subr.bf16.mxu1 %v7520_v9 }
 0x138   : > { %6898 = vmatpush3.bf16.msra.mxu0 %v7521_v10 }
 0x139   : > { %6920 = vmatpush3.bf16.msra.mxu1 %v7522_v11  ;;  %6899 = vmatprep.subr.bf16.mxu0 %v7523_v12 }
 0x13a   : > { %6921 = vmatprep.subr.bf16.mxu1 %v7524_v13  ;;  %v6597_v18 = vpop.f32.mrb[8].mxu0 }
 0x13b   : > { %v6619_v19 = vpop.f32.mrb[8].mxu1  ;;  %v6598_v22 = vpop.f32.mrb[9].mxu0 }
 0x13c   : > { %v6620_v23 = vpop.f32.mrb[9].mxu1  ;;  %v6599_v24 = vadd.f32 %v6598_v22, %v6597_v18  ;;  %v6600_v26 = vpop.f32.mrb[10].mxu0  ;;  %6900 = vmatpush3.bf16.msra.mxu0 %v7525_v14  ;;  %v7563_v14 = vld [vmem:[%s9404_s1 + $0xab0] sm:$0xff]   ;;  %v7567_v22 = vld [vmem:[%s9404_s1 + $0xab8] sm:$0xff]  }
 0x13d   : > { %v6621_v25 = vadd.f32 %v6620_v23, %v6619_v19  ;;  %v6622_v27 = vpop.f32.mrb[10].mxu1  ;;  %6922 = vmatpush3.bf16.msra.mxu1 %v7526_v15  ;;  %v6601_v30 = vpop.f32.mrb[11].mxu0  ;;  %6901 = vmatprep.subr.bf16.mxu0 %v7527_v16  ;;  %v7564_v15 = vld [vmem:[%s9404_s1 + $0xa78] sm:$0xff]   ;;  %v178_v23 = vld [vmem:[%s7871_s27 + $0x50] sm:$0xff]  ;;  %v7569_v26 = vld [vmem:[%s9404_s1 + $0xb40] sm:$0xff]  }
 0x13e   : > { %v6623_v31 = vpop.f32.mrb[11].mxu1  ;;  %6923 = vmatprep.subr.bf16.mxu1 %v7528_v17  ;;  %v4827_v32 = vadd.f32 %v6599_v24, %v8677_v50  ;;  %v7543_v50 = vld [vmem:[%s9404_s1 + $0xa88] sm:$0xff]   ;;  %v7565_v19 = vld [vmem:[%s9404_s1 + $0xaf8] sm:$0xff]   ;;  %v1401_v24 = vrot.slane %v178_v23, %v7886_v41  ;;  %v7570_v27 = vld [vmem:[%s9404_s1 + $0xbc0] sm:$0xff]  }
 0x13f   : > { %v7571_v30 = vld [vmem:[%s9404_s1 + $0xb00] sm:$0xff]  }
 0x140   : > { %v8778_v35 = vadd.f32 %v6621_v25, %v4827_v32  ;;  %6902 = vmatpush3.bf16.msra.mxu0 %v7529_v20  ;;  %v7566_v20 = vld [vmem:[%s9404_s1 + $0xa38] sm:$0xff]   ;;  %v1394_v25 = vcombine.high %v178_v23, %v178_v23  ;;  %v7572_v31 = vld [vmem:[%s9404_s1 + $0xb80] sm:$0xff]   ;;  %v7609_v23 = vld [vmem:[%s9404_s1 + $0xc88] sm:$0xff]  }
 0x141   : > { %6924 = vmatpush3.bf16.msra.mxu1 %v7530_v21  ;;  %6903 = vmatprep.subr.bf16.mxu0 %v7531_v28  ;;  %v1409_v28 = vcombine.high %v1401_v24, %v1401_v24 }
 0x142   : > { %6925 = vmatprep.subr.bf16.mxu1 %v7532_v29  ;;  %v1408_v29 = vrot.slane %v1394_v25, %v7886_v41  ;;  %v7611_v25 = vld [vmem:[%s9404_s1 + $0xcd0] sm:$0xff]  }
 0x144   : > { %6904 = vmatpush3.bf16.msra.mxu0 %v7533_v33  ;;  %v1410_v32 = vcombine.high %v1408_v29, %v1408_v29  ;;  %v7573_v33 = vld [vmem:[%s9404_s1 + $0xb48] sm:$0xff]  }
 0x145   : > { %6926 = vmatpush3.bf16.msra.mxu1 %v7534_v34  ;;  %6933 = vmatprep.subr.bf16.mxu0 %v7536_v39  ;;  %v7574_v34 = vld [vmem:[%s9404_s1 + $0xbc8] sm:$0xff]   ;;  %v7579_v39 = vld [vmem:[%s9404_s1 + $0xb10] sm:$0xff]  }
 0x146   : > { %6955 = vmatprep.subr.bf16.mxu1 %v7537_v40  ;;  %v7580_v40 = vld [vmem:[%s9404_s1 + $0xb90] sm:$0xff]  }
 0x147   : > { %5385 = vmatmul.mubr.bf16.vlgmr.msra.gmra.mrb[36].mxu0 %v1384_v37  ;;  %v7577_v37 = vld [vmem:[%s9404_s1 + $0xb50] sm:$0xff]  }
 0x148   : > { %5425 = vmatmul.mubr.bf16.vlgmr.msra.gmra.mrb[36].mxu1 %v1391_v43  ;;  %6934 = vmatpush3.bf16.msra.mxu0 %v7538_v44  ;;  %v7582_v43 = vld [vmem:[%s9404_s1 + $0xbd8] sm:$0xff]  }
 0x149   : > { %6956 = vmatpush3.bf16.msra.mxu1 %v7539_v45  ;;  %6935 = vmatprep.subr.bf16.mxu0 %v7540_v47  ;;  %v7583_v44 = vld [vmem:[%s9404_s1 + $0xb18] sm:$0xff]   ;;  %v7586_v47 = vld [vmem:[%s9404_s1 + $0xbe0] sm:$0xff]  }
 0x14a   : > { %6957 = vmatprep.subr.bf16.mxu1 %v7541_v48  ;;  %5464 = vmatprep.mubr.bf16.mxu0 %v1409_v28  ;;  %v7584_v45 = vld [vmem:[%s9404_s1 + $0xb98] sm:$0xff]   ;;  %v7587_v48 = vld [vmem:[%s9404_s1 + $0xb20] sm:$0xff]  }
 0x14b   : > { %5504 = vmatprep.mubr.bf16.mxu1 %v1410_v32  ;;  %v7614_v28 = vld [vmem:[%s9404_s1 + $0xc58] sm:$0xff]   ;;  %v7618_v32 = vld [vmem:[%s9404_s1 + $0xc60] sm:$0xff]  }
 0x14c   : > { %6936 = vmatpush3.bf16.msra.mxu0 %v7542_v49  ;;  %v7588_v49 = vld [vmem:[%s9404_s1 + $0xba0] sm:$0xff]  }
 0x14d   : > { %6958 = vmatpush3.bf16.msra.mxu1 %v7543_v50  ;;  %6937 = vmatprep.subr.bf16.mxu0 %v7544_v51  ;;  %v7589_v50 = vld [vmem:[%s9404_s1 + $0xb68] sm:$0xff]  }
 0x14e   : > { %6959 = vmatprep.subr.bf16.mxu1 %v7545_v52  ;;  %v7590_v51 = vld [vmem:[%s9404_s1 + $0xbe8] sm:$0xff]  }
 0x14f   : > { %v7591_v52 = vld [vmem:[%s9404_s1 + $0xb28] sm:$0xff]  }
 0x150   : > { %6938 = vmatpush3.bf16.msra.mxu0 %v7546_v53  ;;  %v7592_v53 = vld [vmem:[%s9404_s1 + $0xba8] sm:$0xff]  }
 0x151   : > { %6960 = vmatpush3.bf16.msra.mxu1 %v7547_v54  ;;  %6939 = vmatprep.subr.bf16.mxu0 %v7548_v55 }
 0x152   : > { %6961 = vmatprep.subr.bf16.mxu1 %v7549_v56  ;;  %v7593_v56 = vld [vmem:[%s9404_s1 + $0xb70] sm:$0xff]  }
 0x154   : > { %6940 = vmatpush3.bf16.msra.mxu0 %v7550_v57  ;;  %v7594_v57 = vld [vmem:[%s9404_s1 + $0xbf0] sm:$0xff]  }
 0x155   : > { %6962 = vmatpush3.bf16.msra.mxu1 %v7551_v58  ;;  %6941 = vmatprep.subr.bf16.mxu0 %v7552_v59 }
 0x156   : > { %6963 = vmatprep.subr.bf16.mxu1 %v7553_v60 }
 0x158   : > { %6942 = vmatpush3.bf16.msra.mxu0 %v7554_v61 }
 0x159   : > { %6964 = vmatpush3.bf16.msra.mxu1 %v7555_v62  ;;  %6943 = vmatprep.subr.bf16.mxu0 %v7556_v63 }
 0x15a   : > { %v6641_v4 = vpop.f32.mrb[12].mxu0  ;;  %6965 = vmatprep.subr.bf16.mxu1 %v7557_v0  ;;  %v7595_v0 = vld [vmem:[%s9404_s1 + $0xb30] sm:$0xff]  }
 0x15b   : > { %v6663_v5 = vpop.f32.mrb[12].mxu1  ;;  %v6642_v8 = vpop.f32.mrb[13].mxu0 }
 0x15c   : > { %v6664_v9 = vpop.f32.mrb[13].mxu1  ;;  %v6643_v10 = vadd.f32 %v6642_v8, %v6641_v4  ;;  %v6644_v12 = vpop.f32.mrb[14].mxu0  ;;  %6944 = vmatpush3.bf16.msra.mxu0 %v7558_v1  ;;  %v7596_v1 = vld [vmem:[%s9404_s1 + $0xbb0] sm:$0xff]   ;;  %v7599_v8 = vld [vmem:[%s9404_s1 + $0xb38] sm:$0xff]  }
 0x15d   : > { %v6665_v11 = vadd.f32 %v6664_v9, %v6663_v5  ;;  %v6666_v13 = vpop.f32.mrb[14].mxu1  ;;  %6966 = vmatpush3.bf16.msra.mxu1 %v7559_v2  ;;  %v6645_v16 = vpop.f32.mrb[15].mxu0  ;;  %6945 = vmatprep.subr.bf16.mxu0 %v7560_v3  ;;  %v7597_v5 = vld [vmem:[%s9404_s1 + $0xb78] sm:$0xff]  }
 0x15e   : > { %v6667_v17 = vpop.f32.mrb[15].mxu1  ;;  %v4907_v18 = vadd.f32 %v6643_v10, %v8778_v35  ;;  %6967 = vmatprep.subr.bf16.mxu1 %v7561_v6  ;;  %v7575_v35 = vld [vmem:[%s9404_s1 + $0xb08] sm:$0xff]   ;;  %v7598_v6 = vld [vmem:[%s9404_s1 + $0xbf8] sm:$0xff]   ;;  %v7602_v13 = vld [vmem:[%s9404_s1 + $0xc40] sm:$0xff]  }
 0x15f   : > { %v7600_v9 = vld [vmem:[%s9404_s1 + $0xbb8] sm:$0xff]   ;;  %v7604_v17 = vld [vmem:[%s9404_s1 + $0xc00] sm:$0xff]  }
 0x160   : > { %v8877_v21 = vadd.f32 %v6665_v11, %v4907_v18  ;;  %6946 = vmatpush3.bf16.msra.mxu0 %v7562_v7  ;;  %v179_v10 = vld [vmem:[%s7871_s27 + $0x58] sm:$0xff]  ;;  %v7605_v18 = vld [vmem:[%s9404_s1 + $0xc80] sm:$0xff]  }
 0x161   : > { %6968 = vmatpush3.bf16.msra.mxu1 %v7563_v14  ;;  %6947 = vmatprep.subr.bf16.mxu0 %v7564_v15  ;;  %v1418_v11 = vrot.slane %v179_v10, %v7886_v41  ;;  %v1411_v12 = vcombine.high %v179_v10, %v179_v10  ;;  %v7603_v14 = vld [vmem:[%s9404_s1 + $0xcc0] sm:$0xff]   ;;  %v7642_v10 = vld [vmem:[%s9404_s1 + $0xd88] sm:$0xff]  }
 0x162   : > { %6969 = vmatprep.subr.bf16.mxu1 %v7565_v19 }
 0x163   : > { %v1426_v15 = vcombine.high %v1418_v11, %v1418_v11  ;;  %v1425_v16 = vrot.slane %v1411_v12, %v7886_v41  ;;  %v7644_v12 = vld [vmem:[%s9404_s1 + $0xdd0] sm:$0xff]  }
 0x164   : > { %6948 = vmatpush3.bf16.msra.mxu0 %v7566_v20  ;;  %v7606_v20 = vld [vmem:[%s9404_s1 + $0xc48] sm:$0xff]  }
 0x165   : > { %6970 = vmatpush3.bf16.msra.mxu1 %v7567_v22  ;;  %6977 = vmatprep.subr.bf16.mxu0 %v7569_v26  ;;  %v1427_v19 = vcombine.high %v1425_v16, %v1425_v16  ;;  %v7608_v22 = vld [vmem:[%s9404_s1 + $0xc08] sm:$0xff]   ;;  %v7612_v26 = vld [vmem:[%s9404_s1 + $0xc10] sm:$0xff]  }
 0x166   : > { %6999 = vmatprep.subr.bf16.mxu1 %v7570_v27  ;;  %v7613_v27 = vld [vmem:[%s9404_s1 + $0xc90] sm:$0xff]  }
 0x167   : > { %5465 = vmatmul.mubr.bf16.vlgmr.msra.gmra.mrb[40].mxu0 %v1401_v24  ;;  %v7610_v24 = vld [vmem:[%s9404_s1 + $0xc50] sm:$0xff]  }
 0x168   : > { %6978 = vmatpush3.bf16.msra.mxu0 %v7571_v30  ;;  %5505 = vmatmul.mubr.bf16.vlgmr.msra.gmra.mrb[40].mxu1 %v1408_v29  ;;  %v7615_v29 = vld [vmem:[%s9404_s1 + $0xcd8] sm:$0xff]  }
 0x169   : > { %6979 = vmatprep.subr.bf16.mxu0 %v7573_v33  ;;  %7000 = vmatpush3.bf16.msra.mxu1 %v7572_v31  ;;  %v7616_v30 = vld [vmem:[%s9404_s1 + $0xc18] sm:$0xff]   ;;  %v7619_v33 = vld [vmem:[%s9404_s1 + $0xce0] sm:$0xff]  }
 0x16a   : > { %7001 = vmatprep.subr.bf16.mxu1 %v7574_v34  ;;  %5544 = vmatprep.mubr.bf16.mxu0 %v1426_v15  ;;  %v7617_v31 = vld [vmem:[%s9404_s1 + $0xc98] sm:$0xff]   ;;  %v7620_v34 = vld [vmem:[%s9404_s1 + $0xc20] sm:$0xff]  }
 0x16b   : > { %5584 = vmatprep.mubr.bf16.mxu1 %v1427_v19  ;;  %v7647_v15 = vld [vmem:[%s9404_s1 + $0xd58] sm:$0xff]   ;;  %v7651_v19 = vld [vmem:[%s9404_s1 + $0xd60] sm:$0xff]  }
 0x16c   : > { %6980 = vmatpush3.bf16.msra.mxu0 %v7575_v35  ;;  %v7621_v35 = vld [vmem:[%s9404_s1 + $0xca0] sm:$0xff]  }
 0x16d   : > { %6981 = vmatprep.subr.bf16.mxu0 %v7577_v37  ;;  %7002 = vmatpush3.bf16.msra.mxu1 %v7576_v36  ;;  %v7622_v36 = vld [vmem:[%s9404_s1 + $0xc68] sm:$0xff]  }
 0x16e   : > { %7003 = vmatprep.subr.bf16.mxu1 %v7578_v38  ;;  %v7623_v37 = vld [vmem:[%s9404_s1 + $0xce8] sm:$0xff]  }
 0x16f   : > { %v7624_v38 = vld [vmem:[%s9404_s1 + $0xc28] sm:$0xff]  }
 0x170   : > { %6982 = vmatpush3.bf16.msra.mxu0 %v7579_v39 }
 0x171   : > { %6983 = vmatprep.subr.bf16.mxu0 %v7581_v42  ;;  %7004 = vmatpush3.bf16.msra.mxu1 %v7580_v40  ;;  %v7625_v42 = vld [vmem:[%s9404_s1 + $0xca8] sm:$0xff]  }
 0x172   : > { %7005 = vmatprep.subr.bf16.mxu1 %v7582_v43  ;;  %v7626_v43 = vld [vmem:[%s9404_s1 + $0xc70] sm:$0xff]  }
 0x174   : > { %6984 = vmatpush3.bf16.msra.mxu0 %v7583_v44 }
 0x175   : > { %6985 = vmatprep.subr.bf16.mxu0 %v7585_v46  ;;  %7006 = vmatpush3.bf16.msra.mxu1 %v7584_v45 }
 0x176   : > { %7007 = vmatprep.subr.bf16.mxu1 %v7586_v47 }
 0x178   : > { %6986 = vmatpush3.bf16.msra.mxu0 %v7587_v48 }
 0x179   : > { %6987 = vmatprep.subr.bf16.mxu0 %v7589_v50  ;;  %7008 = vmatpush3.bf16.msra.mxu1 %v7588_v49  ;;  %v7627_v50 = vld [vmem:[%s9404_s1 + $0xcf0] sm:$0xff]  }
 0x17a   : > { %v6685_v54 = vpop.f32.mrb[16].mxu0  ;;  %7009 = vmatprep.subr.bf16.mxu1 %v7590_v51  ;;  %v7628_v51 = vld [vmem:[%s9404_s1 + $0xc30] sm:$0xff]  }
 0x17b   : > { %v6707_v55 = vpop.f32.mrb[16].mxu1  ;;  %v6686_v58 = vpop.f32.mrb[17].mxu0 }
 0x17c   : > { %v6708_v59 = vpop.f32.mrb[17].mxu1  ;;  %v6687_v60 = vadd.f32 %v6686_v58, %v6685_v54  ;;  %v6688_v62 = vpop.f32.mrb[18].mxu0  ;;  %6988 = vmatpush3.bf16.msra.mxu0 %v7591_v52  ;;  %v7631_v58 = vld [vmem:[%s9404_s1 + $0xcf8] sm:$0xff]  }
 0x17d   : > { %v6709_v61 = vadd.f32 %v6708_v59, %v6707_v55  ;;  %v6710_v63 = vpop.f32.mrb[18].mxu1  ;;  %v6689_v2 = vpop.f32.mrb[19].mxu0  ;;  %6989 = vmatprep.subr.bf16.mxu0 %v7593_v56  ;;  %7010 = vmatpush3.bf16.msra.mxu1 %v7592_v53  ;;  %v7629_v55 = vld [vmem:[%s9404_s1 + $0xcb0] sm:$0xff]   ;;  %v7630_v56 = vld [vmem:[%s9404_s1 + $0xc78] sm:$0xff]  }
 0x17e   : > { %v6711_v3 = vpop.f32.mrb[19].mxu1  ;;  %v4987_v4 = vadd.f32 %v6687_v60, %v8877_v21  ;;  %7011 = vmatprep.subr.bf16.mxu1 %v7594_v57  ;;  %v7607_v21 = vld [vmem:[%s9404_s1 + $0xcc8] sm:$0xff]   ;;  %v7632_v59 = vld [vmem:[%s9404_s1 + $0xc38] sm:$0xff]  }
 0x17f   : > { %v7633_v60 = vld [vmem:[%s9404_s1 + $0xcb8] sm:$0xff]  }
 0x180   : > { %v8976_v7 = vadd.f32 %v6709_v61, %v4987_v4  ;;  %6990 = vmatpush3.bf16.msra.mxu0 %v7595_v0  ;;  %v180_v61 = vld [vmem:[%s7871_s27 + $0x60] sm:$0xff] }
 0x181   : > { %6991 = vmatprep.subr.bf16.mxu0 %v7597_v5  ;;  %7012 = vmatpush3.bf16.msra.mxu1 %v7596_v1  ;;  %v1435_v62 = vrot.slane %v180_v61, %v7886_v41  ;;  %v1428_v63 = vcombine.high %v180_v61, %v180_v61  ;;  %v7635_v0 = vld [vmem:[%s9404_s1 + $0xd40] sm:$0xff]   ;;  %v7675_v61 = vld [vmem:[%s9404_s1 + $0xe88] sm:$0xff]  }
 0x182   : > { %7013 = vmatprep.subr.bf16.mxu1 %v7598_v6  ;;  %v7636_v1 = vld [vmem:[%s9404_s1 + $0xdc0] sm:$0xff]  }
 0x183   : > { %v1443_v2 = vcombine.high %v1435_v62, %v1435_v62  ;;  %v1442_v3 = vrot.slane %v1428_v63, %v7886_v41  ;;  %v7637_v4 = vld [vmem:[%s9404_s1 + $0xd00] sm:$0xff]   ;;  %v7677_v63 = vld [vmem:[%s9404_s1 + $0xed0] sm:$0xff]  }
 0x184   : > { %6992 = vmatpush3.bf16.msra.mxu0 %v7599_v8  ;;  %v7638_v5 = vld [vmem:[%s9404_s1 + $0xd80] sm:$0xff]   ;;  %v7640_v8 = vld [vmem:[%s9404_s1 + $0xdc8] sm:$0xff]  }
 0x185   : > { %7021 = vmatprep.subr.bf16.mxu0 %v7602_v13  ;;  %7014 = vmatpush3.bf16.msra.mxu1 %v7600_v9  ;;  %v1444_v6 = vcombine.high %v1442_v3, %v1442_v3  ;;  %v7641_v9 = vld [vmem:[%s9404_s1 + $0xd08] sm:$0xff]   ;;  %v7645_v13 = vld [vmem:[%s9404_s1 + $0xd10] sm:$0xff]  }
 0x186   : > { %7043 = vmatprep.subr.bf16.mxu1 %v7603_v14  ;;  %v7646_v14 = vld [vmem:[%s9404_s1 + $0xd90] sm:$0xff]  }
 0x187   : > { %5545 = vmatmul.mubr.bf16.vlgmr.msra.gmra.mrb[44].mxu0 %v1418_v11  ;;  %v7643_v11 = vld [vmem:[%s9404_s1 + $0xd50] sm:$0xff]  }
 0x188   : > { %7022 = vmatpush3.bf16.msra.mxu0 %v7604_v17  ;;  %5585 = vmatmul.mubr.bf16.vlgmr.msra.gmra.mrb[44].mxu1 %v1425_v16  ;;  %v7648_v16 = vld [vmem:[%s9404_s1 + $0xdd8] sm:$0xff]  }
 0x189   : > { %7023 = vmatprep.subr.bf16.mxu0 %v7606_v20  ;;  %7044 = vmatpush3.bf16.msra.mxu1 %v7605_v18  ;;  %v7649_v17 = vld [vmem:[%s9404_s1 + $0xd18] sm:$0xff]   ;;  %v7652_v20 = vld [vmem:[%s9404_s1 + $0xde0] sm:$0xff]  }
 0x18a   : > { %7045 = vmatprep.subr.bf16.mxu1 %v7607_v21  ;;  %5624 = vmatprep.mubr.bf16.mxu0 %v1443_v2  ;;  %v7650_v18 = vld [vmem:[%s9404_s1 + $0xd98] sm:$0xff]   ;;  %v7653_v21 = vld [vmem:[%s9404_s1 + $0xd20] sm:$0xff]  }
 0x18b   : > { %5664 = vmatprep.mubr.bf16.mxu1 %v1444_v6  ;;  %v7680_v2 = vld [vmem:[%s9404_s1 + $0xe58] sm:$0xff]   ;;  %v7684_v6 = vld [vmem:[%s9404_s1 + $0xe60] sm:$0xff]  }
 0x18c   : > { %7024 = vmatpush3.bf16.msra.mxu0 %v7608_v22  ;;  %v7654_v22 = vld [vmem:[%s9404_s1 + $0xda0] sm:$0xff]  }
 0x18d   : > { %7025 = vmatprep.subr.bf16.mxu0 %v7610_v24  ;;  %7046 = vmatpush3.bf16.msra.mxu1 %v7609_v23  ;;  %v7655_v23 = vld [vmem:[%s9404_s1 + $0xd68] sm:$0xff]  }
 0x18e   : > { %7047 = vmatprep.subr.bf16.mxu1 %v7611_v25  ;;  %v7656_v24 = vld [vmem:[%s9404_s1 + $0xde8] sm:$0xff]  }
 0x190   : > { %7026 = vmatpush3.bf16.msra.mxu0 %v7612_v26 }
 0x191   : > { %7027 = vmatprep.subr.bf16.mxu0 %v7614_v28  ;;  %7048 = vmatpush3.bf16.msra.mxu1 %v7613_v27  ;;  %v7657_v27 = vld [vmem:[%s9404_s1 + $0xd28] sm:$0xff]  }
 0x192   : > { %7049 = vmatprep.subr.bf16.mxu1 %v7615_v29  ;;  %v7658_v28 = vld [vmem:[%s9404_s1 + $0xda8] sm:$0xff]  }
 0x194   : > { %7028 = vmatpush3.bf16.msra.mxu0 %v7616_v30 }
 0x195   : > { %7029 = vmatprep.subr.bf16.mxu0 %v7618_v32  ;;  %7050 = vmatpush3.bf16.msra.mxu1 %v7617_v31 }
 0x196   : > { %7051 = vmatprep.subr.bf16.mxu1 %v7619_v33 }
 0x198   : > { %7030 = vmatpush3.bf16.msra.mxu0 %v7620_v34 }
 0x199   : > { %7031 = vmatprep.subr.bf16.mxu0 %v7622_v36  ;;  %7052 = vmatpush3.bf16.msra.mxu1 %v7621_v35  ;;  %v7659_v35 = vld [vmem:[%s9404_s1 + $0xd70] sm:$0xff]  }
 0x19a   : > { %v6729_v39 = vpop.f32.mrb[20].mxu0  ;;  %7053 = vmatprep.subr.bf16.mxu1 %v7623_v37  ;;  %v7660_v36 = vld [vmem:[%s9404_s1 + $0xdf0] sm:$0xff]  }
 0x19b   : > { %v6751_v40 = vpop.f32.mrb[20].mxu1  ;;  %v6730_v44 = vpop.f32.mrb[21].mxu0 }
 0x19c   : > { %v6752_v45 = vpop.f32.mrb[21].mxu1  ;;  %v6731_v46 = vadd.f32 %v6730_v44, %v6729_v39  ;;  %v6732_v48 = vpop.f32.mrb[22].mxu0  ;;  %7032 = vmatpush3.bf16.msra.mxu0 %v7624_v38  ;;  %v7663_v44 = vld [vmem:[%s9404_s1 + $0xd78] sm:$0xff]  }
 0x19d   : > { %v6753_v47 = vadd.f32 %v6752_v45, %v6751_v40  ;;  %v6754_v49 = vpop.f32.mrb[22].mxu1  ;;  %v6733_v52 = vpop.f32.mrb[23].mxu0  ;;  %7033 = vmatprep.subr.bf16.mxu0 %v7626_v43  ;;  %7054 = vmatpush3.bf16.msra.mxu1 %v7625_v42  ;;  %v7661_v40 = vld [vmem:[%s9404_s1 + $0xd30] sm:$0xff]   ;;  %v7664_v45 = vld [vmem:[%s9404_s1 + $0xdf8] sm:$0xff]   ;;  %v181_v48 = vld [vmem:[%s7871_s27 + $0x68] sm:$0xff] }
 0x19e   : > { %v6755_v53 = vpop.f32.mrb[23].mxu1  ;;  %v5067_v54 = vadd.f32 %v6731_v46, %v8976_v7  ;;  %7055 = vmatprep.subr.bf16.mxu1 %v7627_v50  ;;  %v7639_v7 = vld [vmem:[%s9404_s1 + $0xd48] sm:$0xff]   ;;  %v7662_v42 = vld [vmem:[%s9404_s1 + $0xdb0] sm:$0xff]   ;;  %v7665_v46 = vld [vmem:[%s9404_s1 + $0xd38] sm:$0xff]   ;;  %v1452_v49 = vrot.slane %v181_v48, %v7886_v41  ;;  %v1445_v50 = vcombine.high %v181_v48, %v181_v48 }
 0x19f   : > { %v7669_v52 = vld [vmem:[%s9404_s1 + $0xec0] sm:$0xff]   ;;  %v7708_v48 = vld [vmem:[%s9404_s1 + $0xf88] sm:$0xff]  }
 0x1a0   : > { %v9075_v57 = vadd.f32 %v6753_v47, %v5067_v54  ;;  %7034 = vmatpush3.bf16.msra.mxu0 %v7628_v51  ;;  %v7666_v47 = vld [vmem:[%s9404_s1 + $0xdb8] sm:$0xff]   ;;  %v7668_v51 = vld [vmem:[%s9404_s1 + $0xe40] sm:$0xff]   ;;  %v1460_v53 = vcombine.high %v1452_v49, %v1452_v49  ;;  %v1459_v54 = vrot.slane %v1445_v50, %v7886_v41  ;;  %v7710_v50 = vld [vmem:[%s9404_s1 + $0xfd0] sm:$0xff]  }
 0x1a1   : > { %7035 = vmatprep.subr.bf16.mxu0 %v7630_v56  ;;  %7056 = vmatpush3.bf16.msra.mxu1 %v7629_v55  ;;  %v7670_v55 = vld [vmem:[%s9404_s1 + $0xe00] sm:$0xff]  }
 0x1a2   : > { %7057 = vmatprep.subr.bf16.mxu1 %v7631_v58  ;;  %v7671_v56 = vld [vmem:[%s9404_s1 + $0xe80] sm:$0xff]   ;;  %v7672_v58 = vld [vmem:[%s9404_s1 + $0xe48] sm:$0xff]  }
 0x1a4   : > { %7036 = vmatpush3.bf16.msra.mxu0 %v7632_v59  ;;  %v7673_v59 = vld [vmem:[%s9404_s1 + $0xec8] sm:$0xff]  }
 0x1a5   : > { %7065 = vmatprep.subr.bf16.mxu0 %v7635_v0  ;;  %7058 = vmatpush3.bf16.msra.mxu1 %v7633_v60  ;;  %v7674_v60 = vld [vmem:[%s9404_s1 + $0xe08] sm:$0xff]   ;;  %v7678_v0 = vld [vmem:[%s9404_s1 + $0xe10] sm:$0xff]  }
 0x1a6   : > { %7087 = vmatprep.subr.bf16.mxu1 %v7636_v1  ;;  %v7679_v1 = vld [vmem:[%s9404_s1 + $0xe90] sm:$0xff]  }
 0x1a7   : > { %5625 = vmatmul.mubr.bf16.vlgmr.msra.gmra.mrb[48].mxu0 %v1435_v62  ;;  %v7676_v62 = vld [vmem:[%s9404_s1 + $0xe50] sm:$0xff]  }
 0x1a8   : > { %7066 = vmatpush3.bf16.msra.mxu0 %v7637_v4  ;;  %5665 = vmatmul.mubr.bf16.vlgmr.msra.gmra.mrb[48].mxu1 %v1442_v3  ;;  %v7681_v3 = vld [vmem:[%s9404_s1 + $0xed8] sm:$0xff]  }
 0x1a9   : > { %7067 = vmatprep.subr.bf16.mxu0 %v7639_v7  ;;  %7088 = vmatpush3.bf16.msra.mxu1 %v7638_v5  ;;  %v7682_v4 = vld [vmem:[%s9404_s1 + $0xe18] sm:$0xff]   ;;  %v7685_v7 = vld [vmem:[%s9404_s1 + $0xee0] sm:$0xff]  }
 0x1aa   : > { %7089 = vmatprep.subr.bf16.mxu1 %v7640_v8  ;;  %5704 = vmatprep.mubr.bf16.mxu0 %v1460_v53  ;;  %v7683_v5 = vld [vmem:[%s9404_s1 + $0xe98] sm:$0xff]   ;;  %v7686_v8 = vld [vmem:[%s9404_s1 + $0xe20] sm:$0xff]  }
 0x1ab   : > { %v7713_v53 = vld [vmem:[%s9404_s1 + $0xf58] sm:$0xff]  }
 0x1ac   : > { %7068 = vmatpush3.bf16.msra.mxu0 %v7641_v9  ;;  %v7687_v9 = vld [vmem:[%s9404_s1 + $0xea0] sm:$0xff]  }
 0x1ad   : > { %7069 = vmatprep.subr.bf16.mxu0 %v7643_v11  ;;  %7090 = vmatpush3.bf16.msra.mxu1 %v7642_v10  ;;  %v7688_v10 = vld [vmem:[%s9404_s1 + $0xe68] sm:$0xff]  }
 0x1ae   : > { %7091 = vmatprep.subr.bf16.mxu1 %v7644_v12 }
 0x1b0   : > { %7070 = vmatpush3.bf16.msra.mxu0 %v7645_v13  ;;  %v7689_v13 = vld [vmem:[%s9404_s1 + $0xee8] sm:$0xff]  }
 0x1b1   : > { %7071 = vmatprep.subr.bf16.mxu0 %v7647_v15  ;;  %7092 = vmatpush3.bf16.msra.mxu1 %v7646_v14  ;;  %v7690_v14 = vld [vmem:[%s9404_s1 + $0xe28] sm:$0xff]  }
 0x1b2   : > { %7093 = vmatprep.subr.bf16.mxu1 %v7648_v16 }
 0x1b4   : > { %7072 = vmatpush3.bf16.msra.mxu0 %v7649_v17 }
 0x1b5   : > { %7073 = vmatprep.subr.bf16.mxu0 %v7651_v19  ;;  %7094 = vmatpush3.bf16.msra.mxu1 %v7650_v18 }
 0x1b6   : > { %7095 = vmatprep.subr.bf16.mxu1 %v7652_v20 }
 0x1b8   : > { %7074 = vmatpush3.bf16.msra.mxu0 %v7653_v21  ;;  %v7691_v21 = vld [vmem:[%s9404_s1 + $0xea8] sm:$0xff]  }
 0x1b9   : > { %7075 = vmatprep.subr.bf16.mxu0 %v7655_v23  ;;  %7096 = vmatpush3.bf16.msra.mxu1 %v7654_v22  ;;  %v7692_v22 = vld [vmem:[%s9404_s1 + $0xe70] sm:$0xff]  }
 0x1ba   : > { %v6773_v25 = vpop.f32.mrb[24].mxu0  ;;  %7097 = vmatprep.subr.bf16.mxu1 %v7656_v24 }
 0x1bb   : > { %v6795_v26 = vpop.f32.mrb[24].mxu1  ;;  %v6774_v29 = vpop.f32.mrb[25].mxu0 }
 0x1bc   : > { %v6796_v30 = vpop.f32.mrb[25].mxu1  ;;  %v6775_v31 = vadd.f32 %v6774_v29, %v6773_v25  ;;  %v6776_v33 = vpop.f32.mrb[26].mxu0  ;;  %7076 = vmatpush3.bf16.msra.mxu0 %v7657_v27  ;;  %v7694_v27 = vld [vmem:[%s9404_s1 + $0xe30] sm:$0xff]  }
 0x1bd   : > { %v6797_v32 = vadd.f32 %v6796_v30, %v6795_v26  ;;  %v6798_v34 = vpop.f32.mrb[26].mxu1  ;;  %v6777_v37 = vpop.f32.mrb[27].mxu0  ;;  %7077 = vmatprep.subr.bf16.mxu0 %v7659_v35  ;;  %7098 = vmatpush3.bf16.msra.mxu1 %v7658_v28  ;;  %v7693_v26 = vld [vmem:[%s9404_s1 + $0xef0] sm:$0xff]   ;;  %v7696_v30 = vld [vmem:[%s9404_s1 + $0xe78] sm:$0xff]  }
 0x1be   : > { %v6799_v38 = vpop.f32.mrb[27].mxu1  ;;  %v5147_v39 = vadd.f32 %v6775_v31, %v9075_v57  ;;  %7099 = vmatprep.subr.bf16.mxu1 %v7660_v36  ;;  %v1461_v57 = vcombine.high %v1459_v54, %v1459_v54  ;;  %v7695_v29 = vld [vmem:[%s9404_s1 + $0xeb0] sm:$0xff]   ;;  %v7697_v31 = vld [vmem:[%s9404_s1 + $0xef8] sm:$0xff]   ;;  %v7701_v37 = vld [vmem:[%s9404_s1 + $0xf40] sm:$0xff]  }
 0x1bf   : > { %v7699_v33 = vld [vmem:[%s9404_s1 + $0xeb8] sm:$0xff]   ;;  %v182_v34 = vld [vmem:[%s7871_s27 + $0x70] sm:$0xff]  ;;  %v7702_v38 = vld [vmem:[%s9404_s1 + $0xfc0] sm:$0xff]  }
 0x1c0   : > { %v9174_v43 = vadd.f32 %v6797_v32, %v5147_v39  ;;  %7078 = vmatpush3.bf16.msra.mxu0 %v7661_v40  ;;  %5744 = vmatprep.mubr.bf16.mxu1 %v1461_v57  ;;  %v7698_v32 = vld [vmem:[%s9404_s1 + $0xe38] sm:$0xff]   ;;  %v1469_v35 = vrot.slane %v182_v34, %v7886_v41  ;;  %v1462_v36 = vcombine.high %v182_v34, %v182_v34  ;;  %v7717_v57 = vld [vmem:[%s9404_s1 + $0xf60] sm:$0xff]  }
 0x1c1   : > { %7079 = vmatprep.subr.bf16.mxu0 %v7663_v44  ;;  %7100 = vmatpush3.bf16.msra.mxu1 %v7662_v42  ;;  %v7703_v42 = vld [vmem:[%s9404_s1 + $0xf00] sm:$0xff]  }
 0x1c2   : > { %7101 = vmatprep.subr.bf16.mxu1 %v7664_v45  ;;  %v1477_v39 = vcombine.high %v1469_v35, %v1469_v35  ;;  %v1476_v40 = vrot.slane %v1462_v36, %v7886_v41  ;;  %v7705_v45 = vld [vmem:[%s9404_s1 + $0xf48] sm:$0xff]  }
 0x1c4   : > { %7080 = vmatpush3.bf16.msra.mxu0 %v7665_v46  ;;  %v1478_v44 = vcombine.high %v1476_v40, %v1476_v40  ;;  %v7706_v46 = vld [vmem:[%s9404_s1 + $0xfc8] sm:$0xff]  }
 0x1c5   : > { %7109 = vmatprep.subr.bf16.mxu0 %v7668_v51  ;;  %7102 = vmatpush3.bf16.msra.mxu1 %v7666_v47  ;;  %v7707_v47 = vld [vmem:[%s9404_s1 + $0xf08] sm:$0xff]   ;;  %v7711_v51 = vld [vmem:[%s9404_s1 + $0xf10] sm:$0xff]  }
 0x1c6   : > { %7131 = vmatprep.subr.bf16.mxu1 %v7669_v52  ;;  %v7712_v52 = vld [vmem:[%s9404_s1 + $0xf90] sm:$0xff]  }
 0x1c7   : > { %5705 = vmatmul.mubr.bf16.vlgmr.msra.gmra.mrb[52].mxu0 %v1452_v49  ;;  %v7709_v49 = vld [vmem:[%s9404_s1 + $0xf50] sm:$0xff]  }
 0x1c8   : > { %7110 = vmatpush3.bf16.msra.mxu0 %v7670_v55  ;;  %5745 = vmatmul.mubr.bf16.vlgmr.msra.gmra.mrb[52].mxu1 %v1459_v54  ;;  %v7714_v54 = vld [vmem:[%s9404_s1 + $0xfd8] sm:$0xff]  }
 0x1c9   : > { %7111 = vmatprep.subr.bf16.mxu0 %v7672_v58  ;;  %7132 = vmatpush3.bf16.msra.mxu1 %v7671_v56  ;;  %v7715_v55 = vld [vmem:[%s9404_s1 + $0xf18] sm:$0xff]   ;;  %v7718_v58 = vld [vmem:[%s9404_s1 + $0xfe0] sm:$0xff]  }
 0x1ca   : > { %7133 = vmatprep.subr.bf16.mxu1 %v7673_v59  ;;  %5784 = vmatprep.mubr.bf16.mxu0 %v1477_v39  ;;  %v7716_v56 = vld [vmem:[%s9404_s1 + $0xf98] sm:$0xff]   ;;  %v7719_v59 = vld [vmem:[%s9404_s1 + $0xf20] sm:$0xff]  }
 0x1cb   : > { %5824 = vmatprep.mubr.bf16.mxu1 %v1478_v44 }
 0x1cc   : > { %7112 = vmatpush3.bf16.msra.mxu0 %v7674_v60  ;;  %v7720_v60 = vld [vmem:[%s9404_s1 + $0xfa0] sm:$0xff]  }
 0x1cd   : > { %7113 = vmatprep.subr.bf16.mxu0 %v7676_v62  ;;  %7134 = vmatpush3.bf16.msra.mxu1 %v7675_v61 }
 0x1ce   : > { %7135 = vmatprep.subr.bf16.mxu1 %v7677_v63  ;;  %v7721_v63 = vld [vmem:[%s9404_s1 + $0xf68] sm:$0xff]  }
 0x1d0   : > { %7114 = vmatpush3.bf16.msra.mxu0 %v7678_v0  ;;  %v7722_v0 = vld [vmem:[%s9404_s1 + $0xfe8] sm:$0xff]  }
 0x1d1   : > { %7115 = vmatprep.subr.bf16.mxu0 %v7680_v2  ;;  %7136 = vmatpush3.bf16.msra.mxu1 %v7679_v1 }
 0x1d2   : > { %7137 = vmatprep.subr.bf16.mxu1 %v7681_v3 }
 0x1d4   : > { %7116 = vmatpush3.bf16.msra.mxu0 %v7682_v4 }
 0x1d5   : > { %7117 = vmatprep.subr.bf16.mxu0 %v7684_v6  ;;  %7138 = vmatpush3.bf16.msra.mxu1 %v7683_v5 }
 0x1d6   : > { %7139 = vmatprep.subr.bf16.mxu1 %v7685_v7  ;;  %v7723_v7 = vld [vmem:[%s9404_s1 + $0xf28] sm:$0xff]  }
 0x1d8   : > { %7118 = vmatpush3.bf16.msra.mxu0 %v7686_v8  ;;  %v7724_v8 = vld [vmem:[%s9404_s1 + $0xfa8] sm:$0xff]  }
 0x1d9   : > { %7119 = vmatprep.subr.bf16.mxu0 %v7688_v10  ;;  %7140 = vmatpush3.bf16.msra.mxu1 %v7687_v9 }
 0x1da   : > { %v6817_v11 = vpop.f32.mrb[28].mxu0  ;;  %7141 = vmatprep.subr.bf16.mxu1 %v7689_v13  ;;  %v7726_v13 = vld [vmem:[%s9404_s1 + $0xff0] sm:$0xff]  }
 0x1db   : > { %v6839_v12 = vpop.f32.mrb[28].mxu1  ;;  %v6818_v15 = vpop.f32.mrb[29].mxu0 }
 0x1dc   : > { %v6840_v16 = vpop.f32.mrb[29].mxu1  ;;  %v6819_v17 = vadd.f32 %v6818_v15, %v6817_v11  ;;  %v6820_v19 = vpop.f32.mrb[30].mxu0  ;;  %7120 = vmatpush3.bf16.msra.mxu0 %v7690_v14  ;;  %v7727_v15 = vld [vmem:[%s9404_s1 + $0xf30] sm:$0xff]  }
 0x1dd   : > { %v6841_v18 = vadd.f32 %v6840_v16, %v6839_v12  ;;  %v6842_v20 = vpop.f32.mrb[30].mxu1  ;;  %v6821_v23 = vpop.f32.mrb[31].mxu0  ;;  %7121 = vmatprep.subr.bf16.mxu0 %v7692_v22  ;;  %7142 = vmatpush3.bf16.msra.mxu1 %v7691_v21  ;;  %v7725_v12 = vld [vmem:[%s9404_s1 + $0xf70] sm:$0xff]   ;;  %v7731_v19 = vld [vmem:[%s9404_s1 + $0xf38] sm:$0xff]  }
 0x1de   : > { %v6843_v24 = vpop.f32.mrb[31].mxu1  ;;  %v5227_v25 = vadd.f32 %v6819_v17, %v9174_v43  ;;  %7143 = vmatprep.subr.bf16.mxu1 %v7693_v26  ;;  %v7704_v43 = vld [vmem:[%s9404_s1 + $0xf80] sm:$0xff]   ;;  %v7728_v16 = vld [vmem:[%s9404_s1 + $0xfb0] sm:$0xff]   ;;  %v7729_v17 = vld [vmem:[%s9404_s1 + $0xf78] sm:$0xff]  }
 0x1df   : > { %v7732_v20 = vld [vmem:[%s9404_s1 + $0xfb8] sm:$0xff]  }
 0x1e0   : > { %v9273_v28 = vadd.f32 %v6841_v18, %v5227_v25  ;;  %7122 = vmatpush3.bf16.msra.mxu0 %v7694_v27  ;;  %v7730_v18 = vld [vmem:[%s9404_s1 + $0xff8] sm:$0xff]  }
 0x1e1   : > { %7123 = vmatprep.subr.bf16.mxu0 %v7696_v30  ;;  %7144 = vmatpush3.bf16.msra.mxu1 %v7695_v29  ;;  %v183_v21 = vld [vmem:[%s7871_s27 + $0x78] sm:$0xff] }
 0x1e2   : > { %7145 = vmatprep.subr.bf16.mxu1 %v7697_v31  ;;  %v1486_v22 = vrot.slane %v183_v21, %v7886_v41  ;;  %v1479_v23 = vcombine.high %v183_v21, %v183_v21 }
 0x1e4   : > { %7124 = vmatpush3.bf16.msra.mxu0 %v7698_v32  ;;  %v1494_v24 = vcombine.high %v1486_v22, %v1486_v22  ;;  %v1493_v25 = vrot.slane %v1479_v23, %v7886_v41 }
 0x1e5   : > { %7153 = vmatprep.subr.bf16.mxu0 %v7701_v37  ;;  %7146 = vmatpush3.bf16.msra.mxu1 %v7699_v33 }
 0x1e6   : > { %7175 = vmatprep.subr.bf16.mxu1 %v7702_v38  ;;  %v1495_v26 = vcombine.high %v1493_v25, %v1493_v25 }
 0x1e7   : > { %5785 = vmatmul.mubr.bf16.vlgmr.msra.gmra.mrb[56].mxu0 %v1469_v35 }
 0x1e8   : > { %7154 = vmatpush3.bf16.msra.mxu0 %v7703_v42  ;;  %5825 = vmatmul.mubr.bf16.vlgmr.msra.gmra.mrb[56].mxu1 %v1476_v40 }
 0x1e9   : > { %7155 = vmatprep.subr.bf16.mxu0 %v7705_v45  ;;  %7176 = vmatpush3.bf16.msra.mxu1 %v7704_v43 }
 0x1ea   : > { %7177 = vmatprep.subr.bf16.mxu1 %v7706_v46  ;;  %5864 = vmatprep.mubr.bf16.mxu0 %v1494_v24 }
 0x1eb   : > { %5904 = vmatprep.mubr.bf16.mxu1 %v1495_v26 }
 0x1ec   : > { %7156 = vmatpush3.bf16.msra.mxu0 %v7707_v47 }
 0x1ed   : > { %7157 = vmatprep.subr.bf16.mxu0 %v7709_v49  ;;  %7178 = vmatpush3.bf16.msra.mxu1 %v7708_v48 }
 0x1ee   : > { %7179 = vmatprep.subr.bf16.mxu1 %v7710_v50 }
 0x1f0   : > { %7158 = vmatpush3.bf16.msra.mxu0 %v7711_v51 }
 0x1f1   : > { %7159 = vmatprep.subr.bf16.mxu0 %v7713_v53  ;;  %7180 = vmatpush3.bf16.msra.mxu1 %v7712_v52 }
 0x1f2   : > { %7181 = vmatprep.subr.bf16.mxu1 %v7714_v54 }
 0x1f4   : > { %7160 = vmatpush3.bf16.msra.mxu0 %v7715_v55 }
 0x1f5   : > { %7161 = vmatprep.subr.bf16.mxu0 %v7717_v57  ;;  %7182 = vmatpush3.bf16.msra.mxu1 %v7716_v56 }
 0x1f6   : > { %7183 = vmatprep.subr.bf16.mxu1 %v7718_v58 }
 0x1f8   : > { %7162 = vmatpush3.bf16.msra.mxu0 %v7719_v59 }
 0x1f9   : > { %7163 = vmatprep.subr.bf16.mxu0 %v7721_v63  ;;  %7184 = vmatpush3.bf16.msra.mxu1 %v7720_v60 }
 0x1fa   : > { %v6861_v61 = vpop.f32.mrb[32].mxu0  ;;  %7185 = vmatprep.subr.bf16.mxu1 %v7722_v0 }
 0x1fb   : > { %v6883_v62 = vpop.f32.mrb[32].mxu1  ;;  %v6862_v1 = vpop.f32.mrb[33].mxu0 }
 0x1fc   : > { %v6884_v2 = vpop.f32.mrb[33].mxu1  ;;  %v6863_v3 = vadd.f32 %v6862_v1, %v6861_v61  ;;  %v6864_v5 = vpop.f32.mrb[34].mxu0  ;;  %7164 = vmatpush3.bf16.msra.mxu0 %v7723_v7 }
 0x1fd   : > { %v6885_v4 = vadd.f32 %v6884_v2, %v6883_v62  ;;  %v6886_v6 = vpop.f32.mrb[34].mxu1  ;;  %v6865_v9 = vpop.f32.mrb[35].mxu0  ;;  %7165 = vmatprep.subr.bf16.mxu0 %v7725_v12  ;;  %7186 = vmatpush3.bf16.msra.mxu1 %v7724_v8 }
 0x1fe   : > { %v6887_v10 = vpop.f32.mrb[35].mxu1  ;;  %v5307_v11 = vadd.f32 %v6863_v3, %v9273_v28  ;;  %7187 = vmatprep.subr.bf16.mxu1 %v7726_v13 }
 0x200   : > { %v5347_v14 = vadd.f32 %v6885_v4, %v5307_v11  ;;  %7166 = vmatpush3.bf16.msra.mxu0 %v7727_v15 }
 0x201   : > { %7167 = vmatprep.subr.bf16.mxu0 %v7729_v17  ;;  %7188 = vmatpush3.bf16.msra.mxu1 %v7728_v16 }
 0x202   : > { %7189 = vmatprep.subr.bf16.mxu1 %v7730_v18 }
 0x204   : > { %7168 = vmatpush3.bf16.msra.mxu0 %v7731_v19 }
 0x205   : > { %7190 = vmatpush3.bf16.msra.mxu1 %v7732_v20 }
 0x207   : > { %5865 = vmatmul.mubr.bf16.vlgmr.msra.gmra.mrb[60].mxu0 %v1486_v22 }
 0x208   : > { %5905 = vmatmul.mubr.bf16.vlgmr.msra.gmra.mrb[60].mxu1 %v1493_v25 }
 0x21a   : > { %v6905_v27 = vpop.f32.mrb[36].mxu0 }
 0x21b   : > { %v6927_v28 = vpop.f32.mrb[36].mxu1  ;;  %v6906_v29 = vpop.f32.mrb[37].mxu0 }
 0x21c   : > { %v6907_v30 = vadd.f32 %v6906_v29, %v6905_v27  ;;  %v6928_v31 = vpop.f32.mrb[37].mxu1  ;;  %v6908_v32 = vpop.f32.mrb[38].mxu0 }
 0x21d   : > { %v6929_v33 = vadd.f32 %v6928_v31, %v6927_v28  ;;  %v6930_v34 = vpop.f32.mrb[38].mxu1  ;;  %v6909_v35 = vpop.f32.mrb[39].mxu0 }
 0x21e   : > { %v5387_v36 = vadd.f32 %v6907_v30, %v5347_v14  ;;  %v6931_v37 = vpop.f32.mrb[39].mxu1 }
 0x220   : > { %v5427_v38 = vadd.f32 %v6929_v33, %v5387_v36 }
 0x23a   : > { %v6949_v39 = vpop.f32.mrb[40].mxu0 }
 0x23b   : > { %v6950_v41 = vpop.f32.mrb[41].mxu0  ;;  %v6971_v40 = vpop.f32.mrb[40].mxu1 }
 0x23c   : > { %v6951_v42 = vadd.f32 %v6950_v41, %v6949_v39  ;;  %v6952_v43 = vpop.f32.mrb[42].mxu0  ;;  %v6972_v44 = vpop.f32.mrb[41].mxu1 }
 0x23d   : > { %v6953_v45 = vpop.f32.mrb[43].mxu0  ;;  %v6973_v47 = vadd.f32 %v6972_v44, %v6971_v40  ;;  %v6974_v48 = vpop.f32.mrb[42].mxu1 }
 0x23e   : > { %v5467_v46 = vadd.f32 %v6951_v42, %v5427_v38  ;;  %v6975_v49 = vpop.f32.mrb[43].mxu1 }
 0x240   : > { %v5507_v50 = vadd.f32 %v6973_v47, %v5467_v46 }
 0x25a   : > { %v6993_v51 = vpop.f32.mrb[44].mxu0 }
 0x25b   : > { %v6994_v52 = vpop.f32.mrb[45].mxu0  ;;  %v7015_v53 = vpop.f32.mrb[44].mxu1 }
 0x25c   : > { %v6995_v54 = vadd.f32 %v6994_v52, %v6993_v51  ;;  %v6996_v55 = vpop.f32.mrb[46].mxu0  ;;  %v7016_v56 = vpop.f32.mrb[45].mxu1 }
 0x25d   : > { %v6997_v57 = vpop.f32.mrb[47].mxu0  ;;  %v7017_v59 = vadd.f32 %v7016_v56, %v7015_v53  ;;  %v7018_v60 = vpop.f32.mrb[46].mxu1 }
 0x25e   : > { %v5547_v58 = vadd.f32 %v6995_v54, %v5507_v50  ;;  %v7019_v61 = vpop.f32.mrb[47].mxu1  ;;  %v5921_v54 = vld [vmem:[%s9405_s2] sm:$0x1] }
 0x260   : > { %v5587_v62 = vadd.f32 %v7017_v59, %v5547_v58 }
 0x27a   : > { %v7037_v63 = vpop.f32.mrb[48].mxu0 }
 0x27b   : > { %v7038_v0 = vpop.f32.mrb[49].mxu0  ;;  %v7059_v1 = vpop.f32.mrb[48].mxu1 }
 0x27c   : > { %v7039_v2 = vadd.f32 %v7038_v0, %v7037_v63  ;;  %v7040_v3 = vpop.f32.mrb[50].mxu0  ;;  %v7060_v4 = vpop.f32.mrb[49].mxu1 }
 0x27d   : > { %v7041_v5 = vpop.f32.mrb[51].mxu0  ;;  %v7061_v7 = vadd.f32 %v7060_v4, %v7059_v1  ;;  %v7062_v8 = vpop.f32.mrb[50].mxu1 }
 0x27e   : > { %v5627_v6 = vadd.f32 %v7039_v2, %v5587_v62  ;;  %v7063_v9 = vpop.f32.mrb[51].mxu1 }
 0x280   : > { %v5667_v10 = vadd.f32 %v7061_v7, %v5627_v6 }
 0x29a   : > { %v7081_v11 = vpop.f32.mrb[52].mxu0 }
 0x29b   : > { %v7082_v12 = vpop.f32.mrb[53].mxu0  ;;  %v7103_v13 = vpop.f32.mrb[52].mxu1 }
 0x29c   : > { %v7083_v14 = vadd.f32 %v7082_v12, %v7081_v11  ;;  %v7084_v15 = vpop.f32.mrb[54].mxu0  ;;  %v7104_v16 = vpop.f32.mrb[53].mxu1 }
 0x29d   : > { %v7085_v17 = vpop.f32.mrb[55].mxu0  ;;  %v7105_v19 = vadd.f32 %v7104_v16, %v7103_v13  ;;  %v7106_v20 = vpop.f32.mrb[54].mxu1 }
 0x29e   : > { %v5707_v18 = vadd.f32 %v7083_v14, %v5667_v10  ;;  %v7107_v21 = vpop.f32.mrb[55].mxu1 }
 0x2a0   : > { %v5747_v22 = vadd.f32 %v7105_v19, %v5707_v18 }
 0x2ba   : > { %v7125_v23 = vpop.f32.mrb[56].mxu0 }
 0x2bb   : > { %v7126_v24 = vpop.f32.mrb[57].mxu0  ;;  %v7147_v25 = vpop.f32.mrb[56].mxu1 }
 0x2bc   : > { %v7127_v26 = vadd.f32 %v7126_v24, %v7125_v23  ;;  %v7128_v27 = vpop.f32.mrb[58].mxu0  ;;  %v7148_v28 = vpop.f32.mrb[57].mxu1 }
 0x2bd   : > { %v7129_v29 = vpop.f32.mrb[59].mxu0  ;;  %v7149_v31 = vadd.f32 %v7148_v28, %v7147_v25  ;;  %v7150_v32 = vpop.f32.mrb[58].mxu1 }
 0x2be   : > { %v5787_v30 = vadd.f32 %v7127_v26, %v5747_v22  ;;  %v7151_v33 = vpop.f32.mrb[59].mxu1 }
 0x2c0   : > { %v5827_v34 = vadd.f32 %v7149_v31, %v5787_v30 }
 0x2da   : > { %v7169_v35 = vpop.f32.mrb[60].mxu0 }
 0x2db   : > { %v7170_v36 = vpop.f32.mrb[61].mxu0  ;;  %v7191_v37 = vpop.f32.mrb[60].mxu1 }
 0x2dc   : > { %v7171_v38 = vadd.f32 %v7170_v36, %v7169_v35  ;;  %v7172_v39 = vpop.f32.mrb[62].mxu0  ;;  %v7192_v41 = vpop.f32.mrb[61].mxu1 }
 0x2dd   : > { %v7173_v40 = vpop.f32.mrb[63].mxu0  ;;  %v7193_v43 = vadd.f32 %v7192_v41, %v7191_v37  ;;  %v7194_v44 = vpop.f32.mrb[62].mxu1 }
 0x2de   : > { %v5867_v42 = vadd.f32 %v7171_v38, %v5827_v34  ;;  %v7195_v45 = vpop.f32.mrb[63].mxu1 }
 0x2e0   : > { %v5907_v46 = vadd.f32 %v7193_v43, %v5867_v42 }
 0x2e2   : > { %v5913_v47 = vsel %vm5912_vm0, %v5907_v46, 0.0 }
 0x2e3   : > { %v5914_v48 = vrot.slane %v5913_v47, 4 }
 0x2e5   : > { %v5915_v49 = vadd.f32 %v5914_v48, %v5913_v47 }
 0x2e7   : > { %v5916_v50 = vrot.slane %v5915_v49, 2 }
 0x2e9   : > { %v5917_v51 = vadd.f32 %v5916_v50, %v5915_v49 }
 0x2eb   : > { %v5918_v52 = vrot.slane %v5917_v51, 1 }
 0x2ed   : > { %v5919_v53 = vadd.f32 %v5918_v52, %v5917_v51 }
 0x2ef   : > { %v5920_v55 = vmul.f32 0.25, %v5919_v53 }
 0x2f1   : > { %v5922_v56 = vadd.f32 %v5921_v54, %v5920_v55 }
 0x2f3   : > { %5923 = vst [vmem:[%s166_s8] sm:$0x1] %v5922_v56 }
 0x2f4 PF: > { %s13_s12 = sadd.s32 1, %s7740_s12  }
 0x2f5   : > { %p10_p4 = scmp.ge.s32.totalorder %s13_s12, 4  }
 0x2f7   :  { %12 = sbr.rel (!%p10_p4) target bundleno = 1 (0x1), region = 62 }

</bundles_post_ra>
